<compile_context>
chip_gen: v5e
topology: v5e:2x2
jax: 0.10.0
libtpu: 0.0.40
codegen_flags: <defaults>
</compile_context>

<pallas_src>
import functools

import jax
import jax.numpy as jnp
from jax import lax
from jax.experimental import pallas as pl
from jax.experimental.pallas import tpu as pltpu


def _round_up(x, m):
    return (x + m - 1) // m * m


_VMEM_LIMIT = 56 * 1024 * 1024  # safe on v5e/v6e (128 MiB) and v7x (64 MiB/TC)


# ----------------------------------------------------------------------------
# Kernel 1: tiled per-channel (sum, sum-of-squares) reduction for ActNorm init
# (only used for the first flow step after each squeeze; subsequent steps get
#  their stats fused into the flow-step kernel below)
# ----------------------------------------------------------------------------
def _stats_kernel(x_ref, sum_ref, sq_ref, *, n_rows, tm):
    i = pl.program_id(0)

    @pl.when(i == 0)
    def _init():
        sum_ref[...] = jnp.zeros_like(sum_ref)
        sq_ref[...] = jnp.zeros_like(sq_ref)

    x = x_ref[...]                                          # [tm, C]
    row = i * tm + lax.broadcasted_iota(jnp.int32, x.shape, 0)
    xm = jnp.where(row < n_rows, x, 0.0)                    # mask padded rows
    sum_ref[...] += jnp.sum(xm, axis=0, keepdims=True)
    sq_ref[...] += jnp.sum(xm * xm, axis=0, keepdims=True)


def pallas_column_stats(x_flat, tm=1024):
    """x_flat: [N, C] f32 -> (sum[1,C], sumsq[1,C]) streamed over row tiles."""
    N, C = x_flat.shape
    tm = min(tm, _round_up(N, 8))
    grid = (pl.cdiv(N, tm),)
    s, ss = pl.pallas_call(
        functools.partial(_stats_kernel, n_rows=N, tm=tm),
        out_shape=(jax.ShapeDtypeStruct((1, C), jnp.float32),
                   jax.ShapeDtypeStruct((1, C), jnp.float32)),
        grid=grid,
        in_specs=[pl.BlockSpec((tm, C), lambda i: (i, 0))],
        out_specs=(pl.BlockSpec((1, C), lambda i: (0, 0)),
                   pl.BlockSpec((1, C), lambda i: (0, 0))),
        compiler_params=pltpu.CompilerParams(
            dimension_semantics=("arbitrary",),
            vmem_limit_bytes=_VMEM_LIMIT),
    )(x_flat)
    return s, ss


# ----------------------------------------------------------------------------
# Kernel 2: fully fused flow step
#   actnorm apply + 1x1 invertible conv + coupling net (3x3 -> 1x1 -> 3x3)
#   + affine coupling epilogue + per-batch logdet partials
#   + per-batch sum/sumsq partials of the output (next step's ActNorm init)
# ----------------------------------------------------------------------------
def _flow_step_kernel(x_ref, scale_ref, loc_ref, wmix_ref,
                      w1_ref, b1_ref, w2_ref, b2_ref, w3_ref, b3_ref,
                      y_ref, ld_ref, ysum_ref, ysq_ref,
                      xpad_ref, hpad_ref,
                      *, H, W, pad, C2):
    HW = H * W
    f32 = jnp.float32

    # --- ActNorm apply (per-channel affine, stats precomputed) ---
    x = x_ref[0].astype(f32)                                  # [HW, C]
    xn = x * scale_ref[...] + loc_ref[...]

    # --- Invertible 1x1 conv: ONE full-width matmul, slice the halves ---
    xm = jnp.dot(xn, wmix_ref[...], preferred_element_type=f32)   # [HW, C]
    x1 = xm[:, :C2]
    x2 = xm[:, C2:]

    # Column-validity masks for the horizontal taps of the 3x3 convs
    # (vertical taps are handled by the zero border rows of the pad scratch).
    jj = lax.broadcasted_iota(jnp.int32, (HW, 1), 0) % W
    mask_left = jj >= 1          # tap dx = -1 valid iff j - 1 >= 0
    mask_right = jj <= (W - 2)   # tap dx = +1 valid iff j + 1 <  W

    def fill_pad(pad_ref, src):
        # Zero only the two border bands; interior rows are fully overwritten.
        cin = pad_ref.shape[1]
        pad_ref[:pad, :] = jnp.zeros((pad, cin), f32)
        pad_ref[pad + HW:pad + HW + pad, :] = jnp.zeros((pad, cin), f32)
        pad_ref[pad:pad + HW, :] = src

    def shifted_taps(pad_ref):
        # 9 shifted views of the padded scratch (no im2col in HBM).
        taps = []
        for dy in (-1, 0, 1):
            for dx in (-1, 0, 1):
                off = pad + dy * W + dx
                sh = pad_ref[off:off + HW, :]
                if dx == -1:
                    sh = jnp.where(mask_left, sh, 0.0)
                elif dx == 1:
                    sh = jnp.where(mask_right, sh, 0.0)
                taps.append(sh)
        return taps

    # --- conv1: 3x3, Cin=C2 (small) -> stack taps along K, one matmul ---
    fill_pad(xpad_ref, x1)
    im2col = jnp.concatenate(shifted_taps(xpad_ref), axis=-1)     # [HW, 9*C2]
    h1 = jnp.maximum(
        jnp.dot(im2col, w1_ref[...], preferred_element_type=f32) + b1_ref[...],
        0.0)

    # --- conv2: 1x1 + ReLU ---
    h2 = jnp.maximum(
        jnp.dot(h1, w2_ref[...], preferred_element_type=f32) + b2_ref[...],
        0.0)

    # --- conv3: 3x3, Cin=hidden -> 9 shifted matmuls, merged shift|scale N ---
    fill_pad(hpad_ref, h2)
    cout = w3_ref.shape[2]                                        # = 2*C2
    acc = jnp.zeros((HW, cout), f32)
    for k, sh in enumerate(shifted_taps(hpad_ref)):
        acc = acc + jnp.dot(sh, w3_ref[k], preferred_element_type=f32)
    out3 = acc + b3_ref[...]                                      # [HW, 2*C2]
    shift = out3[:, :C2]
    z = out3[:, C2:] + 2.0

    # --- Affine coupling epilogue (stable sigmoid / log-sigmoid) ---
    e = jnp.exp(-jnp.abs(z))                                      # exp(-|z|)
    log_s = jnp.minimum(z, 0.0) - jnp.log(1.0 + e)
    inv = pl.reciprocal(1.0 + e, approx=True)
    s = jnp.where(z >= 0.0, inv, e * inv)                         # sigmoid(z)

    y2 = x2 * s + shift
    y = jnp.concatenate([x1, y2], axis=-1)                        # [HW, C]
    y_ref[0] = y
    # Per-batch lane-partial of the coupling logdet (finished outside).
    ld_ref[0] = jnp.sum(log_s, axis=0, keepdims=True)
    # Per-batch partial stats of the output -> next step's ActNorm init.
    ysum_ref[0] = jnp.sum(y, axis=0, keepdims=True)
    ysq_ref[0] = jnp.sum(y * y, axis=0, keepdims=True)


def pallas_flow_step_fused(x3, scale, loc, wmix, w1, b1, w2, b2, w3, b3,
                           *, H, W):
    """x3: [B, H*W, C].  Returns (y[B,HW,C], ld[B,1,C2], ysum[B,1,C], ysq[B,1,C])."""
    B, HW, C = x3.shape
    C2 = C // 2
    hidden = w2.shape[0]
    pad = _round_up(W + 1, 8)

    kernel = functools.partial(_flow_step_kernel, H=H, W=W, pad=pad, C2=C2)

    flops = 2 * B * HW * (C * C + 9 * C2 * hidden + hidden * hidden
                          + 9 * hidden * C)
    cost = pl.CostEstimate(flops=flops,
                           transcendentals=2 * B * HW * C2,
                           bytes_accessed=4 * B * HW * 2 * C)

    y, ld, ysum, ysq = pl.pallas_call(
        kernel,
        out_shape=(jax.ShapeDtypeStruct((B, HW, C), jnp.float32),
                   jax.ShapeDtypeStruct((B, 1, C2), jnp.float32),
                   jax.ShapeDtypeStruct((B, 1, C), jnp.float32),
                   jax.ShapeDtypeStruct((B, 1, C), jnp.float32)),
        grid=(B,),
        in_specs=[
            pl.BlockSpec((1, HW, C), lambda b: (b, 0, 0)),
            pl.BlockSpec((1, C), lambda b: (0, 0)),
            pl.BlockSpec((1, C), lambda b: (0, 0)),
            pl.BlockSpec((C, C), lambda b: (0, 0)),
            pl.BlockSpec((9 * C2, hidden), lambda b: (0, 0)),
            pl.BlockSpec((1, hidden), lambda b: (0, 0)),
            pl.BlockSpec((hidden, hidden), lambda b: (0, 0)),
            pl.BlockSpec((1, hidden), lambda b: (0, 0)),
            pl.BlockSpec((9, hidden, C), lambda b: (0, 0, 0)),
            pl.BlockSpec((1, C), lambda b: (0, 0)),
        ],
        out_specs=(
            pl.BlockSpec((1, HW, C), lambda b: (b, 0, 0)),
            pl.BlockSpec((1, 1, C2), lambda b: (b, 0, 0)),
            pl.BlockSpec((1, 1, C), lambda b: (b, 0, 0)),
            pl.BlockSpec((1, 1, C), lambda b: (b, 0, 0)),
        ),
        scratch_shapes=[
            pltpu.VMEM((HW + 2 * pad, C2), jnp.float32),      # padded x1
            pltpu.VMEM((HW + 2 * pad, hidden), jnp.float32),  # padded h2
        ],
        compiler_params=pltpu.CompilerParams(
            dimension_semantics=("parallel",),
            vmem_limit_bytes=_VMEM_LIMIT),
        cost_estimate=cost,
    )(x3, scale, loc, wmix, w1, b1, w2, b2, w3, b3)
    return y, ld, ysum, ysq


# ----------------------------------------------------------------------------
# Glue (squeeze, multi-scale split, parameter setup) in plain JAX
# ----------------------------------------------------------------------------
def squeeze_nhwc(x):
    """NHWC space-to-depth matching the NCHW reference channel ordering."""
    B, H, W, C = x.shape
    x = x.reshape(B, H // 2, 2, W // 2, 2, C)
    x = jnp.transpose(x, (0, 1, 3, 5, 2, 4))        # [B, H/2, W/2, C, 2, 2]
    return x.reshape(B, H // 2, W // 2, C * 4)       # new ch = c*4 + sh*2 + sw


def flow_step(x3, stats, p, H, W):
    """ActNorm -> Invertible 1x1 conv -> Affine coupling (fused kernel).

    x3: [B, HW, C]; stats = (sum[C], sumsq[C]) of x3 over all B*HW rows.
    Returns (y [B,HW,C], logdet [B], next_stats).
    """
    B, HW, C = x3.shape
    n = B * HW

    # --- ActNorm data-dependent init (reference initializes on 1st forward) ---
    s, ss = stats
    mean = s / n
    var = (ss - n * mean * mean) / (n - 1)            # unbiased: torch.std
    std = jnp.sqrt(jnp.maximum(var, 0.0))
    scale = (1.0 / (std + 1e-6)).reshape(1, C)
    loc = (-mean).reshape(1, C)
    ld_act = -jnp.sum(jnp.log(std + 1e-6)) * HW       # = sum(log|scale|)*h*w

    # slogdet of the tiny CxC 1x1-conv weight has no Pallas hot path.
    _, logabsdet = jnp.linalg.slogdet(p["w_inv"])
    ld_inv = HW * logabsdet

    # --- Fused actnorm-apply + 1x1 conv + coupling net + epilogue + stats ---
    y, ld_part, ysum, ysq = pallas_flow_step_fused(
        x3, scale, loc, p["wmix"], p["w1"], p["b1"], p["w2"], p["b2"],
        p["w3"], p["b3"], H=H, W=W)

    ld_coup = jnp.sum(ld_part, axis=(1, 2))           # [B]
    logdet = ld_act + ld_inv + ld_coup
    next_stats = (jnp.sum(ysum, axis=(0, 1)), jnp.sum(ysq, axis=(0, 1)))
    return y, logdet, next_stats


def glow_forward(x_nchw, params, K, L):
    """Forward pass of Glow.  Input: [B,C,H,W].  Returns (z_list, logdet[B])."""
    x = jnp.transpose(x_nchw, (0, 2, 3, 1)).astype(jnp.float32)   # -> NHWC
    B = x.shape[0]
    z_list = []
    logdet = jnp.zeros((B,), jnp.float32)
    idx = 0
    for i in range(L):
        x = squeeze_nhwc(x)
        _, H, W, C = x.shape
        HW = H * W
        x3 = x.reshape(B, HW, C)
        # Stats for the first flow step of this scale (layout just changed).
        s, ss = pallas_column_stats(x3.reshape(B * HW, C))
        stats = (s.reshape(-1), ss.reshape(-1))
        for _ in range(K):
            x3, det, stats = flow_step(x3, stats, params[idx], H, W)
            logdet = logdet + det
            idx += 1
        x = x3.reshape(B, H, W, C)
        if i < L - 1:
            C = x.shape[-1]
            x, z = x[..., :C // 2], x[..., C // 2:]
            z_list.append(jnp.transpose(z, (0, 3, 1, 2)))  # back to NCHW
    z_list.append(jnp.transpose(x, (0, 3, 1, 2)))
    return z_list, logdet


def init_glow_params(key, in_channels, hidden, K, L):
    """Deterministic synthetic parameters, pre-merged / pre-transposed once
    into the layouts the fused kernel consumes (no per-call reshuffling)."""
    params = []
    c = in_channels
    for i in range(L):
        c *= 4
        c2 = c // 2
        for _ in range(K):
            key, k0, k1, k2, k3, k4 = jax.random.split(key, 6)
            w_inv, _ = jnp.linalg.qr(
                jax.random.normal(k0, (c, c), jnp.float32))        # orthogonal
            params.append({
                "w_inv": w_inv,                                    # [c, c]
                "wmix": w_inv.T,                                   # y = x @ W^T
                # first 3x3 conv: taps stacked along K -> [9*c2, hidden]
                "w1": (0.05 * jax.random.normal(k1, (9, c2, hidden),
                                                jnp.float32)
                       ).reshape(9 * c2, hidden),
                "b1": jnp.zeros((1, hidden), jnp.float32),
                "w2": 0.05 * jax.random.normal(k2, (hidden, hidden), jnp.float32),
                "b2": jnp.zeros((1, hidden), jnp.float32),
                # last 3x3 conv: shift | scale halves merged along N
                "w3": jnp.concatenate(
                    [0.05 * jax.random.normal(k3, (9, hidden, c2), jnp.float32),
                     0.05 * jax.random.normal(k4, (9, hidden, c2), jnp.float32)],
                    axis=-1),                                      # [9,hidden,c]
                "b3": jnp.zeros((1, c), jnp.float32),
            })
        if i < L - 1:
            c //= 2
    return params


if __name__ == "__main__":
    key = jax.random.PRNGKey(0)
    key, kp, kx = jax.random.split(key, 3)

    B, C, H, W = 2, 3, 16, 16
    hidden, K, L = 16, 2, 2

    params = init_glow_params(kp, C, hidden, K, L)
    x = jax.random.normal(kx, (B, C, H, W), jnp.float32)

    fwd = jax.jit(lambda inp: glow_forward(inp, params, K, L))
    z_list, logdet = fwd(x)

    jax.block_until_ready(logdet)
    for z in z_list:
        jax.block_until_ready(z)

    print("KERNEL_OK")
</pallas_src>

<mosaic_0001>
module attributes {stable_mosaic.version = 11 : i64} {
  func.func @_stats_kernel(%arg0: i32, %arg1: memref<128x12xf32, #tpu.memory_space<vmem>>, %arg2: memref<1x12xf32, #tpu.memory_space<vmem>>, %arg3: memref<1x12xf32, #tpu.memory_space<vmem>>) attributes {dimension_semantics = [#tpu.dimension_semantics<arbitrary>], iteration_bounds = array<i64: 1>, scalar_prefetch = 0 : i64, scratch_operands = 0 : i64, tpu.core_type = #tpu.core_type<tc>, window_params = [{transform_indices = @transform_0, window_bounds = array<i64: 128, 12>}, {pipeline_mode = #tpu.pipeline_mode<synchronous>, transform_indices = @transform_1, window_bounds = array<i64: 1, 12>}, {pipeline_mode = #tpu.pipeline_mode<synchronous>, transform_indices = @transform_2, window_bounds = array<i64: 1, 12>}]} {
    %c0_i32 = arith.constant 0 : i32
    %0 = arith.cmpi eq, %arg0, %c0_i32 : i32
    %1 = arith.extui %0 : i1 to i32
    %c0_i32_0 = arith.constant 0 : i32
    %2 = arith.cmpi ne, %1, %c0_i32_0 : i32
    scf.if %2 {
      %cst_13 = arith.constant 0.000000e+00 : f32
      %23 = vector.broadcast %cst_13 : f32 to vector<1x12xf32>
      %c0_14 = arith.constant 0 : index
      %c0_15 = arith.constant 0 : index
      %24 = vector.load %arg2[%c0_14, %c0_15] : memref<1x12xf32, #tpu.memory_space<vmem>>, vector<1x12xf32>
      tpu.vector_store %arg2[%c0_14, %c0_15], %23 {strides = array<i32>} : memref<1x12xf32, #tpu.memory_space<vmem>>, vector<1x12xf32>,
      %cst_16 = arith.constant 0.000000e+00 : f32
      %25 = vector.broadcast %cst_16 : f32 to vector<1x12xf32>
      %c0_17 = arith.constant 0 : index
      %c0_18 = arith.constant 0 : index
      %26 = vector.load %arg3[%c0_17, %c0_18] : memref<1x12xf32, #tpu.memory_space<vmem>>, vector<1x12xf32>
      tpu.vector_store %arg3[%c0_17, %c0_18], %25 {strides = array<i32>} : memref<1x12xf32, #tpu.memory_space<vmem>>, vector<1x12xf32>,
    } else {
    }
    %c0 = arith.constant 0 : index
    %c0_1 = arith.constant 0 : index
    %3 = vector.load %arg1[%c0, %c0_1] : memref<128x12xf32, #tpu.memory_space<vmem>>, vector<128x12xf32>
    %c128_i32 = arith.constant 128 : i32
    %4 = arith.muli %arg0, %c128_i32 : i32
    %5 = tpu.iota {dimensions = array<i32: 0>} : vector<128x12xi32>
    %6 = vector.broadcast %4 : i32 to vector<128x12xi32>
    %7 = arith.addi %6, %5 : vector<128x12xi32>
    %c128_i32_2 = arith.constant 128 : i32
    %8 = vector.broadcast %c128_i32_2 : i32 to vector<128x12xi32>
    %9 = arith.cmpi slt, %7, %8 : vector<128x12xi32>
    %cst = arith.constant 0.000000e+00 : f32
    %10 = vector.broadcast %cst : f32 to vector<128x12xf32>
    %11 = arith.select %9, %3, %10 : vector<128x12xi1>, vector<128x12xf32>
    %c0_3 = arith.constant 0 : index
    %c0_4 = arith.constant 0 : index
    %12 = vector.load %arg2[%c0_3, %c0_4] : memref<1x12xf32, #tpu.memory_space<vmem>>, vector<1x12xf32>
    %cst_5 = arith.constant dense<0.000000e+00> : vector<12xf32>
    %13 = vector.multi_reduction <add>, %11, %cst_5 [0] : vector<128x12xf32> to vector<12xf32>
    %14 = vector.shape_cast %13 : vector<12xf32> to vector<1x12xf32>
    %15 = arith.addf %12, %14 : vector<1x12xf32>
    %c0_6 = arith.constant 0 : index
    %c0_7 = arith.constant 0 : index
    %16 = vector.load %arg2[%c0_6, %c0_7] : memref<1x12xf32, #tpu.memory_space<vmem>>, vector<1x12xf32>
    tpu.vector_store %arg2[%c0_6, %c0_7], %15 {strides = array<i32>} : memref<1x12xf32, #tpu.memory_space<vmem>>, vector<1x12xf32>,
    %c0_8 = arith.constant 0 : index
    %c0_9 = arith.constant 0 : index
    %17 = vector.load %arg3[%c0_8, %c0_9] : memref<1x12xf32, #tpu.memory_space<vmem>>, vector<1x12xf32>
    %18 = arith.mulf %11, %11 : vector<128x12xf32>
    %cst_10 = arith.constant dense<0.000000e+00> : vector<12xf32>
    %19 = vector.multi_reduction <add>, %18, %cst_10 [0] : vector<128x12xf32> to vector<12xf32>
    %20 = vector.shape_cast %19 : vector<12xf32> to vector<1x12xf32>
    %21 = arith.addf %17, %20 : vector<1x12xf32>
    %c0_11 = arith.constant 0 : index
    %c0_12 = arith.constant 0 : index
    %22 = vector.load %arg3[%c0_11, %c0_12] : memref<1x12xf32, #tpu.memory_space<vmem>>, vector<1x12xf32>
    tpu.vector_store %arg3[%c0_11, %c0_12], %21 {strides = array<i32>} : memref<1x12xf32, #tpu.memory_space<vmem>>, vector<1x12xf32>,
    return
  }
  func.func @transform_0(%arg0: i32) -> (i32, i32) {
    %c0_i32 = arith.constant 0 : i32
    %c0_i32_0 = arith.constant 0 : i32
    return %arg0, %c0_i32 : i32, i32
  }
  func.func @transform_1(%arg0: i32) -> (i32, i32) {
    %c0_i32 = arith.constant 0 : i32
    %c0_i32_0 = arith.constant 0 : i32
    %c0_i32_1 = arith.constant 0 : i32
    return %c0_i32, %c0_i32_0 : i32, i32
  }
  func.func @transform_2(%arg0: i32) -> (i32, i32) {
    %c0_i32 = arith.constant 0 : i32
    %c0_i32_0 = arith.constant 0 : i32
    %c0_i32_1 = arith.constant 0 : i32
    return %c0_i32, %c0_i32_0 : i32, i32
  }
}

module attributes {stable_mosaic.version = 11 : i64} {
  func.func @_flow_step_kernel(%arg0: i32, %arg1: memref<1x64x12xf32, #tpu.memory_space<vmem>>, %arg2: memref<1x12xf32, #tpu.memory_space<vmem>>, %arg3: memref<1x12xf32, #tpu.memory_space<vmem>>, %arg4: memref<12x12xf32, #tpu.memory_space<vmem>>, %arg5: memref<54x16xf32, #tpu.memory_space<vmem>>, %arg6: memref<1x16xf32, #tpu.memory_space<vmem>>, %arg7: memref<16x16xf32, #tpu.memory_space<vmem>>, %arg8: memref<1x16xf32, #tpu.memory_space<vmem>>, %arg9: memref<9x16x12xf32, #tpu.memory_space<vmem>>, %arg10: memref<1x12xf32, #tpu.memory_space<vmem>>, %arg11: memref<1x64x12xf32, #tpu.memory_space<vmem>>, %arg12: memref<1x1x6xf32, #tpu.memory_space<vmem>>, %arg13: memref<1x1x12xf32, #tpu.memory_space<vmem>>, %arg14: memref<1x1x12xf32, #tpu.memory_space<vmem>>, %arg15: memref<96x6xf32, #tpu.memory_space<vmem>>, %arg16: memref<96x16xf32, #tpu.memory_space<vmem>>) attributes {dimension_semantics = [#tpu.dimension_semantics<parallel>], iteration_bounds = array<i64: 2>, scalar_prefetch = 0 : i64, scratch_operands = 2 : i64, tpu.core_type = #tpu.core_type<tc>, window_params = [{transform_indices = @transform_0, window_bounds = array<i64: 1, 64, 12>}, {pipeline_mode = #tpu.pipeline_mode<synchronous>, transform_indices = @transform_1, window_bounds = array<i64: 1, 12>}, {pipeline_mode = #tpu.pipeline_mode<synchronous>, transform_indices = @transform_2, window_bounds = array<i64: 1, 12>}, {pipeline_mode = #tpu.pipeline_mode<synchronous>, transform_indices = @transform_3, window_bounds = array<i64: 12, 12>}, {pipeline_mode = #tpu.pipeline_mode<synchronous>, transform_indices = @transform_4, window_bounds = array<i64: 54, 16>}, {pipeline_mode = #tpu.pipeline_mode<synchronous>, transform_indices = @transform_5, window_bounds = array<i64: 1, 16>}, {pipeline_mode = #tpu.pipeline_mode<synchronous>, transform_indices = @transform_6, window_bounds = array<i64: 16, 16>}, {pipeline_mode = #tpu.pipeline_mode<synchronous>, transform_indices = @transform_7, window_bounds = array<i64: 1, 16>}, {pipeline_mode = #tpu.pipeline_mode<synchronous>, transform_indices = @transform_8, window_bounds = array<i64: 9, 16, 12>}, {pipeline_mode = #tpu.pipeline_mode<synchronous>, transform_indices = @transform_9, window_bounds = array<i64: 1, 12>}, {transform_indices = @transform_10, window_bounds = array<i64: 1, 64, 12>}, {transform_indices = @transform_11, window_bounds = array<i64: 1, 1, 6>}, {transform_indices = @transform_12, window_bounds = array<i64: 1, 1, 12>}, {transform_indices = @transform_13, window_bounds = array<i64: 1, 1, 12>}]} {
    %c0 = arith.constant 0 : index
    %c0_0 = arith.constant 0 : index
    %c0_1 = arith.constant 0 : index
    %0 = vector.load %arg1[%c0, %c0_0, %c0_1] : memref<1x64x12xf32, #tpu.memory_space<vmem>>, vector<1x64x12xf32>
    %1 = vector.shape_cast %0 : vector<1x64x12xf32> to vector<64x12xf32>
    %c0_2 = arith.constant 0 : index
    %c0_3 = arith.constant 0 : index
    %2 = vector.load %arg2[%c0_2, %c0_3] : memref<1x12xf32, #tpu.memory_space<vmem>>, vector<1x12xf32>
    %3 = vector.broadcast %2 : vector<1x12xf32> to vector<64x12xf32>
    %4 = arith.mulf %1, %3 : vector<64x12xf32>
    %c0_4 = arith.constant 0 : index
    %c0_5 = arith.constant 0 : index
    %5 = vector.load %arg3[%c0_4, %c0_5] : memref<1x12xf32, #tpu.memory_space<vmem>>, vector<1x12xf32>
    %6 = vector.broadcast %5 : vector<1x12xf32> to vector<64x12xf32>
    %7 = arith.addf %4, %6 : vector<64x12xf32>
    %c0_6 = arith.constant 0 : index
    %c0_7 = arith.constant 0 : index
    %8 = vector.load %arg4[%c0_6, %c0_7] : memref<12x12xf32, #tpu.memory_space<vmem>>, vector<12x12xf32>
    %cst = arith.constant dense<0.000000e+00> : vector<64x12xf32>
    %9 = tpu.matmul %7, %8, %cst {dimension_numbers = #tpu.dot_dimension_numbers<[1], [0], [0], [1], [0, 0, 1, 1], [], []>} : vector<64x12xf32>, vector<12x12xf32>, vector<64x12xf32> -> vector<64x12xf32>
    %10 = vector.extract_strided_slice %9 {offsets = [0, 0], sizes = [64, 6], strides = [1, 1]} : vector<64x12xf32> to vector<64x6xf32>
    %11 = vector.extract_strided_slice %9 {offsets = [0, 6], sizes = [64, 6], strides = [1, 1]} : vector<64x12xf32> to vector<64x6xf32>
    %12 = tpu.iota {dimensions = array<i32: 0>} : vector<64x1xi32>
    %c8_i32 = arith.constant 8 : i32
    %c0_i32 = arith.constant 0 : i32
    %13 = arith.cmpi eq, %c8_i32, %c0_i32 : i32
    %c1_i32 = arith.constant 1 : i32
    %14 = arith.select %13, %c1_i32, %c8_i32 : i32
    %15 = vector.broadcast %14 : i32 to vector<64x1xi32>
    %16 = arith.remsi %12, %15 : vector<64x1xi32>
    %c0_i32_8 = arith.constant 0 : i32
    %17 = vector.broadcast %c0_i32_8 : i32 to vector<64x1xi32>
    %18 = arith.cmpi ne, %16, %17 : vector<64x1xi32>
    %c0_i32_9 = arith.constant 0 : i32
    %19 = vector.broadcast %c0_i32_9 : i32 to vector<64x1xi32>
    %20 = arith.cmpi slt, %16, %19 : vector<64x1xi32>
    %c0_i32_10 = arith.constant 0 : i32
    %21 = arith.cmpi slt, %14, %c0_i32_10 : i32
    %22 = vector.broadcast %21 : i1 to vector<64x1xi1>
    %23 = vector.broadcast %22 : vector<64x1xi1> to vector<64x1xi1>
    %24 = arith.xori %20, %23 : vector<64x1xi1>
    %25 = arith.andi %24, %18 : vector<64x1xi1>
    %26 = vector.broadcast %14 : i32 to vector<64x1xi32>
    %27 = arith.addi %16, %26 : vector<64x1xi32>
    %28 = arith.select %25, %27, %16 : vector<64x1xi1>, vector<64x1xi32>
    %c1_i32_11 = arith.constant 1 : i32
    %29 = vector.broadcast %c1_i32_11 : i32 to vector<64x1xi32>
    %30 = arith.cmpi sge, %28, %29 : vector<64x1xi32>
    %c6_i32 = arith.constant 6 : i32
    %31 = vector.broadcast %c6_i32 : i32 to vector<64x1xi32>
    %32 = arith.cmpi sle, %28, %31 : vector<64x1xi32>
    %cst_12 = arith.constant 0.000000e+00 : f32
    %33 = vector.broadcast %cst_12 : f32 to vector<16x6xf32>
    %c0_13 = arith.constant 0 : index
    %c0_14 = arith.constant 0 : index
    %34 = vector.load %arg15[%c0_13, %c0_14] : memref<96x6xf32, #tpu.memory_space<vmem>>, vector<16x6xf32>
    tpu.vector_store %arg15[%c0_13, %c0_14], %33 {strides = array<i32>} : memref<96x6xf32, #tpu.memory_space<vmem>>, vector<16x6xf32>,
    %cst_15 = arith.constant 0.000000e+00 : f32
    %35 = vector.broadcast %cst_15 : f32 to vector<16x6xf32>
    %c80 = arith.constant 80 : index
    %c0_16 = arith.constant 0 : index
    %36 = vector.load %arg15[%c80, %c0_16] : memref<96x6xf32, #tpu.memory_space<vmem>>, vector<16x6xf32>
    tpu.vector_store %arg15[%c80, %c0_16], %35 {strides = array<i32>} : memref<96x6xf32, #tpu.memory_space<vmem>>, vector<16x6xf32>,
    %c16 = arith.constant 16 : index
    %c0_17 = arith.constant 0 : index
    %37 = vector.load %arg15[%c16, %c0_17] : memref<96x6xf32, #tpu.memory_space<vmem>>, vector<64x6xf32>
    tpu.vector_store %arg15[%c16, %c0_17], %10 {strides = array<i32>} : memref<96x6xf32, #tpu.memory_space<vmem>>, vector<64x6xf32>,
    %c7 = arith.constant 7 : index
    %c0_18 = arith.constant 0 : index
    %38 = vector.load %arg15[%c7, %c0_18] : memref<96x6xf32, #tpu.memory_space<vmem>>, vector<64x6xf32>
    %cst_19 = arith.constant 0.000000e+00 : f32
    %39 = vector.shape_cast %30 : vector<64x1xi1> to vector<64x1xi1>
    %40 = vector.broadcast %39 : vector<64x1xi1> to vector<64x6xi1>
    %41 = vector.broadcast %cst_19 : f32 to vector<64x6xf32>
    %42 = arith.select %40, %38, %41 : vector<64x6xi1>, vector<64x6xf32>
    %c8 = arith.constant 8 : index
    %c0_20 = arith.constant 0 : index
    %43 = vector.load %arg15[%c8, %c0_20] : memref<96x6xf32, #tpu.memory_space<vmem>>, vector<64x6xf32>
    %c9 = arith.constant 9 : index
    %c0_21 = arith.constant 0 : index
    %44 = vector.load %arg15[%c9, %c0_21] : memref<96x6xf32, #tpu.memory_space<vmem>>, vector<64x6xf32>
    %cst_22 = arith.constant 0.000000e+00 : f32
    %45 = vector.shape_cast %32 : vector<64x1xi1> to vector<64x1xi1>
    %46 = vector.broadcast %45 : vector<64x1xi1> to vector<64x6xi1>
    %47 = vector.broadcast %cst_22 : f32 to vector<64x6xf32>
    %48 = arith.select %46, %44, %47 : vector<64x6xi1>, vector<64x6xf32>
    %c15 = arith.constant 15 : index
    %c0_23 = arith.constant 0 : index
    %49 = vector.load %arg15[%c15, %c0_23] : memref<96x6xf32, #tpu.memory_space<vmem>>, vector<64x6xf32>
    %cst_24 = arith.constant 0.000000e+00 : f32
    %50 = vector.shape_cast %30 : vector<64x1xi1> to vector<64x1xi1>
    %51 = vector.broadcast %50 : vector<64x1xi1> to vector<64x6xi1>
    %52 = vector.broadcast %cst_24 : f32 to vector<64x6xf32>
    %53 = arith.select %51, %49, %52 : vector<64x6xi1>, vector<64x6xf32>
    %c16_25 = arith.constant 16 : index
    %c0_26 = arith.constant 0 : index
    %54 = vector.load %arg15[%c16_25, %c0_26] : memref<96x6xf32, #tpu.memory_space<vmem>>, vector<64x6xf32>
    %c17 = arith.constant 17 : index
    %c0_27 = arith.constant 0 : index
    %55 = vector.load %arg15[%c17, %c0_27] : memref<96x6xf32, #tpu.memory_space<vmem>>, vector<64x6xf32>
    %cst_28 = arith.constant 0.000000e+00 : f32
    %56 = vector.shape_cast %32 : vector<64x1xi1> to vector<64x1xi1>
    %57 = vector.broadcast %56 : vector<64x1xi1> to vector<64x6xi1>
    %58 = vector.broadcast %cst_28 : f32 to vector<64x6xf32>
    %59 = arith.select %57, %55, %58 : vector<64x6xi1>, vector<64x6xf32>
    %c23 = arith.constant 23 : index
    %c0_29 = arith.constant 0 : index
    %60 = vector.load %arg15[%c23, %c0_29] : memref<96x6xf32, #tpu.memory_space<vmem>>, vector<64x6xf32>
    %cst_30 = arith.constant 0.000000e+00 : f32
    %61 = vector.shape_cast %30 : vector<64x1xi1> to vector<64x1xi1>
    %62 = vector.broadcast %61 : vector<64x1xi1> to vector<64x6xi1>
    %63 = vector.broadcast %cst_30 : f32 to vector<64x6xf32>
    %64 = arith.select %62, %60, %63 : vector<64x6xi1>, vector<64x6xf32>
    %c24 = arith.constant 24 : index
    %c0_31 = arith.constant 0 : index
    %65 = vector.load %arg15[%c24, %c0_31] : memref<96x6xf32, #tpu.memory_space<vmem>>, vector<64x6xf32>
    %c25 = arith.constant 25 : index
    %c0_32 = arith.constant 0 : index
    %66 = vector.load %arg15[%c25, %c0_32] : memref<96x6xf32, #tpu.memory_space<vmem>>, vector<64x6xf32>
    %cst_33 = arith.constant 0.000000e+00 : f32
    %67 = vector.shape_cast %32 : vector<64x1xi1> to vector<64x1xi1>
    %68 = vector.broadcast %67 : vector<64x1xi1> to vector<64x6xi1>
    %69 = vector.broadcast %cst_33 : f32 to vector<64x6xf32>
    %70 = arith.select %68, %66, %69 : vector<64x6xi1>, vector<64x6xf32>
    %71 = tpu.concatenate %42, %43, %48, %53, %54, %59, %64, %65, %70 in 1 : vector<64x6xf32>, vector<64x6xf32>, vector<64x6xf32>, vector<64x6xf32>, vector<64x6xf32>, vector<64x6xf32>, vector<64x6xf32>, vector<64x6xf32>, vector<64x6xf32> -> vector<64x54xf32>
    %c0_34 = arith.constant 0 : index
    %c0_35 = arith.constant 0 : index
    %72 = vector.load %arg5[%c0_34, %c0_35] : memref<54x16xf32, #tpu.memory_space<vmem>>, vector<54x16xf32>
    %cst_36 = arith.constant dense<0.000000e+00> : vector<64x16xf32>
    %73 = tpu.matmul %71, %72, %cst_36 {dimension_numbers = #tpu.dot_dimension_numbers<[1], [0], [0], [1], [0, 0, 1, 1], [], []>} : vector<64x54xf32>, vector<54x16xf32>, vector<64x16xf32> -> vector<64x16xf32>
    %c0_37 = arith.constant 0 : index
    %c0_38 = arith.constant 0 : index
    %74 = vector.load %arg6[%c0_37, %c0_38] : memref<1x16xf32, #tpu.memory_space<vmem>>, vector<1x16xf32>
    %75 = vector.broadcast %74 : vector<1x16xf32> to vector<64x16xf32>
    %76 = arith.addf %73, %75 : vector<64x16xf32>
    %cst_39 = arith.constant 0.000000e+00 : f32
    %77 = vector.broadcast %cst_39 : f32 to vector<64x16xf32>
    %78 = arith.maximumf %76, %77 : vector<64x16xf32>
    %c0_40 = arith.constant 0 : index
    %c0_41 = arith.constant 0 : index
    %79 = vector.load %arg7[%c0_40, %c0_41] : memref<16x16xf32, #tpu.memory_space<vmem>>, vector<16x16xf32>
    %cst_42 = arith.constant dense<0.000000e+00> : vector<64x16xf32>
    %80 = tpu.matmul %78, %79, %cst_42 {dimension_numbers = #tpu.dot_dimension_numbers<[1], [0], [0], [1], [0, 0, 1, 1], [], []>} : vector<64x16xf32>, vector<16x16xf32>, vector<64x16xf32> -> vector<64x16xf32>
    %c0_43 = arith.constant 0 : index
    %c0_44 = arith.constant 0 : index
    %81 = vector.load %arg8[%c0_43, %c0_44] : memref<1x16xf32, #tpu.memory_space<vmem>>, vector<1x16xf32>
    %82 = vector.broadcast %81 : vector<1x16xf32> to vector<64x16xf32>
    %83 = arith.addf %80, %82 : vector<64x16xf32>
    %cst_45 = arith.constant 0.000000e+00 : f32
    %84 = vector.broadcast %cst_45 : f32 to vector<64x16xf32>
    %85 = arith.maximumf %83, %84 : vector<64x16xf32>
    %cst_46 = arith.constant 0.000000e+00 : f32
    %86 = vector.broadcast %cst_46 : f32 to vector<16x16xf32>
    %c0_47 = arith.constant 0 : index
    %c0_48 = arith.constant 0 : index
    %87 = vector.load %arg16[%c0_47, %c0_48] : memref<96x16xf32, #tpu.memory_space<vmem>>, vector<16x16xf32>
    tpu.vector_store %arg16[%c0_47, %c0_48], %86 {strides = array<i32>} : memref<96x16xf32, #tpu.memory_space<vmem>>, vector<16x16xf32>,
    %cst_49 = arith.constant 0.000000e+00 : f32
    %88 = vector.broadcast %cst_49 : f32 to vector<16x16xf32>
    %c80_50 = arith.constant 80 : index
    %c0_51 = arith.constant 0 : index
    %89 = vector.load %arg16[%c80_50, %c0_51] : memref<96x16xf32, #tpu.memory_space<vmem>>, vector<16x16xf32>
    tpu.vector_store %arg16[%c80_50, %c0_51], %88 {strides = array<i32>} : memref<96x16xf32, #tpu.memory_space<vmem>>, vector<16x16xf32>,
    %c16_52 = arith.constant 16 : index
    %c0_53 = arith.constant 0 : index
    %90 = vector.load %arg16[%c16_52, %c0_53] : memref<96x16xf32, #tpu.memory_space<vmem>>, vector<64x16xf32>
    tpu.vector_store %arg16[%c16_52, %c0_53], %85 {strides = array<i32>} : memref<96x16xf32, #tpu.memory_space<vmem>>, vector<64x16xf32>,
    %cst_54 = arith.constant 0.000000e+00 : f32
    %91 = vector.broadcast %cst_54 : f32 to vector<64x12xf32>
    %c7_55 = arith.constant 7 : index
    %c0_56 = arith.constant 0 : index
    %92 = vector.load %arg16[%c7_55, %c0_56] : memref<96x16xf32, #tpu.memory_space<vmem>>, vector<64x16xf32>
    %cst_57 = arith.constant 0.000000e+00 : f32
    %93 = vector.shape_cast %30 : vector<64x1xi1> to vector<64x1xi1>
    %94 = vector.broadcast %93 : vector<64x1xi1> to vector<64x16xi1>
    %95 = vector.broadcast %cst_57 : f32 to vector<64x16xf32>
    %96 = arith.select %94, %92, %95 : vector<64x16xi1>, vector<64x16xf32>
    %c8_58 = arith.constant 8 : index
    %c0_59 = arith.constant 0 : index
    %97 = vector.load %arg16[%c8_58, %c0_59] : memref<96x16xf32, #tpu.memory_space<vmem>>, vector<64x16xf32>
    %c9_60 = arith.constant 9 : index
    %c0_61 = arith.constant 0 : index
    %98 = vector.load %arg16[%c9_60, %c0_61] : memref<96x16xf32, #tpu.memory_space<vmem>>, vector<64x16xf32>
    %cst_62 = arith.constant 0.000000e+00 : f32
    %99 = vector.shape_cast %32 : vector<64x1xi1> to vector<64x1xi1>
    %100 = vector.broadcast %99 : vector<64x1xi1> to vector<64x16xi1>
    %101 = vector.broadcast %cst_62 : f32 to vector<64x16xf32>
    %102 = arith.select %100, %98, %101 : vector<64x16xi1>, vector<64x16xf32>
    %c15_63 = arith.constant 15 : index
    %c0_64 = arith.constant 0 : index
    %103 = vector.load %arg16[%c15_63, %c0_64] : memref<96x16xf32, #tpu.memory_space<vmem>>, vector<64x16xf32>
    %cst_65 = arith.constant 0.000000e+00 : f32
    %104 = vector.shape_cast %30 : vector<64x1xi1> to vector<64x1xi1>
    %105 = vector.broadcast %104 : vector<64x1xi1> to vector<64x16xi1>
    %106 = vector.broadcast %cst_65 : f32 to vector<64x16xf32>
    %107 = arith.select %105, %103, %106 : vector<64x16xi1>, vector<64x16xf32>
    %c16_66 = arith.constant 16 : index
    %c0_67 = arith.constant 0 : index
    %108 = vector.load %arg16[%c16_66, %c0_67] : memref<96x16xf32, #tpu.memory_space<vmem>>, vector<64x16xf32>
    %c17_68 = arith.constant 17 : index
    %c0_69 = arith.constant 0 : index
    %109 = vector.load %arg16[%c17_68, %c0_69] : memref<96x16xf32, #tpu.memory_space<vmem>>, vector<64x16xf32>
    %cst_70 = arith.constant 0.000000e+00 : f32
    %110 = vector.shape_cast %32 : vector<64x1xi1> to vector<64x1xi1>
    %111 = vector.broadcast %110 : vector<64x1xi1> to vector<64x16xi1>
    %112 = vector.broadcast %cst_70 : f32 to vector<64x16xf32>
    %113 = arith.select %111, %109, %112 : vector<64x16xi1>, vector<64x16xf32>
    %c23_71 = arith.constant 23 : index
    %c0_72 = arith.constant 0 : index
    %114 = vector.load %arg16[%c23_71, %c0_72] : memref<96x16xf32, #tpu.memory_space<vmem>>, vector<64x16xf32>
    %cst_73 = arith.constant 0.000000e+00 : f32
    %115 = vector.shape_cast %30 : vector<64x1xi1> to vector<64x1xi1>
    %116 = vector.broadcast %115 : vector<64x1xi1> to vector<64x16xi1>
    %117 = vector.broadcast %cst_73 : f32 to vector<64x16xf32>
    %118 = arith.select %116, %114, %117 : vector<64x16xi1>, vector<64x16xf32>
    %c24_74 = arith.constant 24 : index
    %c0_75 = arith.constant 0 : index
    %119 = vector.load %arg16[%c24_74, %c0_75] : memref<96x16xf32, #tpu.memory_space<vmem>>, vector<64x16xf32>
    %c25_76 = arith.constant 25 : index
    %c0_77 = arith.constant 0 : index
    %120 = vector.load %arg16[%c25_76, %c0_77] : memref<96x16xf32, #tpu.memory_space<vmem>>, vector<64x16xf32>
    %cst_78 = arith.constant 0.000000e+00 : f32
    %121 = vector.shape_cast %32 : vector<64x1xi1> to vector<64x1xi1>
    %122 = vector.broadcast %121 : vector<64x1xi1> to vector<64x16xi1>
    %123 = vector.broadcast %cst_78 : f32 to vector<64x16xf32>
    %124 = arith.select %122, %120, %123 : vector<64x16xi1>, vector<64x16xf32>
    %c0_79 = arith.constant 0 : index
    %c0_80 = arith.constant 0 : index
    %c0_81 = arith.constant 0 : index
    %125 = vector.load %arg9[%c0_79, %c0_80, %c0_81] : memref<9x16x12xf32, #tpu.memory_space<vmem>>, vector<1x16x12xf32>
    %126 = vector.shape_cast %125 : vector<1x16x12xf32> to vector<16x12xf32>
    %cst_82 = arith.constant dense<0.000000e+00> : vector<64x12xf32>
    %127 = tpu.matmul %96, %126, %cst_82 {dimension_numbers = #tpu.dot_dimension_numbers<[1], [0], [0], [1], [0, 0, 1, 1], [], []>} : vector<64x16xf32>, vector<16x12xf32>, vector<64x12xf32> -> vector<64x12xf32>
    %128 = arith.addf %91, %127 : vector<64x12xf32>
    %c1 = arith.constant 1 : index
    %c0_83 = arith.constant 0 : index
    %c0_84 = arith.constant 0 : index
    %129 = vector.load %arg9[%c1, %c0_83, %c0_84] : memref<9x16x12xf32, #tpu.memory_space<vmem>>, vector<1x16x12xf32>
    %130 = vector.shape_cast %129 : vector<1x16x12xf32> to vector<16x12xf32>
    %cst_85 = arith.constant dense<0.000000e+00> : vector<64x12xf32>
    %131 = tpu.matmul %97, %130, %cst_85 {dimension_numbers = #tpu.dot_dimension_numbers<[1], [0], [0], [1], [0, 0, 1, 1], [], []>} : vector<64x16xf32>, vector<16x12xf32>, vector<64x12xf32> -> vector<64x12xf32>
    %132 = arith.addf %128, %131 : vector<64x12xf32>
    %c2 = arith.constant 2 : index
    %c0_86 = arith.constant 0 : index
    %c0_87 = arith.constant 0 : index
    %133 = vector.load %arg9[%c2, %c0_86, %c0_87] : memref<9x16x12xf32, #tpu.memory_space<vmem>>, vector<1x16x12xf32>
    %134 = vector.shape_cast %133 : vector<1x16x12xf32> to vector<16x12xf32>
    %cst_88 = arith.constant dense<0.000000e+00> : vector<64x12xf32>
    %135 = tpu.matmul %102, %134, %cst_88 {dimension_numbers = #tpu.dot_dimension_numbers<[1], [0], [0], [1], [0, 0, 1, 1], [], []>} : vector<64x16xf32>, vector<16x12xf32>, vector<64x12xf32> -> vector<64x12xf32>
    %136 = arith.addf %132, %135 : vector<64x12xf32>
    %c3 = arith.constant 3 : index
    %c0_89 = arith.constant 0 : index
    %c0_90 = arith.constant 0 : index
    %137 = vector.load %arg9[%c3, %c0_89, %c0_90] : memref<9x16x12xf32, #tpu.memory_space<vmem>>, vector<1x16x12xf32>
    %138 = vector.shape_cast %137 : vector<1x16x12xf32> to vector<16x12xf32>
    %cst_91 = arith.constant dense<0.000000e+00> : vector<64x12xf32>
    %139 = tpu.matmul %107, %138, %cst_91 {dimension_numbers = #tpu.dot_dimension_numbers<[1], [0], [0], [1], [0, 0, 1, 1], [], []>} : vector<64x16xf32>, vector<16x12xf32>, vector<64x12xf32> -> vector<64x12xf32>
    %140 = arith.addf %136, %139 : vector<64x12xf32>
    %c4 = arith.constant 4 : index
    %c0_92 = arith.constant 0 : index
    %c0_93 = arith.constant 0 : index
    %141 = vector.load %arg9[%c4, %c0_92, %c0_93] : memref<9x16x12xf32, #tpu.memory_space<vmem>>, vector<1x16x12xf32>
    %142 = vector.shape_cast %141 : vector<1x16x12xf32> to vector<16x12xf32>
    %cst_94 = arith.constant dense<0.000000e+00> : vector<64x12xf32>
    %143 = tpu.matmul %108, %142, %cst_94 {dimension_numbers = #tpu.dot_dimension_numbers<[1], [0], [0], [1], [0, 0, 1, 1], [], []>} : vector<64x16xf32>, vector<16x12xf32>, vector<64x12xf32> -> vector<64x12xf32>
    %144 = arith.addf %140, %143 : vector<64x12xf32>
    %c5 = arith.constant 5 : index
    %c0_95 = arith.constant 0 : index
    %c0_96 = arith.constant 0 : index
    %145 = vector.load %arg9[%c5, %c0_95, %c0_96] : memref<9x16x12xf32, #tpu.memory_space<vmem>>, vector<1x16x12xf32>
    %146 = vector.shape_cast %145 : vector<1x16x12xf32> to vector<16x12xf32>
    %cst_97 = arith.constant dense<0.000000e+00> : vector<64x12xf32>
    %147 = tpu.matmul %113, %146, %cst_97 {dimension_numbers = #tpu.dot_dimension_numbers<[1], [0], [0], [1], [0, 0, 1, 1], [], []>} : vector<64x16xf32>, vector<16x12xf32>, vector<64x12xf32> -> vector<64x12xf32>
    %148 = arith.addf %144, %147 : vector<64x12xf32>
    %c6 = arith.constant 6 : index
    %c0_98 = arith.constant 0 : index
    %c0_99 = arith.constant 0 : index
    %149 = vector.load %arg9[%c6, %c0_98, %c0_99] : memref<9x16x12xf32, #tpu.memory_space<vmem>>, vector<1x16x12xf32>
    %150 = vector.shape_cast %149 : vector<1x16x12xf32> to vector<16x12xf32>
    %cst_100 = arith.constant dense<0.000000e+00> : vector<64x12xf32>
    %151 = tpu.matmul %118, %150, %cst_100 {dimension_numbers = #tpu.dot_dimension_numbers<[1], [0], [0], [1], [0, 0, 1, 1], [], []>} : vector<64x16xf32>, vector<16x12xf32>, vector<64x12xf32> -> vector<64x12xf32>
    %152 = arith.addf %148, %151 : vector<64x12xf32>
    %c7_101 = arith.constant 7 : index
    %c0_102 = arith.constant 0 : index
    %c0_103 = arith.constant 0 : index
    %153 = vector.load %arg9[%c7_101, %c0_102, %c0_103] : memref<9x16x12xf32, #tpu.memory_space<vmem>>, vector<1x16x12xf32>
    %154 = vector.shape_cast %153 : vector<1x16x12xf32> to vector<16x12xf32>
    %cst_104 = arith.constant dense<0.000000e+00> : vector<64x12xf32>
    %155 = tpu.matmul %119, %154, %cst_104 {dimension_numbers = #tpu.dot_dimension_numbers<[1], [0], [0], [1], [0, 0, 1, 1], [], []>} : vector<64x16xf32>, vector<16x12xf32>, vector<64x12xf32> -> vector<64x12xf32>
    %156 = arith.addf %152, %155 : vector<64x12xf32>
    %c8_105 = arith.constant 8 : index
    %c0_106 = arith.constant 0 : index
    %c0_107 = arith.constant 0 : index
    %157 = vector.load %arg9[%c8_105, %c0_106, %c0_107] : memref<9x16x12xf32, #tpu.memory_space<vmem>>, vector<1x16x12xf32>
    %158 = vector.shape_cast %157 : vector<1x16x12xf32> to vector<16x12xf32>
    %cst_108 = arith.constant dense<0.000000e+00> : vector<64x12xf32>
    %159 = tpu.matmul %124, %158, %cst_108 {dimension_numbers = #tpu.dot_dimension_numbers<[1], [0], [0], [1], [0, 0, 1, 1], [], []>} : vector<64x16xf32>, vector<16x12xf32>, vector<64x12xf32> -> vector<64x12xf32>
    %160 = arith.addf %156, %159 : vector<64x12xf32>
    %c0_109 = arith.constant 0 : index
    %c0_110 = arith.constant 0 : index
    %161 = vector.load %arg10[%c0_109, %c0_110] : memref<1x12xf32, #tpu.memory_space<vmem>>, vector<1x12xf32>
    %162 = vector.broadcast %161 : vector<1x12xf32> to vector<64x12xf32>
    %163 = arith.addf %160, %162 : vector<64x12xf32>
    %164 = vector.extract_strided_slice %163 {offsets = [0, 0], sizes = [64, 6], strides = [1, 1]} : vector<64x12xf32> to vector<64x6xf32>
    %165 = vector.extract_strided_slice %163 {offsets = [0, 6], sizes = [64, 6], strides = [1, 1]} : vector<64x12xf32> to vector<64x6xf32>
    %cst_111 = arith.constant 2.000000e+00 : f32
    %166 = vector.broadcast %cst_111 : f32 to vector<64x6xf32>
    %167 = arith.addf %165, %166 : vector<64x6xf32>
    %168 = math.absf %167 : vector<64x6xf32>
    %cst_112 = arith.constant 0.000000e+00 : f32
    %169 = vector.broadcast %cst_112 : f32 to vector<64x6xf32>
    %170 = arith.subf %169, %168 : vector<64x6xf32>
    %171 = math.exp %170 : vector<64x6xf32>
    %cst_113 = arith.constant 0.000000e+00 : f32
    %172 = vector.broadcast %cst_113 : f32 to vector<64x6xf32>
    %173 = arith.minimumf %167, %172 : vector<64x6xf32>
    %cst_114 = arith.constant 1.000000e+00 : f32
    %174 = vector.broadcast %cst_114 : f32 to vector<64x6xf32>
    %175 = arith.addf %174, %171 : vector<64x6xf32>
    %176 = math.log %175 : vector<64x6xf32>
    %177 = arith.subf %173, %176 : vector<64x6xf32>
    %cst_115 = arith.constant 1.000000e+00 : f32
    %178 = vector.broadcast %cst_115 : f32 to vector<64x6xf32>
    %179 = arith.addf %178, %171 : vector<64x6xf32>
    %180 = tpu.reciprocal %179 {approx = true} : vector<64x6xf32> -> vector<64x6xf32>
    %cst_116 = arith.constant 0.000000e+00 : f32
    %181 = vector.broadcast %cst_116 : f32 to vector<64x6xf32>
    %182 = arith.cmpf oge, %167, %181 : vector<64x6xf32>
    %183 = arith.mulf %171, %180 : vector<64x6xf32>
    %184 = arith.select %182, %180, %183 : vector<64x6xi1>, vector<64x6xf32>
    %185 = arith.mulf %11, %184 : vector<64x6xf32>
    %186 = arith.addf %185, %164 : vector<64x6xf32>
    %187 = tpu.concatenate %10, %186 in 1 : vector<64x6xf32>, vector<64x6xf32> -> vector<64x12xf32>
    %c0_117 = arith.constant 0 : index
    %c0_118 = arith.constant 0 : index
    %c0_119 = arith.constant 0 : index
    %188 = vector.load %arg11[%c0_117, %c0_118, %c0_119] : memref<1x64x12xf32, #tpu.memory_space<vmem>>, vector<1x64x12xf32>
    %189 = vector.shape_cast %188 : vector<1x64x12xf32> to vector<64x12xf32>
    %190 = vector.shape_cast %187 : vector<64x12xf32> to vector<1x64x12xf32>
    tpu.vector_store %arg11[%c0_117, %c0_118, %c0_119], %190 {strides = array<i32>} : memref<1x64x12xf32, #tpu.memory_space<vmem>>, vector<1x64x12xf32>,
    %cst_120 = arith.constant dense<0.000000e+00> : vector<6xf32>
    %191 = vector.multi_reduction <add>, %177, %cst_120 [0] : vector<64x6xf32> to vector<6xf32>
    %192 = vector.shape_cast %191 : vector<6xf32> to vector<1x6xf32>
    %c0_121 = arith.constant 0 : index
    %c0_122 = arith.constant 0 : index
    %c0_123 = arith.constant 0 : index
    %193 = vector.load %arg12[%c0_121, %c0_122, %c0_123] : memref<1x1x6xf32, #tpu.memory_space<vmem>>, vector<1x1x6xf32>
    %194 = vector.shape_cast %193 : vector<1x1x6xf32> to vector<1x6xf32>
    %195 = vector.shape_cast %192 : vector<1x6xf32> to vector<1x1x6xf32>
    tpu.vector_store %arg12[%c0_121, %c0_122, %c0_123], %195 {strides = array<i32>} : memref<1x1x6xf32, #tpu.memory_space<vmem>>, vector<1x1x6xf32>,
    %cst_124 = arith.constant dense<0.000000e+00> : vector<12xf32>
    %196 = vector.multi_reduction <add>, %187, %cst_124 [0] : vector<64x12xf32> to vector<12xf32>
    %197 = vector.shape_cast %196 : vector<12xf32> to vector<1x12xf32>
    %c0_125 = arith.constant 0 : index
    %c0_126 = arith.constant 0 : index
    %c0_127 = arith.constant 0 : index
    %198 = vector.load %arg13[%c0_125, %c0_126, %c0_127] : memref<1x1x12xf32, #tpu.memory_space<vmem>>, vector<1x1x12xf32>
    %199 = vector.shape_cast %198 : vector<1x1x12xf32> to vector<1x12xf32>
    %200 = vector.shape_cast %197 : vector<1x12xf32> to vector<1x1x12xf32>
    tpu.vector_store %arg13[%c0_125, %c0_126, %c0_127], %200 {strides = array<i32>} : memref<1x1x12xf32, #tpu.memory_space<vmem>>, vector<1x1x12xf32>,
    %201 = arith.mulf %187, %187 : vector<64x12xf32>
    %cst_128 = arith.constant dense<0.000000e+00> : vector<12xf32>
    %202 = vector.multi_reduction <add>, %201, %cst_128 [0] : vector<64x12xf32> to vector<12xf32>
    %203 = vector.shape_cast %202 : vector<12xf32> to vector<1x12xf32>
    %c0_129 = arith.constant 0 : index
    %c0_130 = arith.constant 0 : index
    %c0_131 = arith.constant 0 : index
    %204 = vector.load %arg14[%c0_129, %c0_130, %c0_131] : memref<1x1x12xf32, #tpu.memory_space<vmem>>, vector<1x1x12xf32>
    %205 = vector.shape_cast %204 : vector<1x1x12xf32> to vector<1x12xf32>
    %206 = vector.shape_cast %203 : vector<1x12xf32> to vector<1x1x12xf32>
    tpu.vector_store %arg14[%c0_129, %c0_130, %c0_131], %206 {strides = array<i32>} : memref<1x1x12xf32, #tpu.memory_space<vmem>>, vector<1x1x12xf32>,
    return
  }
  func.func @transform_0(%arg0: i32) -> (i32, i32, i32) {
    %c0_i32 = arith.constant 0 : i32
    %c0_i32_0 = arith.constant 0 : i32
    %c0_i32_1 = arith.constant 0 : i32
    return %arg0, %c0_i32, %c0_i32_0 : i32, i32, i32
  }
  func.func @transform_1(%arg0: i32) -> (i32, i32) {
    %c0_i32 = arith.constant 0 : i32
    %c0_i32_0 = arith.constant 0 : i32
    %c0_i32_1 = arith.constant 0 : i32
    return %c0_i32, %c0_i32_0 : i32, i32
  }
  func.func @transform_2(%arg0: i32) -> (i32, i32) {
    %c0_i32 = arith.constant 0 : i32
    %c0_i32_0 = arith.constant 0 : i32
    %c0_i32_1 = arith.constant 0 : i32
    return %c0_i32, %c0_i32_0 : i32, i32
  }
  func.func @transform_3(%arg0: i32) -> (i32, i32) {
    %c0_i32 = arith.constant 0 : i32
    %c0_i32_0 = arith.constant 0 : i32
    %c0_i32_1 = arith.constant 0 : i32
    return %c0_i32, %c0_i32_0 : i32, i32
  }
  func.func @transform_4(%arg0: i32) -> (i32, i32) {
    %c0_i32 = arith.constant 0 : i32
    %c0_i32_0 = arith.constant 0 : i32
    %c0_i32_1 = arith.constant 0 : i32
    return %c0_i32, %c0_i32_0 : i32, i32
  }
  func.func @transform_5(%arg0: i32) -> (i32, i32) {
    %c0_i32 = arith.constant 0 : i32
    %c0_i32_0 = arith.constant 0 : i32
    %c0_i32_1 = arith.constant 0 : i32
    return %c0_i32, %c0_i32_0 : i32, i32
  }
  func.func @transform_6(%arg0: i32) -> (i32, i32) {
    %c0_i32 = arith.constant 0 : i32
    %c0_i32_0 = arith.constant 0 : i32
    %c0_i32_1 = arith.constant 0 : i32
    return %c0_i32, %c0_i32_0 : i32, i32
  }
  func.func @transform_7(%arg0: i32) -> (i32, i32) {
    %c0_i32 = arith.constant 0 : i32
    %c0_i32_0 = arith.constant 0 : i32
    %c0_i32_1 = arith.constant 0 : i32
    return %c0_i32, %c0_i32_0 : i32, i32
  }
  func.func @transform_8(%arg0: i32) -> (i32, i32, i32) {
    %c0_i32 = arith.constant 0 : i32
    %c0_i32_0 = arith.constant 0 : i32
    %c0_i32_1 = arith.constant 0 : i32
    %c0_i32_2 = arith.constant 0 : i32
    return %c0_i32, %c0_i32_0, %c0_i32_1 : i32, i32, i32
  }
  func.func @transform_9(%arg0: i32) -> (i32, i32) {
    %c0_i32 = arith.constant 0 : i32
    %c0_i32_0 = arith.constant 0 : i32
    %c0_i32_1 = arith.constant 0 : i32
    return %c0_i32, %c0_i32_0 : i32, i32
  }
  func.func @transform_10(%arg0: i32) -> (i32, i32, i32) {
    %c0_i32 = arith.constant 0 : i32
    %c0_i32_0 = arith.constant 0 : i32
    %c0_i32_1 = arith.constant 0 : i32
    return %arg0, %c0_i32, %c0_i32_0 : i32, i32, i32
  }
  func.func @transform_11(%arg0: i32) -> (i32, i32, i32) {
    %c0_i32 = arith.constant 0 : i32
    %c0_i32_0 = arith.constant 0 : i32
    %c0_i32_1 = arith.constant 0 : i32
    return %arg0, %c0_i32, %c0_i32_0 : i32, i32, i32
  }
  func.func @transform_12(%arg0: i32) -> (i32, i32, i32) {
    %c0_i32 = arith.constant 0 : i32
    %c0_i32_0 = arith.constant 0 : i32
    %c0_i32_1 = arith.constant 0 : i32
    return %arg0, %c0_i32, %c0_i32_0 : i32, i32, i32
  }
  func.func @transform_13(%arg0: i32) -> (i32, i32, i32) {
    %c0_i32 = arith.constant 0 : i32
    %c0_i32_0 = arith.constant 0 : i32
    %c0_i32_1 = arith.constant 0 : i32
    return %arg0, %c0_i32, %c0_i32_0 : i32, i32, i32
  }
}

module attributes {stable_mosaic.version = 11 : i64} {
  func.func @_flow_step_kernel(%arg0: i32, %arg1: memref<1x64x12xf32, #tpu.memory_space<vmem>>, %arg2: memref<1x12xf32, #tpu.memory_space<vmem>>, %arg3: memref<1x12xf32, #tpu.memory_space<vmem>>, %arg4: memref<12x12xf32, #tpu.memory_space<vmem>>, %arg5: memref<54x16xf32, #tpu.memory_space<vmem>>, %arg6: memref<1x16xf32, #tpu.memory_space<vmem>>, %arg7: memref<16x16xf32, #tpu.memory_space<vmem>>, %arg8: memref<1x16xf32, #tpu.memory_space<vmem>>, %arg9: memref<9x16x12xf32, #tpu.memory_space<vmem>>, %arg10: memref<1x12xf32, #tpu.memory_space<vmem>>, %arg11: memref<1x64x12xf32, #tpu.memory_space<vmem>>, %arg12: memref<1x1x6xf32, #tpu.memory_space<vmem>>, %arg13: memref<1x1x12xf32, #tpu.memory_space<vmem>>, %arg14: memref<1x1x12xf32, #tpu.memory_space<vmem>>, %arg15: memref<96x6xf32, #tpu.memory_space<vmem>>, %arg16: memref<96x16xf32, #tpu.memory_space<vmem>>) attributes {dimension_semantics = [#tpu.dimension_semantics<parallel>], iteration_bounds = array<i64: 2>, scalar_prefetch = 0 : i64, scratch_operands = 2 : i64, tpu.core_type = #tpu.core_type<tc>, window_params = [{transform_indices = @transform_0, window_bounds = array<i64: 1, 64, 12>}, {pipeline_mode = #tpu.pipeline_mode<synchronous>, transform_indices = @transform_1, window_bounds = array<i64: 1, 12>}, {pipeline_mode = #tpu.pipeline_mode<synchronous>, transform_indices = @transform_2, window_bounds = array<i64: 1, 12>}, {pipeline_mode = #tpu.pipeline_mode<synchronous>, transform_indices = @transform_3, window_bounds = array<i64: 12, 12>}, {pipeline_mode = #tpu.pipeline_mode<synchronous>, transform_indices = @transform_4, window_bounds = array<i64: 54, 16>}, {pipeline_mode = #tpu.pipeline_mode<synchronous>, transform_indices = @transform_5, window_bounds = array<i64: 1, 16>}, {pipeline_mode = #tpu.pipeline_mode<synchronous>, transform_indices = @transform_6, window_bounds = array<i64: 16, 16>}, {pipeline_mode = #tpu.pipeline_mode<synchronous>, transform_indices = @transform_7, window_bounds = array<i64: 1, 16>}, {pipeline_mode = #tpu.pipeline_mode<synchronous>, transform_indices = @transform_8, window_bounds = array<i64: 9, 16, 12>}, {pipeline_mode = #tpu.pipeline_mode<synchronous>, transform_indices = @transform_9, window_bounds = array<i64: 1, 12>}, {transform_indices = @transform_10, window_bounds = array<i64: 1, 64, 12>}, {transform_indices = @transform_11, window_bounds = array<i64: 1, 1, 6>}, {transform_indices = @transform_12, window_bounds = array<i64: 1, 1, 12>}, {transform_indices = @transform_13, window_bounds = array<i64: 1, 1, 12>}]} {
    %c0 = arith.constant 0 : index
    %c0_0 = arith.constant 0 : index
    %c0_1 = arith.constant 0 : index
    %0 = vector.load %arg1[%c0, %c0_0, %c0_1] : memref<1x64x12xf32, #tpu.memory_space<vmem>>, vector<1x64x12xf32>
    %1 = vector.shape_cast %0 : vector<1x64x12xf32> to vector<64x12xf32>
    %c0_2 = arith.constant 0 : index
    %c0_3 = arith.constant 0 : index
    %2 = vector.load %arg2[%c0_2, %c0_3] : memref<1x12xf32, #tpu.memory_space<vmem>>, vector<1x12xf32>
    %3 = vector.broadcast %2 : vector<1x12xf32> to vector<64x12xf32>
    %4 = arith.mulf %1, %3 : vector<64x12xf32>
    %c0_4 = arith.constant 0 : index
    %c0_5 = arith.constant 0 : index
    %5 = vector.load %arg3[%c0_4, %c0_5] : memref<1x12xf32, #tpu.memory_space<vmem>>, vector<1x12xf32>
    %6 = vector.broadcast %5 : vector<1x12xf32> to vector<64x12xf32>
    %7 = arith.addf %4, %6 : vector<64x12xf32>
    %c0_6 = arith.constant 0 : index
    %c0_7 = arith.constant 0 : index
    %8 = vector.load %arg4[%c0_6, %c0_7] : memref<12x12xf32, #tpu.memory_space<vmem>>, vector<12x12xf32>
    %cst = arith.constant dense<0.000000e+00> : vector<64x12xf32>
    %9 = tpu.matmul %7, %8, %cst {dimension_numbers = #tpu.dot_dimension_numbers<[1], [0], [0], [1], [0, 0, 1, 1], [], []>} : vector<64x12xf32>, vector<12x12xf32>, vector<64x12xf32> -> vector<64x12xf32>
    %10 = vector.extract_strided_slice %9 {offsets = [0, 0], sizes = [64, 6], strides = [1, 1]} : vector<64x12xf32> to vector<64x6xf32>
    %11 = vector.extract_strided_slice %9 {offsets = [0, 6], sizes = [64, 6], strides = [1, 1]} : vector<64x12xf32> to vector<64x6xf32>
    %12 = tpu.iota {dimensions = array<i32: 0>} : vector<64x1xi32>
    %c8_i32 = arith.constant 8 : i32
    %c0_i32 = arith.constant 0 : i32
    %13 = arith.cmpi eq, %c8_i32, %c0_i32 : i32
    %c1_i32 = arith.constant 1 : i32
    %14 = arith.select %13, %c1_i32, %c8_i32 : i32
    %15 = vector.broadcast %14 : i32 to vector<64x1xi32>
    %16 = arith.remsi %12, %15 : vector<64x1xi32>
    %c0_i32_8 = arith.constant 0 : i32
    %17 = vector.broadcast %c0_i32_8 : i32 to vector<64x1xi32>
    %18 = arith.cmpi ne, %16, %17 : vector<64x1xi32>
    %c0_i32_9 = arith.constant 0 : i32
    %19 = vector.broadcast %c0_i32_9 : i32 to vector<64x1xi32>
    %20 = arith.cmpi slt, %16, %19 : vector<64x1xi32>
    %c0_i32_10 = arith.constant 0 : i32
    %21 = arith.cmpi slt, %14, %c0_i32_10 : i32
    %22 = vector.broadcast %21 : i1 to vector<64x1xi1>
    %23 = vector.broadcast %22 : vector<64x1xi1> to vector<64x1xi1>
    %24 = arith.xori %20, %23 : vector<64x1xi1>
    %25 = arith.andi %24, %18 : vector<64x1xi1>
    %26 = vector.broadcast %14 : i32 to vector<64x1xi32>
    %27 = arith.addi %16, %26 : vector<64x1xi32>
    %28 = arith.select %25, %27, %16 : vector<64x1xi1>, vector<64x1xi32>
    %c1_i32_11 = arith.constant 1 : i32
    %29 = vector.broadcast %c1_i32_11 : i32 to vector<64x1xi32>
    %30 = arith.cmpi sge, %28, %29 : vector<64x1xi32>
    %c6_i32 = arith.constant 6 : i32
    %31 = vector.broadcast %c6_i32 : i32 to vector<64x1xi32>
    %32 = arith.cmpi sle, %28, %31 : vector<64x1xi32>
    %cst_12 = arith.constant 0.000000e+00 : f32
    %33 = vector.broadcast %cst_12 : f32 to vector<16x6xf32>
    %c0_13 = arith.constant 0 : index
    %c0_14 = arith.constant 0 : index
    %34 = vector.load %arg15[%c0_13, %c0_14] : memref<96x6xf32, #tpu.memory_space<vmem>>, vector<16x6xf32>
    tpu.vector_store %arg15[%c0_13, %c0_14], %33 {strides = array<i32>} : memref<96x6xf32, #tpu.memory_space<vmem>>, vector<16x6xf32>,
    %cst_15 = arith.constant 0.000000e+00 : f32
    %35 = vector.broadcast %cst_15 : f32 to vector<16x6xf32>
    %c80 = arith.constant 80 : index
    %c0_16 = arith.constant 0 : index
    %36 = vector.load %arg15[%c80, %c0_16] : memref<96x6xf32, #tpu.memory_space<vmem>>, vector<16x6xf32>
    tpu.vector_store %arg15[%c80, %c0_16], %35 {strides = array<i32>} : memref<96x6xf32, #tpu.memory_space<vmem>>, vector<16x6xf32>,
    %c16 = arith.constant 16 : index
    %c0_17 = arith.constant 0 : index
    %37 = vector.load %arg15[%c16, %c0_17] : memref<96x6xf32, #tpu.memory_space<vmem>>, vector<64x6xf32>
    tpu.vector_store %arg15[%c16, %c0_17], %10 {strides = array<i32>} : memref<96x6xf32, #tpu.memory_space<vmem>>, vector<64x6xf32>,
    %c7 = arith.constant 7 : index
    %c0_18 = arith.constant 0 : index
    %38 = vector.load %arg15[%c7, %c0_18] : memref<96x6xf32, #tpu.memory_space<vmem>>, vector<64x6xf32>
    %cst_19 = arith.constant 0.000000e+00 : f32
    %39 = vector.shape_cast %30 : vector<64x1xi1> to vector<64x1xi1>
    %40 = vector.broadcast %39 : vector<64x1xi1> to vector<64x6xi1>
    %41 = vector.broadcast %cst_19 : f32 to vector<64x6xf32>
    %42 = arith.select %40, %38, %41 : vector<64x6xi1>, vector<64x6xf32>
    %c8 = arith.constant 8 : index
    %c0_20 = arith.constant 0 : index
    %43 = vector.load %arg15[%c8, %c0_20] : memref<96x6xf32, #tpu.memory_space<vmem>>, vector<64x6xf32>
    %c9 = arith.constant 9 : index
    %c0_21 = arith.constant 0 : index
    %44 = vector.load %arg15[%c9, %c0_21] : memref<96x6xf32, #tpu.memory_space<vmem>>, vector<64x6xf32>
    %cst_22 = arith.constant 0.000000e+00 : f32
    %45 = vector.shape_cast %32 : vector<64x1xi1> to vector<64x1xi1>
    %46 = vector.broadcast %45 : vector<64x1xi1> to vector<64x6xi1>
    %47 = vector.broadcast %cst_22 : f32 to vector<64x6xf32>
    %48 = arith.select %46, %44, %47 : vector<64x6xi1>, vector<64x6xf32>
    %c15 = arith.constant 15 : index
    %c0_23 = arith.constant 0 : index
    %49 = vector.load %arg15[%c15, %c0_23] : memref<96x6xf32, #tpu.memory_space<vmem>>, vector<64x6xf32>
    %cst_24 = arith.constant 0.000000e+00 : f32
    %50 = vector.shape_cast %30 : vector<64x1xi1> to vector<64x1xi1>
    %51 = vector.broadcast %50 : vector<64x1xi1> to vector<64x6xi1>
    %52 = vector.broadcast %cst_24 : f32 to vector<64x6xf32>
    %53 = arith.select %51, %49, %52 : vector<64x6xi1>, vector<64x6xf32>
    %c16_25 = arith.constant 16 : index
    %c0_26 = arith.constant 0 : index
    %54 = vector.load %arg15[%c16_25, %c0_26] : memref<96x6xf32, #tpu.memory_space<vmem>>, vector<64x6xf32>
    %c17 = arith.constant 17 : index
    %c0_27 = arith.constant 0 : index
    %55 = vector.load %arg15[%c17, %c0_27] : memref<96x6xf32, #tpu.memory_space<vmem>>, vector<64x6xf32>
    %cst_28 = arith.constant 0.000000e+00 : f32
    %56 = vector.shape_cast %32 : vector<64x1xi1> to vector<64x1xi1>
    %57 = vector.broadcast %56 : vector<64x1xi1> to vector<64x6xi1>
    %58 = vector.broadcast %cst_28 : f32 to vector<64x6xf32>
    %59 = arith.select %57, %55, %58 : vector<64x6xi1>, vector<64x6xf32>
    %c23 = arith.constant 23 : index
    %c0_29 = arith.constant 0 : index
    %60 = vector.load %arg15[%c23, %c0_29] : memref<96x6xf32, #tpu.memory_space<vmem>>, vector<64x6xf32>
    %cst_30 = arith.constant 0.000000e+00 : f32
    %61 = vector.shape_cast %30 : vector<64x1xi1> to vector<64x1xi1>
    %62 = vector.broadcast %61 : vector<64x1xi1> to vector<64x6xi1>
    %63 = vector.broadcast %cst_30 : f32 to vector<64x6xf32>
    %64 = arith.select %62, %60, %63 : vector<64x6xi1>, vector<64x6xf32>
    %c24 = arith.constant 24 : index
    %c0_31 = arith.constant 0 : index
    %65 = vector.load %arg15[%c24, %c0_31] : memref<96x6xf32, #tpu.memory_space<vmem>>, vector<64x6xf32>
    %c25 = arith.constant 25 : index
    %c0_32 = arith.constant 0 : index
    %66 = vector.load %arg15[%c25, %c0_32] : memref<96x6xf32, #tpu.memory_space<vmem>>, vector<64x6xf32>
    %cst_33 = arith.constant 0.000000e+00 : f32
    %67 = vector.shape_cast %32 : vector<64x1xi1> to vector<64x1xi1>
    %68 = vector.broadcast %67 : vector<64x1xi1> to vector<64x6xi1>
    %69 = vector.broadcast %cst_33 : f32 to vector<64x6xf32>
    %70 = arith.select %68, %66, %69 : vector<64x6xi1>, vector<64x6xf32>
    %71 = tpu.concatenate %42, %43, %48, %53, %54, %59, %64, %65, %70 in 1 : vector<64x6xf32>, vector<64x6xf32>, vector<64x6xf32>, vector<64x6xf32>, vector<64x6xf32>, vector<64x6xf32>, vector<64x6xf32>, vector<64x6xf32>, vector<64x6xf32> -> vector<64x54xf32>
    %c0_34 = arith.constant 0 : index
    %c0_35 = arith.constant 0 : index
    %72 = vector.load %arg5[%c0_34, %c0_35] : memref<54x16xf32, #tpu.memory_space<vmem>>, vector<54x16xf32>
    %cst_36 = arith.constant dense<0.000000e+00> : vector<64x16xf32>
    %73 = tpu.matmul %71, %72, %cst_36 {dimension_numbers = #tpu.dot_dimension_numbers<[1], [0], [0], [1], [0, 0, 1, 1], [], []>} : vector<64x54xf32>, vector<54x16xf32>, vector<64x16xf32> -> vector<64x16xf32>
    %c0_37 = arith.constant 0 : index
    %c0_38 = arith.constant 0 : index
    %74 = vector.load %arg6[%c0_37, %c0_38] : memref<1x16xf32, #tpu.memory_space<vmem>>, vector<1x16xf32>
    %75 = vector.broadcast %74 : vector<1x16xf32> to vector<64x16xf32>
    %76 = arith.addf %73, %75 : vector<64x16xf32>
    %cst_39 = arith.constant 0.000000e+00 : f32
    %77 = vector.broadcast %cst_39 : f32 to vector<64x16xf32>
    %78 = arith.maximumf %76, %77 : vector<64x16xf32>
    %c0_40 = arith.constant 0 : index
    %c0_41 = arith.constant 0 : index
    %79 = vector.load %arg7[%c0_40, %c0_41] : memref<16x16xf32, #tpu.memory_space<vmem>>, vector<16x16xf32>
    %cst_42 = arith.constant dense<0.000000e+00> : vector<64x16xf32>
    %80 = tpu.matmul %78, %79, %cst_42 {dimension_numbers = #tpu.dot_dimension_numbers<[1], [0], [0], [1], [0, 0, 1, 1], [], []>} : vector<64x16xf32>, vector<16x16xf32>, vector<64x16xf32> -> vector<64x16xf32>
    %c0_43 = arith.constant 0 : index
    %c0_44 = arith.constant 0 : index
    %81 = vector.load %arg8[%c0_43, %c0_44] : memref<1x16xf32, #tpu.memory_space<vmem>>, vector<1x16xf32>
    %82 = vector.broadcast %81 : vector<1x16xf32> to vector<64x16xf32>
    %83 = arith.addf %80, %82 : vector<64x16xf32>
    %cst_45 = arith.constant 0.000000e+00 : f32
    %84 = vector.broadcast %cst_45 : f32 to vector<64x16xf32>
    %85 = arith.maximumf %83, %84 : vector<64x16xf32>
    %cst_46 = arith.constant 0.000000e+00 : f32
    %86 = vector.broadcast %cst_46 : f32 to vector<16x16xf32>
    %c0_47 = arith.constant 0 : index
    %c0_48 = arith.constant 0 : index
    %87 = vector.load %arg16[%c0_47, %c0_48] : memref<96x16xf32, #tpu.memory_space<vmem>>, vector<16x16xf32>
    tpu.vector_store %arg16[%c0_47, %c0_48], %86 {strides = array<i32>} : memref<96x16xf32, #tpu.memory_space<vmem>>, vector<16x16xf32>,
    %cst_49 = arith.constant 0.000000e+00 : f32
    %88 = vector.broadcast %cst_49 : f32 to vector<16x16xf32>
    %c80_50 = arith.constant 80 : index
    %c0_51 = arith.constant 0 : index
    %89 = vector.load %arg16[%c80_50, %c0_51] : memref<96x16xf32, #tpu.memory_space<vmem>>, vector<16x16xf32>
    tpu.vector_store %arg16[%c80_50, %c0_51], %88 {strides = array<i32>} : memref<96x16xf32, #tpu.memory_space<vmem>>, vector<16x16xf32>,
    %c16_52 = arith.constant 16 : index
    %c0_53 = arith.constant 0 : index
    %90 = vector.load %arg16[%c16_52, %c0_53] : memref<96x16xf32, #tpu.memory_space<vmem>>, vector<64x16xf32>
    tpu.vector_store %arg16[%c16_52, %c0_53], %85 {strides = array<i32>} : memref<96x16xf32, #tpu.memory_space<vmem>>, vector<64x16xf32>,
    %cst_54 = arith.constant 0.000000e+00 : f32
    %91 = vector.broadcast %cst_54 : f32 to vector<64x12xf32>
    %c7_55 = arith.constant 7 : index
    %c0_56 = arith.constant 0 : index
    %92 = vector.load %arg16[%c7_55, %c0_56] : memref<96x16xf32, #tpu.memory_space<vmem>>, vector<64x16xf32>
    %cst_57 = arith.constant 0.000000e+00 : f32
    %93 = vector.shape_cast %30 : vector<64x1xi1> to vector<64x1xi1>
    %94 = vector.broadcast %93 : vector<64x1xi1> to vector<64x16xi1>
    %95 = vector.broadcast %cst_57 : f32 to vector<64x16xf32>
    %96 = arith.select %94, %92, %95 : vector<64x16xi1>, vector<64x16xf32>
    %c8_58 = arith.constant 8 : index
    %c0_59 = arith.constant 0 : index
    %97 = vector.load %arg16[%c8_58, %c0_59] : memref<96x16xf32, #tpu.memory_space<vmem>>, vector<64x16xf32>
    %c9_60 = arith.constant 9 : index
    %c0_61 = arith.constant 0 : index
    %98 = vector.load %arg16[%c9_60, %c0_61] : memref<96x16xf32, #tpu.memory_space<vmem>>, vector<64x16xf32>
    %cst_62 = arith.constant 0.000000e+00 : f32
    %99 = vector.shape_cast %32 : vector<64x1xi1> to vector<64x1xi1>
    %100 = vector.broadcast %99 : vector<64x1xi1> to vector<64x16xi1>
    %101 = vector.broadcast %cst_62 : f32 to vector<64x16xf32>
    %102 = arith.select %100, %98, %101 : vector<64x16xi1>, vector<64x16xf32>
    %c15_63 = arith.constant 15 : index
    %c0_64 = arith.constant 0 : index
    %103 = vector.load %arg16[%c15_63, %c0_64] : memref<96x16xf32, #tpu.memory_space<vmem>>, vector<64x16xf32>
    %cst_65 = arith.constant 0.000000e+00 : f32
    %104 = vector.shape_cast %30 : vector<64x1xi1> to vector<64x1xi1>
    %105 = vector.broadcast %104 : vector<64x1xi1> to vector<64x16xi1>
    %106 = vector.broadcast %cst_65 : f32 to vector<64x16xf32>
    %107 = arith.select %105, %103, %106 : vector<64x16xi1>, vector<64x16xf32>
    %c16_66 = arith.constant 16 : index
    %c0_67 = arith.constant 0 : index
    %108 = vector.load %arg16[%c16_66, %c0_67] : memref<96x16xf32, #tpu.memory_space<vmem>>, vector<64x16xf32>
    %c17_68 = arith.constant 17 : index
    %c0_69 = arith.constant 0 : index
    %109 = vector.load %arg16[%c17_68, %c0_69] : memref<96x16xf32, #tpu.memory_space<vmem>>, vector<64x16xf32>
    %cst_70 = arith.constant 0.000000e+00 : f32
    %110 = vector.shape_cast %32 : vector<64x1xi1> to vector<64x1xi1>
    %111 = vector.broadcast %110 : vector<64x1xi1> to vector<64x16xi1>
    %112 = vector.broadcast %cst_70 : f32 to vector<64x16xf32>
    %113 = arith.select %111, %109, %112 : vector<64x16xi1>, vector<64x16xf32>
    %c23_71 = arith.constant 23 : index
    %c0_72 = arith.constant 0 : index
    %114 = vector.load %arg16[%c23_71, %c0_72] : memref<96x16xf32, #tpu.memory_space<vmem>>, vector<64x16xf32>
    %cst_73 = arith.constant 0.000000e+00 : f32
    %115 = vector.shape_cast %30 : vector<64x1xi1> to vector<64x1xi1>
    %116 = vector.broadcast %115 : vector<64x1xi1> to vector<64x16xi1>
    %117 = vector.broadcast %cst_73 : f32 to vector<64x16xf32>
    %118 = arith.select %116, %114, %117 : vector<64x16xi1>, vector<64x16xf32>
    %c24_74 = arith.constant 24 : index
    %c0_75 = arith.constant 0 : index
    %119 = vector.load %arg16[%c24_74, %c0_75] : memref<96x16xf32, #tpu.memory_space<vmem>>, vector<64x16xf32>
    %c25_76 = arith.constant 25 : index
    %c0_77 = arith.constant 0 : index
    %120 = vector.load %arg16[%c25_76, %c0_77] : memref<96x16xf32, #tpu.memory_space<vmem>>, vector<64x16xf32>
    %cst_78 = arith.constant 0.000000e+00 : f32
    %121 = vector.shape_cast %32 : vector<64x1xi1> to vector<64x1xi1>
    %122 = vector.broadcast %121 : vector<64x1xi1> to vector<64x16xi1>
    %123 = vector.broadcast %cst_78 : f32 to vector<64x16xf32>
    %124 = arith.select %122, %120, %123 : vector<64x16xi1>, vector<64x16xf32>
    %c0_79 = arith.constant 0 : index
    %c0_80 = arith.constant 0 : index
    %c0_81 = arith.constant 0 : index
    %125 = vector.load %arg9[%c0_79, %c0_80, %c0_81] : memref<9x16x12xf32, #tpu.memory_space<vmem>>, vector<1x16x12xf32>
    %126 = vector.shape_cast %125 : vector<1x16x12xf32> to vector<16x12xf32>
    %cst_82 = arith.constant dense<0.000000e+00> : vector<64x12xf32>
    %127 = tpu.matmul %96, %126, %cst_82 {dimension_numbers = #tpu.dot_dimension_numbers<[1], [0], [0], [1], [0, 0, 1, 1], [], []>} : vector<64x16xf32>, vector<16x12xf32>, vector<64x12xf32> -> vector<64x12xf32>
    %128 = arith.addf %91, %127 : vector<64x12xf32>
    %c1 = arith.constant 1 : index
    %c0_83 = arith.constant 0 : index
    %c0_84 = arith.constant 0 : index
    %129 = vector.load %arg9[%c1, %c0_83, %c0_84] : memref<9x16x12xf32, #tpu.memory_space<vmem>>, vector<1x16x12xf32>
    %130 = vector.shape_cast %129 : vector<1x16x12xf32> to vector<16x12xf32>
    %cst_85 = arith.constant dense<0.000000e+00> : vector<64x12xf32>
    %131 = tpu.matmul %97, %130, %cst_85 {dimension_numbers = #tpu.dot_dimension_numbers<[1], [0], [0], [1], [0, 0, 1, 1], [], []>} : vector<64x16xf32>, vector<16x12xf32>, vector<64x12xf32> -> vector<64x12xf32>
    %132 = arith.addf %128, %131 : vector<64x12xf32>
    %c2 = arith.constant 2 : index
    %c0_86 = arith.constant 0 : index
    %c0_87 = arith.constant 0 : index
    %133 = vector.load %arg9[%c2, %c0_86, %c0_87] : memref<9x16x12xf32, #tpu.memory_space<vmem>>, vector<1x16x12xf32>
    %134 = vector.shape_cast %133 : vector<1x16x12xf32> to vector<16x12xf32>
    %cst_88 = arith.constant dense<0.000000e+00> : vector<64x12xf32>
    %135 = tpu.matmul %102, %134, %cst_88 {dimension_numbers = #tpu.dot_dimension_numbers<[1], [0], [0], [1], [0, 0, 1, 1], [], []>} : vector<64x16xf32>, vector<16x12xf32>, vector<64x12xf32> -> vector<64x12xf32>
    %136 = arith.addf %132, %135 : vector<64x12xf32>
    %c3 = arith.constant 3 : index
    %c0_89 = arith.constant 0 : index
    %c0_90 = arith.constant 0 : index
    %137 = vector.load %arg9[%c3, %c0_89, %c0_90] : memref<9x16x12xf32, #tpu.memory_space<vmem>>, vector<1x16x12xf32>
    %138 = vector.shape_cast %137 : vector<1x16x12xf32> to vector<16x12xf32>
    %cst_91 = arith.constant dense<0.000000e+00> : vector<64x12xf32>
    %139 = tpu.matmul %107, %138, %cst_91 {dimension_numbers = #tpu.dot_dimension_numbers<[1], [0], [0], [1], [0, 0, 1, 1], [], []>} : vector<64x16xf32>, vector<16x12xf32>, vector<64x12xf32> -> vector<64x12xf32>
    %140 = arith.addf %136, %139 : vector<64x12xf32>
    %c4 = arith.constant 4 : index
    %c0_92 = arith.constant 0 : index
    %c0_93 = arith.constant 0 : index
    %141 = vector.load %arg9[%c4, %c0_92, %c0_93] : memref<9x16x12xf32, #tpu.memory_space<vmem>>, vector<1x16x12xf32>
    %142 = vector.shape_cast %141 : vector<1x16x12xf32> to vector<16x12xf32>
    %cst_94 = arith.constant dense<0.000000e+00> : vector<64x12xf32>
    %143 = tpu.matmul %108, %142, %cst_94 {dimension_numbers = #tpu.dot_dimension_numbers<[1], [0], [0], [1], [0, 0, 1, 1], [], []>} : vector<64x16xf32>, vector<16x12xf32>, vector<64x12xf32> -> vector<64x12xf32>
    %144 = arith.addf %140, %143 : vector<64x12xf32>
    %c5 = arith.constant 5 : index
    %c0_95 = arith.constant 0 : index
    %c0_96 = arith.constant 0 : index
    %145 = vector.load %arg9[%c5, %c0_95, %c0_96] : memref<9x16x12xf32, #tpu.memory_space<vmem>>, vector<1x16x12xf32>
    %146 = vector.shape_cast %145 : vector<1x16x12xf32> to vector<16x12xf32>
    %cst_97 = arith.constant dense<0.000000e+00> : vector<64x12xf32>
    %147 = tpu.matmul %113, %146, %cst_97 {dimension_numbers = #tpu.dot_dimension_numbers<[1], [0], [0], [1], [0, 0, 1, 1], [], []>} : vector<64x16xf32>, vector<16x12xf32>, vector<64x12xf32> -> vector<64x12xf32>
    %148 = arith.addf %144, %147 : vector<64x12xf32>
    %c6 = arith.constant 6 : index
    %c0_98 = arith.constant 0 : index
    %c0_99 = arith.constant 0 : index
    %149 = vector.load %arg9[%c6, %c0_98, %c0_99] : memref<9x16x12xf32, #tpu.memory_space<vmem>>, vector<1x16x12xf32>
    %150 = vector.shape_cast %149 : vector<1x16x12xf32> to vector<16x12xf32>
    %cst_100 = arith.constant dense<0.000000e+00> : vector<64x12xf32>
    %151 = tpu.matmul %118, %150, %cst_100 {dimension_numbers = #tpu.dot_dimension_numbers<[1], [0], [0], [1], [0, 0, 1, 1], [], []>} : vector<64x16xf32>, vector<16x12xf32>, vector<64x12xf32> -> vector<64x12xf32>
    %152 = arith.addf %148, %151 : vector<64x12xf32>
    %c7_101 = arith.constant 7 : index
    %c0_102 = arith.constant 0 : index
    %c0_103 = arith.constant 0 : index
    %153 = vector.load %arg9[%c7_101, %c0_102, %c0_103] : memref<9x16x12xf32, #tpu.memory_space<vmem>>, vector<1x16x12xf32>
    %154 = vector.shape_cast %153 : vector<1x16x12xf32> to vector<16x12xf32>
    %cst_104 = arith.constant dense<0.000000e+00> : vector<64x12xf32>
    %155 = tpu.matmul %119, %154, %cst_104 {dimension_numbers = #tpu.dot_dimension_numbers<[1], [0], [0], [1], [0, 0, 1, 1], [], []>} : vector<64x16xf32>, vector<16x12xf32>, vector<64x12xf32> -> vector<64x12xf32>
    %156 = arith.addf %152, %155 : vector<64x12xf32>
    %c8_105 = arith.constant 8 : index
    %c0_106 = arith.constant 0 : index
    %c0_107 = arith.constant 0 : index
    %157 = vector.load %arg9[%c8_105, %c0_106, %c0_107] : memref<9x16x12xf32, #tpu.memory_space<vmem>>, vector<1x16x12xf32>
    %158 = vector.shape_cast %157 : vector<1x16x12xf32> to vector<16x12xf32>
    %cst_108 = arith.constant dense<0.000000e+00> : vector<64x12xf32>
    %159 = tpu.matmul %124, %158, %cst_108 {dimension_numbers = #tpu.dot_dimension_numbers<[1], [0], [0], [1], [0, 0, 1, 1], [], []>} : vector<64x16xf32>, vector<16x12xf32>, vector<64x12xf32> -> vector<64x12xf32>
    %160 = arith.addf %156, %159 : vector<64x12xf32>
    %c0_109 = arith.constant 0 : index
    %c0_110 = arith.constant 0 : index
    %161 = vector.load %arg10[%c0_109, %c0_110] : memref<1x12xf32, #tpu.memory_space<vmem>>, vector<1x12xf32>
    %162 = vector.broadcast %161 : vector<1x12xf32> to vector<64x12xf32>
    %163 = arith.addf %160, %162 : vector<64x12xf32>
    %164 = vector.extract_strided_slice %163 {offsets = [0, 0], sizes = [64, 6], strides = [1, 1]} : vector<64x12xf32> to vector<64x6xf32>
    %165 = vector.extract_strided_slice %163 {offsets = [0, 6], sizes = [64, 6], strides = [1, 1]} : vector<64x12xf32> to vector<64x6xf32>
    %cst_111 = arith.constant 2.000000e+00 : f32
    %166 = vector.broadcast %cst_111 : f32 to vector<64x6xf32>
    %167 = arith.addf %165, %166 : vector<64x6xf32>
    %168 = math.absf %167 : vector<64x6xf32>
    %cst_112 = arith.constant 0.000000e+00 : f32
    %169 = vector.broadcast %cst_112 : f32 to vector<64x6xf32>
    %170 = arith.subf %169, %168 : vector<64x6xf32>
    %171 = math.exp %170 : vector<64x6xf32>
    %cst_113 = arith.constant 0.000000e+00 : f32
    %172 = vector.broadcast %cst_113 : f32 to vector<64x6xf32>
    %173 = arith.minimumf %167, %172 : vector<64x6xf32>
    %cst_114 = arith.constant 1.000000e+00 : f32
    %174 = vector.broadcast %cst_114 : f32 to vector<64x6xf32>
    %175 = arith.addf %174, %171 : vector<64x6xf32>
    %176 = math.log %175 : vector<64x6xf32>
    %177 = arith.subf %173, %176 : vector<64x6xf32>
    %cst_115 = arith.constant 1.000000e+00 : f32
    %178 = vector.broadcast %cst_115 : f32 to vector<64x6xf32>
    %179 = arith.addf %178, %171 : vector<64x6xf32>
    %180 = tpu.reciprocal %179 {approx = true} : vector<64x6xf32> -> vector<64x6xf32>
    %cst_116 = arith.constant 0.000000e+00 : f32
    %181 = vector.broadcast %cst_116 : f32 to vector<64x6xf32>
    %182 = arith.cmpf oge, %167, %181 : vector<64x6xf32>
    %183 = arith.mulf %171, %180 : vector<64x6xf32>
    %184 = arith.select %182, %180, %183 : vector<64x6xi1>, vector<64x6xf32>
    %185 = arith.mulf %11, %184 : vector<64x6xf32>
    %186 = arith.addf %185, %164 : vector<64x6xf32>
    %187 = tpu.concatenate %10, %186 in 1 : vector<64x6xf32>, vector<64x6xf32> -> vector<64x12xf32>
    %c0_117 = arith.constant 0 : index
    %c0_118 = arith.constant 0 : index
    %c0_119 = arith.constant 0 : index
    %188 = vector.load %arg11[%c0_117, %c0_118, %c0_119] : memref<1x64x12xf32, #tpu.memory_space<vmem>>, vector<1x64x12xf32>
    %189 = vector.shape_cast %188 : vector<1x64x12xf32> to vector<64x12xf32>
    %190 = vector.shape_cast %187 : vector<64x12xf32> to vector<1x64x12xf32>
    tpu.vector_store %arg11[%c0_117, %c0_118, %c0_119], %190 {strides = array<i32>} : memref<1x64x12xf32, #tpu.memory_space<vmem>>, vector<1x64x12xf32>,
    %cst_120 = arith.constant dense<0.000000e+00> : vector<6xf32>
    %191 = vector.multi_reduction <add>, %177, %cst_120 [0] : vector<64x6xf32> to vector<6xf32>
    %192 = vector.shape_cast %191 : vector<6xf32> to vector<1x6xf32>
    %c0_121 = arith.constant 0 : index
    %c0_122 = arith.constant 0 : index
    %c0_123 = arith.constant 0 : index
    %193 = vector.load %arg12[%c0_121, %c0_122, %c0_123] : memref<1x1x6xf32, #tpu.memory_space<vmem>>, vector<1x1x6xf32>
    %194 = vector.shape_cast %193 : vector<1x1x6xf32> to vector<1x6xf32>
    %195 = vector.shape_cast %192 : vector<1x6xf32> to vector<1x1x6xf32>
    tpu.vector_store %arg12[%c0_121, %c0_122, %c0_123], %195 {strides = array<i32>} : memref<1x1x6xf32, #tpu.memory_space<vmem>>, vector<1x1x6xf32>,
    %cst_124 = arith.constant dense<0.000000e+00> : vector<12xf32>
    %196 = vector.multi_reduction <add>, %187, %cst_124 [0] : vector<64x12xf32> to vector<12xf32>
    %197 = vector.shape_cast %196 : vector<12xf32> to vector<1x12xf32>
    %c0_125 = arith.constant 0 : index
    %c0_126 = arith.constant 0 : index
    %c0_127 = arith.constant 0 : index
    %198 = vector.load %arg13[%c0_125, %c0_126, %c0_127] : memref<1x1x12xf32, #tpu.memory_space<vmem>>, vector<1x1x12xf32>
    %199 = vector.shape_cast %198 : vector<1x1x12xf32> to vector<1x12xf32>
    %200 = vector.shape_cast %197 : vector<1x12xf32> to vector<1x1x12xf32>
    tpu.vector_store %arg13[%c0_125, %c0_126, %c0_127], %200 {strides = array<i32>} : memref<1x1x12xf32, #tpu.memory_space<vmem>>, vector<1x1x12xf32>,
    %201 = arith.mulf %187, %187 : vector<64x12xf32>
    %cst_128 = arith.constant dense<0.000000e+00> : vector<12xf32>
    %202 = vector.multi_reduction <add>, %201, %cst_128 [0] : vector<64x12xf32> to vector<12xf32>
    %203 = vector.shape_cast %202 : vector<12xf32> to vector<1x12xf32>
    %c0_129 = arith.constant 0 : index
    %c0_130 = arith.constant 0 : index
    %c0_131 = arith.constant 0 : index
    %204 = vector.load %arg14[%c0_129, %c0_130, %c0_131] : memref<1x1x12xf32, #tpu.memory_space<vmem>>, vector<1x1x12xf32>
    %205 = vector.shape_cast %204 : vector<1x1x12xf32> to vector<1x12xf32>
    %206 = vector.shape_cast %203 : vector<1x12xf32> to vector<1x1x12xf32>
    tpu.vector_store %arg14[%c0_129, %c0_130, %c0_131], %206 {strides = array<i32>} : memref<1x1x12xf32, #tpu.memory_space<vmem>>, vector<1x1x12xf32>,
    return
  }
  func.func @transform_0(%arg0: i32) -> (i32, i32, i32) {
    %c0_i32 = arith.constant 0 : i32
    %c0_i32_0 = arith.constant 0 : i32
    %c0_i32_1 = arith.constant 0 : i32
    return %arg0, %c0_i32, %c0_i32_0 : i32, i32, i32
  }
  func.func @transform_1(%arg0: i32) -> (i32, i32) {
    %c0_i32 = arith.constant 0 : i32
    %c0_i32_0 = arith.constant 0 : i32
    %c0_i32_1 = arith.constant 0 : i32
    return %c0_i32, %c0_i32_0 : i32, i32
  }
  func.func @transform_2(%arg0: i32) -> (i32, i32) {
    %c0_i32 = arith.constant 0 : i32
    %c0_i32_0 = arith.constant 0 : i32
    %c0_i32_1 = arith.constant 0 : i32
    return %c0_i32, %c0_i32_0 : i32, i32
  }
  func.func @transform_3(%arg0: i32) -> (i32, i32) {
    %c0_i32 = arith.constant 0 : i32
    %c0_i32_0 = arith.constant 0 : i32
    %c0_i32_1 = arith.constant 0 : i32
    return %c0_i32, %c0_i32_0 : i32, i32
  }
  func.func @transform_4(%arg0: i32) -> (i32, i32) {
    %c0_i32 = arith.constant 0 : i32
    %c0_i32_0 = arith.constant 0 : i32
    %c0_i32_1 = arith.constant 0 : i32
    return %c0_i32, %c0_i32_0 : i32, i32
  }
  func.func @transform_5(%arg0: i32) -> (i32, i32) {
    %c0_i32 = arith.constant 0 : i32
    %c0_i32_0 = arith.constant 0 : i32
    %c0_i32_1 = arith.constant 0 : i32
    return %c0_i32, %c0_i32_0 : i32, i32
  }
  func.func @transform_6(%arg0: i32) -> (i32, i32) {
    %c0_i32 = arith.constant 0 : i32
    %c0_i32_0 = arith.constant 0 : i32
    %c0_i32_1 = arith.constant 0 : i32
    return %c0_i32, %c0_i32_0 : i32, i32
  }
  func.func @transform_7(%arg0: i32) -> (i32, i32) {
    %c0_i32 = arith.constant 0 : i32
    %c0_i32_0 = arith.constant 0 : i32
    %c0_i32_1 = arith.constant 0 : i32
    return %c0_i32, %c0_i32_0 : i32, i32
  }
  func.func @transform_8(%arg0: i32) -> (i32, i32, i32) {
    %c0_i32 = arith.constant 0 : i32
    %c0_i32_0 = arith.constant 0 : i32
    %c0_i32_1 = arith.constant 0 : i32
    %c0_i32_2 = arith.constant 0 : i32
    return %c0_i32, %c0_i32_0, %c0_i32_1 : i32, i32, i32
  }
  func.func @transform_9(%arg0: i32) -> (i32, i32) {
    %c0_i32 = arith.constant 0 : i32
    %c0_i32_0 = arith.constant 0 : i32
    %c0_i32_1 = arith.constant 0 : i32
    return %c0_i32, %c0_i32_0 : i32, i32
  }
  func.func @transform_10(%arg0: i32) -> (i32, i32, i32) {
    %c0_i32 = arith.constant 0 : i32
    %c0_i32_0 = arith.constant 0 : i32
    %c0_i32_1 = arith.constant 0 : i32
    return %arg0, %c0_i32, %c0_i32_0 : i32, i32, i32
  }
  func.func @transform_11(%arg0: i32) -> (i32, i32, i32) {
    %c0_i32 = arith.constant 0 : i32
    %c0_i32_0 = arith.constant 0 : i32
    %c0_i32_1 = arith.constant 0 : i32
    return %arg0, %c0_i32, %c0_i32_0 : i32, i32, i32
  }
  func.func @transform_12(%arg0: i32) -> (i32, i32, i32) {
    %c0_i32 = arith.constant 0 : i32
    %c0_i32_0 = arith.constant 0 : i32
    %c0_i32_1 = arith.constant 0 : i32
    return %arg0, %c0_i32, %c0_i32_0 : i32, i32, i32
  }
  func.func @transform_13(%arg0: i32) -> (i32, i32, i32) {
    %c0_i32 = arith.constant 0 : i32
    %c0_i32_0 = arith.constant 0 : i32
    %c0_i32_1 = arith.constant 0 : i32
    return %arg0, %c0_i32, %c0_i32_0 : i32, i32, i32
  }
}

module attributes {stable_mosaic.version = 11 : i64} {
  func.func @_stats_kernel(%arg0: i32, %arg1: memref<32x24xf32, #tpu.memory_space<vmem>>, %arg2: memref<1x24xf32, #tpu.memory_space<vmem>>, %arg3: memref<1x24xf32, #tpu.memory_space<vmem>>) attributes {dimension_semantics = [#tpu.dimension_semantics<arbitrary>], iteration_bounds = array<i64: 1>, scalar_prefetch = 0 : i64, scratch_operands = 0 : i64, tpu.core_type = #tpu.core_type<tc>, window_params = [{transform_indices = @transform_0, window_bounds = array<i64: 32, 24>}, {pipeline_mode = #tpu.pipeline_mode<synchronous>, transform_indices = @transform_1, window_bounds = array<i64: 1, 24>}, {pipeline_mode = #tpu.pipeline_mode<synchronous>, transform_indices = @transform_2, window_bounds = array<i64: 1, 24>}]} {
    %c0_i32 = arith.constant 0 : i32
    %0 = arith.cmpi eq, %arg0, %c0_i32 : i32
    %1 = arith.extui %0 : i1 to i32
    %c0_i32_0 = arith.constant 0 : i32
    %2 = arith.cmpi ne, %1, %c0_i32_0 : i32
    scf.if %2 {
      %cst_13 = arith.constant 0.000000e+00 : f32
      %23 = vector.broadcast %cst_13 : f32 to vector<1x24xf32>
      %c0_14 = arith.constant 0 : index
      %c0_15 = arith.constant 0 : index
      %24 = vector.load %arg2[%c0_14, %c0_15] : memref<1x24xf32, #tpu.memory_space<vmem>>, vector<1x24xf32>
      tpu.vector_store %arg2[%c0_14, %c0_15], %23 {strides = array<i32>} : memref<1x24xf32, #tpu.memory_space<vmem>>, vector<1x24xf32>,
      %cst_16 = arith.constant 0.000000e+00 : f32
      %25 = vector.broadcast %cst_16 : f32 to vector<1x24xf32>
      %c0_17 = arith.constant 0 : index
      %c0_18 = arith.constant 0 : index
      %26 = vector.load %arg3[%c0_17, %c0_18] : memref<1x24xf32, #tpu.memory_space<vmem>>, vector<1x24xf32>
      tpu.vector_store %arg3[%c0_17, %c0_18], %25 {strides = array<i32>} : memref<1x24xf32, #tpu.memory_space<vmem>>, vector<1x24xf32>,
    } else {
    }
    %c0 = arith.constant 0 : index
    %c0_1 = arith.constant 0 : index
    %3 = vector.load %arg1[%c0, %c0_1] : memref<32x24xf32, #tpu.memory_space<vmem>>, vector<32x24xf32>
    %c32_i32 = arith.constant 32 : i32
    %4 = arith.muli %arg0, %c32_i32 : i32
    %5 = tpu.iota {dimensions = array<i32: 0>} : vector<32x24xi32>
    %6 = vector.broadcast %4 : i32 to vector<32x24xi32>
    %7 = arith.addi %6, %5 : vector<32x24xi32>
    %c32_i32_2 = arith.constant 32 : i32
    %8 = vector.broadcast %c32_i32_2 : i32 to vector<32x24xi32>
    %9 = arith.cmpi slt, %7, %8 : vector<32x24xi32>
    %cst = arith.constant 0.000000e+00 : f32
    %10 = vector.broadcast %cst : f32 to vector<32x24xf32>
    %11 = arith.select %9, %3, %10 : vector<32x24xi1>, vector<32x24xf32>
    %c0_3 = arith.constant 0 : index
    %c0_4 = arith.constant 0 : index
    %12 = vector.load %arg2[%c0_3, %c0_4] : memref<1x24xf32, #tpu.memory_space<vmem>>, vector<1x24xf32>
    %cst_5 = arith.constant dense<0.000000e+00> : vector<24xf32>
    %13 = vector.multi_reduction <add>, %11, %cst_5 [0] : vector<32x24xf32> to vector<24xf32>
    %14 = vector.shape_cast %13 : vector<24xf32> to vector<1x24xf32>
    %15 = arith.addf %12, %14 : vector<1x24xf32>
    %c0_6 = arith.constant 0 : index
    %c0_7 = arith.constant 0 : index
    %16 = vector.load %arg2[%c0_6, %c0_7] : memref<1x24xf32, #tpu.memory_space<vmem>>, vector<1x24xf32>
    tpu.vector_store %arg2[%c0_6, %c0_7], %15 {strides = array<i32>} : memref<1x24xf32, #tpu.memory_space<vmem>>, vector<1x24xf32>,
    %c0_8 = arith.constant 0 : index
    %c0_9 = arith.constant 0 : index
    %17 = vector.load %arg3[%c0_8, %c0_9] : memref<1x24xf32, #tpu.memory_space<vmem>>, vector<1x24xf32>
    %18 = arith.mulf %11, %11 : vector<32x24xf32>
    %cst_10 = arith.constant dense<0.000000e+00> : vector<24xf32>
    %19 = vector.multi_reduction <add>, %18, %cst_10 [0] : vector<32x24xf32> to vector<24xf32>
    %20 = vector.shape_cast %19 : vector<24xf32> to vector<1x24xf32>
    %21 = arith.addf %17, %20 : vector<1x24xf32>
    %c0_11 = arith.constant 0 : index
    %c0_12 = arith.constant 0 : index
    %22 = vector.load %arg3[%c0_11, %c0_12] : memref<1x24xf32, #tpu.memory_space<vmem>>, vector<1x24xf32>
    tpu.vector_store %arg3[%c0_11, %c0_12], %21 {strides = array<i32>} : memref<1x24xf32, #tpu.memory_space<vmem>>, vector<1x24xf32>,
    return
  }
  func.func @transform_0(%arg0: i32) -> (i32, i32) {
    %c0_i32 = arith.constant 0 : i32
    %c0_i32_0 = arith.constant 0 : i32
    return %arg0, %c0_i32 : i32, i32
  }
  func.func @transform_1(%arg0: i32) -> (i32, i32) {
    %c0_i32 = arith.constant 0 : i32
    %c0_i32_0 = arith.constant 0 : i32
    %c0_i32_1 = arith.constant 0 : i32
    return %c0_i32, %c0_i32_0 : i32, i32
  }
  func.func @transform_2(%arg0: i32) -> (i32, i32) {
    %c0_i32 = arith.constant 0 : i32
    %c0_i32_0 = arith.constant 0 : i32
    %c0_i32_1 = arith.constant 0 : i32
    return %c0_i32, %c0_i32_0 : i32, i32
  }
}

module attributes {stable_mosaic.version = 11 : i64} {
  func.func @_flow_step_kernel(%arg0: i32, %arg1: memref<1x16x24xf32, #tpu.memory_space<vmem>>, %arg2: memref<1x24xf32, #tpu.memory_space<vmem>>, %arg3: memref<1x24xf32, #tpu.memory_space<vmem>>, %arg4: memref<24x24xf32, #tpu.memory_space<vmem>>, %arg5: memref<108x16xf32, #tpu.memory_space<vmem>>, %arg6: memref<1x16xf32, #tpu.memory_space<vmem>>, %arg7: memref<16x16xf32, #tpu.memory_space<vmem>>, %arg8: memref<1x16xf32, #tpu.memory_space<vmem>>, %arg9: memref<9x16x24xf32, #tpu.memory_space<vmem>>, %arg10: memref<1x24xf32, #tpu.memory_space<vmem>>, %arg11: memref<1x16x24xf32, #tpu.memory_space<vmem>>, %arg12: memref<1x1x12xf32, #tpu.memory_space<vmem>>, %arg13: memref<1x1x24xf32, #tpu.memory_space<vmem>>, %arg14: memref<1x1x24xf32, #tpu.memory_space<vmem>>, %arg15: memref<32x12xf32, #tpu.memory_space<vmem>>, %arg16: memref<32x16xf32, #tpu.memory_space<vmem>>) attributes {dimension_semantics = [#tpu.dimension_semantics<parallel>], iteration_bounds = array<i64: 2>, scalar_prefetch = 0 : i64, scratch_operands = 2 : i64, tpu.core_type = #tpu.core_type<tc>, window_params = [{transform_indices = @transform_0, window_bounds = array<i64: 1, 16, 24>}, {pipeline_mode = #tpu.pipeline_mode<synchronous>, transform_indices = @transform_1, window_bounds = array<i64: 1, 24>}, {pipeline_mode = #tpu.pipeline_mode<synchronous>, transform_indices = @transform_2, window_bounds = array<i64: 1, 24>}, {pipeline_mode = #tpu.pipeline_mode<synchronous>, transform_indices = @transform_3, window_bounds = array<i64: 24, 24>}, {pipeline_mode = #tpu.pipeline_mode<synchronous>, transform_indices = @transform_4, window_bounds = array<i64: 108, 16>}, {pipeline_mode = #tpu.pipeline_mode<synchronous>, transform_indices = @transform_5, window_bounds = array<i64: 1, 16>}, {pipeline_mode = #tpu.pipeline_mode<synchronous>, transform_indices = @transform_6, window_bounds = array<i64: 16, 16>}, {pipeline_mode = #tpu.pipeline_mode<synchronous>, transform_indices = @transform_7, window_bounds = array<i64: 1, 16>}, {pipeline_mode = #tpu.pipeline_mode<synchronous>, transform_indices = @transform_8, window_bounds = array<i64: 9, 16, 24>}, {pipeline_mode = #tpu.pipeline_mode<synchronous>, transform_indices = @transform_9, window_bounds = array<i64: 1, 24>}, {transform_indices = @transform_10, window_bounds = array<i64: 1, 16, 24>}, {transform_indices = @transform_11, window_bounds = array<i64: 1, 1, 12>}, {transform_indices = @transform_12, window_bounds = array<i64: 1, 1, 24>}, {transform_indices = @transform_13, window_bounds = array<i64: 1, 1, 24>}]} {
    %c0 = arith.constant 0 : index
    %c0_0 = arith.constant 0 : index
    %c0_1 = arith.constant 0 : index
    %0 = vector.load %arg1[%c0, %c0_0, %c0_1] : memref<1x16x24xf32, #tpu.memory_space<vmem>>, vector<1x16x24xf32>
    %1 = vector.shape_cast %0 : vector<1x16x24xf32> to vector<16x24xf32>
    %c0_2 = arith.constant 0 : index
    %c0_3 = arith.constant 0 : index
    %2 = vector.load %arg2[%c0_2, %c0_3] : memref<1x24xf32, #tpu.memory_space<vmem>>, vector<1x24xf32>
    %3 = vector.broadcast %2 : vector<1x24xf32> to vector<16x24xf32>
    %4 = arith.mulf %1, %3 : vector<16x24xf32>
    %c0_4 = arith.constant 0 : index
    %c0_5 = arith.constant 0 : index
    %5 = vector.load %arg3[%c0_4, %c0_5] : memref<1x24xf32, #tpu.memory_space<vmem>>, vector<1x24xf32>
    %6 = vector.broadcast %5 : vector<1x24xf32> to vector<16x24xf32>
    %7 = arith.addf %4, %6 : vector<16x24xf32>
    %c0_6 = arith.constant 0 : index
    %c0_7 = arith.constant 0 : index
    %8 = vector.load %arg4[%c0_6, %c0_7] : memref<24x24xf32, #tpu.memory_space<vmem>>, vector<24x24xf32>
    %cst = arith.constant dense<0.000000e+00> : vector<16x24xf32>
    %9 = tpu.matmul %7, %8, %cst {dimension_numbers = #tpu.dot_dimension_numbers<[1], [0], [0], [1], [0, 0, 1, 1], [], []>} : vector<16x24xf32>, vector<24x24xf32>, vector<16x24xf32> -> vector<16x24xf32>
    %10 = vector.extract_strided_slice %9 {offsets = [0, 0], sizes = [16, 12], strides = [1, 1]} : vector<16x24xf32> to vector<16x12xf32>
    %11 = vector.extract_strided_slice %9 {offsets = [0, 12], sizes = [16, 12], strides = [1, 1]} : vector<16x24xf32> to vector<16x12xf32>
    %12 = tpu.iota {dimensions = array<i32: 0>} : vector<16x1xi32>
    %c4_i32 = arith.constant 4 : i32
    %c0_i32 = arith.constant 0 : i32
    %13 = arith.cmpi eq, %c4_i32, %c0_i32 : i32
    %c1_i32 = arith.constant 1 : i32
    %14 = arith.select %13, %c1_i32, %c4_i32 : i32
    %15 = vector.broadcast %14 : i32 to vector<16x1xi32>
    %16 = arith.remsi %12, %15 : vector<16x1xi32>
    %c0_i32_8 = arith.constant 0 : i32
    %17 = vector.broadcast %c0_i32_8 : i32 to vector<16x1xi32>
    %18 = arith.cmpi ne, %16, %17 : vector<16x1xi32>
    %c0_i32_9 = arith.constant 0 : i32
    %19 = vector.broadcast %c0_i32_9 : i32 to vector<16x1xi32>
    %20 = arith.cmpi slt, %16, %19 : vector<16x1xi32>
    %c0_i32_10 = arith.constant 0 : i32
    %21 = arith.cmpi slt, %14, %c0_i32_10 : i32
    %22 = vector.broadcast %21 : i1 to vector<16x1xi1>
    %23 = vector.broadcast %22 : vector<16x1xi1> to vector<16x1xi1>
    %24 = arith.xori %20, %23 : vector<16x1xi1>
    %25 = arith.andi %24, %18 : vector<16x1xi1>
    %26 = vector.broadcast %14 : i32 to vector<16x1xi32>
    %27 = arith.addi %16, %26 : vector<16x1xi32>
    %28 = arith.select %25, %27, %16 : vector<16x1xi1>, vector<16x1xi32>
    %c1_i32_11 = arith.constant 1 : i32
    %29 = vector.broadcast %c1_i32_11 : i32 to vector<16x1xi32>
    %30 = arith.cmpi sge, %28, %29 : vector<16x1xi32>
    %c2_i32 = arith.constant 2 : i32
    %31 = vector.broadcast %c2_i32 : i32 to vector<16x1xi32>
    %32 = arith.cmpi sle, %28, %31 : vector<16x1xi32>
    %cst_12 = arith.constant 0.000000e+00 : f32
    %33 = vector.broadcast %cst_12 : f32 to vector<8x12xf32>
    %c0_13 = arith.constant 0 : index
    %c0_14 = arith.constant 0 : index
    %34 = vector.load %arg15[%c0_13, %c0_14] : memref<32x12xf32, #tpu.memory_space<vmem>>, vector<8x12xf32>
    tpu.vector_store %arg15[%c0_13, %c0_14], %33 {strides = array<i32>} : memref<32x12xf32, #tpu.memory_space<vmem>>, vector<8x12xf32>,
    %cst_15 = arith.constant 0.000000e+00 : f32
    %35 = vector.broadcast %cst_15 : f32 to vector<8x12xf32>
    %c24 = arith.constant 24 : index
    %c0_16 = arith.constant 0 : index
    %36 = vector.load %arg15[%c24, %c0_16] : memref<32x12xf32, #tpu.memory_space<vmem>>, vector<8x12xf32>
    tpu.vector_store %arg15[%c24, %c0_16], %35 {strides = array<i32>} : memref<32x12xf32, #tpu.memory_space<vmem>>, vector<8x12xf32>,
    %c8 = arith.constant 8 : index
    %c0_17 = arith.constant 0 : index
    %37 = vector.load %arg15[%c8, %c0_17] : memref<32x12xf32, #tpu.memory_space<vmem>>, vector<16x12xf32>
    tpu.vector_store %arg15[%c8, %c0_17], %10 {strides = array<i32>} : memref<32x12xf32, #tpu.memory_space<vmem>>, vector<16x12xf32>,
    %c3 = arith.constant 3 : index
    %c0_18 = arith.constant 0 : index
    %38 = vector.load %arg15[%c3, %c0_18] : memref<32x12xf32, #tpu.memory_space<vmem>>, vector<16x12xf32>
    %cst_19 = arith.constant 0.000000e+00 : f32
    %39 = vector.shape_cast %30 : vector<16x1xi1> to vector<16x1xi1>
    %40 = vector.broadcast %39 : vector<16x1xi1> to vector<16x12xi1>
    %41 = vector.broadcast %cst_19 : f32 to vector<16x12xf32>
    %42 = arith.select %40, %38, %41 : vector<16x12xi1>, vector<16x12xf32>
    %c4 = arith.constant 4 : index
    %c0_20 = arith.constant 0 : index
    %43 = vector.load %arg15[%c4, %c0_20] : memref<32x12xf32, #tpu.memory_space<vmem>>, vector<16x12xf32>
    %c5 = arith.constant 5 : index
    %c0_21 = arith.constant 0 : index
    %44 = vector.load %arg15[%c5, %c0_21] : memref<32x12xf32, #tpu.memory_space<vmem>>, vector<16x12xf32>
    %cst_22 = arith.constant 0.000000e+00 : f32
    %45 = vector.shape_cast %32 : vector<16x1xi1> to vector<16x1xi1>
    %46 = vector.broadcast %45 : vector<16x1xi1> to vector<16x12xi1>
    %47 = vector.broadcast %cst_22 : f32 to vector<16x12xf32>
    %48 = arith.select %46, %44, %47 : vector<16x12xi1>, vector<16x12xf32>
    %c7 = arith.constant 7 : index
    %c0_23 = arith.constant 0 : index
    %49 = vector.load %arg15[%c7, %c0_23] : memref<32x12xf32, #tpu.memory_space<vmem>>, vector<16x12xf32>
    %cst_24 = arith.constant 0.000000e+00 : f32
    %50 = vector.shape_cast %30 : vector<16x1xi1> to vector<16x1xi1>
    %51 = vector.broadcast %50 : vector<16x1xi1> to vector<16x12xi1>
    %52 = vector.broadcast %cst_24 : f32 to vector<16x12xf32>
    %53 = arith.select %51, %49, %52 : vector<16x12xi1>, vector<16x12xf32>
    %c8_25 = arith.constant 8 : index
    %c0_26 = arith.constant 0 : index
    %54 = vector.load %arg15[%c8_25, %c0_26] : memref<32x12xf32, #tpu.memory_space<vmem>>, vector<16x12xf32>
    %c9 = arith.constant 9 : index
    %c0_27 = arith.constant 0 : index
    %55 = vector.load %arg15[%c9, %c0_27] : memref<32x12xf32, #tpu.memory_space<vmem>>, vector<16x12xf32>
    %cst_28 = arith.constant 0.000000e+00 : f32
    %56 = vector.shape_cast %32 : vector<16x1xi1> to vector<16x1xi1>
    %57 = vector.broadcast %56 : vector<16x1xi1> to vector<16x12xi1>
    %58 = vector.broadcast %cst_28 : f32 to vector<16x12xf32>
    %59 = arith.select %57, %55, %58 : vector<16x12xi1>, vector<16x12xf32>
    %c11 = arith.constant 11 : index
    %c0_29 = arith.constant 0 : index
    %60 = vector.load %arg15[%c11, %c0_29] : memref<32x12xf32, #tpu.memory_space<vmem>>, vector<16x12xf32>
    %cst_30 = arith.constant 0.000000e+00 : f32
    %61 = vector.shape_cast %30 : vector<16x1xi1> to vector<16x1xi1>
    %62 = vector.broadcast %61 : vector<16x1xi1> to vector<16x12xi1>
    %63 = vector.broadcast %cst_30 : f32 to vector<16x12xf32>
    %64 = arith.select %62, %60, %63 : vector<16x12xi1>, vector<16x12xf32>
    %c12 = arith.constant 12 : index
    %c0_31 = arith.constant 0 : index
    %65 = vector.load %arg15[%c12, %c0_31] : memref<32x12xf32, #tpu.memory_space<vmem>>, vector<16x12xf32>
    %c13 = arith.constant 13 : index
    %c0_32 = arith.constant 0 : index
    %66 = vector.load %arg15[%c13, %c0_32] : memref<32x12xf32, #tpu.memory_space<vmem>>, vector<16x12xf32>
    %cst_33 = arith.constant 0.000000e+00 : f32
    %67 = vector.shape_cast %32 : vector<16x1xi1> to vector<16x1xi1>
    %68 = vector.broadcast %67 : vector<16x1xi1> to vector<16x12xi1>
    %69 = vector.broadcast %cst_33 : f32 to vector<16x12xf32>
    %70 = arith.select %68, %66, %69 : vector<16x12xi1>, vector<16x12xf32>
    %71 = tpu.concatenate %42, %43, %48, %53, %54, %59, %64, %65, %70 in 1 : vector<16x12xf32>, vector<16x12xf32>, vector<16x12xf32>, vector<16x12xf32>, vector<16x12xf32>, vector<16x12xf32>, vector<16x12xf32>, vector<16x12xf32>, vector<16x12xf32> -> vector<16x108xf32>
    %c0_34 = arith.constant 0 : index
    %c0_35 = arith.constant 0 : index
    %72 = vector.load %arg5[%c0_34, %c0_35] : memref<108x16xf32, #tpu.memory_space<vmem>>, vector<108x16xf32>
    %cst_36 = arith.constant dense<0.000000e+00> : vector<16x16xf32>
    %73 = tpu.matmul %71, %72, %cst_36 {dimension_numbers = #tpu.dot_dimension_numbers<[1], [0], [0], [1], [0, 0, 1, 1], [], []>} : vector<16x108xf32>, vector<108x16xf32>, vector<16x16xf32> -> vector<16x16xf32>
    %c0_37 = arith.constant 0 : index
    %c0_38 = arith.constant 0 : index
    %74 = vector.load %arg6[%c0_37, %c0_38] : memref<1x16xf32, #tpu.memory_space<vmem>>, vector<1x16xf32>
    %75 = vector.broadcast %74 : vector<1x16xf32> to vector<16x16xf32>
    %76 = arith.addf %73, %75 : vector<16x16xf32>
    %cst_39 = arith.constant 0.000000e+00 : f32
    %77 = vector.broadcast %cst_39 : f32 to vector<16x16xf32>
    %78 = arith.maximumf %76, %77 : vector<16x16xf32>
    %c0_40 = arith.constant 0 : index
    %c0_41 = arith.constant 0 : index
    %79 = vector.load %arg7[%c0_40, %c0_41] : memref<16x16xf32, #tpu.memory_space<vmem>>, vector<16x16xf32>
    %cst_42 = arith.constant dense<0.000000e+00> : vector<16x16xf32>
    %80 = tpu.matmul %78, %79, %cst_42 {dimension_numbers = #tpu.dot_dimension_numbers<[1], [0], [0], [1], [0, 0, 1, 1], [], []>} : vector<16x16xf32>, vector<16x16xf32>, vector<16x16xf32> -> vector<16x16xf32>
    %c0_43 = arith.constant 0 : index
    %c0_44 = arith.constant 0 : index
    %81 = vector.load %arg8[%c0_43, %c0_44] : memref<1x16xf32, #tpu.memory_space<vmem>>, vector<1x16xf32>
    %82 = vector.broadcast %81 : vector<1x16xf32> to vector<16x16xf32>
    %83 = arith.addf %80, %82 : vector<16x16xf32>
    %cst_45 = arith.constant 0.000000e+00 : f32
    %84 = vector.broadcast %cst_45 : f32 to vector<16x16xf32>
    %85 = arith.maximumf %83, %84 : vector<16x16xf32>
    %cst_46 = arith.constant 0.000000e+00 : f32
    %86 = vector.broadcast %cst_46 : f32 to vector<8x16xf32>
    %c0_47 = arith.constant 0 : index
    %c0_48 = arith.constant 0 : index
    %87 = vector.load %arg16[%c0_47, %c0_48] : memref<32x16xf32, #tpu.memory_space<vmem>>, vector<8x16xf32>
    tpu.vector_store %arg16[%c0_47, %c0_48], %86 {strides = array<i32>} : memref<32x16xf32, #tpu.memory_space<vmem>>, vector<8x16xf32>,
    %cst_49 = arith.constant 0.000000e+00 : f32
    %88 = vector.broadcast %cst_49 : f32 to vector<8x16xf32>
    %c24_50 = arith.constant 24 : index
    %c0_51 = arith.constant 0 : index
    %89 = vector.load %arg16[%c24_50, %c0_51] : memref<32x16xf32, #tpu.memory_space<vmem>>, vector<8x16xf32>
    tpu.vector_store %arg16[%c24_50, %c0_51], %88 {strides = array<i32>} : memref<32x16xf32, #tpu.memory_space<vmem>>, vector<8x16xf32>,
    %c8_52 = arith.constant 8 : index
    %c0_53 = arith.constant 0 : index
    %90 = vector.load %arg16[%c8_52, %c0_53] : memref<32x16xf32, #tpu.memory_space<vmem>>, vector<16x16xf32>
    tpu.vector_store %arg16[%c8_52, %c0_53], %85 {strides = array<i32>} : memref<32x16xf32, #tpu.memory_space<vmem>>, vector<16x16xf32>,
    %cst_54 = arith.constant 0.000000e+00 : f32
    %91 = vector.broadcast %cst_54 : f32 to vector<16x24xf32>
    %c3_55 = arith.constant 3 : index
    %c0_56 = arith.constant 0 : index
    %92 = vector.load %arg16[%c3_55, %c0_56] : memref<32x16xf32, #tpu.memory_space<vmem>>, vector<16x16xf32>
    %cst_57 = arith.constant 0.000000e+00 : f32
    %93 = vector.shape_cast %30 : vector<16x1xi1> to vector<16x1xi1>
    %94 = vector.broadcast %93 : vector<16x1xi1> to vector<16x16xi1>
    %95 = vector.broadcast %cst_57 : f32 to vector<16x16xf32>
    %96 = arith.select %94, %92, %95 : vector<16x16xi1>, vector<16x16xf32>
    %c4_58 = arith.constant 4 : index
    %c0_59 = arith.constant 0 : index
    %97 = vector.load %arg16[%c4_58, %c0_59] : memref<32x16xf32, #tpu.memory_space<vmem>>, vector<16x16xf32>
    %c5_60 = arith.constant 5 : index
    %c0_61 = arith.constant 0 : index
    %98 = vector.load %arg16[%c5_60, %c0_61] : memref<32x16xf32, #tpu.memory_space<vmem>>, vector<16x16xf32>
    %cst_62 = arith.constant 0.000000e+00 : f32
    %99 = vector.shape_cast %32 : vector<16x1xi1> to vector<16x1xi1>
    %100 = vector.broadcast %99 : vector<16x1xi1> to vector<16x16xi1>
    %101 = vector.broadcast %cst_62 : f32 to vector<16x16xf32>
    %102 = arith.select %100, %98, %101 : vector<16x16xi1>, vector<16x16xf32>
    %c7_63 = arith.constant 7 : index
    %c0_64 = arith.constant 0 : index
    %103 = vector.load %arg16[%c7_63, %c0_64] : memref<32x16xf32, #tpu.memory_space<vmem>>, vector<16x16xf32>
    %cst_65 = arith.constant 0.000000e+00 : f32
    %104 = vector.shape_cast %30 : vector<16x1xi1> to vector<16x1xi1>
    %105 = vector.broadcast %104 : vector<16x1xi1> to vector<16x16xi1>
    %106 = vector.broadcast %cst_65 : f32 to vector<16x16xf32>
    %107 = arith.select %105, %103, %106 : vector<16x16xi1>, vector<16x16xf32>
    %c8_66 = arith.constant 8 : index
    %c0_67 = arith.constant 0 : index
    %108 = vector.load %arg16[%c8_66, %c0_67] : memref<32x16xf32, #tpu.memory_space<vmem>>, vector<16x16xf32>
    %c9_68 = arith.constant 9 : index
    %c0_69 = arith.constant 0 : index
    %109 = vector.load %arg16[%c9_68, %c0_69] : memref<32x16xf32, #tpu.memory_space<vmem>>, vector<16x16xf32>
    %cst_70 = arith.constant 0.000000e+00 : f32
    %110 = vector.shape_cast %32 : vector<16x1xi1> to vector<16x1xi1>
    %111 = vector.broadcast %110 : vector<16x1xi1> to vector<16x16xi1>
    %112 = vector.broadcast %cst_70 : f32 to vector<16x16xf32>
    %113 = arith.select %111, %109, %112 : vector<16x16xi1>, vector<16x16xf32>
    %c11_71 = arith.constant 11 : index
    %c0_72 = arith.constant 0 : index
    %114 = vector.load %arg16[%c11_71, %c0_72] : memref<32x16xf32, #tpu.memory_space<vmem>>, vector<16x16xf32>
    %cst_73 = arith.constant 0.000000e+00 : f32
    %115 = vector.shape_cast %30 : vector<16x1xi1> to vector<16x1xi1>
    %116 = vector.broadcast %115 : vector<16x1xi1> to vector<16x16xi1>
    %117 = vector.broadcast %cst_73 : f32 to vector<16x16xf32>
    %118 = arith.select %116, %114, %117 : vector<16x16xi1>, vector<16x16xf32>
    %c12_74 = arith.constant 12 : index
    %c0_75 = arith.constant 0 : index
    %119 = vector.load %arg16[%c12_74, %c0_75] : memref<32x16xf32, #tpu.memory_space<vmem>>, vector<16x16xf32>
    %c13_76 = arith.constant 13 : index
    %c0_77 = arith.constant 0 : index
    %120 = vector.load %arg16[%c13_76, %c0_77] : memref<32x16xf32, #tpu.memory_space<vmem>>, vector<16x16xf32>
    %cst_78 = arith.constant 0.000000e+00 : f32
    %121 = vector.shape_cast %32 : vector<16x1xi1> to vector<16x1xi1>
    %122 = vector.broadcast %121 : vector<16x1xi1> to vector<16x16xi1>
    %123 = vector.broadcast %cst_78 : f32 to vector<16x16xf32>
    %124 = arith.select %122, %120, %123 : vector<16x16xi1>, vector<16x16xf32>
    %c0_79 = arith.constant 0 : index
    %c0_80 = arith.constant 0 : index
    %c0_81 = arith.constant 0 : index
    %125 = vector.load %arg9[%c0_79, %c0_80, %c0_81] : memref<9x16x24xf32, #tpu.memory_space<vmem>>, vector<1x16x24xf32>
    %126 = vector.shape_cast %125 : vector<1x16x24xf32> to vector<16x24xf32>
    %cst_82 = arith.constant dense<0.000000e+00> : vector<16x24xf32>
    %127 = tpu.matmul %96, %126, %cst_82 {dimension_numbers = #tpu.dot_dimension_numbers<[1], [0], [0], [1], [0, 0, 1, 1], [], []>} : vector<16x16xf32>, vector<16x24xf32>, vector<16x24xf32> -> vector<16x24xf32>
    %128 = arith.addf %91, %127 : vector<16x24xf32>
    %c1 = arith.constant 1 : index
    %c0_83 = arith.constant 0 : index
    %c0_84 = arith.constant 0 : index
    %129 = vector.load %arg9[%c1, %c0_83, %c0_84] : memref<9x16x24xf32, #tpu.memory_space<vmem>>, vector<1x16x24xf32>
    %130 = vector.shape_cast %129 : vector<1x16x24xf32> to vector<16x24xf32>
    %cst_85 = arith.constant dense<0.000000e+00> : vector<16x24xf32>
    %131 = tpu.matmul %97, %130, %cst_85 {dimension_numbers = #tpu.dot_dimension_numbers<[1], [0], [0], [1], [0, 0, 1, 1], [], []>} : vector<16x16xf32>, vector<16x24xf32>, vector<16x24xf32> -> vector<16x24xf32>
    %132 = arith.addf %128, %131 : vector<16x24xf32>
    %c2 = arith.constant 2 : index
    %c0_86 = arith.constant 0 : index
    %c0_87 = arith.constant 0 : index
    %133 = vector.load %arg9[%c2, %c0_86, %c0_87] : memref<9x16x24xf32, #tpu.memory_space<vmem>>, vector<1x16x24xf32>
    %134 = vector.shape_cast %133 : vector<1x16x24xf32> to vector<16x24xf32>
    %cst_88 = arith.constant dense<0.000000e+00> : vector<16x24xf32>
    %135 = tpu.matmul %102, %134, %cst_88 {dimension_numbers = #tpu.dot_dimension_numbers<[1], [0], [0], [1], [0, 0, 1, 1], [], []>} : vector<16x16xf32>, vector<16x24xf32>, vector<16x24xf32> -> vector<16x24xf32>
    %136 = arith.addf %132, %135 : vector<16x24xf32>
    %c3_89 = arith.constant 3 : index
    %c0_90 = arith.constant 0 : index
    %c0_91 = arith.constant 0 : index
    %137 = vector.load %arg9[%c3_89, %c0_90, %c0_91] : memref<9x16x24xf32, #tpu.memory_space<vmem>>, vector<1x16x24xf32>
    %138 = vector.shape_cast %137 : vector<1x16x24xf32> to vector<16x24xf32>
    %cst_92 = arith.constant dense<0.000000e+00> : vector<16x24xf32>
    %139 = tpu.matmul %107, %138, %cst_92 {dimension_numbers = #tpu.dot_dimension_numbers<[1], [0], [0], [1], [0, 0, 1, 1], [], []>} : vector<16x16xf32>, vector<16x24xf32>, vector<16x24xf32> -> vector<16x24xf32>
    %140 = arith.addf %136, %139 : vector<16x24xf32>
    %c4_93 = arith.constant 4 : index
    %c0_94 = arith.constant 0 : index
    %c0_95 = arith.constant 0 : index
    %141 = vector.load %arg9[%c4_93, %c0_94, %c0_95] : memref<9x16x24xf32, #tpu.memory_space<vmem>>, vector<1x16x24xf32>
    %142 = vector.shape_cast %141 : vector<1x16x24xf32> to vector<16x24xf32>
    %cst_96 = arith.constant dense<0.000000e+00> : vector<16x24xf32>
    %143 = tpu.matmul %108, %142, %cst_96 {dimension_numbers = #tpu.dot_dimension_numbers<[1], [0], [0], [1], [0, 0, 1, 1], [], []>} : vector<16x16xf32>, vector<16x24xf32>, vector<16x24xf32> -> vector<16x24xf32>
    %144 = arith.addf %140, %143 : vector<16x24xf32>
    %c5_97 = arith.constant 5 : index
    %c0_98 = arith.constant 0 : index
    %c0_99 = arith.constant 0 : index
    %145 = vector.load %arg9[%c5_97, %c0_98, %c0_99] : memref<9x16x24xf32, #tpu.memory_space<vmem>>, vector<1x16x24xf32>
    %146 = vector.shape_cast %145 : vector<1x16x24xf32> to vector<16x24xf32>
    %cst_100 = arith.constant dense<0.000000e+00> : vector<16x24xf32>
    %147 = tpu.matmul %113, %146, %cst_100 {dimension_numbers = #tpu.dot_dimension_numbers<[1], [0], [0], [1], [0, 0, 1, 1], [], []>} : vector<16x16xf32>, vector<16x24xf32>, vector<16x24xf32> -> vector<16x24xf32>
    %148 = arith.addf %144, %147 : vector<16x24xf32>
    %c6 = arith.constant 6 : index
    %c0_101 = arith.constant 0 : index
    %c0_102 = arith.constant 0 : index
    %149 = vector.load %arg9[%c6, %c0_101, %c0_102] : memref<9x16x24xf32, #tpu.memory_space<vmem>>, vector<1x16x24xf32>
    %150 = vector.shape_cast %149 : vector<1x16x24xf32> to vector<16x24xf32>
    %cst_103 = arith.constant dense<0.000000e+00> : vector<16x24xf32>
    %151 = tpu.matmul %118, %150, %cst_103 {dimension_numbers = #tpu.dot_dimension_numbers<[1], [0], [0], [1], [0, 0, 1, 1], [], []>} : vector<16x16xf32>, vector<16x24xf32>, vector<16x24xf32> -> vector<16x24xf32>
    %152 = arith.addf %148, %151 : vector<16x24xf32>
    %c7_104 = arith.constant 7 : index
    %c0_105 = arith.constant 0 : index
    %c0_106 = arith.constant 0 : index
    %153 = vector.load %arg9[%c7_104, %c0_105, %c0_106] : memref<9x16x24xf32, #tpu.memory_space<vmem>>, vector<1x16x24xf32>
    %154 = vector.shape_cast %153 : vector<1x16x24xf32> to vector<16x24xf32>
    %cst_107 = arith.constant dense<0.000000e+00> : vector<16x24xf32>
    %155 = tpu.matmul %119, %154, %cst_107 {dimension_numbers = #tpu.dot_dimension_numbers<[1], [0], [0], [1], [0, 0, 1, 1], [], []>} : vector<16x16xf32>, vector<16x24xf32>, vector<16x24xf32> -> vector<16x24xf32>
    %156 = arith.addf %152, %155 : vector<16x24xf32>
    %c8_108 = arith.constant 8 : index
    %c0_109 = arith.constant 0 : index
    %c0_110 = arith.constant 0 : index
    %157 = vector.load %arg9[%c8_108, %c0_109, %c0_110] : memref<9x16x24xf32, #tpu.memory_space<vmem>>, vector<1x16x24xf32>
    %158 = vector.shape_cast %157 : vector<1x16x24xf32> to vector<16x24xf32>
    %cst_111 = arith.constant dense<0.000000e+00> : vector<16x24xf32>
    %159 = tpu.matmul %124, %158, %cst_111 {dimension_numbers = #tpu.dot_dimension_numbers<[1], [0], [0], [1], [0, 0, 1, 1], [], []>} : vector<16x16xf32>, vector<16x24xf32>, vector<16x24xf32> -> vector<16x24xf32>
    %160 = arith.addf %156, %159 : vector<16x24xf32>
    %c0_112 = arith.constant 0 : index
    %c0_113 = arith.constant 0 : index
    %161 = vector.load %arg10[%c0_112, %c0_113] : memref<1x24xf32, #tpu.memory_space<vmem>>, vector<1x24xf32>
    %162 = vector.broadcast %161 : vector<1x24xf32> to vector<16x24xf32>
    %163 = arith.addf %160, %162 : vector<16x24xf32>
    %164 = vector.extract_strided_slice %163 {offsets = [0, 0], sizes = [16, 12], strides = [1, 1]} : vector<16x24xf32> to vector<16x12xf32>
    %165 = vector.extract_strided_slice %163 {offsets = [0, 12], sizes = [16, 12], strides = [1, 1]} : vector<16x24xf32> to vector<16x12xf32>
    %cst_114 = arith.constant 2.000000e+00 : f32
    %166 = vector.broadcast %cst_114 : f32 to vector<16x12xf32>
    %167 = arith.addf %165, %166 : vector<16x12xf32>
    %168 = math.absf %167 : vector<16x12xf32>
    %cst_115 = arith.constant 0.000000e+00 : f32
    %169 = vector.broadcast %cst_115 : f32 to vector<16x12xf32>
    %170 = arith.subf %169, %168 : vector<16x12xf32>
    %171 = math.exp %170 : vector<16x12xf32>
    %cst_116 = arith.constant 0.000000e+00 : f32
    %172 = vector.broadcast %cst_116 : f32 to vector<16x12xf32>
    %173 = arith.minimumf %167, %172 : vector<16x12xf32>
    %cst_117 = arith.constant 1.000000e+00 : f32
    %174 = vector.broadcast %cst_117 : f32 to vector<16x12xf32>
    %175 = arith.addf %174, %171 : vector<16x12xf32>
    %176 = math.log %175 : vector<16x12xf32>
    %177 = arith.subf %173, %176 : vector<16x12xf32>
    %cst_118 = arith.constant 1.000000e+00 : f32
    %178 = vector.broadcast %cst_118 : f32 to vector<16x12xf32>
    %179 = arith.addf %178, %171 : vector<16x12xf32>
    %180 = tpu.reciprocal %179 {approx = true} : vector<16x12xf32> -> vector<16x12xf32>
    %cst_119 = arith.constant 0.000000e+00 : f32
    %181 = vector.broadcast %cst_119 : f32 to vector<16x12xf32>
    %182 = arith.cmpf oge, %167, %181 : vector<16x12xf32>
    %183 = arith.mulf %171, %180 : vector<16x12xf32>
    %184 = arith.select %182, %180, %183 : vector<16x12xi1>, vector<16x12xf32>
    %185 = arith.mulf %11, %184 : vector<16x12xf32>
    %186 = arith.addf %185, %164 : vector<16x12xf32>
    %187 = tpu.concatenate %10, %186 in 1 : vector<16x12xf32>, vector<16x12xf32> -> vector<16x24xf32>
    %c0_120 = arith.constant 0 : index
    %c0_121 = arith.constant 0 : index
    %c0_122 = arith.constant 0 : index
    %188 = vector.load %arg11[%c0_120, %c0_121, %c0_122] : memref<1x16x24xf32, #tpu.memory_space<vmem>>, vector<1x16x24xf32>
    %189 = vector.shape_cast %188 : vector<1x16x24xf32> to vector<16x24xf32>
    %190 = vector.shape_cast %187 : vector<16x24xf32> to vector<1x16x24xf32>
    tpu.vector_store %arg11[%c0_120, %c0_121, %c0_122], %190 {strides = array<i32>} : memref<1x16x24xf32, #tpu.memory_space<vmem>>, vector<1x16x24xf32>,
    %cst_123 = arith.constant dense<0.000000e+00> : vector<12xf32>
    %191 = vector.multi_reduction <add>, %177, %cst_123 [0] : vector<16x12xf32> to vector<12xf32>
    %192 = vector.shape_cast %191 : vector<12xf32> to vector<1x12xf32>
    %c0_124 = arith.constant 0 : index
    %c0_125 = arith.constant 0 : index
    %c0_126 = arith.constant 0 : index
    %193 = vector.load %arg12[%c0_124, %c0_125, %c0_126] : memref<1x1x12xf32, #tpu.memory_space<vmem>>, vector<1x1x12xf32>
    %194 = vector.shape_cast %193 : vector<1x1x12xf32> to vector<1x12xf32>
    %195 = vector.shape_cast %192 : vector<1x12xf32> to vector<1x1x12xf32>
    tpu.vector_store %arg12[%c0_124, %c0_125, %c0_126], %195 {strides = array<i32>} : memref<1x1x12xf32, #tpu.memory_space<vmem>>, vector<1x1x12xf32>,
    %cst_127 = arith.constant dense<0.000000e+00> : vector<24xf32>
    %196 = vector.multi_reduction <add>, %187, %cst_127 [0] : vector<16x24xf32> to vector<24xf32>
    %197 = vector.shape_cast %196 : vector<24xf32> to vector<1x24xf32>
    %c0_128 = arith.constant 0 : index
    %c0_129 = arith.constant 0 : index
    %c0_130 = arith.constant 0 : index
    %198 = vector.load %arg13[%c0_128, %c0_129, %c0_130] : memref<1x1x24xf32, #tpu.memory_space<vmem>>, vector<1x1x24xf32>
    %199 = vector.shape_cast %198 : vector<1x1x24xf32> to vector<1x24xf32>
    %200 = vector.shape_cast %197 : vector<1x24xf32> to vector<1x1x24xf32>
    tpu.vector_store %arg13[%c0_128, %c0_129, %c0_130], %200 {strides = array<i32>} : memref<1x1x24xf32, #tpu.memory_space<vmem>>, vector<1x1x24xf32>,
    %201 = arith.mulf %187, %187 : vector<16x24xf32>
    %cst_131 = arith.constant dense<0.000000e+00> : vector<24xf32>
    %202 = vector.multi_reduction <add>, %201, %cst_131 [0] : vector<16x24xf32> to vector<24xf32>
    %203 = vector.shape_cast %202 : vector<24xf32> to vector<1x24xf32>
    %c0_132 = arith.constant 0 : index
    %c0_133 = arith.constant 0 : index
    %c0_134 = arith.constant 0 : index
    %204 = vector.load %arg14[%c0_132, %c0_133, %c0_134] : memref<1x1x24xf32, #tpu.memory_space<vmem>>, vector<1x1x24xf32>
    %205 = vector.shape_cast %204 : vector<1x1x24xf32> to vector<1x24xf32>
    %206 = vector.shape_cast %203 : vector<1x24xf32> to vector<1x1x24xf32>
    tpu.vector_store %arg14[%c0_132, %c0_133, %c0_134], %206 {strides = array<i32>} : memref<1x1x24xf32, #tpu.memory_space<vmem>>, vector<1x1x24xf32>,
    return
  }
  func.func @transform_0(%arg0: i32) -> (i32, i32, i32) {
    %c0_i32 = arith.constant 0 : i32
    %c0_i32_0 = arith.constant 0 : i32
    %c0_i32_1 = arith.constant 0 : i32
    return %arg0, %c0_i32, %c0_i32_0 : i32, i32, i32
  }
  func.func @transform_1(%arg0: i32) -> (i32, i32) {
    %c0_i32 = arith.constant 0 : i32
    %c0_i32_0 = arith.constant 0 : i32
    %c0_i32_1 = arith.constant 0 : i32
    return %c0_i32, %c0_i32_0 : i32, i32
  }
  func.func @transform_2(%arg0: i32) -> (i32, i32) {
    %c0_i32 = arith.constant 0 : i32
    %c0_i32_0 = arith.constant 0 : i32
    %c0_i32_1 = arith.constant 0 : i32
    return %c0_i32, %c0_i32_0 : i32, i32
  }
  func.func @transform_3(%arg0: i32) -> (i32, i32) {
    %c0_i32 = arith.constant 0 : i32
    %c0_i32_0 = arith.constant 0 : i32
    %c0_i32_1 = arith.constant 0 : i32
    return %c0_i32, %c0_i32_0 : i32, i32
  }
  func.func @transform_4(%arg0: i32) -> (i32, i32) {
    %c0_i32 = arith.constant 0 : i32
    %c0_i32_0 = arith.constant 0 : i32
    %c0_i32_1 = arith.constant 0 : i32
    return %c0_i32, %c0_i32_0 : i32, i32
  }
  func.func @transform_5(%arg0: i32) -> (i32, i32) {
    %c0_i32 = arith.constant 0 : i32
    %c0_i32_0 = arith.constant 0 : i32
    %c0_i32_1 = arith.constant 0 : i32
    return %c0_i32, %c0_i32_0 : i32, i32
  }
  func.func @transform_6(%arg0: i32) -> (i32, i32) {
    %c0_i32 = arith.constant 0 : i32
    %c0_i32_0 = arith.constant 0 : i32
    %c0_i32_1 = arith.constant 0 : i32
    return %c0_i32, %c0_i32_0 : i32, i32
  }
  func.func @transform_7(%arg0: i32) -> (i32, i32) {
    %c0_i32 = arith.constant 0 : i32
    %c0_i32_0 = arith.constant 0 : i32
    %c0_i32_1 = arith.constant 0 : i32
    return %c0_i32, %c0_i32_0 : i32, i32
  }
  func.func @transform_8(%arg0: i32) -> (i32, i32, i32) {
    %c0_i32 = arith.constant 0 : i32
    %c0_i32_0 = arith.constant 0 : i32
    %c0_i32_1 = arith.constant 0 : i32
    %c0_i32_2 = arith.constant 0 : i32
    return %c0_i32, %c0_i32_0, %c0_i32_1 : i32, i32, i32
  }
  func.func @transform_9(%arg0: i32) -> (i32, i32) {
    %c0_i32 = arith.constant 0 : i32
    %c0_i32_0 = arith.constant 0 : i32
    %c0_i32_1 = arith.constant 0 : i32
    return %c0_i32, %c0_i32_0 : i32, i32
  }
  func.func @transform_10(%arg0: i32) -> (i32, i32, i32) {
    %c0_i32 = arith.constant 0 : i32
    %c0_i32_0 = arith.constant 0 : i32
    %c0_i32_1 = arith.constant 0 : i32
    return %arg0, %c0_i32, %c0_i32_0 : i32, i32, i32
  }
  func.func @transform_11(%arg0: i32) -> (i32, i32, i32) {
    %c0_i32 = arith.constant 0 : i32
    %c0_i32_0 = arith.constant 0 : i32
    %c0_i32_1 = arith.constant 0 : i32
    return %arg0, %c0_i32, %c0_i32_0 : i32, i32, i32
  }
  func.func @transform_12(%arg0: i32) -> (i32, i32, i32) {
    %c0_i32 = arith.constant 0 : i32
    %c0_i32_0 = arith.constant 0 : i32
    %c0_i32_1 = arith.constant 0 : i32
    return %arg0, %c0_i32, %c0_i32_0 : i32, i32, i32
  }
  func.func @transform_13(%arg0: i32) -> (i32, i32, i32) {
    %c0_i32 = arith.constant 0 : i32
    %c0_i32_0 = arith.constant 0 : i32
    %c0_i32_1 = arith.constant 0 : i32
    return %arg0, %c0_i32, %c0_i32_0 : i32, i32, i32
  }
}

module attributes {stable_mosaic.version = 11 : i64} {
  func.func @_flow_step_kernel(%arg0: i32, %arg1: memref<1x16x24xf32, #tpu.memory_space<vmem>>, %arg2: memref<1x24xf32, #tpu.memory_space<vmem>>, %arg3: memref<1x24xf32, #tpu.memory_space<vmem>>, %arg4: memref<24x24xf32, #tpu.memory_space<vmem>>, %arg5: memref<108x16xf32, #tpu.memory_space<vmem>>, %arg6: memref<1x16xf32, #tpu.memory_space<vmem>>, %arg7: memref<16x16xf32, #tpu.memory_space<vmem>>, %arg8: memref<1x16xf32, #tpu.memory_space<vmem>>, %arg9: memref<9x16x24xf32, #tpu.memory_space<vmem>>, %arg10: memref<1x24xf32, #tpu.memory_space<vmem>>, %arg11: memref<1x16x24xf32, #tpu.memory_space<vmem>>, %arg12: memref<1x1x12xf32, #tpu.memory_space<vmem>>, %arg13: memref<1x1x24xf32, #tpu.memory_space<vmem>>, %arg14: memref<1x1x24xf32, #tpu.memory_space<vmem>>, %arg15: memref<32x12xf32, #tpu.memory_space<vmem>>, %arg16: memref<32x16xf32, #tpu.memory_space<vmem>>) attributes {dimension_semantics = [#tpu.dimension_semantics<parallel>], iteration_bounds = array<i64: 2>, scalar_prefetch = 0 : i64, scratch_operands = 2 : i64, tpu.core_type = #tpu.core_type<tc>, window_params = [{transform_indices = @transform_0, window_bounds = array<i64: 1, 16, 24>}, {pipeline_mode = #tpu.pipeline_mode<synchronous>, transform_indices = @transform_1, window_bounds = array<i64: 1, 24>}, {pipeline_mode = #tpu.pipeline_mode<synchronous>, transform_indices = @transform_2, window_bounds = array<i64: 1, 24>}, {pipeline_mode = #tpu.pipeline_mode<synchronous>, transform_indices = @transform_3, window_bounds = array<i64: 24, 24>}, {pipeline_mode = #tpu.pipeline_mode<synchronous>, transform_indices = @transform_4, window_bounds = array<i64: 108, 16>}, {pipeline_mode = #tpu.pipeline_mode<synchronous>, transform_indices = @transform_5, window_bounds = array<i64: 1, 16>}, {pipeline_mode = #tpu.pipeline_mode<synchronous>, transform_indices = @transform_6, window_bounds = array<i64: 16, 16>}, {pipeline_mode = #tpu.pipeline_mode<synchronous>, transform_indices = @transform_7, window_bounds = array<i64: 1, 16>}, {pipeline_mode = #tpu.pipeline_mode<synchronous>, transform_indices = @transform_8, window_bounds = array<i64: 9, 16, 24>}, {pipeline_mode = #tpu.pipeline_mode<synchronous>, transform_indices = @transform_9, window_bounds = array<i64: 1, 24>}, {transform_indices = @transform_10, window_bounds = array<i64: 1, 16, 24>}, {transform_indices = @transform_11, window_bounds = array<i64: 1, 1, 12>}, {transform_indices = @transform_12, window_bounds = array<i64: 1, 1, 24>}, {transform_indices = @transform_13, window_bounds = array<i64: 1, 1, 24>}]} {
    %c0 = arith.constant 0 : index
    %c0_0 = arith.constant 0 : index
    %c0_1 = arith.constant 0 : index
    %0 = vector.load %arg1[%c0, %c0_0, %c0_1] : memref<1x16x24xf32, #tpu.memory_space<vmem>>, vector<1x16x24xf32>
    %1 = vector.shape_cast %0 : vector<1x16x24xf32> to vector<16x24xf32>
    %c0_2 = arith.constant 0 : index
    %c0_3 = arith.constant 0 : index
    %2 = vector.load %arg2[%c0_2, %c0_3] : memref<1x24xf32, #tpu.memory_space<vmem>>, vector<1x24xf32>
    %3 = vector.broadcast %2 : vector<1x24xf32> to vector<16x24xf32>
    %4 = arith.mulf %1, %3 : vector<16x24xf32>
    %c0_4 = arith.constant 0 : index
    %c0_5 = arith.constant 0 : index
    %5 = vector.load %arg3[%c0_4, %c0_5] : memref<1x24xf32, #tpu.memory_space<vmem>>, vector<1x24xf32>
    %6 = vector.broadcast %5 : vector<1x24xf32> to vector<16x24xf32>
    %7 = arith.addf %4, %6 : vector<16x24xf32>
    %c0_6 = arith.constant 0 : index
    %c0_7 = arith.constant 0 : index
    %8 = vector.load %arg4[%c0_6, %c0_7] : memref<24x24xf32, #tpu.memory_space<vmem>>, vector<24x24xf32>
    %cst = arith.constant dense<0.000000e+00> : vector<16x24xf32>
    %9 = tpu.matmul %7, %8, %cst {dimension_numbers = #tpu.dot_dimension_numbers<[1], [0], [0], [1], [0, 0, 1, 1], [], []>} : vector<16x24xf32>, vector<24x24xf32>, vector<16x24xf32> -> vector<16x24xf32>
    %10 = vector.extract_strided_slice %9 {offsets = [0, 0], sizes = [16, 12], strides = [1, 1]} : vector<16x24xf32> to vector<16x12xf32>
    %11 = vector.extract_strided_slice %9 {offsets = [0, 12], sizes = [16, 12], strides = [1, 1]} : vector<16x24xf32> to vector<16x12xf32>
    %12 = tpu.iota {dimensions = array<i32: 0>} : vector<16x1xi32>
    %c4_i32 = arith.constant 4 : i32
    %c0_i32 = arith.constant 0 : i32
    %13 = arith.cmpi eq, %c4_i32, %c0_i32 : i32
    %c1_i32 = arith.constant 1 : i32
    %14 = arith.select %13, %c1_i32, %c4_i32 : i32
    %15 = vector.broadcast %14 : i32 to vector<16x1xi32>
    %16 = arith.remsi %12, %15 : vector<16x1xi32>
    %c0_i32_8 = arith.constant 0 : i32
    %17 = vector.broadcast %c0_i32_8 : i32 to vector<16x1xi32>
    %18 = arith.cmpi ne, %16, %17 : vector<16x1xi32>
    %c0_i32_9 = arith.constant 0 : i32
    %19 = vector.broadcast %c0_i32_9 : i32 to vector<16x1xi32>
    %20 = arith.cmpi slt, %16, %19 : vector<16x1xi32>
    %c0_i32_10 = arith.constant 0 : i32
    %21 = arith.cmpi slt, %14, %c0_i32_10 : i32
    %22 = vector.broadcast %21 : i1 to vector<16x1xi1>
    %23 = vector.broadcast %22 : vector<16x1xi1> to vector<16x1xi1>
    %24 = arith.xori %20, %23 : vector<16x1xi1>
    %25 = arith.andi %24, %18 : vector<16x1xi1>
    %26 = vector.broadcast %14 : i32 to vector<16x1xi32>
    %27 = arith.addi %16, %26 : vector<16x1xi32>
    %28 = arith.select %25, %27, %16 : vector<16x1xi1>, vector<16x1xi32>
    %c1_i32_11 = arith.constant 1 : i32
    %29 = vector.broadcast %c1_i32_11 : i32 to vector<16x1xi32>
    %30 = arith.cmpi sge, %28, %29 : vector<16x1xi32>
    %c2_i32 = arith.constant 2 : i32
    %31 = vector.broadcast %c2_i32 : i32 to vector<16x1xi32>
    %32 = arith.cmpi sle, %28, %31 : vector<16x1xi32>
    %cst_12 = arith.constant 0.000000e+00 : f32
    %33 = vector.broadcast %cst_12 : f32 to vector<8x12xf32>
    %c0_13 = arith.constant 0 : index
    %c0_14 = arith.constant 0 : index
    %34 = vector.load %arg15[%c0_13, %c0_14] : memref<32x12xf32, #tpu.memory_space<vmem>>, vector<8x12xf32>
    tpu.vector_store %arg15[%c0_13, %c0_14], %33 {strides = array<i32>} : memref<32x12xf32, #tpu.memory_space<vmem>>, vector<8x12xf32>,
    %cst_15 = arith.constant 0.000000e+00 : f32
    %35 = vector.broadcast %cst_15 : f32 to vector<8x12xf32>
    %c24 = arith.constant 24 : index
    %c0_16 = arith.constant 0 : index
    %36 = vector.load %arg15[%c24, %c0_16] : memref<32x12xf32, #tpu.memory_space<vmem>>, vector<8x12xf32>
    tpu.vector_store %arg15[%c24, %c0_16], %35 {strides = array<i32>} : memref<32x12xf32, #tpu.memory_space<vmem>>, vector<8x12xf32>,
    %c8 = arith.constant 8 : index
    %c0_17 = arith.constant 0 : index
    %37 = vector.load %arg15[%c8, %c0_17] : memref<32x12xf32, #tpu.memory_space<vmem>>, vector<16x12xf32>
    tpu.vector_store %arg15[%c8, %c0_17], %10 {strides = array<i32>} : memref<32x12xf32, #tpu.memory_space<vmem>>, vector<16x12xf32>,
    %c3 = arith.constant 3 : index
    %c0_18 = arith.constant 0 : index
    %38 = vector.load %arg15[%c3, %c0_18] : memref<32x12xf32, #tpu.memory_space<vmem>>, vector<16x12xf32>
    %cst_19 = arith.constant 0.000000e+00 : f32
    %39 = vector.shape_cast %30 : vector<16x1xi1> to vector<16x1xi1>
    %40 = vector.broadcast %39 : vector<16x1xi1> to vector<16x12xi1>
    %41 = vector.broadcast %cst_19 : f32 to vector<16x12xf32>
    %42 = arith.select %40, %38, %41 : vector<16x12xi1>, vector<16x12xf32>
    %c4 = arith.constant 4 : index
    %c0_20 = arith.constant 0 : index
    %43 = vector.load %arg15[%c4, %c0_20] : memref<32x12xf32, #tpu.memory_space<vmem>>, vector<16x12xf32>
    %c5 = arith.constant 5 : index
    %c0_21 = arith.constant 0 : index
    %44 = vector.load %arg15[%c5, %c0_21] : memref<32x12xf32, #tpu.memory_space<vmem>>, vector<16x12xf32>
    %cst_22 = arith.constant 0.000000e+00 : f32
    %45 = vector.shape_cast %32 : vector<16x1xi1> to vector<16x1xi1>
    %46 = vector.broadcast %45 : vector<16x1xi1> to vector<16x12xi1>
    %47 = vector.broadcast %cst_22 : f32 to vector<16x12xf32>
    %48 = arith.select %46, %44, %47 : vector<16x12xi1>, vector<16x12xf32>
    %c7 = arith.constant 7 : index
    %c0_23 = arith.constant 0 : index
    %49 = vector.load %arg15[%c7, %c0_23] : memref<32x12xf32, #tpu.memory_space<vmem>>, vector<16x12xf32>
    %cst_24 = arith.constant 0.000000e+00 : f32
    %50 = vector.shape_cast %30 : vector<16x1xi1> to vector<16x1xi1>
    %51 = vector.broadcast %50 : vector<16x1xi1> to vector<16x12xi1>
    %52 = vector.broadcast %cst_24 : f32 to vector<16x12xf32>
    %53 = arith.select %51, %49, %52 : vector<16x12xi1>, vector<16x12xf32>
    %c8_25 = arith.constant 8 : index
    %c0_26 = arith.constant 0 : index
    %54 = vector.load %arg15[%c8_25, %c0_26] : memref<32x12xf32, #tpu.memory_space<vmem>>, vector<16x12xf32>
    %c9 = arith.constant 9 : index
    %c0_27 = arith.constant 0 : index
    %55 = vector.load %arg15[%c9, %c0_27] : memref<32x12xf32, #tpu.memory_space<vmem>>, vector<16x12xf32>
    %cst_28 = arith.constant 0.000000e+00 : f32
    %56 = vector.shape_cast %32 : vector<16x1xi1> to vector<16x1xi1>
    %57 = vector.broadcast %56 : vector<16x1xi1> to vector<16x12xi1>
    %58 = vector.broadcast %cst_28 : f32 to vector<16x12xf32>
    %59 = arith.select %57, %55, %58 : vector<16x12xi1>, vector<16x12xf32>
    %c11 = arith.constant 11 : index
    %c0_29 = arith.constant 0 : index
    %60 = vector.load %arg15[%c11, %c0_29] : memref<32x12xf32, #tpu.memory_space<vmem>>, vector<16x12xf32>
    %cst_30 = arith.constant 0.000000e+00 : f32
    %61 = vector.shape_cast %30 : vector<16x1xi1> to vector<16x1xi1>
    %62 = vector.broadcast %61 : vector<16x1xi1> to vector<16x12xi1>
    %63 = vector.broadcast %cst_30 : f32 to vector<16x12xf32>
    %64 = arith.select %62, %60, %63 : vector<16x12xi1>, vector<16x12xf32>
    %c12 = arith.constant 12 : index
    %c0_31 = arith.constant 0 : index
    %65 = vector.load %arg15[%c12, %c0_31] : memref<32x12xf32, #tpu.memory_space<vmem>>, vector<16x12xf32>
    %c13 = arith.constant 13 : index
    %c0_32 = arith.constant 0 : index
    %66 = vector.load %arg15[%c13, %c0_32] : memref<32x12xf32, #tpu.memory_space<vmem>>, vector<16x12xf32>
    %cst_33 = arith.constant 0.000000e+00 : f32
    %67 = vector.shape_cast %32 : vector<16x1xi1> to vector<16x1xi1>
    %68 = vector.broadcast %67 : vector<16x1xi1> to vector<16x12xi1>
    %69 = vector.broadcast %cst_33 : f32 to vector<16x12xf32>
    %70 = arith.select %68, %66, %69 : vector<16x12xi1>, vector<16x12xf32>
    %71 = tpu.concatenate %42, %43, %48, %53, %54, %59, %64, %65, %70 in 1 : vector<16x12xf32>, vector<16x12xf32>, vector<16x12xf32>, vector<16x12xf32>, vector<16x12xf32>, vector<16x12xf32>, vector<16x12xf32>, vector<16x12xf32>, vector<16x12xf32> -> vector<16x108xf32>
    %c0_34 = arith.constant 0 : index
    %c0_35 = arith.constant 0 : index
    %72 = vector.load %arg5[%c0_34, %c0_35] : memref<108x16xf32, #tpu.memory_space<vmem>>, vector<108x16xf32>
    %cst_36 = arith.constant dense<0.000000e+00> : vector<16x16xf32>
    %73 = tpu.matmul %71, %72, %cst_36 {dimension_numbers = #tpu.dot_dimension_numbers<[1], [0], [0], [1], [0, 0, 1, 1], [], []>} : vector<16x108xf32>, vector<108x16xf32>, vector<16x16xf32> -> vector<16x16xf32>
    %c0_37 = arith.constant 0 : index
    %c0_38 = arith.constant 0 : index
    %74 = vector.load %arg6[%c0_37, %c0_38] : memref<1x16xf32, #tpu.memory_space<vmem>>, vector<1x16xf32>
    %75 = vector.broadcast %74 : vector<1x16xf32> to vector<16x16xf32>
    %76 = arith.addf %73, %75 : vector<16x16xf32>
    %cst_39 = arith.constant 0.000000e+00 : f32
    %77 = vector.broadcast %cst_39 : f32 to vector<16x16xf32>
    %78 = arith.maximumf %76, %77 : vector<16x16xf32>
    %c0_40 = arith.constant 0 : index
    %c0_41 = arith.constant 0 : index
    %79 = vector.load %arg7[%c0_40, %c0_41] : memref<16x16xf32, #tpu.memory_space<vmem>>, vector<16x16xf32>
    %cst_42 = arith.constant dense<0.000000e+00> : vector<16x16xf32>
    %80 = tpu.matmul %78, %79, %cst_42 {dimension_numbers = #tpu.dot_dimension_numbers<[1], [0], [0], [1], [0, 0, 1, 1], [], []>} : vector<16x16xf32>, vector<16x16xf32>, vector<16x16xf32> -> vector<16x16xf32>
    %c0_43 = arith.constant 0 : index
    %c0_44 = arith.constant 0 : index
    %81 = vector.load %arg8[%c0_43, %c0_44] : memref<1x16xf32, #tpu.memory_space<vmem>>, vector<1x16xf32>
    %82 = vector.broadcast %81 : vector<1x16xf32> to vector<16x16xf32>
    %83 = arith.addf %80, %82 : vector<16x16xf32>
    %cst_45 = arith.constant 0.000000e+00 : f32
    %84 = vector.broadcast %cst_45 : f32 to vector<16x16xf32>
    %85 = arith.maximumf %83, %84 : vector<16x16xf32>
    %cst_46 = arith.constant 0.000000e+00 : f32
    %86 = vector.broadcast %cst_46 : f32 to vector<8x16xf32>
    %c0_47 = arith.constant 0 : index
    %c0_48 = arith.constant 0 : index
    %87 = vector.load %arg16[%c0_47, %c0_48] : memref<32x16xf32, #tpu.memory_space<vmem>>, vector<8x16xf32>
    tpu.vector_store %arg16[%c0_47, %c0_48], %86 {strides = array<i32>} : memref<32x16xf32, #tpu.memory_space<vmem>>, vector<8x16xf32>,
    %cst_49 = arith.constant 0.000000e+00 : f32
    %88 = vector.broadcast %cst_49 : f32 to vector<8x16xf32>
    %c24_50 = arith.constant 24 : index
    %c0_51 = arith.constant 0 : index
    %89 = vector.load %arg16[%c24_50, %c0_51] : memref<32x16xf32, #tpu.memory_space<vmem>>, vector<8x16xf32>
    tpu.vector_store %arg16[%c24_50, %c0_51], %88 {strides = array<i32>} : memref<32x16xf32, #tpu.memory_space<vmem>>, vector<8x16xf32>,
    %c8_52 = arith.constant 8 : index
    %c0_53 = arith.constant 0 : index
    %90 = vector.load %arg16[%c8_52, %c0_53] : memref<32x16xf32, #tpu.memory_space<vmem>>, vector<16x16xf32>
    tpu.vector_store %arg16[%c8_52, %c0_53], %85 {strides = array<i32>} : memref<32x16xf32, #tpu.memory_space<vmem>>, vector<16x16xf32>,
    %cst_54 = arith.constant 0.000000e+00 : f32
    %91 = vector.broadcast %cst_54 : f32 to vector<16x24xf32>
    %c3_55 = arith.constant 3 : index
    %c0_56 = arith.constant 0 : index
    %92 = vector.load %arg16[%c3_55, %c0_56] : memref<32x16xf32, #tpu.memory_space<vmem>>, vector<16x16xf32>
    %cst_57 = arith.constant 0.000000e+00 : f32
    %93 = vector.shape_cast %30 : vector<16x1xi1> to vector<16x1xi1>
    %94 = vector.broadcast %93 : vector<16x1xi1> to vector<16x16xi1>
    %95 = vector.broadcast %cst_57 : f32 to vector<16x16xf32>
    %96 = arith.select %94, %92, %95 : vector<16x16xi1>, vector<16x16xf32>
    %c4_58 = arith.constant 4 : index
    %c0_59 = arith.constant 0 : index
    %97 = vector.load %arg16[%c4_58, %c0_59] : memref<32x16xf32, #tpu.memory_space<vmem>>, vector<16x16xf32>
    %c5_60 = arith.constant 5 : index
    %c0_61 = arith.constant 0 : index
    %98 = vector.load %arg16[%c5_60, %c0_61] : memref<32x16xf32, #tpu.memory_space<vmem>>, vector<16x16xf32>
    %cst_62 = arith.constant 0.000000e+00 : f32
    %99 = vector.shape_cast %32 : vector<16x1xi1> to vector<16x1xi1>
    %100 = vector.broadcast %99 : vector<16x1xi1> to vector<16x16xi1>
    %101 = vector.broadcast %cst_62 : f32 to vector<16x16xf32>
    %102 = arith.select %100, %98, %101 : vector<16x16xi1>, vector<16x16xf32>
    %c7_63 = arith.constant 7 : index
    %c0_64 = arith.constant 0 : index
    %103 = vector.load %arg16[%c7_63, %c0_64] : memref<32x16xf32, #tpu.memory_space<vmem>>, vector<16x16xf32>
    %cst_65 = arith.constant 0.000000e+00 : f32
    %104 = vector.shape_cast %30 : vector<16x1xi1> to vector<16x1xi1>
    %105 = vector.broadcast %104 : vector<16x1xi1> to vector<16x16xi1>
    %106 = vector.broadcast %cst_65 : f32 to vector<16x16xf32>
    %107 = arith.select %105, %103, %106 : vector<16x16xi1>, vector<16x16xf32>
    %c8_66 = arith.constant 8 : index
    %c0_67 = arith.constant 0 : index
    %108 = vector.load %arg16[%c8_66, %c0_67] : memref<32x16xf32, #tpu.memory_space<vmem>>, vector<16x16xf32>
    %c9_68 = arith.constant 9 : index
    %c0_69 = arith.constant 0 : index
    %109 = vector.load %arg16[%c9_68, %c0_69] : memref<32x16xf32, #tpu.memory_space<vmem>>, vector<16x16xf32>
    %cst_70 = arith.constant 0.000000e+00 : f32
    %110 = vector.shape_cast %32 : vector<16x1xi1> to vector<16x1xi1>
    %111 = vector.broadcast %110 : vector<16x1xi1> to vector<16x16xi1>
    %112 = vector.broadcast %cst_70 : f32 to vector<16x16xf32>
    %113 = arith.select %111, %109, %112 : vector<16x16xi1>, vector<16x16xf32>
    %c11_71 = arith.constant 11 : index
    %c0_72 = arith.constant 0 : index
    %114 = vector.load %arg16[%c11_71, %c0_72] : memref<32x16xf32, #tpu.memory_space<vmem>>, vector<16x16xf32>
    %cst_73 = arith.constant 0.000000e+00 : f32
    %115 = vector.shape_cast %30 : vector<16x1xi1> to vector<16x1xi1>
    %116 = vector.broadcast %115 : vector<16x1xi1> to vector<16x16xi1>
    %117 = vector.broadcast %cst_73 : f32 to vector<16x16xf32>
    %118 = arith.select %116, %114, %117 : vector<16x16xi1>, vector<16x16xf32>
    %c12_74 = arith.constant 12 : index
    %c0_75 = arith.constant 0 : index
    %119 = vector.load %arg16[%c12_74, %c0_75] : memref<32x16xf32, #tpu.memory_space<vmem>>, vector<16x16xf32>
    %c13_76 = arith.constant 13 : index
    %c0_77 = arith.constant 0 : index
    %120 = vector.load %arg16[%c13_76, %c0_77] : memref<32x16xf32, #tpu.memory_space<vmem>>, vector<16x16xf32>
    %cst_78 = arith.constant 0.000000e+00 : f32
    %121 = vector.shape_cast %32 : vector<16x1xi1> to vector<16x1xi1>
    %122 = vector.broadcast %121 : vector<16x1xi1> to vector<16x16xi1>
    %123 = vector.broadcast %cst_78 : f32 to vector<16x16xf32>
    %124 = arith.select %122, %120, %123 : vector<16x16xi1>, vector<16x16xf32>
    %c0_79 = arith.constant 0 : index
    %c0_80 = arith.constant 0 : index
    %c0_81 = arith.constant 0 : index
    %125 = vector.load %arg9[%c0_79, %c0_80, %c0_81] : memref<9x16x24xf32, #tpu.memory_space<vmem>>, vector<1x16x24xf32>
    %126 = vector.shape_cast %125 : vector<1x16x24xf32> to vector<16x24xf32>
    %cst_82 = arith.constant dense<0.000000e+00> : vector<16x24xf32>
    %127 = tpu.matmul %96, %126, %cst_82 {dimension_numbers = #tpu.dot_dimension_numbers<[1], [0], [0], [1], [0, 0, 1, 1], [], []>} : vector<16x16xf32>, vector<16x24xf32>, vector<16x24xf32> -> vector<16x24xf32>
    %128 = arith.addf %91, %127 : vector<16x24xf32>
    %c1 = arith.constant 1 : index
    %c0_83 = arith.constant 0 : index
    %c0_84 = arith.constant 0 : index
    %129 = vector.load %arg9[%c1, %c0_83, %c0_84] : memref<9x16x24xf32, #tpu.memory_space<vmem>>, vector<1x16x24xf32>
    %130 = vector.shape_cast %129 : vector<1x16x24xf32> to vector<16x24xf32>
    %cst_85 = arith.constant dense<0.000000e+00> : vector<16x24xf32>
    %131 = tpu.matmul %97, %130, %cst_85 {dimension_numbers = #tpu.dot_dimension_numbers<[1], [0], [0], [1], [0, 0, 1, 1], [], []>} : vector<16x16xf32>, vector<16x24xf32>, vector<16x24xf32> -> vector<16x24xf32>
    %132 = arith.addf %128, %131 : vector<16x24xf32>
    %c2 = arith.constant 2 : index
    %c0_86 = arith.constant 0 : index
    %c0_87 = arith.constant 0 : index
    %133 = vector.load %arg9[%c2, %c0_86, %c0_87] : memref<9x16x24xf32, #tpu.memory_space<vmem>>, vector<1x16x24xf32>
    %134 = vector.shape_cast %133 : vector<1x16x24xf32> to vector<16x24xf32>
    %cst_88 = arith.constant dense<0.000000e+00> : vector<16x24xf32>
    %135 = tpu.matmul %102, %134, %cst_88 {dimension_numbers = #tpu.dot_dimension_numbers<[1], [0], [0], [1], [0, 0, 1, 1], [], []>} : vector<16x16xf32>, vector<16x24xf32>, vector<16x24xf32> -> vector<16x24xf32>
    %136 = arith.addf %132, %135 : vector<16x24xf32>
    %c3_89 = arith.constant 3 : index
    %c0_90 = arith.constant 0 : index
    %c0_91 = arith.constant 0 : index
    %137 = vector.load %arg9[%c3_89, %c0_90, %c0_91] : memref<9x16x24xf32, #tpu.memory_space<vmem>>, vector<1x16x24xf32>
    %138 = vector.shape_cast %137 : vector<1x16x24xf32> to vector<16x24xf32>
    %cst_92 = arith.constant dense<0.000000e+00> : vector<16x24xf32>
    %139 = tpu.matmul %107, %138, %cst_92 {dimension_numbers = #tpu.dot_dimension_numbers<[1], [0], [0], [1], [0, 0, 1, 1], [], []>} : vector<16x16xf32>, vector<16x24xf32>, vector<16x24xf32> -> vector<16x24xf32>
    %140 = arith.addf %136, %139 : vector<16x24xf32>
    %c4_93 = arith.constant 4 : index
    %c0_94 = arith.constant 0 : index
    %c0_95 = arith.constant 0 : index
    %141 = vector.load %arg9[%c4_93, %c0_94, %c0_95] : memref<9x16x24xf32, #tpu.memory_space<vmem>>, vector<1x16x24xf32>
    %142 = vector.shape_cast %141 : vector<1x16x24xf32> to vector<16x24xf32>
    %cst_96 = arith.constant dense<0.000000e+00> : vector<16x24xf32>
    %143 = tpu.matmul %108, %142, %cst_96 {dimension_numbers = #tpu.dot_dimension_numbers<[1], [0], [0], [1], [0, 0, 1, 1], [], []>} : vector<16x16xf32>, vector<16x24xf32>, vector<16x24xf32> -> vector<16x24xf32>
    %144 = arith.addf %140, %143 : vector<16x24xf32>
    %c5_97 = arith.constant 5 : index
    %c0_98 = arith.constant 0 : index
    %c0_99 = arith.constant 0 : index
    %145 = vector.load %arg9[%c5_97, %c0_98, %c0_99] : memref<9x16x24xf32, #tpu.memory_space<vmem>>, vector<1x16x24xf32>
    %146 = vector.shape_cast %145 : vector<1x16x24xf32> to vector<16x24xf32>
    %cst_100 = arith.constant dense<0.000000e+00> : vector<16x24xf32>
    %147 = tpu.matmul %113, %146, %cst_100 {dimension_numbers = #tpu.dot_dimension_numbers<[1], [0], [0], [1], [0, 0, 1, 1], [], []>} : vector<16x16xf32>, vector<16x24xf32>, vector<16x24xf32> -> vector<16x24xf32>
    %148 = arith.addf %144, %147 : vector<16x24xf32>
    %c6 = arith.constant 6 : index
    %c0_101 = arith.constant 0 : index
    %c0_102 = arith.constant 0 : index
    %149 = vector.load %arg9[%c6, %c0_101, %c0_102] : memref<9x16x24xf32, #tpu.memory_space<vmem>>, vector<1x16x24xf32>
    %150 = vector.shape_cast %149 : vector<1x16x24xf32> to vector<16x24xf32>
    %cst_103 = arith.constant dense<0.000000e+00> : vector<16x24xf32>
    %151 = tpu.matmul %118, %150, %cst_103 {dimension_numbers = #tpu.dot_dimension_numbers<[1], [0], [0], [1], [0, 0, 1, 1], [], []>} : vector<16x16xf32>, vector<16x24xf32>, vector<16x24xf32> -> vector<16x24xf32>
    %152 = arith.addf %148, %151 : vector<16x24xf32>
    %c7_104 = arith.constant 7 : index
    %c0_105 = arith.constant 0 : index
    %c0_106 = arith.constant 0 : index
    %153 = vector.load %arg9[%c7_104, %c0_105, %c0_106] : memref<9x16x24xf32, #tpu.memory_space<vmem>>, vector<1x16x24xf32>
    %154 = vector.shape_cast %153 : vector<1x16x24xf32> to vector<16x24xf32>
    %cst_107 = arith.constant dense<0.000000e+00> : vector<16x24xf32>
    %155 = tpu.matmul %119, %154, %cst_107 {dimension_numbers = #tpu.dot_dimension_numbers<[1], [0], [0], [1], [0, 0, 1, 1], [], []>} : vector<16x16xf32>, vector<16x24xf32>, vector<16x24xf32> -> vector<16x24xf32>
    %156 = arith.addf %152, %155 : vector<16x24xf32>
    %c8_108 = arith.constant 8 : index
    %c0_109 = arith.constant 0 : index
    %c0_110 = arith.constant 0 : index
    %157 = vector.load %arg9[%c8_108, %c0_109, %c0_110] : memref<9x16x24xf32, #tpu.memory_space<vmem>>, vector<1x16x24xf32>
    %158 = vector.shape_cast %157 : vector<1x16x24xf32> to vector<16x24xf32>
    %cst_111 = arith.constant dense<0.000000e+00> : vector<16x24xf32>
    %159 = tpu.matmul %124, %158, %cst_111 {dimension_numbers = #tpu.dot_dimension_numbers<[1], [0], [0], [1], [0, 0, 1, 1], [], []>} : vector<16x16xf32>, vector<16x24xf32>, vector<16x24xf32> -> vector<16x24xf32>
    %160 = arith.addf %156, %159 : vector<16x24xf32>
    %c0_112 = arith.constant 0 : index
    %c0_113 = arith.constant 0 : index
    %161 = vector.load %arg10[%c0_112, %c0_113] : memref<1x24xf32, #tpu.memory_space<vmem>>, vector<1x24xf32>
    %162 = vector.broadcast %161 : vector<1x24xf32> to vector<16x24xf32>
    %163 = arith.addf %160, %162 : vector<16x24xf32>
    %164 = vector.extract_strided_slice %163 {offsets = [0, 0], sizes = [16, 12], strides = [1, 1]} : vector<16x24xf32> to vector<16x12xf32>
    %165 = vector.extract_strided_slice %163 {offsets = [0, 12], sizes = [16, 12], strides = [1, 1]} : vector<16x24xf32> to vector<16x12xf32>
    %cst_114 = arith.constant 2.000000e+00 : f32
    %166 = vector.broadcast %cst_114 : f32 to vector<16x12xf32>
    %167 = arith.addf %165, %166 : vector<16x12xf32>
    %168 = math.absf %167 : vector<16x12xf32>
    %cst_115 = arith.constant 0.000000e+00 : f32
    %169 = vector.broadcast %cst_115 : f32 to vector<16x12xf32>
    %170 = arith.subf %169, %168 : vector<16x12xf32>
    %171 = math.exp %170 : vector<16x12xf32>
    %cst_116 = arith.constant 0.000000e+00 : f32
    %172 = vector.broadcast %cst_116 : f32 to vector<16x12xf32>
    %173 = arith.minimumf %167, %172 : vector<16x12xf32>
    %cst_117 = arith.constant 1.000000e+00 : f32
    %174 = vector.broadcast %cst_117 : f32 to vector<16x12xf32>
    %175 = arith.addf %174, %171 : vector<16x12xf32>
    %176 = math.log %175 : vector<16x12xf32>
    %177 = arith.subf %173, %176 : vector<16x12xf32>
    %cst_118 = arith.constant 1.000000e+00 : f32
    %178 = vector.broadcast %cst_118 : f32 to vector<16x12xf32>
    %179 = arith.addf %178, %171 : vector<16x12xf32>
    %180 = tpu.reciprocal %179 {approx = true} : vector<16x12xf32> -> vector<16x12xf32>
    %cst_119 = arith.constant 0.000000e+00 : f32
    %181 = vector.broadcast %cst_119 : f32 to vector<16x12xf32>
    %182 = arith.cmpf oge, %167, %181 : vector<16x12xf32>
    %183 = arith.mulf %171, %180 : vector<16x12xf32>
    %184 = arith.select %182, %180, %183 : vector<16x12xi1>, vector<16x12xf32>
    %185 = arith.mulf %11, %184 : vector<16x12xf32>
    %186 = arith.addf %185, %164 : vector<16x12xf32>
    %187 = tpu.concatenate %10, %186 in 1 : vector<16x12xf32>, vector<16x12xf32> -> vector<16x24xf32>
    %c0_120 = arith.constant 0 : index
    %c0_121 = arith.constant 0 : index
    %c0_122 = arith.constant 0 : index
    %188 = vector.load %arg11[%c0_120, %c0_121, %c0_122] : memref<1x16x24xf32, #tpu.memory_space<vmem>>, vector<1x16x24xf32>
    %189 = vector.shape_cast %188 : vector<1x16x24xf32> to vector<16x24xf32>
    %190 = vector.shape_cast %187 : vector<16x24xf32> to vector<1x16x24xf32>
    tpu.vector_store %arg11[%c0_120, %c0_121, %c0_122], %190 {strides = array<i32>} : memref<1x16x24xf32, #tpu.memory_space<vmem>>, vector<1x16x24xf32>,
    %cst_123 = arith.constant dense<0.000000e+00> : vector<12xf32>
    %191 = vector.multi_reduction <add>, %177, %cst_123 [0] : vector<16x12xf32> to vector<12xf32>
    %192 = vector.shape_cast %191 : vector<12xf32> to vector<1x12xf32>
    %c0_124 = arith.constant 0 : index
    %c0_125 = arith.constant 0 : index
    %c0_126 = arith.constant 0 : index
    %193 = vector.load %arg12[%c0_124, %c0_125, %c0_126] : memref<1x1x12xf32, #tpu.memory_space<vmem>>, vector<1x1x12xf32>
    %194 = vector.shape_cast %193 : vector<1x1x12xf32> to vector<1x12xf32>
    %195 = vector.shape_cast %192 : vector<1x12xf32> to vector<1x1x12xf32>
    tpu.vector_store %arg12[%c0_124, %c0_125, %c0_126], %195 {strides = array<i32>} : memref<1x1x12xf32, #tpu.memory_space<vmem>>, vector<1x1x12xf32>,
    %cst_127 = arith.constant dense<0.000000e+00> : vector<24xf32>
    %196 = vector.multi_reduction <add>, %187, %cst_127 [0] : vector<16x24xf32> to vector<24xf32>
    %197 = vector.shape_cast %196 : vector<24xf32> to vector<1x24xf32>
    %c0_128 = arith.constant 0 : index
    %c0_129 = arith.constant 0 : index
    %c0_130 = arith.constant 0 : index
    %198 = vector.load %arg13[%c0_128, %c0_129, %c0_130] : memref<1x1x24xf32, #tpu.memory_space<vmem>>, vector<1x1x24xf32>
    %199 = vector.shape_cast %198 : vector<1x1x24xf32> to vector<1x24xf32>
    %200 = vector.shape_cast %197 : vector<1x24xf32> to vector<1x1x24xf32>
    tpu.vector_store %arg13[%c0_128, %c0_129, %c0_130], %200 {strides = array<i32>} : memref<1x1x24xf32, #tpu.memory_space<vmem>>, vector<1x1x24xf32>,
    %201 = arith.mulf %187, %187 : vector<16x24xf32>
    %cst_131 = arith.constant dense<0.000000e+00> : vector<24xf32>
    %202 = vector.multi_reduction <add>, %201, %cst_131 [0] : vector<16x24xf32> to vector<24xf32>
    %203 = vector.shape_cast %202 : vector<24xf32> to vector<1x24xf32>
    %c0_132 = arith.constant 0 : index
    %c0_133 = arith.constant 0 : index
    %c0_134 = arith.constant 0 : index
    %204 = vector.load %arg14[%c0_132, %c0_133, %c0_134] : memref<1x1x24xf32, #tpu.memory_space<vmem>>, vector<1x1x24xf32>
    %205 = vector.shape_cast %204 : vector<1x1x24xf32> to vector<1x24xf32>
    %206 = vector.shape_cast %203 : vector<1x24xf32> to vector<1x1x24xf32>
    tpu.vector_store %arg14[%c0_132, %c0_133, %c0_134], %206 {strides = array<i32>} : memref<1x1x24xf32, #tpu.memory_space<vmem>>, vector<1x1x24xf32>,
    return
  }
  func.func @transform_0(%arg0: i32) -> (i32, i32, i32) {
    %c0_i32 = arith.constant 0 : i32
    %c0_i32_0 = arith.constant 0 : i32
    %c0_i32_1 = arith.constant 0 : i32
    return %arg0, %c0_i32, %c0_i32_0 : i32, i32, i32
  }
  func.func @transform_1(%arg0: i32) -> (i32, i32) {
    %c0_i32 = arith.constant 0 : i32
    %c0_i32_0 = arith.constant 0 : i32
    %c0_i32_1 = arith.constant 0 : i32
    return %c0_i32, %c0_i32_0 : i32, i32
  }
  func.func @transform_2(%arg0: i32) -> (i32, i32) {
    %c0_i32 = arith.constant 0 : i32
    %c0_i32_0 = arith.constant 0 : i32
    %c0_i32_1 = arith.constant 0 : i32
    return %c0_i32, %c0_i32_0 : i32, i32
  }
  func.func @transform_3(%arg0: i32) -> (i32, i32) {
    %c0_i32 = arith.constant 0 : i32
    %c0_i32_0 = arith.constant 0 : i32
    %c0_i32_1 = arith.constant 0 : i32
    return %c0_i32, %c0_i32_0 : i32, i32
  }
  func.func @transform_4(%arg0: i32) -> (i32, i32) {
    %c0_i32 = arith.constant 0 : i32
    %c0_i32_0 = arith.constant 0 : i32
    %c0_i32_1 = arith.constant 0 : i32
    return %c0_i32, %c0_i32_0 : i32, i32
  }
  func.func @transform_5(%arg0: i32) -> (i32, i32) {
    %c0_i32 = arith.constant 0 : i32
    %c0_i32_0 = arith.constant 0 : i32
    %c0_i32_1 = arith.constant 0 : i32
    return %c0_i32, %c0_i32_0 : i32, i32
  }
  func.func @transform_6(%arg0: i32) -> (i32, i32) {
    %c0_i32 = arith.constant 0 : i32
    %c0_i32_0 = arith.constant 0 : i32
    %c0_i32_1 = arith.constant 0 : i32
    return %c0_i32, %c0_i32_0 : i32, i32
  }
  func.func @transform_7(%arg0: i32) -> (i32, i32) {
    %c0_i32 = arith.constant 0 : i32
    %c0_i32_0 = arith.constant 0 : i32
    %c0_i32_1 = arith.constant 0 : i32
    return %c0_i32, %c0_i32_0 : i32, i32
  }
  func.func @transform_8(%arg0: i32) -> (i32, i32, i32) {
    %c0_i32 = arith.constant 0 : i32
    %c0_i32_0 = arith.constant 0 : i32
    %c0_i32_1 = arith.constant 0 : i32
    %c0_i32_2 = arith.constant 0 : i32
    return %c0_i32, %c0_i32_0, %c0_i32_1 : i32, i32, i32
  }
  func.func @transform_9(%arg0: i32) -> (i32, i32) {
    %c0_i32 = arith.constant 0 : i32
    %c0_i32_0 = arith.constant 0 : i32
    %c0_i32_1 = arith.constant 0 : i32
    return %c0_i32, %c0_i32_0 : i32, i32
  }
  func.func @transform_10(%arg0: i32) -> (i32, i32, i32) {
    %c0_i32 = arith.constant 0 : i32
    %c0_i32_0 = arith.constant 0 : i32
    %c0_i32_1 = arith.constant 0 : i32
    return %arg0, %c0_i32, %c0_i32_0 : i32, i32, i32
  }
  func.func @transform_11(%arg0: i32) -> (i32, i32, i32) {
    %c0_i32 = arith.constant 0 : i32
    %c0_i32_0 = arith.constant 0 : i32
    %c0_i32_1 = arith.constant 0 : i32
    return %arg0, %c0_i32, %c0_i32_0 : i32, i32, i32
  }
  func.func @transform_12(%arg0: i32) -> (i32, i32, i32) {
    %c0_i32 = arith.constant 0 : i32
    %c0_i32_0 = arith.constant 0 : i32
    %c0_i32_1 = arith.constant 0 : i32
    return %arg0, %c0_i32, %c0_i32_0 : i32, i32, i32
  }
  func.func @transform_13(%arg0: i32) -> (i32, i32, i32) {
    %c0_i32 = arith.constant 0 : i32
    %c0_i32_0 = arith.constant 0 : i32
    %c0_i32_1 = arith.constant 0 : i32
    return %arg0, %c0_i32, %c0_i32_0 : i32, i32, i32
  }
}

</mosaic_0001>

<bundles_post_ra>
// kernel: _lambda_.6
= control target key start
LH: loop header
LB: loop body
LE: loop exit
PB: predicated region body
PF: predicated region fallthrough
CT: control target
= control target key end

     0   :  { %vm14_vm0 = vcmask 90112   ;;  %vm101_vm1 = vcmask 97280   ;;  %v207_v0 = vmov 0.0   ;;  %s325_s0 = inlined_call_operand.vmem [shape: f32[128,12], index: 0, kind: input, shape index: {}]   ;;  %s326_s1 = inlined_call_operand.vmem [shape: f32[1,12], index: 1, kind: output, shape index: {0}]   ;;  %s327_s2 = inlined_call_operand.vmem [shape: f32[1,12], index: 2, kind: output, shape index: {1}]  }
   0x1   :  { %15 = vst.msk [vmem:[%s326_s1] sm:$0x1] %vm14_vm0, %v207_v0  ;;  %v17_v1 = vld [vmem:[%s325_s0] sm:$0xff]  ;;  %v18_v2 = vld [vmem:[%s325_s0 + $0x8] sm:$0xff]  ;;  %v19_v3 = vld [vmem:[%s325_s0 + $0x10] sm:$0xff] }
   0x2   :  { %v102_v4 = vsel %vm101_vm1, %v17_v1, 0.0  ;;  %v103_v5 = vsel %vm101_vm1, %v18_v2, 0.0  ;;  %v105_v6 = vsel %vm101_vm1, %v19_v3, 0.0  ;;  %v20_v7 = vld [vmem:[%s325_s0 + $0x18] sm:$0xff]  ;;  %v21_v10 = vld [vmem:[%s325_s0 + $0x20] sm:$0xff]  ;;  %v22_v13 = vld [vmem:[%s325_s0 + $0x28] sm:$0xff]  ;;  %v143_v15 = vmul.f32 %v17_v1, %v17_v1 }
   0x3   :  { %v104_v8 = vadd.f32 %v103_v5, %v102_v4  ;;  %v107_v9 = vsel %vm101_vm1, %v20_v7, 0.0  ;;  %v109_v12 = vsel %vm101_vm1, %v21_v10, 0.0  ;;  %16 = vst.msk [vmem:[%s327_s2] sm:$0x1] %vm14_vm0, %v207_v0  ;;  %v144_v16 = vmul.f32 %v18_v2, %v18_v2  ;;  %v23_v19 = vld [vmem:[%s325_s0 + $0x30] sm:$0xff]  ;;  %v24_v24 = vld [vmem:[%s325_s0 + $0x38] sm:$0xff] }
   0x4   :  { %v145_v17 = vmul.f32 %v19_v3, %v19_v3  ;;  %v111_v18 = vsel %vm101_vm1, %v22_v13, 0.0  ;;  %v146_v21 = vmul.f32 %v20_v7, %v20_v7  ;;  %v113_v22 = vsel %vm101_vm1, %v23_v19, 0.0  ;;  %v25_v31 = vld [vmem:[%s325_s0 + $0x40] sm:$0xff]  ;;  %v26_v37 = vld [vmem:[%s325_s0 + $0x48] sm:$0xff]  ;;  %v27_v43 = vld [vmem:[%s325_s0 + $0x50] sm:$0xff] }
   0x5   :  { %v106_v11 = vadd.f32 %v105_v6, %v104_v8  ;;  %v147_v23 = vmul.f32 %v21_v10, %v21_v10  ;;  %v159_v26 = vsel %vm101_vm1, %v143_v15, 0.0  ;;  %v160_v27 = vsel %vm101_vm1, %v144_v16, 0.0  ;;  %v28_v49 = vld [vmem:[%s325_s0 + $0x58] sm:$0xff]  ;;  %v29_v55 = vld [vmem:[%s325_s0 + $0x60] sm:$0xff]  ;;  %v30_v61 = vld [vmem:[%s325_s0 + $0x68] sm:$0xff] }
   0x6   :  { %v162_v28 = vsel %vm101_vm1, %v145_v17, 0.0  ;;  %v115_v29 = vsel %vm101_vm1, %v24_v24, 0.0  ;;  %v161_v30 = vadd.f32 %v160_v27, %v159_v26  ;;  %v148_v33 = vmul.f32 %v22_v13, %v22_v13  ;;  %v31_v3 = vld [vmem:[%s325_s0 + $0x70] sm:$0xff] }
   0x7   :  { %v108_v14 = vadd.f32 %v107_v9, %v106_v11  ;;  %v164_v34 = vsel %vm101_vm1, %v146_v21, 0.0  ;;  %v117_v35 = vsel %vm101_vm1, %v25_v31, 0.0  ;;  %v149_v39 = vmul.f32 %v23_v19, %v23_v19  ;;  %v32_v9 = vld [vmem:[%s325_s0 + $0x78] sm:$0xff] }
   0x8   :  { %v163_v36 = vadd.f32 %v162_v28, %v161_v30  ;;  %v166_v40 = vsel %vm101_vm1, %v147_v23, 0.0  ;;  %v119_v41 = vsel %vm101_vm1, %v26_v37, 0.0  ;;  %v150_v45 = vmul.f32 %v24_v24, %v24_v24 }
   0x9   :  { %v110_v20 = vadd.f32 %v109_v12, %v108_v14  ;;  %v168_v46 = vsel %vm101_vm1, %v148_v33, 0.0  ;;  %v121_v47 = vsel %vm101_vm1, %v27_v43, 0.0  ;;  %v151_v51 = vmul.f32 %v25_v31, %v25_v31 }
   0xa   :  { %v165_v42 = vadd.f32 %v164_v34, %v163_v36  ;;  %v170_v52 = vsel %vm101_vm1, %v149_v39, 0.0  ;;  %v123_v53 = vsel %vm101_vm1, %v28_v49, 0.0  ;;  %v152_v57 = vmul.f32 %v26_v37, %v26_v37  ;;  %v100_v36 = vld [vmem:[%s326_s1] sm:$0x1] }
   0xb   :  { %v112_v25 = vadd.f32 %v111_v18, %v110_v20  ;;  %v172_v58 = vsel %vm101_vm1, %v150_v45, 0.0  ;;  %v125_v59 = vsel %vm101_vm1, %v29_v55, 0.0  ;;  %v153_v63 = vmul.f32 %v27_v43, %v27_v43 }
   0xc   :  { %v167_v48 = vadd.f32 %v166_v40, %v165_v42  ;;  %v174_v0 = vsel %vm101_vm1, %v151_v51, 0.0  ;;  %v127_v1 = vsel %vm101_vm1, %v30_v61, 0.0  ;;  %v154_v5 = vmul.f32 %v28_v49, %v28_v49 }
   0xd   :  { %v114_v32 = vadd.f32 %v113_v22, %v112_v25  ;;  %v176_v6 = vsel %vm101_vm1, %v152_v57, 0.0  ;;  %v129_v7 = vsel %vm101_vm1, %v31_v3, 0.0  ;;  %v155_v11 = vmul.f32 %v29_v55, %v29_v55 }
   0xe   :  { %v169_v54 = vadd.f32 %v168_v46, %v167_v48  ;;  %v178_v12 = vsel %vm101_vm1, %v153_v63, 0.0  ;;  %v131_v13 = vsel %vm101_vm1, %v32_v9, 0.0  ;;  %v156_v16 = vmul.f32 %v30_v61, %v30_v61 }
   0xf   :  { %v116_v38 = vadd.f32 %v115_v29, %v114_v32  ;;  %v180_v17 = vsel %vm101_vm1, %v154_v5, 0.0  ;;  %v157_v20 = vmul.f32 %v31_v3, %v31_v3  ;;  %v182_v21 = vsel %vm101_vm1, %v155_v11, 0.0 }
  0x10   :  { %v171_v60 = vadd.f32 %v170_v52, %v169_v54  ;;  %v158_v24 = vmul.f32 %v32_v9, %v32_v9  ;;  %v184_v25 = vsel %vm101_vm1, %v156_v16, 0.0 }
  0x11   :  { %v118_v44 = vadd.f32 %v117_v35, %v116_v38  ;;  %v186_v28 = vsel %vm101_vm1, %v157_v20, 0.0 }
  0x12   :  { %v173_v2 = vadd.f32 %v172_v58, %v171_v60  ;;  %v188_v31 = vsel %vm101_vm1, %v158_v24, 0.0 }
  0x13   :  { %v120_v50 = vadd.f32 %v119_v41, %v118_v44  ;;  %v142_v44 = vld [vmem:[%s327_s2] sm:$0x1] }
  0x14   :  { %v175_v8 = vadd.f32 %v174_v0, %v173_v2 }
  0x15   :  { %v122_v56 = vadd.f32 %v121_v47, %v120_v50 }
  0x16   :  { %v177_v14 = vadd.f32 %v176_v6, %v175_v8 }
  0x17   :  { %v124_v62 = vadd.f32 %v123_v53, %v122_v56 }
  0x18   :  { %v179_v18 = vadd.f32 %v178_v12, %v177_v14 }
  0x19   :  { %v126_v4 = vadd.f32 %v125_v59, %v124_v62 }
  0x1a   :  { %v181_v22 = vadd.f32 %v180_v17, %v179_v18 }
  0x1b   :  { %v128_v10 = vadd.f32 %v127_v1, %v126_v4 }
  0x1c   :  { %v183_v26 = vadd.f32 %v182_v21, %v181_v22 }
  0x1d   :  { %v130_v15 = vadd.f32 %v129_v7, %v128_v10 }
  0x1e   :  { %v185_v29 = vadd.f32 %v184_v25, %v183_v26 }
  0x1f   :  { %v132_v19 = vadd.f32 %v131_v13, %v130_v15 }
  0x20   :  { %v187_v32 = vadd.f32 %v186_v28, %v185_v29 }
  0x21   :  { %v133_v23 = vrot.slane %v132_v19, 4 }
  0x22   :  { %v189_v34 = vadd.f32 %v188_v31, %v187_v32 }
  0x23   :  { %v134_v27 = vadd.f32 %v133_v23, %v132_v19 }
  0x24   :  { %v190_v37 = vrot.slane %v189_v34, 4 }
  0x25   :  { %v135_v30 = vrot.slane %v134_v27, 2 }
  0x26   :  { %v191_v39 = vadd.f32 %v190_v37, %v189_v34 }
  0x27   :  { %v136_v33 = vadd.f32 %v135_v30, %v134_v27 }
  0x28   :  { %v192_v41 = vrot.slane %v191_v39, 2 }
  0x29   :  { %v137_v35 = vrot.slane %v136_v33, 1 }
  0x2a   :  { %v193_v42 = vadd.f32 %v192_v41, %v191_v39 }
  0x2b   :  { %v138_v38 = vadd.f32 %v137_v35, %v136_v33 }
  0x2c   :  { %v194_v43 = vrot.slane %v193_v42, 1 }
  0x2d   :  { %v139_v40 = vadd.f32 %v138_v38, %v100_v36 }
  0x2e   :  { %v195_v45 = vadd.f32 %v194_v43, %v193_v42 }
  0x2f   :  { %141 = vst.msk [vmem:[%s326_s1] sm:$0x1] %vm14_vm0, %v139_v40 }
  0x30   :  { %v196_v46 = vadd.f32 %v195_v45, %v142_v44 }
  0x32   :  { %197 = vst.msk [vmem:[%s327_s2] sm:$0x1] %vm14_vm0, %v196_v46 }

// kernel: custom-call.18
= control target key start
LH: loop header
LB: loop body
LE: loop exit
PB: predicated region body
PF: predicated region fallthrough
CT: control target
= control target key end

     0   :  { %5 = vsyncpa [#allocation1], 0  ;;  %s786_s0 = inlined_call_operand.hbm [shape: f32[24,24], index: 0, kind: input, shape index: {}]   ;;  %s787_s1 = inlined_call_operand.vmem [shape: f32[24,24], index: 1, kind: output, shape index: {0}]   ;;  %s788_s2 = inlined_call_operand.hbm [shape: s32[24], index: 2, kind: output, shape index: {1}]   ;;  %s789_s3 = inlined_call_operand.hbm [shape: s32[24], index: 3, kind: output, shape index: {2}]  }
   0x1   :  { %6 = vsyncpa [#allocation2], 0 }
   0x2   :  { %7 = vsyncpa [#allocation8], 0  ;;  %s11_s14 = sshll.u32 %s786_s0, 4  ;;  %s657_s15 = smov [#allocation0]   ;;  %s12_s14 = int_to_ptr.hbm [resolvable:$true] %s11_s14 }
   0x3   :  { %s13_s16 = sshll.u32 %s657_s15, 4  ;;  %s14_s16 = int_to_ptr.vmem [resolvable:$true] %s13_s16 }
   0x4   :  { %16 = dma.hbm_to_vmem [thread:$0]  %s12_s14, 384, %s14_s16, [#allocation1]  }
   0x5   :  { %635 = dma.done.wait [#allocation1], 384  }
   0x6   :  { %636 = vsyncadd [#allocation1], 4294966912  ;;  %v30_v0 = vlaneseq  ;;  %v658_v1 = vmov 0   ;;  %v19_v3 = vld [vmem:[#allocation0] sm:$0xff]  ;;  %v23_v4 = vld [vmem:[#allocation0 + $0x8] sm:$0xff]  ;;  %s641_s0 = smov 0  }
   0x7   :  { %29 = vst [vmem:[#allocation4] sm:$0x1] %v658_v1  ;;  %v27_v5 = vld [vmem:[#allocation0 + $0x10] sm:$0xff] }
   0x8   :  { %v685_v2 = vshrl.u32 %v30_v0, 7  ;;  %20 = vst [vmem:[#allocation3] sm:$0xff] %v19_v3 }
   0x9   :  { %24 = vst [vmem:[#allocation3 + $0x8] sm:$0xff] %v23_v4 }
   0xa   :  { %28 = vst [vmem:[#allocation3 + $0x10] sm:$0xff] %v27_v5 }
   0xb LB: > { %s435_s17 = sshll.u32 %s643_s0, 3  ;;  %s38_s0 = sadd.s32 1, %s643_s0   ;;  %s643_s0 = sphi %s641_s0, %s38_s0  }
   0xc   : > { %v42_v6 = vstv %s435_s17  ;;  %s40_s18 = scalar_lea.vmem [#allocation9], %s435_s17  ;;  %p35_p0 = scmp.ge.s32.totalorder %s38_s0, 3  }
   0xd   : > { %v43_v7 = vadd.s32 %v42_v6, %v685_v2  ;;  %s688_s19 = smov (%p35_p0), 0  }
   0xe   :  { %37 = sbr.rel (!%p35_p0) target bundleno = 11 (0xb), region = 98 }
   0xf   : > { %44 = vst [vmem:[%s40_s18] sm:$0xff] %v43_v7 }
  0x13 LB: > { %v55_v8 = vld [vmem:[#allocation3] sm:$0xff]  ;;  %v67_v9 = vld [vmem:[#allocation3 + $0x8] sm:$0xff]  ;;  %v694_v10 = vadd.s32 8, %v685_v2  ;;  %v697_v12 = vstv %s647_s19  ;;  %v79_v14 = vld [vmem:[#allocation3 + $0x10] sm:$0xff]  ;;  %v702_v15 = vadd.s32 16, %v685_v2  ;;  %s125_s20 = ssub.s32 128, %s647_s19  ;;  %s647_s19 = sphi %s688_s19, %s50_s19  }
  0x14   : > { %v56_v11 = vand.u32 2147483647, %v55_v8  ;;  %v68_v13 = vand.u32 2147483647, %v67_v9  ;;  %vm59_vm0 = vcmp.ge.s32.totalorder %v685_v2, %v697_v12  ;;  %v80_v18 = vand.u32 2147483647, %v79_v14 }
  0x15   : > { %vm71_vm3 = vcmp.ge.s32.totalorder %v694_v10, %v697_v12  ;;  %vm83_vm6 = vcmp.ge.s32.totalorder %v702_v15, %v697_v12  ;;  %v714_v51 = vand.u32 127, %v30_v0  ;;  %v134_v53 = vld [vmem:[#allocation4] ss:$0 sm:$0xff]  ;;  %s137_s22 = scalar_lea.vmem [#allocation3], %s647_s19  ;;  %s143_s24 = scalar_lea.vmem [#allocation9], %s647_s19 }
  0x16   : > { %vm437_vm1 = vcmp.gt.f32.partialorder %v56_v11, -inf  ;;  %v139_v54 = vld [vmem:[%s137_s22] ss:$0 sm:$0xff]  ;;  %s50_s19 = sadd.s32 1, %s647_s19  }
  0x17   : > { %vm63_vm2 = vmand %vm59_vm0, %vm437_vm1  ;;  %vm718_vm0 = vcmp.eq.s32.totalorder %v714_v51, %v697_v12  ;;  %v145_v58 = vld [vmem:[%s143_s24] ss:$0 sm:$0xff]  ;;  %p47_p1 = scmp.ge.s32.totalorder %s50_s19, 24  }
  0x18   : > { %v64_v16 = vsel %vm63_vm2, %v685_v2, %v697_v12  ;;  %v65_v17 = vsel %vm63_vm2, %v56_v11, -inf  ;;  %vm191_vm2 = vcmp.gt.s32.totalorder %v694_v10, %v697_v12  ;;  %s649_s28 = smov (%p47_p1), %s787_s1   ;;  %s653_s29 = smov (%p47_p1), [#allocation3]  }
  0x19   : > { %vm74_vm4 = vcmp.lt.f32.partialorder %v65_v17, %v68_v13 }
  0x1a   : > { %vm75_vm5 = vmand %vm71_vm3, %vm74_vm4  ;;  %vm163_vm3 = vcmp.gt.s32.totalorder %v685_v2, %v697_v12  ;;  %vm219_vm4 = vcmp.gt.s32.totalorder %v702_v15, %v697_v12 }
  0x1b   : > { %v76_v19 = vsel %vm75_vm5, %v694_v10, %v64_v16  ;;  %v77_v20 = vsel %vm75_vm5, %v68_v13, %v65_v17 }
  0x1c   : > { %vm86_vm7 = vcmp.lt.f32.partialorder %v77_v20, %v80_v18 }
  0x1d   : > { %vm87_vm8 = vmand %vm83_vm6, %vm86_vm7 }
  0x1e   : > { %v88_v21 = vsel %vm87_vm8, %v702_v15, %v76_v19  ;;  %v89_v22 = vsel %vm87_vm8, %v80_v18, %v77_v20 }
  0x1f   : > { %v90_v23 = vrot.slane %v89_v22, 1  ;;  %v91_v24 = vrot.slane %v88_v21, 1 }
  0x21   : > { %vm92_vm9 = vcmp.ge.f32.partialorder %v90_v23, %v89_v22  ;;  %v95_v25 = vrot.slane %v90_v23, 1  ;;  %v96_v26 = vrot.slane %v91_v24, 1 }
  0x22   : > { %v93_v27 = vsel %vm92_vm9, %v90_v23, %v89_v22  ;;  %v94_v28 = vsel %vm92_vm9, %v91_v24, %v88_v21 }
  0x23   : > { %vm97_vm10 = vcmp.ge.f32.partialorder %v95_v25, %v93_v27  ;;  %v100_v29 = vrot.slane %v95_v25, 1  ;;  %v101_v30 = vrot.slane %v96_v26, 1 }
  0x24   : > { %v98_v31 = vsel %vm97_vm10, %v95_v25, %v93_v27  ;;  %v99_v32 = vsel %vm97_vm10, %v96_v26, %v94_v28 }
  0x25   : > { %vm102_vm11 = vcmp.ge.f32.partialorder %v100_v29, %v98_v31  ;;  %v105_v33 = vrot.slane %v100_v29, 1  ;;  %v106_v34 = vrot.slane %v101_v30, 1 }
  0x26   : > { %v103_v35 = vsel %vm102_vm11, %v100_v29, %v98_v31  ;;  %v104_v36 = vsel %vm102_vm11, %v101_v30, %v99_v32  ;;  %vm753_vm11 = vmand %vm191_vm2, %vm718_vm0 }
  0x27   : > { %vm107_vm12 = vcmp.ge.f32.partialorder %v105_v33, %v103_v35  ;;  %v110_v37 = vrot.slane %v105_v33, 1  ;;  %v111_v38 = vrot.slane %v106_v34, 1 }
  0x28   : > { %v108_v39 = vsel %vm107_vm12, %v105_v33, %v103_v35  ;;  %v109_v40 = vsel %vm107_vm12, %v106_v34, %v104_v36 }
  0x29   : > { %vm112_vm13 = vcmp.ge.f32.partialorder %v110_v37, %v108_v39  ;;  %v115_v41 = vrot.slane %v110_v37, 1  ;;  %v116_v42 = vrot.slane %v111_v38, 1 }
  0x2a   : > { %v113_v43 = vsel %vm112_vm13, %v110_v37, %v108_v39  ;;  %v114_v44 = vsel %vm112_vm13, %v111_v38, %v109_v40 }
  0x2b   : > { %vm117_vm14 = vcmp.ge.f32.partialorder %v115_v41, %v113_v43  ;;  %v120_v45 = vrot.slane %v115_v41, 1  ;;  %v121_v46 = vrot.slane %v116_v42, 1 }
  0x2c   : > { %v118_v47 = vsel %vm117_vm14, %v115_v41, %v113_v43  ;;  %v119_v48 = vsel %vm117_vm14, %v116_v42, %v114_v44 }
  0x2d   : > { %vm122_vm15 = vcmp.ge.f32.partialorder %v120_v45, %v118_v47 }
  0x2e   : > { %v124_v49 = vsel %vm122_vm15, %v121_v46, %v119_v48 }
  0x2f   : > { %126 = vrot.lane.b32.xlu0 %v124_v49, %s125_s20 }
  0xa1   : > { %v127_v50 = vpop.permute.xlu0 %126 }
  0xa2   : > { %442 = vpush %v127_v50 }
  0xd3   : > { %s443_s21 = spop %442 }
  0xd4   : > { %v133_v55 = vstv %s443_s21  ;;  %s138_s23 = scalar_lea.vmem [#allocation3], %s443_s21  ;;  %s144_s25 = scalar_lea.vmem [#allocation9], %s443_s21 }
  0xd5   : > { %v135_v56 = vsel %vm718_vm0, %v133_v55, %v134_v53  ;;  %v725_v57 = vld [vmem:[%s138_s23] ss:$0 sm:$0xff] }
  0xd6   : > { %136 = vst [vmem:[#allocation4] sm:$0x1] %v135_v56  ;;  %v146_v59 = vld [vmem:[%s144_s25] ss:$0 sm:$0xff]  ;;  %vm149_vm1 = vcmp.ne.f32.partialorder %v725_v57, 0.0 }
  0xd7   : > { %141 = vst [vmem:[%s138_s23] sm:$0x1] %v139_v54  ;;  %vm150_vm5 = vmand %vm718_vm0, %vm149_vm1 }
  0xd8   : > { %142 = vst [vmem:[%s137_s22] sm:$0x1] %v725_v57  ;;  %v151_v60 = vsel %vm150_vm5, %v725_v57, 1.0  ;;  %vm180_vm5 = vmand %vm163_vm3, %vm718_vm0 }
  0xd9   : > { %147 = vst [vmem:[%s144_s25] sm:$0x1] %v145_v58  ;;  %v192_v61 = vsel %vm191_vm2, %v151_v60, 1.0  ;;  %v164_v62 = vsel %vm163_vm3, %v151_v60, 1.0  ;;  %v220_v63 = vsel %vm219_vm4, %v151_v60, 1.0  ;;  %vm155_vm3 = vcmp.gt.s32.totalorder %v714_v51, %v697_v12 }
  0xda   : > { %148 = vst [vmem:[%s143_s24] sm:$0x1] %v146_v59  ;;  %521 = vrcp.f32 %v192_v61  ;;  %v202_v8 = vand.u32 2147483647, %v192_v61  ;;  %vm198_vm6 = vweird.f32 %v192_v61  ;;  %v204_v11 = vand.u32 2147483648, %v192_v61 }
  0xdb   : > { %523 = vrcp.f32 %v164_v62  ;;  %v176_v16 = vand.u32 2147483648, %v164_v62  ;;  %vm170_vm8 = vweird.f32 %v164_v62  ;;  %v174_v19 = vand.u32 2147483647, %v164_v62 }
  0xdc   : > { %525 = vrcp.f32 %v220_v63  ;;  %vm203_vm10 = vcmp.eq.f32.partialorder %v202_v8, 8.507059e+37  ;;  %v205_v23 = vor.u32 1.1754944e-38, %v204_v11  ;;  %vm226_vm14 = vweird.f32 %v220_v63 }
  0xdd   : > { %v232_v25 = vand.u32 2147483648, %v220_v63  ;;  %v177_v27 = vor.u32 1.1754944e-38, %v176_v16  ;;  %v230_v29 = vand.u32 2147483647, %v220_v63  ;;  %vm175_vm1 = vcmp.eq.f32.partialorder %v174_v19, 8.507059e+37 }
  0xde   : > { %v156_v44 = vsel %vm155_vm3, %v725_v57, 0.0  ;;  %v296_v55 = vld [vmem:[#allocation4] sm:$0x1] (%p47_p1) }
  0xdf   : > { %v188_v30 = vld [vmem:[#allocation3 + $0x8] sm:$0xff]  ;;  %v160_v33 = vld [vmem:[#allocation3] sm:$0xff]  ;;  %v233_v37 = vor.u32 1.1754944e-38, %v232_v25  ;;  %v216_v41 = vld [vmem:[#allocation3 + $0x10] sm:$0xff]  ;;  %299 = vst [vmem:[#allocation5] sm:$0x1] (%p47_p1), %v296_v55 }
  0xe0   : > { %v522_v1 = vpop.eup %521 }
  0xe1   : > { %v524_v3 = vpop.eup %523  ;;  %v194_v4 = vmul.f32 %v522_v1, %v192_v61  ;;  %vm199_vm7 = vweird.f32 %v522_v1  ;;  %v243_v12 = vld [vmem:[#allocation9] sm:$0xff] (%p47_p1)  ;;  %v245_v15 = vld [vmem:[#allocation9 + $0x8] sm:$0xff] (%p47_p1)  ;;  %v247_v51 = vld [vmem:[#allocation9 + $0x10] sm:$0xff] (%p47_p1) }
  0xe2   : > { %v526_v5 = vpop.eup %525  ;;  %v166_v6 = vmul.f32 %v524_v3, %v164_v62  ;;  %vm171_vm9 = vweird.f32 %v524_v3  ;;  %vm200_vm13 = vmor %vm198_vm6, %vm199_vm7  ;;  %vm231_vm6 = vcmp.eq.f32.partialorder %v230_v29, 8.507059e+37 }
  0xe3   : > { %v195_v7 = vsub.f32 1.0, %v194_v4  ;;  %v222_v9 = vmul.f32 %v526_v5, %v220_v63  ;;  %vm227_vm12 = vweird.f32 %v526_v5  ;;  %vm172_vm15 = vmor %vm170_vm8, %vm171_vm9 }
  0xe4   : > { %v167_v13 = vsub.f32 1.0, %v166_v6  ;;  %vm228_vm2 = vmor %vm226_vm14, %vm227_vm12 }
  0xe5   : > { %v196_v14 = vmul.f32 %v522_v1, %v195_v7  ;;  %v223_v17 = vsub.f32 1.0, %v222_v9  ;;  %vm236_vm7 = vmand %vm219_vm4, %vm718_vm0 }
  0xe6   : > { %v168_v18 = vmul.f32 %v524_v3, %v167_v13 }
  0xe7   : > { %v197_v20 = vadd.f32 %v522_v1, %v196_v14  ;;  %v224_v22 = vmul.f32 %v526_v5, %v223_v17 }
  0xe8   : > { %v169_v24 = vadd.f32 %v524_v3, %v168_v18 }
  0xe9   : > { %v201_v26 = vsel %vm200_vm13, %v522_v1, %v197_v20  ;;  %v225_v28 = vadd.f32 %v526_v5, %v224_v22 }
  0xea   : > { %v206_v31 = vsel %vm203_vm10, %v205_v23, %v201_v26  ;;  %v173_v10 = vsel %vm172_vm15, %v524_v3, %v169_v24 }
  0xeb   : > { %v207_v32 = vmul.f32 %v206_v31, %v188_v30  ;;  %v178_v34 = vsel %vm175_vm1, %v177_v27, %v173_v10  ;;  %v229_v35 = vsel %vm228_vm2, %v526_v5, %v225_v28 }
  0xec   : > { %v179_v36 = vmul.f32 %v178_v34, %v160_v33  ;;  %v234_v40 = vsel %vm231_vm6, %v233_v37, %v229_v35 }
  0xed   : > { %v209_v38 = vsel %vm753_vm11, %v207_v32, 0.0  ;;  %v235_v42 = vmul.f32 %v234_v40, %v216_v41 }
  0xee   : > { %210 = vadd.xlane.f32.xlu1 %v209_v38  ;;  %v181_v39 = vsel %vm180_vm5, %v179_v36, 0.0 }
  0xef   : > { %182 = vadd.xlane.f32.xlu0 %v181_v39  ;;  %v237_v43 = vsel %vm236_vm7, %v235_v42, 0.0 }
  0xf6   : > { %238 = vadd.xlane.f32.xlu1 %v237_v43 }
 0x118   :  { %261 = vxpose.xlu0.b32.start [1/3] (short) (narrow) (%p47_p1), %v243_v12, 8 }
 0x120   :  { %262 = vxpose.xlu0.b32.cont [2/3] (short) (narrow) (%p47_p1), %v245_v15, 8 }
 0x128   :  { %263 = vxpose.xlu0.b32.end [3/3] (short) (narrow) (%p47_p1), %v247_v51, 8 }
 0x161   : > { %v211_v45 = vpop.xlane.xlu1 %210 }
 0x162   : > { %v212_v46 = vmul.f32 %v211_v45, %v156_v44  ;;  %v183_v47 = vpop.xlane.xlu0 %182 }
 0x163   : > { %v184_v48 = vmul.f32 %v183_v47, %v156_v44 }
 0x164   : > { %v213_v49 = vsub.f32 %v207_v32, %v212_v46 }
 0x165   : > { %v185_v50 = vsub.f32 %v179_v36, %v184_v48 }
 0x166   : > { %214 = vst [vmem:[#allocation3 + $0x8] sm:$0xff] %v213_v49 }
 0x167   : > { %186 = vst [vmem:[#allocation3] sm:$0xff] %v185_v50 }
 0x169   : > { %v239_v52 = vpop.xlane.xlu1 %238 }
 0x16a   : > { %v240_v53 = vmul.f32 %v239_v52, %v156_v44 }
 0x16c   : > { %v241_v54 = vsub.f32 %v235_v42, %v240_v53  ;;  %49 = sbr.rel (!%p47_p1) target bundleno = 19 (0x13), region = 109 }
 0x16e   : > { %242 = vst [vmem:[#allocation3 + $0x10] sm:$0xff] %v241_v54 }
 0x1bc   :  { %v277_v56 = vpop.trf.xlu0 }
 0x1bd   :  { %293 = vst [vmem:[#allocation6] sm:$0x1] %v277_v56 }
 0x1c4   :  { %v302_v57 = vld [vmem:[#allocation6] sm:$0x1] }
 0x1c5   :  { %305 = vst [vmem:[#allocation7] sm:$0x1] %v302_v57 }
 0x1c6 LB: > { %v349_v0 = vld [vmem:[%s655_s29] sm:$0xff]  ;;  %s351_s29 = scalar_lea.vmem %s655_s29, 8   ;;  %s655_s29 = sphi %s653_s29, %s351_s29   ;;  %s651_s28 = sphi %s649_s28, %s352_s28  }
 0x1c7   : > { %350 = vst [vmem:[%s651_s28] sm:$0xff] %v349_v0  ;;  %s352_s28 = scalar_lea.vmem %s651_s28, 8   ;;  %p346_p2 = scmp.gt.s32.totalorder %s351_s29, [#allocation3 + $0x10] }
 0x1c8   :  { %s369_s5 = sshll.u32 (%p346_p2), %s788_s2, 4  ;;  %s659_s6 = smov (%p346_p2), [#allocation5]   ;;  %s370_s5 = int_to_ptr.hbm [resolvable:$true] %s369_s5 }
 0x1c9   :  { %348 = sbr.rel (!%p346_p2) target bundleno = 454 (0x1c6), region = 131  ;;  %s367_s7 = sshll.u32 (%p346_p2), %s659_s6, 4  ;;  %s368_s7 = int_to_ptr.vmem [resolvable:$true] %s367_s7 }
 0x1ca   :  { %372 = dma.vmem_to_hbm [thread:$0]  (%p346_p2), %s368_s7, 16, %s370_s5, [#allocation2]  }
 0x1cb   :  { %s660_s1 = smov (%p346_p2), [#allocation7]   ;;  %s380_s11 = sshll.u32 (%p346_p2), %s789_s3, 4  ;;  %s381_s11 = int_to_ptr.hbm [resolvable:$true] %s380_s11 }
 0x1cc   :  { %s378_s8 = sshll.u32 (%p346_p2), %s660_s1, 4  ;;  %s379_s8 = int_to_ptr.vmem [resolvable:$true] %s378_s8 }
 0x1cd   :  { %383 = dma.vmem_to_hbm [thread:$0]  (%p346_p2), %s379_s8, 16, %s381_s11, [#allocation8]  }
 0x1ce   :  { %637 = dma.done.wait [#allocation2], 16  }
 0x1cf   :  { %638 = vsyncadd [#allocation2], 4294967280 }
 0x1d0   :  { %639 = dma.done.wait [#allocation8], 16  }
 0x1d1   :  { %640 = vsyncadd [#allocation8], 4294967280 }
 0x1d2   :  { %392 = vsyncpa [#allocation1], 1 }
 0x1d3   :  { %393 = vsyncpa [#allocation2], 1 }
 0x1d4   :  { %394 = vsyncpa [#allocation8], 1 }

// kernel: _lambda_.9
= control target key start
LH: loop header
LB: loop body
LE: loop exit
PB: predicated region body
PF: predicated region fallthrough
CT: control target
= control target key end

     0   :  { %vm14_vm0 = vcmask 188416   ;;  %vm41_vm1 = vcmask 195584   ;;  %v87_v0 = vmov 0.0   ;;  %s145_s0 = inlined_call_operand.vmem [shape: f32[32,24], index: 0, kind: input, shape index: {}]   ;;  %s146_s1 = inlined_call_operand.vmem [shape: f32[1,24], index: 1, kind: output, shape index: {0}]   ;;  %s147_s2 = inlined_call_operand.vmem [shape: f32[1,24], index: 2, kind: output, shape index: {1}]  }
   0x1   :  { %15 = vst.msk [vmem:[%s146_s1] sm:$0x1] %vm14_vm0, %v87_v0  ;;  %v17_v1 = vld [vmem:[%s145_s0] sm:$0xff]  ;;  %v18_v2 = vld [vmem:[%s145_s0 + $0x8] sm:$0xff]  ;;  %v19_v3 = vld [vmem:[%s145_s0 + $0x10] sm:$0xff] }
   0x2   :  { %v20_v4 = vld [vmem:[%s145_s0 + $0x18] sm:$0xff]  ;;  %v42_v5 = vsel %vm41_vm1, %v17_v1, 0.0  ;;  %v43_v6 = vsel %vm41_vm1, %v18_v2, 0.0  ;;  %v45_v7 = vsel %vm41_vm1, %v19_v3, 0.0  ;;  %16 = vst.msk [vmem:[%s147_s2] sm:$0x1] %vm14_vm0, %v87_v0  ;;  %v59_v8 = vmul.f32 %v17_v1, %v17_v1 }
   0x3   :  { %v44_v9 = vadd.f32 %v43_v6, %v42_v5  ;;  %v60_v10 = vmul.f32 %v18_v2, %v18_v2  ;;  %v61_v11 = vmul.f32 %v19_v3, %v19_v3  ;;  %v47_v12 = vsel %vm41_vm1, %v20_v4, 0.0 }
   0x4   :  { %v62_v13 = vmul.f32 %v20_v4, %v20_v4  ;;  %v63_v14 = vsel %vm41_vm1, %v59_v8, 0.0 }
   0x5   :  { %v46_v15 = vadd.f32 %v45_v7, %v44_v9  ;;  %v64_v16 = vsel %vm41_vm1, %v60_v10, 0.0  ;;  %v66_v17 = vsel %vm41_vm1, %v61_v11, 0.0 }
   0x6   :  { %v65_v18 = vadd.f32 %v64_v16, %v63_v14  ;;  %v68_v20 = vsel %vm41_vm1, %v62_v13, 0.0 }
   0x7   :  { %v48_v19 = vadd.f32 %v47_v12, %v46_v15 }
   0x8   :  { %v67_v21 = vadd.f32 %v66_v17, %v65_v18  ;;  %v40_v31 = vld [vmem:[%s146_s1] sm:$0x1] }
   0x9   :  { %v49_v22 = vrot.slane %v48_v19, 4  ;;  %v58_v36 = vld [vmem:[%s147_s2] sm:$0x1] }
   0xa   :  { %v69_v23 = vadd.f32 %v68_v20, %v67_v21 }
   0xb   :  { %v50_v24 = vadd.f32 %v49_v22, %v48_v19 }
   0xc   :  { %v70_v25 = vrot.slane %v69_v23, 4 }
   0xd   :  { %v51_v26 = vrot.slane %v50_v24, 2 }
   0xe   :  { %v71_v27 = vadd.f32 %v70_v25, %v69_v23 }
   0xf   :  { %v52_v28 = vadd.f32 %v51_v26, %v50_v24 }
  0x10   :  { %v72_v29 = vrot.slane %v71_v27, 2 }
  0x11   :  { %v53_v30 = vrot.slane %v52_v28, 1 }
  0x12   :  { %v73_v32 = vadd.f32 %v72_v29, %v71_v27 }
  0x13   :  { %v54_v33 = vadd.f32 %v53_v30, %v52_v28 }
  0x14   :  { %v74_v34 = vrot.slane %v73_v32, 1 }
  0x15   :  { %v55_v35 = vadd.f32 %v54_v33, %v40_v31 }
  0x16   :  { %v75_v37 = vadd.f32 %v74_v34, %v73_v32 }
  0x17   :  { %57 = vst.msk [vmem:[%s146_s1] sm:$0x1] %vm14_vm0, %v55_v35 }
  0x18   :  { %v76_v38 = vadd.f32 %v75_v37, %v58_v36 }
  0x1a   :  { %77 = vst.msk [vmem:[%s147_s2] sm:$0x1] %vm14_vm0, %v76_v38 }

// kernel: _lambda_.7
= control target key start
LH: loop header
LB: loop body
LE: loop exit
PB: predicated region body
PF: predicated region fallthrough
CT: control target
= control target key end

     0   :  { %s2702_s25 = smov 0   ;;  %s3780_s0 = inlined_call_operand.vmem [shape: f32[2,64,12], index: 0, kind: input, shape index: {}]   ;;  %s3781_s1 = inlined_call_operand.vmem [shape: f32[1,12], index: 1, kind: input, shape index: {}]   ;;  %s3782_s2 = inlined_call_operand.vmem [shape: f32[1,12], index: 2, kind: input, shape index: {}]   ;;  %s3783_s3 = inlined_call_operand.vmem [shape: f32[12,12], index: 3, kind: input, shape index: {}]   ;;  %s3784_s4 = inlined_call_operand.vmem [shape: f32[54,16], index: 4, kind: input, shape index: {}]   ;;  %s3785_s5 = inlined_call_operand.vmem [shape: f32[1,16], index: 5, kind: input, shape index: {}, may-alias: {5,7}]   ;;  %s3786_s6 = inlined_call_operand.vmem [shape: f32[16,16], index: 6, kind: input, shape index: {}]   ;;  %s3787_s7 = inlined_call_operand.vmem [shape: f32[1,16], index: 7, kind: input, shape index: {}, may-alias: {5,7}]   ;;  %s3788_s8 = inlined_call_operand.vmem [shape: f32[9,16,12], index: 8, kind: input, shape index: {}]   ;;  %s3789_s9 = inlined_call_operand.vmem [shape: f32[1,12], index: 9, kind: input, shape index: {}]   ;;  %s3790_s10 = inlined_call_operand.vmem [shape: f32[2,64,12], index: 10, kind: output, shape index: {0}]   ;;  %s3791_s11 = inlined_call_operand.vmem [shape: f32[2,1,6], index: 11, kind: output, shape index: {1}]   ;;  %s3792_s12 = inlined_call_operand.vmem [shape: f32[2,1,12], index: 12, kind: output, shape index: {2}]   ;;  %s3793_s13 = inlined_call_operand.vmem [shape: f32[2,1,12], index: 13, kind: output, shape index: {3}]  }
   0x1 LB: > { %s2409_s26 = sadd.s32 4294967295, %s2620_s25   ;;  %p2413_p0 = scmp.ge.s32.totalorder %s2620_s25, 1  ;;  %s2620_s25 = sphi %s2702_s25, %s24_s25  }
   0x2   : > { %p394_p1 = scmp.lt.s32.totalorder %s2620_s25, 3 }
   0x4   : > { %p395_p2 = pnand %p2413_p0, %p394_p1 }
   0x6   : > { %398 = sbr.rel (%p395_p2) target bundleno = 1114 (0x45a), region = 60 }
   0xb   : > { %v499_v0 = vld [vmem:[%s3783_s3 + $0x8] sm:$0xf]  ;;  %vm525_vm0 = vcmask 1043456   ;;  %v498_v1 = vld [vmem:[%s3783_s3] sm:$0xff]  ;;  %p447_p3 = scmp.lt.s32.totalorder %s2409_s26, 1  ;;  %vm3794_vm1 = vcmask 97280   ;;  %v570_v30 = vlaneseq }
   0xc   : > { %2418 = vmatpush.msk.msra.mxu0 %vm525_vm0, %v499_v0  ;;  %v2561_v2 = vld [vmem:[%s3781_s1] ss:$0 sm:$0xff]  ;;  %vm3801_vm2 = vcmask 48128   ;;  %v2622_v28 = vmov 0.0   ;;  %s2623_s22 = smov 6   ;;  %s2624_s23 = smov 24  }
   0xd   : > { %s3962_s26 = smov (!%p447_p3, %s2409_s26), 1  ;;  %v2562_v3 = vld [vmem:[%s3782_s2] ss:$0 sm:$0xff]  ;;  %693 = vst.msk [vmem:[#allocation2 + $0x8] sm:$0xff] %vm3801_vm2, %v2622_v28  ;;  %v2749_v32 = vshrl.u32 %v570_v30, 7  ;;  %s2625_s24 = smov 12  }
   0xe   : > { %544 = vmatpush.msra.mxu0 %v498_v1  ;;  %s2534_s16 = sshll.u32 %s3962_s26, 6  ;;  %692 = vst.msk [vmem:[#allocation2] sm:$0xff] %vm3801_vm2, %v2622_v28  ;;  %s2626_s27 = smov 18   ;;  %v3830_v47 = vmov 0  ;;  %v3835_v62 = vmov 0  ;;  %vm1162_vm15 = vcmask 1045504  }
   0xf   : > { %s451_s19 = scalar_lea.vmem %s3780_s0, %s2534_s16  ;;  %694 = vst.msk [vmem:[#allocation2 + $0x50] sm:$0xff] %vm3801_vm2, %v2622_v28  ;;  %v583_v33 = vand.u32 7, %v2749_v32  ;;  %v572_v42 = vadd.s32 8, %v2749_v32  ;;  %s2627_s28 = smov 42   ;;  %v573_v58 = vadd.s32 16, %v2749_v32 }
  0x10   : > { %v466_v4 = vld [vmem:[%s451_s19] sm:$0xff]  ;;  %v467_v6 = vld [vmem:[%s451_s19 + $0x8] sm:$0xff]  ;;  %v468_v10 = vld [vmem:[%s451_s19 + $0x10] sm:$0xff]  ;;  %695 = vst.msk [vmem:[#allocation2 + $0x58] sm:$0xff] %vm3801_vm2, %v2622_v28  ;;  %s2628_s29 = smov 30   ;;  %s2629_s30 = smov 36  }
  0x11   : > { %v478_v5 = vmul.f32 %v2561_v2, %v466_v4  ;;  %v479_v8 = vmul.f32 %v2561_v2, %v467_v6  ;;  %v480_v11 = vmul.f32 %v2561_v2, %v468_v10  ;;  %v469_v13 = vld [vmem:[%s451_s19 + $0x18] sm:$0xff]  ;;  %v470_v16 = vld [vmem:[%s451_s19 + $0x20] sm:$0xff]  ;;  %v471_v19 = vld [vmem:[%s451_s19 + $0x28] sm:$0xff]  ;;  %vm2754_vm3 = vcmp.le.s32.totalorder %v583_v33, 6  ;;  %s2630_s14 = smov 48   ;;  %s2631_s20 = smov 122  }
  0x12   : > { %v481_v14 = vmul.f32 %v2561_v2, %v469_v13  ;;  %v482_v17 = vmul.f32 %v2561_v2, %v470_v16  ;;  %v483_v20 = vmul.f32 %v2561_v2, %v471_v19  ;;  %v472_v22 = vld [vmem:[%s451_s19 + $0x30] sm:$0xff]  ;;  %v473_v25 = vld [vmem:[%s451_s19 + $0x38] sm:$0xff]  ;;  %vm2767_vm4 = vcmp.ge.s32.totalorder %v583_v33, 1  ;;  %s3702_s19 = scalar_lea.vmem %s3790_s10, %s2534_s16  ;;  %s462_s15 = scalar_lea.vmem %s3792_s12, %s3962_s26 }
  0x13   : > { %v490_v7 = vadd.f32 %v2562_v3, %v478_v5  ;;  %v491_v9 = vadd.f32 %v2562_v3, %v479_v8  ;;  %v492_v12 = vadd.f32 %v2562_v3, %v480_v11  ;;  %v484_v23 = vmul.f32 %v2561_v2, %v472_v22 }
  0x14   : > { %v493_v15 = vadd.f32 %v2562_v3, %v481_v14  ;;  %v494_v18 = vadd.f32 %v2562_v3, %v482_v17  ;;  %v495_v21 = vadd.f32 %v2562_v3, %v483_v20  ;;  %v485_v26 = vmul.f32 %v2561_v2, %v473_v25  ;;  %v736_v29 = vld [vmem:[#allocation2 + $0x8] sm:$0xff] }
  0x15   : > { %2419 = vmatmul.msk.f32.vlgmr.msra.gmra.mxu0 %vm3794_vm1, %v490_v7  ;;  %v496_v24 = vadd.f32 %v2562_v3, %v484_v23  ;;  %822 = vrot.lane.b32.xlu0 %v736_v29, %s2623_s22  ;;  %v590_v45 = vand.u32 7, %v572_v42  ;;  %v597_v61 = vand.u32 7, %v573_v58  ;;  %v574_v8 = vadd.s32 24, %v2749_v32 }
  0x16   : > { %v497_v27 = vadd.f32 %v2562_v3, %v485_v26  ;;  %v3842_v14 = vmov 0  ;;  %v575_v19 = vadd.s32 32, %v2749_v32  ;;  %v3844_v23 = vmov 0 }
  0x17   : > { %vm2784_vm5 = vcmp.le.s32.totalorder %v590_v45, 6  ;;  %vm2801_vm6 = vcmp.ge.s32.totalorder %v590_v45, 1  ;;  %vm2828_vm7 = vcmp.le.s32.totalorder %v597_v61, 6  ;;  %vm2838_vm8 = vcmp.ge.s32.totalorder %v597_v61, 1  ;;  %v1132_v61 = vld [vmem:[%s3784_s4 + $0x30] sm:$0x3f] }
  0x18   : > { %v3831_v47 = vsel %vm2784_vm5, 4294967295, %v3830_v47  ;;  %v3836_v62 = vsel %vm2828_vm7, 4294967295, %v3835_v62  ;;  %v604_v11 = vand.u32 7, %v574_v8  ;;  %v3846_v29 = vmov 0  ;;  %2427 = vmatpush.msk.msrb.mxu0 %vm1162_vm15, %v1132_v61  ;;  %2536 = vmatpush.msk.msra.mxu1 %vm1162_vm15, %v1132_v61 }
  0x19   : > { %v576_v42 = vadd.s32 40, %v2749_v32 }
  0x1a   : > { %vm2866_vm9 = vcmp.le.s32.totalorder %v604_v11, 6  ;;  %vm2872_vm10 = vcmp.ge.s32.totalorder %v604_v11, 1 }
  0x1b   : > { %v3843_v14 = vsel %vm2872_vm10, 4294967295, %v3842_v14  ;;  %v618_v45 = vand.u32 7, %v576_v42 }
  0x1d   : > { %2420 = vmatmul.msk.f32.gmra.mxu0 %vm3794_vm1, %v491_v9  ;;  %vm2933_vm13 = vcmp.le.s32.totalorder %v618_v45, 6  ;;  %vm2943_vm14 = vcmp.ge.s32.totalorder %v618_v45, 1 }
  0x25   : > { %2421 = vmatmul.msk.f32.gmra.mxu0 %vm3794_vm1, %v492_v12  ;;  %v3840_v12 = vmov 0 }
  0x26   : > { %v3841_v12 = vsel %vm2866_vm9, 4294967295, %v3840_v12 }
  0x2d   : > { %2422 = vmatmul.msk.f32.gmra.mxu0 %vm3794_vm1, %v493_v15 }
  0x35   : > { %2423 = vmatmul.msk.f32.gmra.mxu0 %vm3794_vm1, %v494_v18 }
  0x3d   : > { %2424 = vmatmul.msk.f32.gmra.mxu0 %vm3794_vm1, %v495_v21  ;;  %v611_v21 = vand.u32 7, %v575_v19 }
  0x3f   : > { %vm2895_vm11 = vcmp.le.s32.totalorder %v611_v21, 6  ;;  %vm2910_vm12 = vcmp.ge.s32.totalorder %v611_v21, 1 }
  0x40   : > { %v3845_v23 = vsel %vm2895_vm11, 4294967295, %v3844_v23  ;;  %v3847_v29 = vsel %vm2910_vm12, 4294967295, %v3846_v29 }
  0x45   : > { %2425 = vmatmul.msk.f32.gmra.mxu0 %vm3794_vm1, %v496_v24 }
  0x4d   : > { %2426 = vmatmul.msk.f32.gmra.mxu0 %vm3794_vm1, %v497_v27  ;;  %vm3805_vm1 = vcmask 195584  }
  0x92   : > { %v2747_v31 = vpop.f32.mrf.mxu0 }
  0x93   : > { %696 = vst.msk [vmem:[#allocation2 + $0x10] sm:$0xff] %vm3801_vm2, %v2747_v31 }
  0x9a   : > { %v2758_v35 = vpop.f32.mrf.mxu0  ;;  %v737_v36 = vld [vmem:[#allocation2 + $0x10] sm:$0xff] }
  0x9b   : > { %v744_v37 = vld [vmem:[#allocation2 + $0x9] sm:$0xff]  ;;  %697 = vst.msk [vmem:[#allocation2 + $0x18] sm:$0xff] %vm3801_vm2, %v2758_v35  ;;  %824 = vrot.lane.b32.xlu2 %v737_v36, %s2623_s22  ;;  %911 = vrot.lane.b32.xlu1 %v737_v36, %s2624_s23 }
  0x9c   : > { %v768_v38 = vsel %vm2754_vm3, %v744_v37, 0.0  ;;  %v2771_v40 = vld [vmem:[#allocation2 + $0xf] sm:$0xff] }
  0x9d   : > { %854 = vrot.lane.b32.xlu0 %v768_v38, %s2625_s24  ;;  %v777_v43 = vsel %vm2767_vm4, %v2771_v40, 0.0 }
  0xa2   : > { %v2773_v41 = vpop.f32.mrf.mxu0  ;;  %v738_v44 = vld [vmem:[#allocation2 + $0x18] sm:$0xff] }
  0xa3   : > { %698 = vst.msk [vmem:[#allocation2 + $0x20] sm:$0xff] %vm3801_vm2, %v2773_v41  ;;  %886 = vrot.lane.b32.xlu1 %v777_v43, %s2626_s27  ;;  %913 = vrot.lane.b32.xlu2 %v738_v44, %s2624_s23  ;;  %v745_v46 = vld [vmem:[#allocation2 + $0x11] sm:$0xff] }
  0xa4   : > { %v787_v48 = vsel %vm2754_vm3, %v745_v46, 0.0  ;;  %v769_v50 = vsel %vm2784_vm5, %v745_v46, 0.0  ;;  %v2799_v51 = vld [vmem:[#allocation2 + $0x17] sm:$0xff]  ;;  %v3848_v46 = vmov 0 }
  0xa5   : > { %1000 = vrot.lane.b32.xlu0 %v738_v44, %s2627_s28  ;;  %v796_v54 = vsel %vm2767_vm4, %v2799_v51, 0.0  ;;  %v778_v55 = vsel %vm2801_vm6, %v2799_v51, 0.0  ;;  %v3849_v46 = vsel %vm2933_vm13, 4294967295, %v3848_v46 }
  0xaa   : > { %v2790_v49 = vpop.f32.mrf.mxu0  ;;  %v739_v53 = vld [vmem:[#allocation2 + $0x20] sm:$0xff] }
  0xab   : > { %826 = vrot.lane.b32.xlu1 %v738_v44, %s2623_s22  ;;  %943 = vrot.lane.b32.xlu2 %v787_v48, %s2628_s29  ;;  %699 = vst.msk [vmem:[#allocation2 + $0x28] sm:$0xff] %vm3801_vm2, %v2790_v49  ;;  %v746_v57 = vld [vmem:[#allocation2 + $0x19] sm:$0xff] }
  0xac   : > { %v788_v60 = vsel %vm2784_vm5, %v746_v57, 0.0  ;;  %v2832_v63 = vld [vmem:[#allocation2 + $0x1f] sm:$0xff]  ;;  %v806_v0 = vsel %vm2754_vm3, %v746_v57, 0.0  ;;  %v770_v1 = vsel %vm2828_vm7, %v746_v57, 0.0  ;;  %v2953_v57 = vpop.permute.xlu0 %822 }
  0xad   : > { %856 = vrot.lane.b32.xlu0 %v769_v50, %s2625_s24  ;;  %v779_v3 = vsel %vm2838_vm8, %v2832_v63, 0.0  ;;  %v797_v5 = vsel %vm2801_vm6, %v2832_v63, 0.0 }
  0xb2   : > { %v2811_v56 = vpop.f32.mrf.mxu0  ;;  %v740_v4 = vld [vmem:[#allocation2 + $0x28] sm:$0xff] }
  0xb3   : > { %975 = vrot.lane.b32.xlu2 %v796_v54, %s2629_s30  ;;  %888 = vrot.lane.b32.xlu1 %v778_v55, %s2626_s27  ;;  %700 = vst.msk [vmem:[#allocation2 + $0x30] sm:$0xff] %vm3801_vm2, %v2811_v56  ;;  %v747_v7 = vld [vmem:[#allocation2 + $0x21] sm:$0xff] }
  0xb4   : > { %v789_v9 = vsel %vm2828_vm7, %v747_v7, 0.0  ;;  %v807_v10 = vsel %vm2784_vm5, %v747_v7, 0.0  ;;  %v2870_v13 = vld [vmem:[#allocation2 + $0x27] sm:$0xff]  ;;  %v771_v15 = vsel %vm2866_vm9, %v747_v7, 0.0 }
  0xb5   : > { %828 = vrot.lane.b32.xlu0 %v739_v53, %s2623_s22  ;;  %v780_v16 = vsel %vm2872_vm10, %v2870_v13, 0.0  ;;  %v798_v17 = vsel %vm2838_vm8, %v2870_v13, 0.0 }
  0xba   : > { %v2819_v59 = vpop.f32.mrf.mxu0  ;;  %v741_v18 = vld [vmem:[#allocation2 + $0x30] sm:$0xff] }
  0xbb   : > { %3834 = vst [vmem:[#allocation4_spill] sm:$0xff] %v2819_v59  ;;  %915 = vrot.lane.b32.xlu1 %v739_v53, %s2624_s23  ;;  %1002 = vrot.lane.b32.xlu2 %v739_v53, %s2627_s28  ;;  %v748_v22 = vld [vmem:[#allocation2 + $0x29] sm:$0xff] }
  0xbc   : > { %701 = vst.msk [vmem:[#allocation2 + $0x38] sm:$0xff] %vm3801_vm2, %v2819_v59  ;;  %v790_v24 = vsel %vm2866_vm9, %v748_v22, 0.0  ;;  %v808_v25 = vsel %vm2828_vm7, %v748_v22, 0.0  ;;  %v772_v26 = vsel %vm2895_vm11, %v748_v22, 0.0  ;;  %v2908_v27 = vld [vmem:[#allocation2 + $0x2f] sm:$0xff]  ;;  %vm3873_vm7 = vcmask 441344  }
  0xbd   : > { %945 = vrot.lane.b32.xlu0 %v788_v60, %s2628_s29  ;;  %v799_v33 = vsel %vm2872_vm10, %v2908_v27, 0.0  ;;  %v781_v36 = vsel %vm2910_vm12, %v2908_v27, 0.0 }
  0xc2   : > { %v2854_v6 = vpop.f32.mrf.mxu0 }
  0xc3   : > { %1032 = vrot.lane.b32.xlu1 %v806_v0, %s2630_s14  ;;  %858 = vrot.lane.b32.xlu2 %v770_v1, %s2625_s24  ;;  %3839 = vst [vmem:[#allocation5_spill] sm:$0xff] %v2854_v6  ;;  %v742_v30 = vld [vmem:[#allocation2 + $0x38] sm:$0xff]  ;;  %v577_v0 = vadd.s32 48, %v2749_v32 }
  0xc4   : > { %702 = vst.msk [vmem:[#allocation2 + $0x40] sm:$0xff] %vm3801_vm2, %v2854_v6  ;;  %v749_v38 = vld [vmem:[#allocation2 + $0x31] sm:$0xff] }
  0xc5   : > { %890 = vrot.lane.b32.xlu0 %v779_v3, %s2626_s27  ;;  %v791_v43 = vsel %vm2895_vm11, %v749_v38, 0.0  ;;  %v2937_v48 = vld [vmem:[#allocation2 + $0x37] sm:$0xff]  ;;  %v809_v50 = vsel %vm2866_vm9, %v749_v38, 0.0  ;;  %v773_v53 = vsel %vm2933_vm13, %v749_v38, 0.0  ;;  %vm3859_vm9 = vcmask 146432  }
  0xc6   : > { %v782_v55 = vsel %vm2943_vm14, %v2937_v48, 0.0  ;;  %v800_v1 = vsel %vm2910_vm12, %v2937_v48, 0.0 }
  0xca   : > { %v2891_v20 = vpop.f32.mrf.mxu0 }
  0xcb   : > { %977 = vrot.lane.b32.xlu1 %v797_v5, %s2629_s30  ;;  %830 = vrot.lane.b32.xlu2 %v740_v4, %s2623_s22  ;;  %703 = vst.msk [vmem:[#allocation2 + $0x48] sm:$0xff] %vm3801_vm2, %v2891_v20  ;;  %v750_v60 = vld [vmem:[#allocation2 + $0x39] sm:$0xff]  ;;  %v1131_v5 = vld [vmem:[%s3784_s4 + $0x28] sm:$0xff] }
  0xcc   : > { %v792_v3 = vsel %vm2933_vm13, %v750_v60, 0.0  ;;  %1176 = vmatpush.msrb.mxu0 %v1131_v5  ;;  %2537 = vmatpush.msra.mxu1 %v1131_v5  ;;  %v743_v19 = vld [vmem:[#allocation2 + $0x40] sm:$0xff] }
  0xcd   : > { %917 = vrot.lane.b32.xlu0 %v740_v4, %s2624_s23 }
  0xd2   : > { %v751_v38 = vld [vmem:[#allocation2 + $0x41] sm:$0xff] }
  0xd3   : > { %947 = vrot.lane.b32.xlu2 %v789_v9, %s2628_s29  ;;  %1004 = vrot.lane.b32.xlu1 %v740_v4, %s2627_s28  ;;  %v810_v4 = vsel %vm2895_vm11, %v750_v60, 0.0  ;;  %v625_v9 = vand.u32 7, %v577_v0  ;;  %v776_v61 = vld [vmem:[#allocation2 + $0x47] sm:$0xff] }
  0xd5   : > { %1034 = vrot.lane.b32.xlu0 %v807_v10, %s2630_s14  ;;  %v1130_v10 = vld [vmem:[%s3784_s4 + $0x20] sm:$0xff]  ;;  %vm2989_vm0 = vcmp.ge.s32.totalorder %v625_v9, 1  ;;  %vm3012_vm15 = vcmp.le.s32.totalorder %v625_v9, 6 }
  0xd6   : > { %1177 = vmatpush.msrb.mxu0 %v1130_v10  ;;  %2538 = vmatpush.msra.mxu1 %v1130_v10  ;;  %v774_v42 = vsel %vm3012_vm15, %v750_v60, 0.0  ;;  %v802_v0 = vsel %vm2989_vm0, %v776_v61, 0.0 }
  0xdb   : > { %860 = vrot.lane.b32.xlu1 %v771_v15, %s2625_s24  ;;  %892 = vrot.lane.b32.xlu2 %v780_v16, %s2626_s27  ;;  %v2981_v15 = vld [vmem:[#allocation2 + $0x3f] sm:$0xff] }
  0xdc   : > { %v1129_v16 = vld [vmem:[%s3784_s4 + $0x18] sm:$0xff]  ;;  %v783_v21 = vsel %vm2989_vm0, %v2981_v15, 0.0  ;;  %v801_v22 = vsel %vm2943_vm14, %v2981_v15, 0.0 }
  0xdd   : > { %979 = vrot.lane.b32.xlu0 %v798_v17, %s2629_s30  ;;  %v1128_v17 = vld [vmem:[%s3784_s4 + $0x10] sm:$0xff]  ;;  %1178 = vmatpush.msrb.mxu0 %v1129_v16 }
  0xde   : > { %2539 = vmatpush.msra.mxu1 %v1129_v16  ;;  %v732_v16 = vsel %vm2910_vm12, %v2870_v13, 0.0  ;;  %vm3868_vm12 = vcmask 48128  }
  0xdf   : > { %1179 = vmatpush.msrb.mxu0 %v1128_v17 }
  0xe0   : > { %2540 = vmatpush.msra.mxu1 %v1128_v17 }
  0xe3   : > { %832 = vrot.lane.b32.xlu1 %v741_v18, %s2623_s22  ;;  %919 = vrot.lane.b32.xlu2 %v741_v18, %s2624_s23 }
  0xe5   : > { %1006 = vrot.lane.b32.xlu0 %v741_v18, %s2627_s28 }
  0xeb   : > { %949 = vrot.lane.b32.xlu1 %v790_v24, %s2628_s29  ;;  %1036 = vrot.lane.b32.xlu2 %v808_v25, %s2630_s14  ;;  %v1127_v24 = vld [vmem:[%s3784_s4 + $0x8] sm:$0xff] }
  0xec   : > { %1180 = vmatpush.msrb.mxu0 %v1127_v24  ;;  %2541 = vmatpush.msra.mxu1 %v1127_v24 }
  0xed   : > { %862 = vrot.lane.b32.xlu0 %v772_v26, %s2625_s24 }
  0xf3   : > { %981 = vrot.lane.b32.xlu2 %v799_v33, %s2629_s30  ;;  %894 = vrot.lane.b32.xlu1 %v781_v36, %s2626_s27  ;;  %v1126_v33 = vld [vmem:[%s3784_s4] sm:$0xff]  ;;  %v3854_v36 = vmov 0 }
  0xf4   : > { %v3855_v36 = vsel %vm3012_vm15, 4294967295, %v3854_v36  ;;  %1181 = vmatpush.msrb.mxu0 %v1126_v33  ;;  %2542 = vmatpush.msra.mxu1 %v1126_v33 }
  0xf5   : > { %834 = vrot.lane.b32.xlu0 %v742_v30, %s2623_s22  ;;  %v2923_v37 = vpop.permute.xlu2 %824 }
  0xfb   : > { %921 = vrot.lane.b32.xlu1 %v742_v30, %s2624_s23  ;;  %1008 = vrot.lane.b32.xlu2 %v742_v30, %s2627_s28 }
  0xfd   : > { %951 = vrot.lane.b32.xlu0 %v791_v43, %s2628_s29  ;;  %v2931_v44 = vpop.permute.xlu2 %913  ;;  %v811_v43 = vsel %vm2933_vm13, %v751_v38, 0.0  ;;  %vm3856_vm13 = vcmask 97280  }
 0x103   : > { %1038 = vrot.lane.b32.xlu1 %v809_v50, %s2630_s14  ;;  %864 = vrot.lane.b32.xlu2 %v773_v53, %s2625_s24 }
 0x105   : > { %896 = vrot.lane.b32.xlu0 %v782_v55, %s2626_s27  ;;  %v2955_v58 = vpop.permute.xlu2 %943  ;;  %v704_v55 = vld [vmem:[#allocation2 + $0x7] sm:$0xff] }
 0x106   : > { %v728_v60 = vsel %vm2767_vm4, %v704_v55, 0.0 }
 0x107   : > { %v1056_v5 = vsel %vm3801_vm2, %v728_v60, %v2953_v57  ;;  %v786_v57 = vld [vmem:[#allocation2 + $0x49] sm:$0xff] }
 0x10b   : > { %983 = vrot.lane.b32.xlu1 %v800_v1, %s2629_s30  ;;  %953 = vrot.lane.b32.xlu2 %v792_v3, %s2628_s29  ;;  %v793_v1 = vsel %vm3012_vm15, %v751_v38, 0.0  ;;  %v578_v3 = vadd.s32 56, %v2749_v32 }
 0x10d   : > { %1040 = vrot.lane.b32.xlu0 %v810_v4, %s2630_s14  ;;  %v2974_v7 = vpop.permute.xlu1 %911  ;;  %v2976_v8 = vpop.permute.xlu2 %975  ;;  %v785_v4 = vld [vmem:[#allocation2 + $0x48] sm:$0xff] }
 0x10f   : > { %v855_v11 = vpop.permute.xlu0 %854 }
 0x110   : > { %v1064_v33 = vsel %vm3856_vm13, %v1056_v5, %v855_v11  ;;  %vm3804_vm13 = vcmask 244736  }
 0x113   : > { %1010 = vrot.lane.b32.xlu1 %v743_v19, %s2627_s28  ;;  %898 = vrot.lane.b32.xlu2 %v783_v21, %s2626_s27  ;;  %v731_v21 = vsel %vm2872_vm10, %v2832_v63, 0.0  ;;  %vm3874_vm10 = vcmask 195584  }
 0x115   : > { %985 = vrot.lane.b32.xlu0 %v801_v22, %s2629_s30  ;;  %v887_v25 = vpop.permute.xlu1 %886  ;;  %v3005_v26 = vpop.permute.xlu2 %1002  ;;  %v632_v22 = vand.u32 7, %v578_v3 }
 0x116   : > { %v1073_v13 = vsel %vm3859_vm9, %v1064_v33, %v887_v25  ;;  %vm3809_vm9 = vcmask 293888  }
 0x117   : > { %v3007_v30 = vpop.permute.xlu0 %1000  ;;  %vm3054_vm11 = vcmp.le.s32.totalorder %v632_v22, 6  ;;  %v1082_v11 = vsel %vm3805_vm1, %v1073_v13, %v2974_v7  ;;  %vm3807_vm1 = vcmask 441344  }
 0x118   : > { %v775_v63 = vsel %vm3054_vm11, %v751_v38, 0.0  ;;  %v1091_v25 = vsel %vm3804_vm13, %v1082_v11, %v2955_v58  ;;  %vm3806_vm13 = vcmask 392192  }
 0x119   : > { %v1100_v38 = vsel %vm3809_vm9, %v1091_v25, %v2976_v8  ;;  %vm3865_vm9 = vcmask 195584   ;;  %v730_v25 = vsel %vm2838_vm8, %v2799_v51, 0.0 }
 0x11b   : > { %866 = vrot.lane.b32.xlu1 %v774_v42, %s2625_s24  ;;  %1042 = vrot.lane.b32.xlu2 %v811_v43, %s2630_s14  ;;  %v3857_v42 = vmov 0  ;;  %v812_v43 = vsel %vm3012_vm15, %v786_v57, 0.0  ;;  %vm3808_vm15 = vcmask 343040  }
 0x11c   : > { %v3858_v42 = vsel %vm3054_vm11, 4294967295, %v3857_v42  ;;  %v1109_v58 = vsel %vm3808_vm15, %v1100_v38, %v3007_v30  ;;  %v729_v30 = vsel %vm2801_vm6, %v2771_v40, 0.0  ;;  %vm3864_vm15 = vcmask 146432  }
 0x11d   : > { %923 = vrot.lane.b32.xlu0 %v743_v19, %s2624_s23  ;;  %v3023_v45 = vpop.permute.xlu1 %826  ;;  %v3025_v50 = vpop.permute.xlu2 %858 }
 0x11e   : > { %v1058_v38 = vsel %vm3868_vm12, %v730_v25, %v3023_v45  ;;  %vm3876_vm12 = vcmask 293888  }
 0x11f   : > { %v3027_v53 = vpop.permute.xlu0 %856 }
 0x123   : > { %987 = vrot.lane.b32.xlu2 %v802_v0, %s2629_s30  ;;  %955 = vrot.lane.b32.xlu1 %v793_v1, %s2628_s29  ;;  %v794_v1 = vsel %vm3054_vm11, %v786_v57, 0.0 }
 0x125   : > { %1012 = vrot.lane.b32.xlu0 %v785_v4, %s2627_s28  ;;  %v889_v9 = vpop.permute.xlu1 %888  ;;  %v831_v10 = vpop.permute.xlu2 %830 }
 0x126   : > { %v3045_v17 = vsel %vm3801_vm2, %v732_v16, %v831_v10  ;;  %v804_v16 = vld [vmem:[#allocation2 + $0x50] sm:$0xff] }
 0x127   : > { %v829_v32 = vpop.permute.xlu0 %828 }
 0x128   : > { %v3051_v24 = vsel %vm3801_vm2, %v731_v21, %v829_v32  ;;  %vm3070_vm2 = vcmp.ge.s32.totalorder %v632_v22, 1 }
 0x129   : > { %v784_v7 = vsel %vm3070_vm2, %v776_v61, 0.0  ;;  %v805_v61 = vld [vmem:[#allocation2 + $0x51] sm:$0xff] }
 0x12a   : > { %v813_v32 = vsel %vm3054_vm11, %v805_v61, 0.0  ;;  %vm3866_vm11 = vcmask 244736  }
 0x12b   : > { %836 = vrot.lane.b32.xlu2 %v743_v19, %s2623_s22  ;;  %1044 = vrot.lane.b32.xlu1 %v812_v43, %s2630_s14  ;;  %v3860_v19 = vmov 0 }
 0x12c   : > { %v3861_v19 = vsel %vm3070_vm2, 4294967295, %v3860_v19 }
 0x12d   : > { %868 = vrot.lane.b32.xlu0 %v775_v63, %s2625_s24  ;;  %v916_v55 = vpop.permute.xlu1 %915  ;;  %v948_v60 = vpop.permute.xlu2 %947  ;;  %s465_s24 = scalar_lea.vmem %s3793_s13, %s3962_s26 }
 0x12f   : > { %v946_v0 = vpop.permute.xlu0 %945 }
 0x133   : > { %925 = vrot.lane.b32.xlu2 %v785_v4, %s2624_s23  ;;  %900 = vrot.lane.b32.xlu1 %v784_v7, %s2626_s27  ;;  %v795_v4 = vld [vmem:[#allocation2 + $0x4f] sm:$0xff] }
 0x134   : > { %v803_v21 = vsel %vm3070_vm2, %v795_v4, 0.0 }
 0x135   : > { %957 = vrot.lane.b32.xlu0 %v794_v1, %s2628_s29  ;;  %v1033_v3 = vpop.permute.xlu1 %1032  ;;  %v893_v5 = vpop.permute.xlu2 %892  ;;  %s459_s29 = scalar_lea.vmem %s3791_s11, %s3962_s26 }
 0x136   : > { %v1118_v8 = vsel %vm3806_vm13, %v1109_v58, %v1033_v3  ;;  %vm3862_vm13 = vcmask 48128  }
 0x137   : > { %v891_v10 = vpop.permute.xlu0 %890  ;;  %2428 = vmatmul.msk.f32.vlgmr.msrb.gmra.mxu0 %vm3807_vm1, %v1118_v8  ;;  %v1057_v22 = vsel %vm3862_vm13, %v729_v30, %v2923_v37  ;;  %vm3863_vm1 = vcmask 97280   ;;  %vm3867_vm13 = vcmask 293888  }
 0x138   : > { %v1065_v57 = vsel %vm3863_vm1, %v1057_v22, %v3027_v53  ;;  %vm3869_vm1 = vcmask 343040  }
 0x139   : > { %v1074_v13 = vsel %vm3864_vm15, %v1065_v57, %v889_v9  ;;  %vm3870_vm15 = vcmask 97280   ;;  %vm3877_vm5 = vmmov %vm3869_vm1 }
 0x13a   : > { %v1083_v40 = vsel %vm3865_vm9, %v1074_v13, %v2931_v44  ;;  %v1066_v1 = vsel %vm3870_vm15, %v1058_v38, %v3025_v50  ;;  %vm3871_vm9 = vcmask 392192   ;;  %vm3879_vm15 = vmmov %vm3873_vm7 }
 0x13b   : > { %989 = vrot.lane.b32.xlu1 %v803_v21, %s2629_s30  ;;  %1014 = vrot.lane.b32.xlu2 %v804_v16, %s2627_s28  ;;  %v1092_v11 = vsel %vm3866_vm11, %v1083_v40, %v946_v0  ;;  %vm3872_vm11 = vcmask 146432  }
 0x13c   : > { %v1075_v0 = vsel %vm3872_vm11, %v1066_v1, %v891_v10 }
 0x13d   : > { %1046 = vrot.lane.b32.xlu0 %v813_v32, %s2630_s14  ;;  %v978_v33 = vpop.permute.xlu1 %977  ;;  %v920_v63 = vpop.permute.xlu2 %919  ;;  %v1084_v58 = vsel %vm3874_vm10, %v1075_v0, %v916_v55  ;;  %vm3881_vm10 = vmmov %vm3872_vm11  ;;  %v733_v0 = vsel %vm2943_vm14, %v2908_v27, 0.0 }
 0x13e   : > { %v1101_v37 = vsel %vm3867_vm13, %v1092_v11, %v978_v33  ;;  %vm3875_vm13 = vcmask 244736   ;;  %vm3884_vm11 = vmmov %vm3876_vm12 }
 0x13f   : > { %v918_v43 = vpop.permute.xlu0 %917  ;;  %v1110_v9 = vsel %vm3869_vm1, %v1101_v37, %v3005_v26  ;;  %v1093_v45 = vsel %vm3875_vm13, %v1084_v58, %v948_v60  ;;  %vm3878_vm1 = vmmov %vm3871_vm9 }
 0x145   : > { %v1005_v53 = vpop.permute.xlu1 %1004  ;;  %v1037_v51 = vpop.permute.xlu2 %1036 }
 0x147   : > { %v1035_v7 = vpop.permute.xlu0 %1034 }
 0x148   : > { %v1119_v44 = vsel %vm3871_vm9, %v1110_v9, %v1035_v7  ;;  %vm3883_vm9 = vmmov %vm3875_vm13  ;;  %vm3885_vm13 = vcmask 343040  }
 0x149   : > { %2429 = vmatmul.msk.f32.vlgmr.msra.gmra.mxu1 %vm3873_vm7, %v1119_v44  ;;  %vm3880_vm7 = vcmask 97280  }
 0x14d   : > { %v861_v3 = vpop.permute.xlu1 %860  ;;  %v982_v50 = vpop.permute.xlu2 %981 }
 0x14e   : > { %v1067_v60 = vsel %vm3880_vm7, %v3051_v24, %v861_v3 }
 0x14f   : > { %v980_v8 = vpop.permute.xlu0 %979  ;;  %v1076_v33 = vsel %vm3881_vm10, %v1067_v60, %v893_v5  ;;  %v734_v60 = vsel %vm2989_vm0, %v2937_v48, 0.0  ;;  %v1215_v48 = vld [vmem:[%s3786_s6] sm:$0xff] }
 0x150   : > { %v1102_v61 = vsel %vm3876_vm12, %v1093_v45, %v980_v8  ;;  %vm3886_vm12 = vmmov %vm3878_vm1 }
 0x151   : > { %v1111_v26 = vsel %vm3877_vm5, %v1102_v61, %v1005_v53  ;;  %vm3882_vm5 = vcmask 195584  }
 0x152   : > { %v1120_v4 = vsel %vm3878_vm1, %v1111_v26, %v1037_v51  ;;  %v1085_v40 = vsel %vm3882_vm5, %v1076_v33, %v918_v43  ;;  %vm3887_vm1 = vmmov %vm3879_vm15 }
 0x153   : > { %2430 = vmatmul.msk.f32.gmra.mxu1 %vm3879_vm15, %v1120_v4  ;;  %vm3888_vm15 = vmmov %vm3880_vm7 }
 0x154   : > { %vm3889_vm7 = vmmov %vm3881_vm10 }
 0x155   : > { %v833_v16 = vpop.permute.xlu1 %832  ;;  %v1009_v21 = vpop.permute.xlu2 %1008  ;;  %vm3890_vm10 = vmmov %vm3882_vm5 }
 0x156   : > { %vm3891_vm5 = vmmov %vm3883_vm9 }
 0x157   : > { %v1007_v10 = vpop.permute.xlu0 %1006 }
 0x15d   : > { %v950_v32 = vpop.permute.xlu1 %949  ;;  %v865_v57 = vpop.permute.xlu2 %864 }
 0x15e   : > { %v1094_v25 = vsel %vm3883_vm9, %v1085_v40, %v950_v32  ;;  %vm3892_vm9 = vcmask 48128  }
 0x15f   : > { %v863_v30 = vpop.permute.xlu0 %862  ;;  %v1103_v37 = vsel %vm3884_vm11, %v1094_v25, %v982_v50  ;;  %v1061_v3 = vsel %vm3892_vm9, %v733_v0, %v833_v16  ;;  %vm3898_vm9 = vmmov %vm3884_vm11 }
 0x160   : > { %v1112_v7 = vsel %vm3885_vm13, %v1103_v37, %v1007_v10  ;;  %v1068_v24 = vsel %vm3888_vm15, %v3045_v17, %v863_v30  ;;  %vm3893_vm13 = vmmov %vm3888_vm15  ;;  %vm3896_vm15 = vcmask 392192  }
 0x161   : > { %v1069_v61 = vsel %vm3893_vm13, %v1061_v3, %v865_v57  ;;  %vm3900_vm13 = vmmov %vm3896_vm15 }
 0x165   : > { %v895_v22 = vpop.permute.xlu1 %894  ;;  %v954_v38 = vpop.permute.xlu2 %953 }
 0x166   : > { %v1077_v5 = vsel %vm3889_vm7, %v1068_v24, %v895_v22 }
 0x167   : > { %v835_v55 = vpop.permute.xlu0 %834  ;;  %v1086_v44 = vsel %vm3890_vm10, %v1077_v5, %v920_v63 }
 0x16d   : > { %v922_v13 = vpop.permute.xlu1 %921  ;;  %v899_v43 = vpop.permute.xlu2 %898 }
 0x16f   : > { %v952_v11 = vpop.permute.xlu0 %951 }
 0x170   : > { %v1095_v51 = vsel %vm3891_vm5, %v1086_v44, %v952_v11  ;;  %v735_v44 = vsel %vm3070_vm2, %v2981_v15, 0.0 }
 0x175   : > { %v1039_v53 = vpop.permute.xlu1 %1038  ;;  %v1043_v50 = vpop.permute.xlu2 %1042 }
 0x176   : > { %v1121_v1 = vsel %vm3886_vm12, %v1112_v7, %v1039_v53  ;;  %vm3894_vm12 = vcmask 343040   ;;  %v1216_v53 = vld [vmem:[%s3786_s6 + $0x8] sm:$0xff] }
 0x177   : > { %v897_v9 = vpop.permute.xlu0 %896  ;;  %2431 = vmatmul.msk.f32.gmra.mxu1 %vm3887_vm1, %v1121_v1  ;;  %vm3895_vm1 = vmmov %vm3889_vm7  ;;  %vm3897_vm7 = vcmask 441344   ;;  %1260 = vmatpush.msra.mxu2 %v1216_v53 }
 0x178   : > { %v1078_v26 = vsel %vm3895_vm1, %v1069_v61, %v897_v9  ;;  %vm3902_vm1 = vcmask 48128  }
 0x179   : > { %v1087_v27 = vsel %vm3890_vm10, %v1078_v26, %v922_v13  ;;  %v1062_v33 = vsel %vm3902_vm1, %v734_v60, %v835_v55  ;;  %1261 = vmatpush.msra.mxu2 %v1215_v48  ;;  %vm3908_vm1 = vcmask 441344  }
 0x17a   : > { %v1096_v10 = vsel %vm3891_vm5, %v1087_v27, %v954_v38 }
 0x17d   : > { %v984_v58 = vpop.permute.xlu1 %983  ;;  %v988_v13 = vpop.permute.xlu2 %987 }
 0x17e   : > { %v1104_v45 = vsel %vm3884_vm11, %v1095_v51, %v984_v58  ;;  %vm3899_vm11 = vmmov %vm3894_vm12 }
 0x17f   : > { %v1041_v8 = vpop.permute.xlu0 %1040  ;;  %v1113_v17 = vsel %vm3894_vm12, %v1104_v45, %v1009_v21  ;;  %vm3901_vm12 = vmmov %vm3897_vm7 }
 0x180   : > { %v1122_v63 = vsel %vm3896_vm15, %v1113_v17, %v1041_v8  ;;  %vm3903_vm15 = vcmask 97280  }
 0x181   : > { %2432 = vmatmul.msk.f32.gmra.mxu1 %vm3897_vm7, %v1122_v63  ;;  %vm3904_vm7 = vcmask 146432  }
 0x185   : > { %v1011_v4 = vpop.permute.xlu1 %1010  ;;  %v837_v55 = vpop.permute.xlu2 %836 }
 0x187   : > { %v986_v16 = vpop.permute.xlu0 %985 }
 0x188   : > { %v1105_v32 = vsel %vm3898_vm9, %v1096_v10, %v986_v16  ;;  %vm1221_vm9 = vcmask 130048  }
 0x189   : > { %v1114_v30 = vsel %vm3899_vm11, %v1105_v32, %v1011_v4  ;;  %1295 = vst.msk [vmem:[#allocation3] sm:$0xff] %vm1221_vm9, %v2622_v28  ;;  %vm3905_vm11 = vcmask 293888  }
 0x18a   : > { %v1123_v22 = vsel %vm3900_vm13, %v1114_v30, %v1043_v50  ;;  %1296 = vst.msk [vmem:[#allocation3 + $0x8] sm:$0xff] %vm1221_vm9, %v2622_v28  ;;  %vm3906_vm13 = vcmask 343040   ;;  %v2563_v50 = vld [vmem:[%s3785_s5] ss:$0 sm:$0xff] }
 0x18b   : > { %2433 = vmatmul.msk.f32.gmra.mxu1 %vm3901_vm12, %v1123_v22  ;;  %1297 = vst.msk [vmem:[#allocation3 + $0x50] sm:$0xff] %vm1221_vm9, %v2622_v28  ;;  %vm3907_vm12 = vcmask 392192  }
 0x18c   : > { %1298 = vst.msk [vmem:[#allocation3 + $0x58] sm:$0xff] %vm1221_vm9, %v2622_v28 }
 0x18d   : > { %v867_v21 = vpop.permute.xlu1 %866  ;;  %v926_v0 = vpop.permute.xlu2 %925 }
 0x18e   : > { %v1070_v40 = vsel %vm3903_vm15, %v1062_v33, %v867_v21  ;;  %vm3909_vm15 = vcmask 48128  }
 0x18f   : > { %v924_v57 = vpop.permute.xlu0 %923  ;;  %v1079_v11 = vsel %vm3904_vm7, %v1070_v40, %v899_v43  ;;  %v1063_v51 = vsel %vm3909_vm15, %v735_v44, %v837_v55  ;;  %vm3910_vm7 = vcmask 97280   ;;  %vm3917_vm15 = vcmask 441344  }
 0x190   : > { %v1088_v37 = vsel %vm3890_vm10, %v1079_v11, %v924_v57  ;;  %vm3911_vm10 = vcmask 146432  }
 0x191   : > { %v1323_v44 = vld [vmem:[#allocation3 + $0x8] sm:$0xff] }
 0x195   : > { %v956_v25 = vpop.permute.xlu1 %955  ;;  %v1015_v61 = vpop.permute.xlu2 %1014 }
 0x196   : > { %v1097_v7 = vsel %vm3891_vm5, %v1088_v37, %v956_v25  ;;  %vm3912_vm5 = vcmask 195584  }
 0x197   : > { %v1013_v38 = vpop.permute.xlu0 %1012  ;;  %v1106_v9 = vsel %vm3905_vm11, %v1097_v7, %v988_v13  ;;  %vm3913_vm11 = vcmask 244736  }
 0x198   : > { %v1115_v1 = vsel %vm3906_vm13, %v1106_v9, %v1013_v38  ;;  %vm3914_vm13 = vcmask 293888  }
 0x19d   : > { %v1045_v24 = vpop.permute.xlu1 %1044 }
 0x19e   : > { %v1124_v43 = vsel %vm3907_vm12, %v1115_v1, %v1045_v24  ;;  %vm3915_vm12 = vcmask 343040   ;;  %v2445_v1 = vld [vmem:[%s3788_s8 + $0x18] sm:$0xff] }
 0x19f   : > { %v869_v5 = vpop.permute.xlu0 %868  ;;  %2434 = vmatmul.msk.f32.gmra.mxu1 %vm3908_vm1, %v1124_v43  ;;  %vm3916_vm1 = vcmask 392192   ;;  %1428 = vmatpush.msra.mxu3 %v2445_v1  ;;  %v2444_v43 = vld [vmem:[%s3788_s8 + $0x10] sm:$0xff] }
 0x1a0   : > { %v1071_v3 = vsel %vm3910_vm7, %v1063_v51, %v869_v5  ;;  %v1386_v5 = vld [vmem:[%s3788_s8 + $0x8] sm:$0xff]  ;;  %vm3918_vm7 = vnez %v3831_v47 }
 0x1a1   : > { %1493 = vmatpush.msra.mxu0 %v1386_v5  ;;  %1429 = vmatpush.msra.mxu3 %v2444_v43  ;;  %v1307_v51 = vld [vmem:[#allocation3 + $0x7] sm:$0xff] }
 0x1a2   : > { %2446 = vmatmul.msk.f32.vlgmr.msra.gmra.mxu3 %vm1221_vm9, %v1323_v44 }
 0x1a5   : > { %v901_v58 = vpop.permute.xlu1 %900 }
 0x1a6   : > { %v1080_v28 = vsel %vm3911_vm10, %v1071_v3, %v901_v58  ;;  %v1315_v58 = vsel %vm2767_vm4, %v1307_v51, 0.0  ;;  %v2483_v3 = vld [vmem:[%s3788_s8 + $0x48] sm:$0xff]  ;;  %vm3919_vm10 = vnez %v3843_v14 }
 0x1a7   : > { %v958_v45 = vpop.permute.xlu0 %957  ;;  %v1089_v8 = vsel %vm3912_vm5, %v1080_v28, %v926_v0  ;;  %v1385_v0 = vld [vmem:[%s3788_s8] sm:$0xff]  ;;  %1692 = vmatpush.msrb.mxu1 %v2483_v3  ;;  %vm3920_vm5 = vnez %v3836_v62 }
 0x1a8   : > { %v1098_v17 = vsel %vm3913_vm11, %v1089_v8, %v958_v45  ;;  %1494 = vmatpush.msra.mxu0 %v1385_v0  ;;  %v2463_v45 = vld [vmem:[%s3788_s8 + $0x28] sm:$0xff]  ;;  %v2482_v28 = vld [vmem:[%s3788_s8 + $0x40] sm:$0xff]  ;;  %vm3921_vm11 = vnez %v3847_v29 }
 0x1a9   : > { %2454 = vmatmul.msk.f32.vlgmr.msra.gmra.mxu0 %vm1221_vm9, %v1315_v58  ;;  %1561 = vmatpush.msrb.mxu2 %v2463_v45  ;;  %v2462_v8 = vld [vmem:[%s3788_s8 + $0x20] sm:$0xff] }
 0x1aa   : > { %1693 = vmatpush.msrb.mxu1 %v2482_v28 }
 0x1ab   : > { %1562 = vmatpush.msrb.mxu2 %v2462_v8 }
 0x1ad   : > { %v990_v26 = vpop.permute.xlu1 %989 }
 0x1ae   : > { %v1107_v63 = vsel %vm3914_vm13, %v1098_v17, %v990_v26  ;;  %vm3922_vm13 = vnez %v3841_v12 }
 0x1af   : > { %v1047_v27 = vpop.permute.xlu0 %1046  ;;  %v1116_v15 = vsel %vm3915_vm12, %v1107_v63, %v1015_v61  ;;  %v3234_v63 = vld [vmem:[%s3787_s7] ss:$0 sm:$0xff]  ;;  %vm3923_vm12 = vnez %v3845_v23 }
 0x1b0   : > { %v1125_v4 = vsel %vm3916_vm1, %v1116_v15, %v1047_v27  ;;  %vm3924_vm1 = vnez %v3849_v46 }
 0x1b1   : > { %2435 = vmatmul.msk.f32.gmra.mxu1 %vm3917_vm15, %v1125_v4  ;;  %vm3925_vm15 = vnez %v3855_v36 }
 0x1b4   : > { %v1183_v10 = vpop.f32.mrf.mxu0 }
 0x1b5   : > { %v1184_v16 = vadd.f32 %v2563_v50, %v1183_v10  ;;  %v2473_v10 = vld [vmem:[%s3788_s8 + $0x38] sm:$0xff] }
 0x1b6   : > { %1637 = vmatpush.msrb.mxu3 %v2473_v10 }
 0x1b7   : > { %v1207_v32 = vmax.f32 %v1184_v16, 0.0 }
 0x1b9   : > { %2436 = vmatmul.msk.f32.vlgmr.msra.gmra.mxu2 %vm1221_vm9, %v1207_v32 }
 0x1c6   : > { %v1186_v30 = vpop.f32.mrf.mxu1 }
 0x1c7   : > { %v1187_v22 = vadd.f32 %v2563_v50, %v1186_v30 }
 0x1c9   : > { %v1208_v21 = vmax.f32 %v1187_v22, 0.0 }
 0x1cb   : > { %2437 = vmatmul.msk.f32.gmra.mxu2 %vm1221_vm9, %v1208_v21 }
 0x1d0   : > { %v1189_v60 = vpop.f32.mrf.mxu1 }
 0x1d1   : > { %v1190_v57 = vadd.f32 %v2563_v50, %v1189_v60 }
 0x1d3   : > { %v1209_v33 = vmax.f32 %v1190_v57, 0.0 }
 0x1d5   : > { %2438 = vmatmul.msk.f32.gmra.mxu2 %vm1221_vm9, %v1209_v33 }
 0x1f4   : > { %v1192_v13 = vpop.f32.mrf.mxu1 }
 0x1f5   : > { %v1193_v40 = vadd.f32 %v2563_v50, %v1192_v13 }
 0x1f7   : > { %v1210_v11 = vmax.f32 %v1193_v40, 0.0 }
 0x1f9   : > { %2439 = vmatmul.msk.f32.gmra.mxu2 %vm1221_vm9, %v1210_v11 }
 0x1fe   : > { %v1195_v25 = vpop.f32.mrf.mxu1 }
 0x1ff   : > { %v1196_v37 = vadd.f32 %v2563_v50, %v1195_v25 }
 0x201   : > { %v1211_v38 = vmax.f32 %v1196_v37, 0.0 }
 0x203   : > { %2440 = vmatmul.msk.f32.gmra.mxu2 %vm1221_vm9, %v1211_v38 }
 0x208   : > { %v1198_v53 = vpop.f32.mrf.mxu1 }
 0x209   : > { %v1199_v7 = vadd.f32 %v2563_v50, %v1198_v53 }
 0x20b   : > { %v1212_v48 = vmax.f32 %v1199_v7, 0.0 }
 0x20d   : > { %2441 = vmatmul.msk.f32.gmra.mxu2 %vm1221_vm9, %v1212_v48 }
 0x21c   : > { %v1201_v55 = vpop.f32.mrf.mxu1 }
 0x21d   : > { %v1202_v9 = vadd.f32 %v2563_v50, %v1201_v55 }
 0x21f   : > { %v1213_v24 = vmax.f32 %v1202_v9, 0.0 }
 0x221   : > { %2442 = vmatmul.msk.f32.gmra.mxu2 %vm1221_vm9, %v1213_v24  ;;  %v2472_v24 = vld [vmem:[%s3788_s8 + $0x30] sm:$0xff] }
 0x222   : > { %1638 = vmatpush.msrb.mxu3 %v2472_v24 }
 0x22e   : > { %v1204_v61 = vpop.f32.mrf.mxu1 }
 0x22f   : > { %v1205_v17 = vadd.f32 %v2563_v50, %v1204_v61 }
 0x231   : > { %v1214_v26 = vmax.f32 %v1205_v17, 0.0 }
 0x233   : > { %2443 = vmatmul.msk.f32.gmra.mxu2 %vm1221_vm9, %v1214_v26 }
 0x23c   : > { %v1263_v27 = vpop.f32.mrf.mxu2 }
 0x23d   : > { %v1264_v15 = vadd.f32 %v3234_v63, %v1263_v27 }
 0x23f   : > { %v1287_v4 = vmax.f32 %v1264_v15, 0.0 }
 0x241   : > { %1299 = vst.msk [vmem:[#allocation3 + $0x10] sm:$0xff] %vm1221_vm9, %v1287_v4 }
 0x248   : > { %v1324_v50 = vld [vmem:[#allocation3 + $0x10] sm:$0xff] }
 0x249   : > { %v3241_v16 = vld [vmem:[#allocation3 + $0xf] sm:$0xff]  ;;  %2447 = vmatmul.msk.f32.gmra.mxu3 %vm1221_vm9, %v1324_v50  ;;  %2484 = vmatmul.msk.f32.vlgmr.msrb.gmra.mxu1 %vm1221_vm9, %v1324_v50 }
 0x24a   : > { %v1331_v32 = vld [vmem:[#allocation3 + $0x9] sm:$0xff]  ;;  %v1316_v30 = vsel %vm2801_vm6, %v3241_v16, 0.0 }
 0x24b   : > { %v1339_v22 = vsel %vm2754_vm3, %v1331_v32, 0.0  ;;  %2455 = vmatmul.msk.f32.gmra.mxu0 %vm1221_vm9, %v1316_v30  ;;  %v2493_v30 = vld [vmem:[%s3788_s8 + $0x58] sm:$0xff] }
 0x24c   : > { %2464 = vmatmul.msk.f32.vlgmr.msrb.gmra.mxu2 %vm1221_vm9, %v1339_v22  ;;  %1768 = vmatpush.msrb.mxu0 %v2493_v30  ;;  %v2492_v22 = vld [vmem:[%s3788_s8 + $0x50] sm:$0xff] }
 0x24e   : > { %v1266_v21 = vpop.f32.mrf.mxu2  ;;  %1769 = vmatpush.msrb.mxu0 %v2492_v22 }
 0x24f   : > { %v1267_v60 = vadd.f32 %v3234_v63, %v1266_v21 }
 0x251   : > { %v1288_v57 = vmax.f32 %v1267_v60, 0.0 }
 0x253   : > { %1300 = vst.msk [vmem:[#allocation3 + $0x18] sm:$0xff] %vm1221_vm9, %v1288_v57 }
 0x258   : > { %v1269_v33 = vpop.f32.mrf.mxu2 }
 0x259   : > { %v1270_v13 = vadd.f32 %v3234_v63, %v1269_v33 }
 0x25a   : > { %v3255_v40 = vld [vmem:[#allocation3 + $0x18] sm:$0xff] }
 0x25b   : > { %v3257_v11 = vld [vmem:[#allocation3 + $0x17] sm:$0xff]  ;;  %v1289_v37 = vmax.f32 %v1270_v13, 0.0  ;;  %2448 = vmatmul.msk.f32.gmra.mxu3 %vm1221_vm9, %v3255_v40  ;;  %2485 = vmatmul.msk.f32.gmra.mxu1 %vm1221_vm9, %v3255_v40 }
 0x25c   : > { %v3259_v25 = vld [vmem:[#allocation3 + $0x11] sm:$0xff]  ;;  %v1317_v38 = vsel %vm2838_vm8, %v3257_v11, 0.0 }
 0x25d   : > { %v1340_v53 = vsel %vm3918_vm7, %v3259_v25, 0.0  ;;  %2456 = vmatmul.msk.f32.gmra.mxu0 %vm1221_vm9, %v1317_v38  ;;  %1301 = vst.msk [vmem:[#allocation3 + $0x20] sm:$0xff] %vm1221_vm9, %v1289_v37  ;;  %v2503_v37 = vld [vmem:[%s3788_s8 + $0x68] sm:$0xff]  ;;  %v2513_v38 = vld [vmem:[%s3788_s8 + $0x78] sm:$0xff] }
 0x25e   : > { %2465 = vmatmul.msk.f32.gmra.mxu2 %vm1221_vm9, %v1340_v53  ;;  %1899 = vmatpush.msra.mxu3 %v2513_v38  ;;  %v2523_v53 = vld [vmem:[%s3788_s8 + $0x88] sm:$0xff]  ;;  %v1367_v38 = vsel %vm2767_vm4, %v3257_v11, 0.0 }
 0x25f   : > { %1844 = vmatpush.msra.mxu2 %v2503_v37  ;;  %1975 = vmatpush.msra.mxu1 %v2523_v53 }
 0x264   : > { %v3274_v7 = vld [vmem:[#allocation3 + $0x20] sm:$0xff] }
 0x265   : > { %v3276_v48 = vld [vmem:[#allocation3 + $0x1f] sm:$0xff]  ;;  %2449 = vmatmul.msk.f32.gmra.mxu3 %vm1221_vm9, %v3274_v7  ;;  %2486 = vmatmul.msk.f32.gmra.mxu1 %vm1221_vm9, %v3274_v7 }
 0x266   : > { %v3278_v55 = vld [vmem:[#allocation3 + $0x19] sm:$0xff]  ;;  %v1318_v9 = vsel %vm3919_vm10, %v3276_v48, 0.0  ;;  %v1368_v39 = vsel %vm2801_vm6, %v3276_v48, 0.0 }
 0x267   : > { %v1341_v1 = vsel %vm3920_vm5, %v3278_v55, 0.0  ;;  %2457 = vmatmul.msk.f32.gmra.mxu0 %vm1221_vm9, %v1318_v9  ;;  %v1377_v37 = vsel %vm2754_vm3, %v3278_v55, 0.0 }
 0x268   : > { %2466 = vmatmul.msk.f32.gmra.mxu2 %vm1221_vm9, %v1341_v1 }
 0x27c   : > { %v1272_v5 = vpop.f32.mrf.mxu2 }
 0x27d   : > { %v1273_v43 = vadd.f32 %v3234_v63, %v1272_v5  ;;  %v2522_v5 = vld [vmem:[%s3788_s8 + $0x80] sm:$0xff] }
 0x27e   : > { %1976 = vmatpush.msra.mxu1 %v2522_v5 }
 0x27f   : > { %v1290_v44 = vmax.f32 %v1273_v43, 0.0  ;;  %v2502_v43 = vld [vmem:[%s3788_s8 + $0x60] sm:$0xff] }
 0x280   : > { %1845 = vmatpush.msra.mxu2 %v2502_v43 }
 0x281   : > { %1302 = vst.msk [vmem:[#allocation3 + $0x28] sm:$0xff] %vm1221_vm9, %v1290_v44 }
 0x286   : > { %v1275_v0 = vpop.f32.mrf.mxu2 }
 0x287   : > { %v1276_v51 = vadd.f32 %v3234_v63, %v1275_v0 }
 0x288   : > { %v3298_v58 = vld [vmem:[#allocation3 + $0x28] sm:$0xff] }
 0x289   : > { %v3300_v3 = vld [vmem:[#allocation3 + $0x27] sm:$0xff]  ;;  %v1291_v28 = vmax.f32 %v1276_v51, 0.0  ;;  %2450 = vmatmul.msk.f32.gmra.mxu3 %vm1221_vm9, %v3298_v58  ;;  %2487 = vmatmul.msk.f32.gmra.mxu1 %vm1221_vm9, %v3298_v58 }
 0x28a   : > { %v3302_v45 = vld [vmem:[#allocation3 + $0x21] sm:$0xff]  ;;  %v1319_v8 = vsel %vm3921_vm11, %v3300_v3, 0.0  ;;  %v1351_v53 = vsel %vm3919_vm10, %v3300_v3, 0.0  ;;  %v1369_v52 = vsel %vm2838_vm8, %v3300_v3, 0.0 }
 0x28b   : > { %v1342_v61 = vsel %vm3922_vm13, %v3302_v45, 0.0  ;;  %2458 = vmatmul.msk.f32.gmra.mxu0 %vm1221_vm9, %v1319_v8  ;;  %1303 = vst.msk [vmem:[#allocation3 + $0x30] sm:$0xff] %vm1221_vm9, %v1291_v28  ;;  %v1378_v34 = vsel %vm3918_vm7, %v3302_v45, 0.0 }
 0x28c   : > { %2467 = vmatmul.msk.f32.gmra.mxu2 %vm1221_vm9, %v1342_v61 }
 0x290   : > { %v1278_v17 = vpop.f32.mrf.mxu2 }
 0x291   : > { %v1279_v26 = vadd.f32 %v3234_v63, %v1278_v17 }
 0x292   : > { %v3318_v15 = vld [vmem:[#allocation3 + $0x30] sm:$0xff] }
 0x293   : > { %v1292_v27 = vmax.f32 %v1279_v26, 0.0  ;;  %v3320_v4 = vld [vmem:[#allocation3 + $0x2f] sm:$0xff]  ;;  %2451 = vmatmul.msk.f32.gmra.mxu3 %vm1221_vm9, %v3318_v15  ;;  %2488 = vmatmul.msk.f32.gmra.mxu1 %vm1221_vm9, %v3318_v15  ;;  %v1348_v26 = vsel %vm2767_vm4, %v3241_v16, 0.0  ;;  %v1359_v16 = vsel %vm3918_vm7, %v3278_v55, 0.0  ;;  %vm2198_vm4 = vcmask 97328  }
 0x294   : > { %v3322_v10 = vld [vmem:[#allocation3 + $0x29] sm:$0xff]  ;;  %v1320_v50 = vsel %vm2943_vm14, %v3320_v4, 0.0  ;;  %v1370_v2 = vsel %vm3919_vm10, %v3320_v4, 0.0 }
 0x295   : > { %v1343_v32 = vsel %vm3923_vm12, %v3322_v10, 0.0  ;;  %1304 = vst.msk [vmem:[#allocation3 + $0x38] sm:$0xff] %vm1221_vm9, %v1292_v27  ;;  %2459 = vmatmul.msk.f32.gmra.mxu0 %vm1221_vm9, %v1320_v50  ;;  %v1358_v27 = vsel %vm2754_vm3, %v3259_v25, 0.0  ;;  %v1379_v47 = vsel %vm3920_vm5, %v3322_v10, 0.0  ;;  %vm3927_vm3 = vnez %v3861_v19 }
 0x296   : > { %2468 = vmatmul.msk.f32.gmra.mxu2 %vm1221_vm9, %v1343_v32  ;;  %v2512_v32 = vld [vmem:[%s3788_s8 + $0x70] sm:$0xff] }
 0x297   : > { %1900 = vmatpush.msra.mxu3 %v2512_v32 }
 0x29c   : > { %v3343_v21 = vld [vmem:[#allocation3 + $0x38] sm:$0xff] }
 0x29d   : > { %v3345_v60 = vld [vmem:[#allocation3 + $0x37] sm:$0xff]  ;;  %2452 = vmatmul.msk.f32.gmra.mxu3 %vm1221_vm9, %v3343_v21  ;;  %2489 = vmatmul.msk.f32.gmra.mxu1 %vm1221_vm9, %v3343_v21 }
 0x29e   : > { %v3347_v57 = vld [vmem:[#allocation3 + $0x31] sm:$0xff]  ;;  %v1321_v33 = vsel %vm2989_vm0, %v3345_v60, 0.0  ;;  %v1371_v14 = vsel %vm3921_vm11, %v3345_v60, 0.0 }
 0x29f   : > { %v1344_v13 = vsel %vm3924_vm1, %v3347_v57, 0.0  ;;  %2460 = vmatmul.msk.f32.gmra.mxu0 %vm1221_vm9, %v1321_v33  ;;  %v1350_v33 = vsel %vm2838_vm8, %v3276_v48, 0.0  ;;  %v1362_v55 = vsel %vm3923_vm12, %v3347_v57, 0.0  ;;  %v1353_v48 = vsel %vm2943_vm14, %v3345_v60, 0.0  ;;  %v1431_v60 = vpop.f32.mrf.mxu3 }
 0x2a0   : > { %2469 = vmatmul.msk.f32.gmra.mxu2 %vm1221_vm9, %v1344_v13  ;;  %v1360_v13 = vsel %vm3920_vm5, %v3302_v45, 0.0  ;;  %v1380_v62 = vsel %vm3922_vm13, %v3347_v57, 0.0  ;;  %vm3928_vm5 = vcmask 48128  }
 0x2a4   : > { %v1281_v9 = vpop.f32.mrf.mxu2 }
 0x2a5   : > { %v1282_v1 = vadd.f32 %v3234_v63, %v1281_v9  ;;  %v1361_v9 = vsel %vm3922_vm13, %v3322_v10, 0.0  ;;  %vm3930_vm13 = vmmov %vm3928_vm5 }
 0x2a7   : > { %v1293_v24 = vmax.f32 %v1282_v1, 0.0 }
 0x2a9   : > { %1305 = vst.msk [vmem:[#allocation3 + $0x40] sm:$0xff] %vm1221_vm9, %v1293_v24 }
 0x2b0   : > { %v3378_v44 = vld [vmem:[#allocation3 + $0x40] sm:$0xff] }
 0x2b1   : > { %v3380_v0 = vld [vmem:[#allocation3 + $0x3f] sm:$0xff]  ;;  %2453 = vmatmul.msk.f32.gmra.mxu3 %vm1221_vm9, %v3378_v44  ;;  %2490 = vmatmul.msk.f32.gmra.mxu1 %vm1221_vm9, %v3378_v44 }
 0x2b2   : > { %v3382_v51 = vld [vmem:[#allocation3 + $0x39] sm:$0xff]  ;;  %v1322_v28 = vsel %vm3070_vm2, %v3380_v0, 0.0  ;;  %vm3926_vm2 = vnez %v3858_v42  ;;  %v1354_v3 = vsel %vm2989_vm0, %v3380_v0, 0.0  ;;  %v1372_v29 = vsel %vm2943_vm14, %v3380_v0, 0.0 }
 0x2b3   : > { %v1345_v8 = vsel %vm3925_vm15, %v3382_v51, 0.0  ;;  %2461 = vmatmul.msk.f32.gmra.mxu0 %vm1221_vm9, %v1322_v28  ;;  %v1363_v45 = vsel %vm3924_vm1, %v3382_v51, 0.0  ;;  %v1381_v12 = vsel %vm3923_vm12, %v3382_v51, 0.0  ;;  %v1496_v51 = vpop.f32.mrf.mxu0 }
 0x2b4   : > { %2470 = vmatmul.msk.f32.gmra.mxu2 %vm1221_vm9, %v1345_v8 }
 0x2b6   : > { %v1284_v61 = vpop.f32.mrf.mxu2 }
 0x2b7   : > { %v1285_v17 = vadd.f32 %v3234_v63, %v1284_v61  ;;  %v1349_v63 = vsel %vm2801_vm6, %v3257_v11, 0.0  ;;  %v1352_v11 = vsel %vm3921_vm11, %v3320_v4, 0.0  ;;  %vm3929_vm11 = vcmask 97280  }
 0x2b8   : > { %vm3931_vm12 = vmmov %vm3929_vm11 }
 0x2b9   : > { %v1294_v50 = vmax.f32 %v1285_v17, 0.0  ;;  %2474 = vmatmul.msk.f32.vlgmr.msrb.gmra.mxu3 %vm1221_vm9, %v1348_v26 }
 0x2bb   : > { %2494 = vmatmul.msk.f32.vlgmr.msrb.gmra.mxu0 %vm1221_vm9, %v1358_v27  ;;  %1306 = vst.msk [vmem:[#allocation3 + $0x48] sm:$0xff] %vm1221_vm9, %v1294_v50 }
 0x2c1   : > { %2475 = vmatmul.msk.f32.gmra.mxu3 %vm1221_vm9, %v1349_v63 }
 0x2c2   : > { %v3417_v25 = vld [vmem:[#allocation3 + $0x48] sm:$0xff] }
 0x2c3   : > { %2495 = vmatmul.msk.f32.gmra.mxu0 %vm1221_vm9, %v1359_v16  ;;  %v1338_v30 = vld [vmem:[#allocation3 + $0x41] sm:$0xff]  ;;  %2491 = vmatmul.msk.f32.gmra.mxu1 %vm1221_vm9, %v3417_v25  ;;  %v1357_v57 = vld [vmem:[#allocation3 + $0x49] sm:$0xff] }
 0x2c4   : > { %v1346_v22 = vsel %vm3926_vm2, %v1338_v30, 0.0  ;;  %v1364_v10 = vsel %vm3925_vm15, %v1338_v30, 0.0  ;;  %v1347_v4 = vld [vmem:[#allocation3 + $0x47] sm:$0xff]  ;;  %v1365_v24 = vsel %vm3926_vm2, %v1357_v57, 0.0  ;;  %v1382_v23 = vsel %vm3924_vm1, %v1338_v30, 0.0  ;;  %v1366_v43 = vld [vmem:[#allocation3 + $0x4f] sm:$0xff]  ;;  %vm3932_vm1 = vmmov %vm3929_vm11 }
 0x2c5   : > { %2471 = vmatmul.msk.f32.gmra.mxu2 %vm1221_vm9, %v1346_v22  ;;  %v1355_v1 = vsel %vm3927_vm3, %v1347_v4, 0.0  ;;  %v1383_v5 = vsel %vm3925_vm15, %v1357_v57, 0.0  ;;  %v1373_v46 = vsel %vm2989_vm0, %v1347_v4, 0.0  ;;  %v1374_v0 = vsel %vm3927_vm3, %v1366_v43, 0.0  ;;  %vm3933_vm15 = vmmov %vm3932_vm1 }
 0x2c6   : > { %v1695_v28 = vpop.f32.mrf.mxu1  ;;  %vm3934_vm3 = vmmov %vm3932_vm1 }
 0x2c8   : > { %v1499_v8 = vpop.f32.mrf.mxu0 }
 0x2c9   : > { %2476 = vmatmul.msk.f32.gmra.mxu3 %vm1221_vm9, %v1350_v33 }
 0x2cb   : > { %2496 = vmatmul.msk.f32.gmra.mxu0 %vm1221_vm9, %v1360_v13  ;;  %2524 = vmatmul.msk.f32.vlgmr.msra.gmra.mxu1 %vm1221_vm9, %v1377_v37 }
 0x2cc   : > { %v1434_v54 = vpop.f32.mrf.mxu3 }
 0x2cd   : > { %2504 = vmatmul.msk.f32.vlgmr.msra.gmra.mxu2 %vm1221_vm9, %v1367_v38 }
 0x2d1   : > { %2477 = vmatmul.msk.f32.gmra.mxu3 %vm1221_vm9, %v1351_v53 }
 0x2d3   : > { %2497 = vmatmul.msk.f32.gmra.mxu0 %vm1221_vm9, %v1361_v9  ;;  %2525 = vmatmul.msk.f32.gmra.mxu1 %vm1221_vm9, %v1378_v34 }
 0x2d5   : > { %2505 = vmatmul.msk.f32.gmra.mxu2 %vm1221_vm9, %v1368_v39 }
 0x2d8   : > { %v1698_v17 = vpop.f32.mrf.mxu1 }
 0x2d9   : > { %2478 = vmatmul.msk.f32.gmra.mxu3 %vm1221_vm9, %v1352_v11 }
 0x2da   : > { %v1502_v27 = vpop.f32.mrf.mxu0 }
 0x2db   : > { %2498 = vmatmul.msk.f32.gmra.mxu0 %vm1221_vm9, %v1362_v55  ;;  %2526 = vmatmul.msk.f32.gmra.mxu1 %vm1221_vm9, %v1379_v47 }
 0x2dd   : > { %2506 = vmatmul.msk.f32.gmra.mxu2 %vm1221_vm9, %v1369_v52 }
 0x2de   : > { %v3531_v36 = vpop.f32.mrf.mxu3 }
 0x2df   : > { %v1503_v6 = vadd.f32 %v1502_v27, %v3531_v36 }
 0x2e1   : > { %2479 = vmatmul.msk.f32.gmra.mxu3 %vm1221_vm9, %v1353_v48 }
 0x2e2   : > { %v1701_v50 = vpop.f32.mrf.mxu1 }
 0x2e3   : > { %2499 = vmatmul.msk.f32.gmra.mxu0 %vm1221_vm9, %v1363_v45  ;;  %2527 = vmatmul.msk.f32.gmra.mxu1 %vm1221_vm9, %v1380_v62 }
 0x2e4   : > { %v1505_v63 = vpop.f32.mrf.mxu0 }
 0x2e5   : > { %2507 = vmatmul.msk.f32.gmra.mxu2 %vm1221_vm9, %v1370_v2 }
 0x2e8   : > { %v3535_v18 = vpop.f32.mrf.mxu3 }
 0x2e9   : > { %2480 = vmatmul.msk.f32.gmra.mxu3 %vm1221_vm9, %v1354_v3  ;;  %v1506_v27 = vadd.f32 %v1505_v63, %v3535_v18 }
 0x2eb   : > { %2500 = vmatmul.msk.f32.gmra.mxu0 %vm1221_vm9, %v1364_v10  ;;  %2528 = vmatmul.msk.f32.gmra.mxu1 %vm1221_vm9, %v1381_v12  ;;  %v1497_v10 = vadd.f32 %v1496_v51, %v1431_v60 }
 0x2ed   : > { %2508 = vmatmul.msk.f32.gmra.mxu2 %vm1221_vm9, %v1371_v14 }
 0x2f1   : > { %2481 = vmatmul.msk.f32.gmra.mxu3 %vm1221_vm9, %v1355_v1 }
 0x2f3   : > { %2501 = vmatmul.msk.f32.gmra.mxu0 %vm1221_vm9, %v1365_v24  ;;  %2529 = vmatmul.msk.f32.gmra.mxu1 %vm1221_vm9, %v1382_v23 }
 0x2f5   : > { %2509 = vmatmul.msk.f32.gmra.mxu2 %vm1221_vm9, %v1372_v29  ;;  %v1500_v29 = vadd.f32 %v1499_v8, %v1434_v54 }
 0x2f9   : > { %2514 = vmatmul.msk.f32.vlgmr.msra.gmra.mxu3 %vm1221_vm9, %v3255_v40  ;;  %v1376_v40 = vld [vmem:[#allocation3 + $0x51] sm:$0xff] }
 0x2fb   : > { %2530 = vmatmul.msk.f32.gmra.mxu1 %vm1221_vm9, %v1383_v5 }
 0x2fd   : > { %2510 = vmatmul.msk.f32.gmra.mxu2 %vm1221_vm9, %v1373_v46 }
 0x301   : > { %2515 = vmatmul.msk.f32.gmra.mxu3 %vm1221_vm9, %v3274_v7  ;;  %v1384_v7 = vsel %vm3926_vm2, %v1376_v40, 0.0 }
 0x303   : > { %2531 = vmatmul.msk.f32.gmra.mxu1 %vm1221_vm9, %v1384_v7 }
 0x305   : > { %2511 = vmatmul.msk.f32.gmra.mxu2 %vm1221_vm9, %v1374_v0 }
 0x306   : > { %v3555_v30 = vpop.f32.mrf.mxu1 }
 0x308   : > { %v3557_v22 = vpop.f32.mrf.mxu0 }
 0x309   : > { %2516 = vmatmul.msk.f32.gmra.mxu3 %vm1221_vm9, %v3298_v58 }
 0x30c   : > { %v3542_v19 = vpop.f32.mrf.mxu3 }
 0x310   : > { %v3561_v13 = vpop.f32.mrf.mxu1 }
 0x311   : > { %2517 = vmatmul.msk.f32.gmra.mxu3 %vm1221_vm9, %v3318_v15  ;;  %v1564_v15 = vpop.f32.mrf.mxu2 }
 0x312   : > { %v3563_v38 = vpop.f32.mrf.mxu0  ;;  %v1588_v14 = vadd.f32 %v1564_v15, %v1497_v10 }
 0x316   : > { %v3546_v58 = vpop.f32.mrf.mxu3 }
 0x319   : > { %2518 = vmatmul.msk.f32.gmra.mxu3 %vm1221_vm9, %v3343_v21  ;;  %v1567_v61 = vpop.f32.mrf.mxu2  ;;  %v1375_v21 = vld [vmem:[#allocation3 + $0x50] sm:$0xff] }
 0x31a   : > { %v3567_v34 = vpop.f32.mrf.mxu1  ;;  %v1589_v46 = vadd.f32 %v1567_v61, %v1500_v29 }
 0x31c   : > { %v3569_v39 = vpop.f32.mrf.mxu0 }
 0x320   : > { %v3550_v42 = vpop.f32.mrf.mxu3 }
 0x321   : > { %2519 = vmatmul.msk.f32.gmra.mxu3 %vm1221_vm9, %v3378_v44  ;;  %v1570_v44 = vpop.f32.mrf.mxu2 }
 0x322   : > { %v1590_v10 = vadd.f32 %v1570_v44, %v1503_v6 }
 0x329   : > { %2520 = vmatmul.msk.f32.gmra.mxu3 %vm1221_vm9, %v3417_v25  ;;  %v1573_v16 = vpop.f32.mrf.mxu2 }
 0x32a   : > { %v1591_v29 = vadd.f32 %v1573_v16, %v1506_v27 }
 0x32e   : > { %v3575_v47 = vpop.f32.mrf.mxu1 }
 0x330   : > { %v3577_v52 = vpop.f32.mrf.mxu0 }
 0x331   : > { %2521 = vmatmul.msk.f32.gmra.mxu3 %vm1221_vm9, %v1375_v21  ;;  %v3559_v33 = vpop.f32.mrf.mxu2 }
 0x334   : > { %v3553_v26 = vpop.f32.mrf.mxu3 }
 0x338   : > { %v1771_v2 = vpop.f32.mrf.mxu0 }
 0x339   : > { %v3565_v53 = vpop.f32.mrf.mxu2 }
 0x33c   : > { %v1640_v32 = vpop.f32.mrf.mxu3 }
 0x33d   : > { %v1664_v57 = vadd.f32 %v1640_v32, %v1588_v14  ;;  %v3593_v32 = vld [vmem:[%s3789_s9] ss:$0 sm:$0xff] }
 0x33f   : > { %v1719_v5 = vadd.f32 %v1695_v28, %v1664_v57 }
 0x340   : > { %v3583_v62 = vpop.f32.mrf.mxu1  ;;  %v1774_v1 = vpop.f32.mrf.mxu0 }
 0x341   : > { %v3571_v11 = vpop.f32.mrf.mxu2  ;;  %v1795_v0 = vadd.f32 %v1771_v2, %v1719_v5 }
 0x344   : > { %v1643_v25 = vpop.f32.mrf.mxu3 }
 0x345   : > { %v1665_v43 = vadd.f32 %v1643_v25, %v1589_v46 }
 0x347   : > { %v1720_v60 = vadd.f32 %v1698_v17, %v1665_v43 }
 0x348   : > { %v1978_v4 = vpop.f32.mrf.mxu1  ;;  %v1777_v51 = vpop.f32.mrf.mxu0 }
 0x349   : > { %v3579_v48 = vpop.f32.mrf.mxu2  ;;  %v1796_v8 = vadd.f32 %v1774_v1, %v1720_v60 }
 0x34c   : > { %v1646_v37 = vpop.f32.mrf.mxu3 }
 0x34d   : > { %v1666_v28 = vadd.f32 %v1646_v37, %v1590_v10 }
 0x350   : > { %v1981_v40 = vpop.f32.mrf.mxu1  ;;  %v1780_v6 = vpop.f32.mrf.mxu0 }
 0x351   : > { %v1847_v3 = vpop.f32.mrf.mxu2 }
 0x352   : > { %v1871_v7 = vadd.f32 %v1847_v3, %v1795_v0  ;;  %v1721_v3 = vadd.f32 %v1701_v50, %v1666_v28  ;;  %v1509_v50 = vadd.f32 %v3557_v22, %v3542_v19 }
 0x354   : > { %v1649_v9 = vpop.f32.mrf.mxu3  ;;  %v1797_v5 = vadd.f32 %v1777_v51, %v1721_v3 }
 0x355   : > { %v1667_v1 = vadd.f32 %v1649_v9, %v1591_v29 }
 0x357   : > { %v1722_v63 = vadd.f32 %v3555_v30, %v1667_v1 }
 0x358   : > { %v1984_v36 = vpop.f32.mrf.mxu1  ;;  %v1783_v51 = vpop.f32.mrf.mxu0 }
 0x359   : > { %v1850_v24 = vpop.f32.mrf.mxu2  ;;  %v1798_v10 = vadd.f32 %v1780_v6, %v1722_v63 }
 0x35a   : > { %v1872_v25 = vadd.f32 %v1850_v24, %v1796_v8 }
 0x35c   : > { %v3573_v55 = vpop.f32.mrf.mxu3 }
 0x360   : > { %v1987_v9 = vpop.f32.mrf.mxu1 }
 0x361   : > { %v1853_v59 = vpop.f32.mrf.mxu2 }
 0x362   : > { %v1873_v43 = vadd.f32 %v1853_v59, %v1797_v5  ;;  %v1515_v5 = vadd.f32 %v3569_v39, %v3550_v42 }
 0x364   : > { %v3581_v45 = vpop.f32.mrf.mxu3  ;;  %v1594_v63 = vadd.f32 %v3571_v11, %v1515_v5 }
 0x369   : > { %v1856_v44 = vpop.f32.mrf.mxu2 }
 0x36a   : > { %v1874_v22 = vadd.f32 %v1856_v44, %v1798_v10 }
 0x36c   : > { %v3585_v12 = vpop.f32.mrf.mxu3 }
 0x36d   : > { %v1670_v42 = vadd.f32 %v3585_v12, %v1594_v63  ;;  %v1518_v12 = vadd.f32 %v3577_v52, %v3553_v26 }
 0x374   : > { %v3587_v23 = vpop.f32.mrf.mxu3 }
 0x37c   : > { %v1902_v21 = vpop.f32.mrf.mxu3 }
 0x37d   : > { %v1926_v15 = vadd.f32 %v1902_v21, %v1871_v7  ;;  %v1592_v7 = vadd.f32 %v3559_v33, %v1509_v50  ;;  %v1512_v33 = vadd.f32 %v3563_v38, %v3546_v58 }
 0x37f   : > { %v2002_v54 = vadd.f32 %v1978_v4, %v1926_v15  ;;  %v1668_v15 = vadd.f32 %v3573_v55, %v1592_v7 }
 0x381   : > { %v2014_v61 = vadd.f32 %v3593_v32, %v2002_v54  ;;  %v1859_v54 = vpop.f32.mrf.mxu2 }
 0x383   : > { %2150 = vrot.lane.b32.xlu1 %v2014_v61, %s2623_s22  ;;  %v3597_v2 = vadd.f32 2.0, %v2014_v61 }
 0x384   : > { %v1905_v17 = vpop.f32.mrf.mxu3 }
 0x385   : > { %v2030_v14 = vand.u32 2147483647, %v3597_v2  ;;  %v1927_v57 = vadd.f32 %v1905_v17, %v1872_v25  ;;  %v1723_v25 = vadd.f32 %v3561_v13, %v1668_v15  ;;  %v1593_v17 = vadd.f32 %v3565_v53, %v1512_v33 }
 0x386   : > { %vm2110_vm2 = vcmp.ge.f32.partialorder %v3597_v2, 0.0 }
 0x387   : > { %v2038_v37 = vsub.f32 0.0, %v2030_v14  ;;  %v2003_v4 = vadd.f32 %v1981_v40, %v1927_v57  ;;  %v1669_v14 = vadd.f32 %v3581_v45, %v1593_v17  ;;  %v1990_v57 = vpop.f32.mrf.mxu1  ;;  %v1799_v6 = vadd.f32 %v1783_v51, %v1723_v25 }
 0x388   : > { %v1595_v17 = vadd.f32 %v3579_v48, %v1518_v12 }
 0x389   : > { %v2046_v24 = vmul.f32 1.442695, %v2038_v37  ;;  %v2015_v46 = vadd.f32 %v3593_v32, %v2003_v4  ;;  %v1786_v37 = vpop.f32.mrf.mxu0  ;;  %v1875_v4 = vadd.f32 %v1859_v54, %v1799_v6  ;;  %v1862_v1 = vpop.f32.mrf.mxu2 }
 0x38b   : > { %2566 = vpow2.f32 %v2046_v24  ;;  %2152 = vrot.lane.b32.xlu2 %v2015_v46, %s2623_s22  ;;  %v3603_v0 = vadd.f32 2.0, %v2015_v46  ;;  %v1724_v24 = vadd.f32 %v3567_v34, %v1669_v14 }
 0x38c   : > { %v1908_v18 = vpop.f32.mrf.mxu3 }
 0x38d   : > { %v2031_v16 = vand.u32 2147483647, %v3603_v0  ;;  %v1928_v40 = vadd.f32 %v1908_v18, %v1873_v43  ;;  %v1800_v39 = vadd.f32 %v1786_v37, %v1724_v24  ;;  %v2063_v54 = vmin.f32 %v3603_v0, 0.0 }
 0x38e   : > { %vm2111_vm10 = vcmp.ge.f32.partialorder %v3603_v0, 0.0 }
 0x38f   : > { %v2039_v21 = vsub.f32 0.0, %v2031_v16  ;;  %v2004_v60 = vadd.f32 %v1984_v36, %v1928_v40  ;;  %v1993_v15 = vpop.f32.mrf.mxu1  ;;  %v1876_v10 = vadd.f32 %v1862_v1, %v1800_v39 }
 0x391   : > { %v2567_v59 = vpop.eup %2566  ;;  %v2048_v28 = vmul.f32 1.442695, %v2039_v21  ;;  %v2016_v8 = vadd.f32 %v3593_v32, %v2004_v60  ;;  %v2062_v21 = vmin.f32 %v3597_v2, 0.0  ;;  %v1725_v2 = vadd.f32 %v3575_v47, %v1670_v42  ;;  %v1789_v33 = vpop.f32.mrf.mxu0 }
 0x392   : > { %v2070_v19 = vadd.f32 1.0, %v2567_v59  ;;  %v1671_v47 = vadd.f32 %v3587_v23, %v1595_v17 }
 0x393   : > { %2568 = vpow2.f32 %v2048_v28  ;;  %2154 = vrot.lane.b32.xlu0 %v2016_v8, %s2623_s22  ;;  %v3613_v30 = vadd.f32 2.0, %v2016_v8  ;;  %v1801_v52 = vadd.f32 %v1789_v33, %v1725_v2 }
 0x394   : > { %v1911_v61 = vpop.f32.mrf.mxu3  ;;  %2570 = vrcp.f32 %v2070_v19  ;;  %v1726_v23 = vadd.f32 %v3583_v62, %v1671_v47 }
 0x395   : > { %v2032_v55 = vand.u32 2147483647, %v3613_v30  ;;  %v1929_v36 = vadd.f32 %v1911_v61, %v1874_v22  ;;  %2572 = vlog2.f32 %v2070_v19  ;;  %v1865_v61 = vpop.f32.mrf.mxu2  ;;  %v2064_v48 = vmin.f32 %v3613_v30, 0.0 }
 0x396   : > { %v1877_v37 = vadd.f32 %v1865_v61, %v1801_v52  ;;  %vm2112_vm6 = vcmp.ge.f32.partialorder %v3613_v30, 0.0 }
 0x397   : > { %v2040_v27 = vsub.f32 0.0, %v2032_v55  ;;  %v2005_v3 = vadd.f32 %v1987_v9, %v1929_v36  ;;  %v1996_v24 = vpop.f32.mrf.mxu1 }
 0x399   : > { %v3621_v29 = vpop.eup %2568  ;;  %v2050_v44 = vmul.f32 1.442695, %v2040_v27  ;;  %v2017_v58 = vadd.f32 %v3593_v32, %v2005_v3 }
 0x39a   : > { %v3625_v13 = vadd.f32 1.0, %v3621_v29  ;;  %v2571_v38 = vpop.eup %2570 }
 0x39b   : > { %2574 = vpow2.f32 %v2050_v44  ;;  %2156 = vrot.lane.b32.xlu1 %v2017_v58, %s2623_s22  ;;  %v3628_v53 = vadd.f32 2.0, %v2017_v58  ;;  %v2573_v45 = vpop.eup %2572  ;;  %v2118_v43 = vmul.f32 %v2571_v38, %v2567_v59 }
 0x39c   : > { %2576 = vlog2.f32 %v3625_v13  ;;  %v1914_v46 = vpop.f32.mrf.mxu3  ;;  %v2079_v40 = vmul.f32 0.6931472, %v2573_v45 }
 0x39d   : > { %v2033_v18 = vand.u32 2147483647, %v3628_v53  ;;  %v1930_v50 = vadd.f32 %v1914_v46, %v1875_v4  ;;  %v3637_v16 = vsel %vm2110_vm2, %v2571_v38, %v2118_v43  ;;  %vm2113_vm8 = vcmp.ge.f32.partialorder %v3628_v53, 0.0  ;;  %vm3935_vm2 = vmmov %vm3932_vm1 }
 0x39e   : > { %v2094_v28 = vsub.f32 %v2062_v21, %v2079_v40  ;;  %v1792_v40 = vpop.f32.mrf.mxu0 }
 0x39f   : > { %v2041_v9 = vsub.f32 0.0, %v2033_v18  ;;  %v2006_v7 = vadd.f32 %v1990_v57, %v1930_v50  ;;  %v1802_v21 = vadd.f32 %v1792_v40, %v1726_v23  ;;  %v1999_v2 = vpop.f32.mrf.mxu1 }
 0x3a0   : > { %v2199_v27 = vsel %vm2198_vm4, %v2094_v28, 0.0 }
 0x3a1   : > { %v2575_v34 = vpop.eup %2574  ;;  %v2052_v60 = vmul.f32 1.442695, %v2041_v9  ;;  %v2018_v59 = vadd.f32 %v3593_v32, %v2006_v7  ;;  %v1868_v9 = vpop.f32.mrf.mxu2 }
 0x3a2   : > { %v2577_v51 = vpop.eup %2576  ;;  %v2072_v11 = vadd.f32 1.0, %v2575_v34 }
 0x3a3   : > { %v2081_v8 = vmul.f32 0.6931472, %v2577_v51  ;;  %2578 = vpow2.f32 %v2052_v60  ;;  %2158 = vrot.lane.b32.xlu2 %v2018_v59, %s2623_s22  ;;  %v3644_v19 = vadd.f32 2.0, %v2018_v59 }
 0x3a4   : > { %2580 = vlog2.f32 %v2072_v11  ;;  %v1917_v22 = vpop.f32.mrf.mxu3 }
 0x3a5   : > { %v2095_v25 = vsub.f32 %v2063_v54, %v2081_v8  ;;  %v2034_v55 = vand.u32 2147483647, %v3644_v19  ;;  %v1931_v36 = vadd.f32 %v1917_v22, %v1876_v10  ;;  %2582 = vrcp.f32 %v2072_v11 }
 0x3a6   : > { %v1878_v54 = vadd.f32 %v1868_v9, %v1802_v21  ;;  %v2065_v11 = vmin.f32 %v3628_v53, 0.0  ;;  %vm2114_vm14 = vcmp.ge.f32.partialorder %v3644_v19, 0.0 }
 0x3a7   : > { %v2200_v3 = vsel %vm2198_vm4, %v2095_v25, 0.0  ;;  %v2042_v14 = vsub.f32 0.0, %v2034_v55  ;;  %v2007_v26 = vadd.f32 %v1993_v15, %v1931_v36 }
 0x3a8   : > { %v2201_v57 = vadd.f32 %v2200_v3, %v2199_v27 }
 0x3a9   : > { %v2579_v6 = vpop.eup %2578  ;;  %v2054_v44 = vmul.f32 1.442695, %v2042_v14  ;;  %v2019_v58 = vadd.f32 %v3593_v32, %v2007_v26 }
 0x3aa   : > { %v2581_v38 = vpop.eup %2580  ;;  %v2073_v4 = vadd.f32 1.0, %v2579_v6 }
 0x3ab   : > { %v2083_v1 = vmul.f32 0.6931472, %v2581_v38  ;;  %2584 = vpow2.f32 %v2054_v44  ;;  %2160 = vrot.lane.b32.xlu0 %v2019_v58, %s2623_s22  ;;  %v3657_v45 = vadd.f32 2.0, %v2019_v58  ;;  %v2583_v5 = vpop.eup %2582  ;;  %v2066_v44 = vmin.f32 %v3644_v19, 0.0 }
 0x3ac   : > { %2586 = vlog2.f32 %v2073_v4  ;;  %v1920_v46 = vpop.f32.mrf.mxu3  ;;  %v2120_v63 = vmul.f32 %v2583_v5, %v2575_v34 }
 0x3ad   : > { %v2096_v43 = vsub.f32 %v2064_v48, %v2083_v1  ;;  %v2035_v18 = vand.u32 2147483647, %v3657_v45  ;;  %v1932_v50 = vadd.f32 %v1920_v46, %v1877_v37  ;;  %2588 = vrcp.f32 %v2073_v4 }
 0x3ae   : > { %v3663_v62 = vsel %vm2112_vm6, %v2583_v5, %v2120_v63  ;;  %vm2115_vm0 = vcmp.ge.f32.partialorder %v3657_v45, 0.0  ;;  %vm3937_vm6 = vmmov %vm3932_vm1 }
 0x3af   : > { %v2202_v7 = vsel %vm2198_vm4, %v2096_v43, 0.0  ;;  %v2043_v42 = vsub.f32 0.0, %v2035_v18  ;;  %v2008_v39 = vadd.f32 %v1996_v24, %v1932_v50  ;;  %v2067_v18 = vmin.f32 %v3657_v45, 0.0 }
 0x3b0   : > { %v2203_v60 = vadd.f32 %v2202_v7, %v2201_v57 }
 0x3b1   : > { %v2585_v59 = vpop.eup %2584  ;;  %v2056_v51 = vmul.f32 1.442695, %v2043_v42  ;;  %v2020_v15 = vadd.f32 %v3593_v32, %v2008_v39 }
 0x3b2   : > { %v2587_v10 = vpop.eup %2586  ;;  %v2074_v34 = vadd.f32 1.0, %v2585_v59 }
 0x3b3   : > { %v2085_v28 = vmul.f32 0.6931472, %v2587_v10  ;;  %2590 = vpow2.f32 %v2056_v51  ;;  %2162 = vrot.lane.b32.xlu1 %v2020_v15, %s2623_s22  ;;  %v3668_v8 = vadd.f32 2.0, %v2020_v15  ;;  %v2589_v30 = vpop.eup %2588 }
 0x3b4   : > { %2592 = vlog2.f32 %v2074_v34  ;;  %v1923_v12 = vpop.f32.mrf.mxu3  ;;  %v2121_v25 = vmul.f32 %v2589_v30, %v2579_v6 }
 0x3b5   : > { %v2097_v22 = vsub.f32 %v2065_v11, %v2085_v28  ;;  %v2036_v33 = vand.u32 2147483647, %v3668_v8  ;;  %v1933_v61 = vadd.f32 %v1923_v12, %v1878_v54  ;;  %2594 = vrcp.f32 %v2074_v34 }
 0x3b6   : > { %v3673_v3 = vsel %vm2113_vm8, %v2589_v30, %v2121_v25  ;;  %v2068_v51 = vmin.f32 %v3668_v8, 0.0  ;;  %vm2116_vm9 = vcmp.ge.f32.partialorder %v3668_v8, 0.0 }
 0x3b7   : > { %v2204_v55 = vsel %vm2198_vm4, %v2097_v22, 0.0  ;;  %v2044_v36 = vsub.f32 0.0, %v2036_v33  ;;  %v2009_v17 = vadd.f32 %v1999_v2, %v1933_v61 }
 0x3b8   : > { %v2205_v27 = vadd.f32 %v2204_v55, %v2203_v60 }
 0x3b9   : > { %v2591_v14 = vpop.eup %2590  ;;  %v2058_v26 = vmul.f32 1.442695, %v2044_v36  ;;  %v2021_v47 = vadd.f32 %v3593_v32, %v2009_v17 }
 0x3ba   : > { %v2593_v52 = vpop.eup %2592  ;;  %v2075_v57 = vadd.f32 1.0, %v2591_v14 }
 0x3bb   : > { %v2087_v58 = vmul.f32 0.6931472, %v2593_v52  ;;  %2596 = vpow2.f32 %v2058_v26  ;;  %v2029_v6 = vadd.f32 2.0, %v2021_v47  ;;  %2164 = vrot.lane.b32.xlu2 %v2021_v47, %s2623_s22  ;;  %v2595_v38 = vpop.eup %2594 }
 0x3bc   : > { %2598 = vlog2.f32 %v2075_v57  ;;  %v2122_v4 = vmul.f32 %v2595_v38, %v2585_v59 }
 0x3bd   : > { %v2098_v37 = vsub.f32 %v2066_v44, %v2087_v58  ;;  %v2037_v53 = vand.u32 2147483647, %v2029_v6  ;;  %2600 = vrcp.f32 %v2075_v57  ;;  %v2069_v12 = vmin.f32 %v2029_v6, 0.0 }
 0x3be   : > { %v3680_v1 = vsel %vm2114_vm14, %v2595_v38, %v2122_v4  ;;  %vm2117_vm7 = vcmp.ge.f32.partialorder %v2029_v6, 0.0  ;;  %vm3939_vm14 = vmmov %vm3932_vm1 }
 0x3bf   : > { %v2206_v48 = vsel %vm2198_vm4, %v2098_v37, 0.0  ;;  %v2045_v32 = vsub.f32 0.0, %v2037_v53 }
 0x3c0   : > { %v2207_v5 = vadd.f32 %v2206_v48, %v2205_v27 }
 0x3c1   : > { %v2597_v23 = vpop.eup %2596  ;;  %v2060_v24 = vmul.f32 1.442695, %v2045_v32 }
 0x3c2   : > { %v2599_v46 = vpop.eup %2598  ;;  %v2076_v43 = vadd.f32 1.0, %v2597_v23 }
 0x3c3   : > { %v2089_v50 = vmul.f32 0.6931472, %v2599_v46  ;;  %2602 = vpow2.f32 %v2060_v24  ;;  %v2601_v63 = vpop.eup %2600  ;;  %v2138_v24 = vmul.f32 %v3680_v1, %v2811_v56 }
 0x3c4   : > { %2604 = vlog2.f32 %v2076_v43  ;;  %v2123_v9 = vmul.f32 %v2601_v63, %v2591_v14 }
 0x3c5   : > { %v2099_v40 = vsub.f32 %v2067_v18, %v2089_v50  ;;  %2606 = vrcp.f32 %v2076_v43  ;;  %v2136_v18 = vmul.f32 %v3663_v62, %v2773_v41 }
 0x3c6   : > { %v3685_v7 = vsel %vm2115_vm0, %v2601_v63, %v2123_v9  ;;  %vm3940_vm0 = vmmov %vm3932_vm1 }
 0x3c7   : > { %v2208_v19 = vsel %vm2198_vm4, %v2099_v40, 0.0 }
 0x3c8   : > { %v2209_v42 = vadd.f32 %v2208_v19, %v2207_v5 }
 0x3c9   : > { %v2603_v39 = vpop.eup %2602 }
 0x3ca   : > { %v2605_v21 = vpop.eup %2604  ;;  %v2077_v60 = vadd.f32 1.0, %v2603_v39 }
 0x3cb   : > { %v2607_v59 = vpop.eup %2606  ;;  %v2091_v15 = vmul.f32 0.6931472, %v2605_v21 }
 0x3cc   : > { %2608 = vlog2.f32 %v2077_v60  ;;  %v2124_v10 = vmul.f32 %v2607_v59, %v2597_v23 }
 0x3cd   : > { %v2100_v54 = vsub.f32 %v2068_v51, %v2091_v15  ;;  %2610 = vrcp.f32 %v2077_v60 }
 0x3ce   : > { %v3689_v34 = vsel %vm2116_vm9, %v2607_v59, %v2124_v10  ;;  %2612 = vrcp.f32 %v3625_v13  ;;  %vm3941_vm9 = vmmov %vm3940_vm0 }
 0x3cf   : > { %v2210_v45 = vsel %vm2198_vm4, %v2100_v54, 0.0 }
 0x3d0   : > { %v2211_v11 = vadd.f32 %v2210_v45, %v2209_v42 }
 0x3d2   : > { %v2609_v28 = vpop.eup %2608 }
 0x3d3   : > { %v2611_v30 = vpop.eup %2610  ;;  %v2093_v2 = vmul.f32 0.6931472, %v2609_v28 }
 0x3d4   : > { %v2125_v22 = vmul.f32 %v2611_v30, %v2603_v39  ;;  %v2613_v8 = vpop.eup %2612  ;;  %v2137_v39 = vmul.f32 %v3673_v3, %v2790_v49 }
 0x3d5   : > { %v2101_v33 = vsub.f32 %v2069_v12, %v2093_v2  ;;  %v2119_v27 = vmul.f32 %v2613_v8, %v3621_v29  ;;  %v2134_v29 = vmul.f32 %v3637_v16, %v2747_v31 }
 0x3d6   : > { %v2133_v61 = vsel %vm2117_vm7, %v2611_v30, %v2125_v22  ;;  %v3950_v22 = vld [vmem:[#allocation4_spill] sm:$0xff] }
 0x3d7   : > { %v2212_v25 = vsel %vm2198_vm4, %v2101_v33, 0.0  ;;  %v2127_v47 = vsel %vm2111_vm10, %v2613_v8, %v2119_v27  ;;  %vm3936_vm4 = vmmov %vm3928_vm5  ;;  %v2141_v3 = vmul.f32 %v2133_v61, %v2891_v20  ;;  %v2139_v33 = vmul.f32 %v3685_v7, %v3950_v22 }
 0x3d8   : > { %v2213_v55 = vadd.f32 %v2212_v25, %v2211_v11  ;;  %v2135_v13 = vmul.f32 %v2127_v47, %v2758_v35  ;;  %vm3938_vm8 = vmmov %vm3936_vm4 }
 0x3d9   : > { %vm3942_vm7 = vmmov %vm3936_vm4 }
 0x3da   : > { %v2214_v36 = vrot.slane %v2213_v55, 4  ;;  %vm3943_vm10 = vmmov %vm3940_vm0 }
 0x3dc   : > { %v2215_v17 = vadd.f32 %v2214_v36, %v2213_v55 }
 0x3de   : > { %v2216_v14 = vrot.slane %v2215_v17, 2 }
 0x3e0   : > { %v2217_v26 = vadd.f32 %v2216_v14, %v2215_v17  ;;  %v3955_v14 = vld [vmem:[#allocation5_spill] sm:$0xff] }
 0x3e2   : > { %v2218_v52 = vrot.slane %v2217_v26, 1 }
 0x3e4   : > { %v2219_v57 = vadd.f32 %v2218_v52, %v2217_v26  ;;  %v2140_v26 = vmul.f32 %v3689_v34, %v3955_v14 }
 0x3e5   : > { %v2153_v44 = vpop.permute.xlu2 %2152 }
 0x3e6   : > { %v2175_v58 = vadd.f32 %v2153_v44, %v2135_v13  ;;  %2221 = vrot.lane.b32.xlu0 %v2219_v57, %s2631_s20 }
 0x3e8   : > { %v2183_v0 = vsel %vm3928_vm5, %v2758_v35, %v2175_v58  ;;  %vm3944_vm5 = vmmov %vm3940_vm0 }
 0x3e9   : > { %2191 = vst.msk [vmem:[%s3702_s19 + $0x8] sm:$0xff] %vm3929_vm11, %v2183_v0  ;;  %v2250_v37 = vmul.f32 %v2183_v0, %v2183_v0  ;;  %v2227_v4 = vsel %vm3931_vm12, %v2183_v0, 0.0  ;;  %vm3945_vm11 = vmmov %vm3940_vm0 }
 0x3ea   : > { %vm3947_vm12 = vmmov %vm3940_vm0 }
 0x3eb   : > { %v2258_v5 = vsel %vm3934_vm3, %v2250_v37, 0.0 }
 0x3f5   : > { %v2151_v6 = vpop.permute.xlu1 %2150 }
 0x3f6   : > { %v2174_v38 = vadd.f32 %v2151_v6, %v2134_v29 }
 0x3f8   : > { %v2182_v53 = vsel %vm3930_vm13, %v2747_v31, %v2174_v38  ;;  %vm3946_vm13 = vmmov %vm3940_vm0 }
 0x3f9   : > { %2190 = vst.msk [vmem:[%s3702_s19] sm:$0xff] %vm3932_vm1, %v2182_v53  ;;  %v2226_v48 = vsel %vm3933_vm15, %v2182_v53, 0.0  ;;  %v2249_v35 = vmul.f32 %v2182_v53, %v2182_v53  ;;  %vm3948_vm1 = vmmov %vm3936_vm4 }
 0x3fa   : > { %v2228_v32 = vadd.f32 %v2227_v4, %v2226_v48  ;;  %vm3949_vm15 = vmmov %vm3940_vm0 }
 0x3fb   : > { %v2257_v16 = vsel %vm3935_vm2, %v2249_v35, 0.0  ;;  %vm3951_vm3 = vmmov %vm3948_vm1 }
 0x3fc   : > { %v2259_v23 = vadd.f32 %v2258_v5, %v2257_v16  ;;  %vm3952_vm2 = vmmov %vm3940_vm0 }
 0x3fd   : > { %v2159_v46 = vpop.permute.xlu2 %2158 }
 0x3fe   : > { %v2178_v43 = vadd.f32 %v2159_v46, %v2138_v24 }
 0x400   : > { %v2186_v31 = vsel %vm3936_vm4, %v2811_v56, %v2178_v43  ;;  %vm3953_vm4 = vmmov %vm3940_vm0 }
 0x401   : > { %2194 = vst.msk [vmem:[%s3702_s19 + $0x20] sm:$0xff] %vm3937_vm6, %v2186_v31  ;;  %v2253_v59 = vmul.f32 %v2186_v31, %v2186_v31  ;;  %v2233_v10 = vsel %vm3945_vm11, %v2186_v31, 0.0  ;;  %vm3954_vm6 = vmmov %vm3940_vm0  ;;  %vm2224_vm11 = vcmask 40960  }
 0x403   : > { %v2264_v28 = vsel %vm3947_vm12, %v2253_v59, 0.0 }
 0x405   : > { %v2155_v50 = vpop.permute.xlu0 %2154 }
 0x406   : > { %v2176_v63 = vadd.f32 %v2155_v50, %v2136_v18 }
 0x408   : > { %v2184_v40 = vsel %vm3938_vm8, %v2773_v41, %v2176_v63  ;;  %vm3956_vm8 = vmmov %vm3948_vm1 }
 0x409   : > { %2192 = vst.msk [vmem:[%s3702_s19 + $0x10] sm:$0xff] %vm3939_vm14, %v2184_v40  ;;  %v2229_v1 = vsel %vm3940_vm0, %v2184_v40, 0.0  ;;  %v2251_v9 = vmul.f32 %v2184_v40, %v2184_v40  ;;  %vm3957_vm14 = vmmov %vm3940_vm0 }
 0x40a   : > { %v2230_v19 = vadd.f32 %v2229_v1, %v2228_v32 }
 0x40b   : > { %v2260_v42 = vsel %vm3941_vm9, %v2251_v9, 0.0  ;;  %vm3958_vm9 = vmmov %vm3940_vm0 }
 0x40c   : > { %v2261_v56 = vadd.f32 %v2260_v42, %v2259_v23 }
 0x40d   : > { %v2157_v21 = vpop.permute.xlu1 %2156 }
 0x40e   : > { %v2177_v60 = vadd.f32 %v2157_v21, %v2137_v39 }
 0x410   : > { %v2185_v62 = vsel %vm3942_vm7, %v2790_v49, %v2177_v60  ;;  %vm3959_vm7 = vmmov %vm3940_vm0 }
 0x411   : > { %2193 = vst.msk [vmem:[%s3702_s19 + $0x18] sm:$0xff] %vm3943_vm10, %v2185_v62  ;;  %v2231_v41 = vsel %vm3944_vm5, %v2185_v62, 0.0  ;;  %v2252_v51 = vmul.f32 %v2185_v62, %v2185_v62  ;;  %vm3960_vm10 = vmmov %vm3940_vm0  ;;  %vm2247_vm5 = vcmask 90112  }
 0x412   : > { %v2232_v15 = vadd.f32 %v2231_v41, %v2230_v19 }
 0x413   : > { %v2262_v54 = vsel %vm3946_vm13, %v2252_v51, 0.0 }
 0x414   : > { %v2263_v45 = vadd.f32 %v2262_v54, %v2261_v56  ;;  %v2234_v11 = vadd.f32 %v2233_v10, %v2232_v15 }
 0x415   : > { %v2165_v49 = vpop.permute.xlu2 %2164 }
 0x416   : > { %v2181_v30 = vadd.f32 %v2165_v49, %v2141_v3  ;;  %v2265_v12 = vadd.f32 %v2264_v28, %v2263_v45 }
 0x418   : > { %v2189_v2 = vsel %vm3948_vm1, %v2891_v20, %v2181_v30 }
 0x419   : > { %2197 = vst.msk [vmem:[%s3702_s19 + $0x38] sm:$0xff] %vm3949_vm15, %v2189_v2  ;;  %v2256_v13 = vmul.f32 %v2189_v2, %v2189_v2  ;;  %v2239_v0 = vsel %vm3958_vm9, %v2189_v2, 0.0 }
 0x41b   : > { %v2270_v34 = vsel %vm3960_vm10, %v2256_v13, 0.0 }
 0x41d   : > { %v2161_v25 = vpop.permute.xlu0 %2160 }
 0x41e   : > { %v2179_v55 = vadd.f32 %v2161_v25, %v2139_v33 }
 0x420   : > { %v2187_v61 = vsel %vm3951_vm3, %v3950_v22, %v2179_v55 }
 0x421   : > { %2195 = vst.msk [vmem:[%s3702_s19 + $0x28] sm:$0xff] %vm3952_vm2, %v2187_v61  ;;  %v2235_v8 = vsel %vm3953_vm4, %v2187_v61, 0.0  ;;  %v2254_v36 = vmul.f32 %v2187_v61, %v2187_v61 }
 0x422   : > { %v2236_v17 = vadd.f32 %v2235_v8, %v2234_v11 }
 0x423   : > { %v2266_v27 = vsel %vm3954_vm6, %v2254_v36, 0.0 }
 0x424   : > { %v2267_v20 = vadd.f32 %v2266_v27, %v2265_v12 }
 0x425   : > { %v2163_v47 = vpop.permute.xlu1 %2162 }
 0x426   : > { %v2180_v52 = vadd.f32 %v2163_v47, %v2140_v26 }
 0x428   : > { %v2188_v7 = vsel %vm3956_vm8, %v3955_v14, %v2180_v52 }
 0x429   : > { %2196 = vst.msk [vmem:[%s3702_s19 + $0x30] sm:$0xff] %vm3957_vm14, %v2188_v7  ;;  %v2237_v57 = vsel %vm3940_vm0, %v2188_v7, 0.0  ;;  %v2255_v44 = vmul.f32 %v2188_v7, %v2188_v7 }
 0x42a   : > { %v2238_v58 = vadd.f32 %v2237_v57, %v2236_v17 }
 0x42b   : > { %v2268_v29 = vsel %vm3959_vm7, %v2255_v44, 0.0 }
 0x42c   : > { %v2240_v6 = vadd.f32 %v2239_v0, %v2238_v58  ;;  %v2269_v38 = vadd.f32 %v2268_v29, %v2267_v20 }
 0x42e   : > { %v2241_v37 = vrot.slane %v2240_v6, 4  ;;  %v2271_v53 = vadd.f32 %v2270_v34, %v2269_v38 }
 0x430   : > { %v2242_v4 = vadd.f32 %v2241_v37, %v2240_v6  ;;  %v2272_v48 = vrot.slane %v2271_v53, 4 }
 0x432   : > { %v2243_v35 = vrot.slane %v2242_v4, 2  ;;  %v2273_v32 = vadd.f32 %v2272_v48, %v2271_v53 }
 0x434   : > { %v2244_v5 = vadd.f32 %v2243_v35, %v2242_v4  ;;  %v2274_v16 = vrot.slane %v2273_v32, 2 }
 0x436   : > { %v2245_v23 = vrot.slane %v2244_v5, 1  ;;  %v2275_v24 = vadd.f32 %v2274_v16, %v2273_v32 }
 0x438   : > { %v2246_v46 = vadd.f32 %v2245_v23, %v2244_v5  ;;  %v2276_v43 = vrot.slane %v2275_v24, 1 }
 0x43a   : > { %2248 = vst.msk [vmem:[%s462_s15] sm:$0x1] %vm2247_vm5, %v2246_v46  ;;  %v2277_v31 = vadd.f32 %v2276_v43, %v2275_v24 }
 0x43c   : > { %2278 = vst.msk [vmem:[%s465_s24] sm:$0x1] %vm2247_vm5, %v2277_v31 }
 0x458   : > { %v2222_v18 = vpop.permute.xlu0 %2221 }
 0x459   : > { %2225 = vst.msk [vmem:[%s459_s29] sm:$0x1] %vm2224_vm11, %v2222_v18 }
 0x45a PF: > { %s24_s25 = sadd.s32 1, %s2620_s25  }
 0x45b   : > { %p21_p4 = scmp.ge.s32.totalorder %s24_s25, 4  }
 0x45d   :  { %23 = sbr.rel (!%p21_p4) target bundleno = 1 (0x1), region = 134 }

// kernel: _lambda_.8
= control target key start
LH: loop header
LB: loop body
LE: loop exit
PB: predicated region body
PF: predicated region fallthrough
CT: control target
= control target key end

     0   :  { %s4049_s0 = inlined_call_operand.vmem [shape: f32[2,64,12], index: 0, kind: input, shape index: {}]   ;;  %s4050_s1 = inlined_call_operand.vmem [shape: f32[1,12], index: 1, kind: input, shape index: {}]   ;;  %s4051_s2 = inlined_call_operand.vmem [shape: f32[1,12], index: 2, kind: input, shape index: {}]   ;;  %s4052_s3 = inlined_call_operand.vmem [shape: f32[12,12], index: 3, kind: input, shape index: {}]   ;;  %s4053_s4 = inlined_call_operand.vmem [shape: f32[54,16], index: 4, kind: input, shape index: {}]   ;;  %s4054_s5 = inlined_call_operand.vmem [shape: f32[1,16], index: 5, kind: input, shape index: {}, may-alias: {5,7}]   ;;  %s4055_s6 = inlined_call_operand.vmem [shape: f32[16,16], index: 6, kind: input, shape index: {}]   ;;  %s4056_s7 = inlined_call_operand.vmem [shape: f32[1,16], index: 7, kind: input, shape index: {}, may-alias: {5,7}]   ;;  %s4057_s8 = inlined_call_operand.vmem [shape: f32[9,16,12], index: 8, kind: input, shape index: {}]   ;;  %s4058_s9 = inlined_call_operand.vmem [shape: f32[1,12], index: 9, kind: input, shape index: {}]   ;;  %s4059_s10 = inlined_call_operand.vmem [shape: f32[2,64,12], index: 10, kind: output, shape index: {0}]   ;;  %s4060_s11 = inlined_call_operand.vmem [shape: f32[2,1,6], index: 11, kind: output, shape index: {1}]   ;;  %s4061_s12 = inlined_call_operand.hbm [shape: f32[2,1,12], index: 12, kind: output, shape index: {2}]   ;;  %s4062_s13 = inlined_call_operand.hbm [shape: f32[2,1,12], index: 13, kind: output, shape index: {3}]  }
   0x1   :  { %4107 = sst [smem:[#allocation14_spill]] %s4049_s0 }
   0x2   :  { %4108 = sst [smem:[#allocation15_spill]] %s4050_s1 }
   0x3   :  { %4109 = sst [smem:[#allocation16_spill]] %s4051_s2 }
   0x4   :  { %4110 = sst [smem:[#allocation17_spill]] %s4052_s3 }
   0x5   :  { %4111 = sst [smem:[#allocation18_spill]] %s4053_s4 }
   0x6   :  { %19 = vsyncpa [#allocation5], 0 }
   0x7   :  { %21 = vsyncpa [#allocation5 + $0x1], 0 }
   0x8   :  { %22 = vsyncpa [#allocation7], 0 }
   0x9   :  { %24 = vsyncpa [#allocation7 + $0x1], 0  ;;  %s2868_s25 = smov 0   ;;  %s2870_s26 = smov 0  }
   0xa   :  { %s2872_s27 = smov 0   ;;  %s2874_s28 = smov 0  }
   0xb LB: > { %4112 = sst [smem:[#allocation10_spill]] %s2782_s27  ;;  %s2889_s29 = sadd.s32 4294967295, %s2786_s28   ;;  %s2786_s28 = sphi %s2874_s28, %s4266_s28   ;;  %s2782_s27 = sphi %s2872_s27, %s4263_s27   ;;  %s2778_s26 = sphi %s2870_s26, %s4265_s26   ;;  %s2774_s25 = sphi %s2868_s25, %s4264_s25  }
   0xc   : > { %s2452_s30 = sadd.s32 4294967294, %s2786_s28   ;;  %s2893_s14 = sadd.s32 1, %s2786_s28  }
   0xd   : > { %s304_s15 = sadd.s32 1, %s2782_s27  ;;  %s301_s16 = ssub.s32 %s2786_s28, %s2893_s14 }
   0xe   : > { %p314_p0 = scmp.ne.s32.totalorder %s2782_s27, %s2778_s26  ;;  %p302_p1 = scmp.eq.s32.totalorder %s301_s16, 0 }
   0xf   : > { %p315_p2 = scmp.eq.s32.totalorder %s2889_s29, 1  ;;  %p320_p3 = scmp.ne.s32.totalorder %s2778_s26, %s2774_s25 }
  0x10   : > { %p321_p4 = scmp.eq.s32.totalorder %s2452_s30, 1  ;;  %p2455_p7 = scmp.ge.s32.totalorder %s2786_s28, 1 }
  0x11   : > { %s2904_s17 = scalar_select %p302_p1, %s2782_s27, %s304_s15  }
  0x12   : > { %p2906_p5 = por %p315_p2, %p314_p0  ;;  %p2910_p6 = por %p321_p4, %p320_p3 }
  0x13   : > { %4113 = sst [smem:[#allocation11_spill]] %s2904_s17  ;;  %p400_p8 = scmp.lt.s32.totalorder %s2786_s28, 3 }
  0x15   : > { %p401_p9 = pnand %p2455_p7, %p400_p8 }
  0x17   : > { %404 = sbr.rel (%p401_p9) target bundleno = 1137 (0x471), region = 60 }
  0x1c   : > { %s4116_s3 = sld [smem:[#allocation17_spill]]  ;;  %vm527_vm0 = vcmask 1043456   ;;  %p455_p10 = scmp.lt.s32.totalorder %s2889_s29, 1  ;;  %vm4075_vm1 = vcmask 97280   ;;  %vm4082_vm2 = vcmask 48128   ;;  %v2788_v28 = vmov 0.0  }
  0x1d   : > { %s4117_s1 = sld [smem:[#allocation15_spill]]  ;;  %695 = vst.msk [vmem:[#allocation2 + $0x8] sm:$0xff] %vm4082_vm2, %v2788_v28  ;;  %s4065_s27 = smov 6   ;;  %v572_v30 = vlaneseq  ;;  %v4124_v47 = vmov 0  ;;  %v4129_v62 = vmov 0  ;;  %vm1164_vm15 = vcmask 1045504  }
  0x1e   : > { %s2924_s24 = scalar_select %p455_p10, %s2889_s29, 1  ;;  %694 = vst.msk [vmem:[#allocation2] sm:$0xff] %vm4082_vm2, %v2788_v28 }
  0x1f   : > { %s4118_s0 = sld [smem:[#allocation14_spill]]  ;;  %696 = vst.msk [vmem:[#allocation2 + $0x50] sm:$0xff] %vm4082_vm2, %v2788_v28  ;;  %v2957_v32 = vshrl.u32 %v572_v30, 7  ;;  %s4069_s23 = smov 12  }
  0x20   : > { %s4064_s16 = sshll.u32 %s2924_s24, 6  ;;  %s4119_s2 = sld [smem:[#allocation16_spill]]  ;;  %697 = vst.msk [vmem:[#allocation2 + $0x58] sm:$0xff] %vm4082_vm2, %v2788_v28 }
  0x21   : > { %v585_v33 = vand.u32 7, %v2957_v32  ;;  %v574_v42 = vadd.s32 8, %v2957_v32  ;;  %s2792_s30 = smov 18   ;;  %s2793_s15 = smov 42   ;;  %v575_v58 = vadd.s32 16, %v2957_v32 }
  0x22   : > { %v501_v0 = vld [vmem:[%s4116_s3 + $0x8] sm:$0xf]  ;;  %v500_v1 = vld [vmem:[%s4116_s3] sm:$0xff]  ;;  %s4071_s20 = smov 30   ;;  %s2795_s21 = smov 36  }
  0x23   : > { %2460 = vmatpush.msk.msra.mxu0 %vm527_vm0, %v501_v0  ;;  %v2639_v2 = vld [vmem:[%s4117_s1] ss:$0 sm:$0xff]  ;;  %vm2962_vm3 = vcmp.le.s32.totalorder %v585_v33, 6  ;;  %vm2975_vm4 = vcmp.ge.s32.totalorder %v585_v33, 1  ;;  %v592_v45 = vand.u32 7, %v574_v42  ;;  %v599_v61 = vand.u32 7, %v575_v58 }
  0x24   : > { %v738_v29 = vld [vmem:[#allocation2 + $0x8] sm:$0xff]  ;;  %s4073_s22 = smov 48   ;;  %v578_v42 = vadd.s32 40, %v2957_v32  ;;  %s4146_s4 = sld [smem:[#allocation18_spill]] }
  0x25   : > { %546 = vmatpush.msra.mxu0 %v500_v1  ;;  %s459_s17 = scalar_lea.vmem %s4118_s0, %s4064_s16  ;;  %824 = vrot.lane.b32.xlu0 %v738_v29, %s4065_s27  ;;  %vm2992_vm5 = vcmp.le.s32.totalorder %v592_v45, 6  ;;  %vm3009_vm6 = vcmp.ge.s32.totalorder %v592_v45, 1  ;;  %vm3036_vm7 = vcmp.le.s32.totalorder %v599_v61, 6  ;;  %vm3046_vm8 = vcmp.ge.s32.totalorder %v599_v61, 1  ;;  %s4151_s16 = smov 12  }
  0x26   : > { %v2640_v3 = vld [vmem:[%s4119_s2] ss:$0 sm:$0xff]  ;;  %v469_v6 = vld [vmem:[%s459_s17 + $0x8] sm:$0xff]  ;;  %v470_v10 = vld [vmem:[%s459_s17 + $0x10] sm:$0xff]  ;;  %v4125_v47 = vsel %vm2992_vm5, 4294967295, %v4124_v47  ;;  %v4130_v62 = vsel %vm3036_vm7, 4294967295, %v4129_v62 }
  0x27   : > { %v468_v4 = vld [vmem:[%s459_s17] sm:$0xff]  ;;  %v481_v8 = vmul.f32 %v2639_v2, %v469_v6  ;;  %v482_v11 = vmul.f32 %v2639_v2, %v470_v10  ;;  %v471_v13 = vld [vmem:[%s459_s17 + $0x18] sm:$0xff]  ;;  %v473_v19 = vld [vmem:[%s459_s17 + $0x28] sm:$0xff]  ;;  %v4140_v29 = vmov 0  ;;  %v620_v45 = vand.u32 7, %v578_v42  ;;  %s2712_s2 = scalar_lea.hbm %s4061_s12, 2 }
  0x28   : > { %v480_v5 = vmul.f32 %v2639_v2, %v468_v4  ;;  %v483_v14 = vmul.f32 %v2639_v2, %v471_v13  ;;  %v472_v16 = vld [vmem:[%s459_s17 + $0x20] sm:$0xff]  ;;  %v485_v20 = vmul.f32 %v2639_v2, %v473_v19  ;;  %v474_v22 = vld [vmem:[%s459_s17 + $0x30] sm:$0xff]  ;;  %v475_v25 = vld [vmem:[%s459_s17 + $0x38] sm:$0xff]  ;;  %s4067_s17 = smov 24   ;;  %v577_v19 = vadd.s32 32, %v2957_v32 }
  0x29   : > { %v493_v9 = vadd.f32 %v2640_v3, %v481_v8  ;;  %v494_v12 = vadd.f32 %v2640_v3, %v482_v11  ;;  %v484_v17 = vmul.f32 %v2639_v2, %v472_v16  ;;  %v486_v23 = vmul.f32 %v2639_v2, %v474_v22 }
  0x2a   : > { %v492_v7 = vadd.f32 %v2640_v3, %v480_v5  ;;  %v495_v15 = vadd.f32 %v2640_v3, %v483_v14  ;;  %v497_v21 = vadd.f32 %v2640_v3, %v485_v20  ;;  %v487_v26 = vmul.f32 %v2639_v2, %v475_v25  ;;  %v1134_v61 = vld [vmem:[%s4146_s4 + $0x30] sm:$0x3f] }
  0x2b   : > { %v496_v18 = vadd.f32 %v2640_v3, %v484_v17  ;;  %v498_v24 = vadd.f32 %v2640_v3, %v486_v23  ;;  %v576_v8 = vadd.s32 24, %v2957_v32  ;;  %v4136_v14 = vmov 0  ;;  %2469 = vmatpush.msk.msrb.mxu0 %vm1164_vm15, %v1134_v61  ;;  %2578 = vmatpush.msk.msra.mxu1 %vm1164_vm15, %v1134_v61 }
  0x2c   : > { %2461 = vmatmul.msk.f32.vlgmr.msra.gmra.mxu0 %vm4075_vm1, %v492_v7  ;;  %v499_v27 = vadd.f32 %v2640_v3, %v487_v26  ;;  %v4138_v23 = vmov 0  ;;  %vm3141_vm13 = vcmp.le.s32.totalorder %v620_v45, 6  ;;  %vm3151_vm14 = vcmp.ge.s32.totalorder %v620_v45, 1 }
  0x2d   : > { %v606_v11 = vand.u32 7, %v576_v8 }
  0x2f   : > { %vm3074_vm9 = vcmp.le.s32.totalorder %v606_v11, 6  ;;  %vm3080_vm10 = vcmp.ge.s32.totalorder %v606_v11, 1 }
  0x30   : > { %v4137_v14 = vsel %vm3080_vm10, 4294967295, %v4136_v14 }
  0x34   : > { %2462 = vmatmul.msk.f32.gmra.mxu0 %vm4075_vm1, %v493_v9 }
  0x3c   : > { %2463 = vmatmul.msk.f32.gmra.mxu0 %vm4075_vm1, %v494_v12  ;;  %v4134_v12 = vmov 0 }
  0x3d   : > { %v4135_v12 = vsel %vm3074_vm9, 4294967295, %v4134_v12 }
  0x44   : > { %2464 = vmatmul.msk.f32.gmra.mxu0 %vm4075_vm1, %v495_v15 }
  0x4c   : > { %2465 = vmatmul.msk.f32.gmra.mxu0 %vm4075_vm1, %v496_v18 }
  0x54   : > { %2466 = vmatmul.msk.f32.gmra.mxu0 %vm4075_vm1, %v497_v21  ;;  %v613_v21 = vand.u32 7, %v577_v19 }
  0x56   : > { %vm3103_vm11 = vcmp.le.s32.totalorder %v613_v21, 6  ;;  %vm3118_vm12 = vcmp.ge.s32.totalorder %v613_v21, 1 }
  0x57   : > { %v4139_v23 = vsel %vm3103_vm11, 4294967295, %v4138_v23  ;;  %v4141_v29 = vsel %vm3118_vm12, 4294967295, %v4140_v29 }
  0x5c   : > { %2467 = vmatmul.msk.f32.gmra.mxu0 %vm4075_vm1, %v498_v24 }
  0x64   : > { %2468 = vmatmul.msk.f32.gmra.mxu0 %vm4075_vm1, %v499_v27  ;;  %vm4086_vm1 = vcmask 195584  }
  0xa9   : > { %v2955_v31 = vpop.f32.mrf.mxu0 }
  0xaa   : > { %698 = vst.msk [vmem:[#allocation2 + $0x10] sm:$0xff] %vm4082_vm2, %v2955_v31 }
  0xb1   : > { %v2966_v35 = vpop.f32.mrf.mxu0  ;;  %v739_v36 = vld [vmem:[#allocation2 + $0x10] sm:$0xff] }
  0xb2   : > { %v746_v37 = vld [vmem:[#allocation2 + $0x9] sm:$0xff]  ;;  %699 = vst.msk [vmem:[#allocation2 + $0x18] sm:$0xff] %vm4082_vm2, %v2966_v35  ;;  %826 = vrot.lane.b32.xlu2 %v739_v36, %s4065_s27  ;;  %913 = vrot.lane.b32.xlu1 %v739_v36, %s4067_s17 }
  0xb3   : > { %v770_v38 = vsel %vm2962_vm3, %v746_v37, 0.0  ;;  %v2979_v40 = vld [vmem:[#allocation2 + $0xf] sm:$0xff] }
  0xb4   : > { %856 = vrot.lane.b32.xlu0 %v770_v38, %s4069_s23  ;;  %v779_v43 = vsel %vm2975_vm4, %v2979_v40, 0.0 }
  0xb9   : > { %v2981_v41 = vpop.f32.mrf.mxu0  ;;  %v740_v44 = vld [vmem:[#allocation2 + $0x18] sm:$0xff] }
  0xba   : > { %700 = vst.msk [vmem:[#allocation2 + $0x20] sm:$0xff] %vm4082_vm2, %v2981_v41  ;;  %888 = vrot.lane.b32.xlu1 %v779_v43, %s2792_s30  ;;  %915 = vrot.lane.b32.xlu2 %v740_v44, %s4067_s17  ;;  %v747_v46 = vld [vmem:[#allocation2 + $0x11] sm:$0xff] }
  0xbb   : > { %v789_v48 = vsel %vm2962_vm3, %v747_v46, 0.0  ;;  %v771_v50 = vsel %vm2992_vm5, %v747_v46, 0.0  ;;  %v3007_v51 = vld [vmem:[#allocation2 + $0x17] sm:$0xff]  ;;  %v4142_v46 = vmov 0 }
  0xbc   : > { %1002 = vrot.lane.b32.xlu0 %v740_v44, %s2793_s15  ;;  %v798_v54 = vsel %vm2975_vm4, %v3007_v51, 0.0  ;;  %v780_v55 = vsel %vm3009_vm6, %v3007_v51, 0.0  ;;  %v4143_v46 = vsel %vm3141_vm13, 4294967295, %v4142_v46 }
  0xc1   : > { %v2998_v49 = vpop.f32.mrf.mxu0  ;;  %v741_v53 = vld [vmem:[#allocation2 + $0x20] sm:$0xff] }
  0xc2   : > { %828 = vrot.lane.b32.xlu1 %v740_v44, %s4065_s27  ;;  %945 = vrot.lane.b32.xlu2 %v789_v48, %s4071_s20  ;;  %701 = vst.msk [vmem:[#allocation2 + $0x28] sm:$0xff] %vm4082_vm2, %v2998_v49  ;;  %v748_v57 = vld [vmem:[#allocation2 + $0x19] sm:$0xff] }
  0xc3   : > { %v790_v60 = vsel %vm2992_vm5, %v748_v57, 0.0  ;;  %v3040_v63 = vld [vmem:[#allocation2 + $0x1f] sm:$0xff]  ;;  %v808_v0 = vsel %vm2962_vm3, %v748_v57, 0.0  ;;  %v772_v1 = vsel %vm3036_vm7, %v748_v57, 0.0  ;;  %v3161_v57 = vpop.permute.xlu0 %824 }
  0xc4   : > { %858 = vrot.lane.b32.xlu0 %v771_v50, %s4069_s23  ;;  %v781_v3 = vsel %vm3046_vm8, %v3040_v63, 0.0  ;;  %v799_v5 = vsel %vm3009_vm6, %v3040_v63, 0.0 }
  0xc9   : > { %v3019_v56 = vpop.f32.mrf.mxu0  ;;  %v742_v4 = vld [vmem:[#allocation2 + $0x28] sm:$0xff] }
  0xca   : > { %977 = vrot.lane.b32.xlu2 %v798_v54, %s2795_s21  ;;  %890 = vrot.lane.b32.xlu1 %v780_v55, %s2792_s30  ;;  %702 = vst.msk [vmem:[#allocation2 + $0x30] sm:$0xff] %vm4082_vm2, %v3019_v56  ;;  %v749_v7 = vld [vmem:[#allocation2 + $0x21] sm:$0xff] }
  0xcb   : > { %v791_v9 = vsel %vm3036_vm7, %v749_v7, 0.0  ;;  %v809_v10 = vsel %vm2992_vm5, %v749_v7, 0.0  ;;  %v3078_v13 = vld [vmem:[#allocation2 + $0x27] sm:$0xff]  ;;  %v773_v15 = vsel %vm3074_vm9, %v749_v7, 0.0 }
  0xcc   : > { %830 = vrot.lane.b32.xlu0 %v741_v53, %s4065_s27  ;;  %v782_v16 = vsel %vm3080_vm10, %v3078_v13, 0.0  ;;  %v800_v17 = vsel %vm3046_vm8, %v3078_v13, 0.0 }
  0xd1   : > { %v3027_v59 = vpop.f32.mrf.mxu0  ;;  %v743_v18 = vld [vmem:[#allocation2 + $0x30] sm:$0xff] }
  0xd2   : > { %4128 = vst [vmem:[#allocation12_spill] sm:$0xff] %v3027_v59  ;;  %917 = vrot.lane.b32.xlu1 %v741_v53, %s4067_s17  ;;  %1004 = vrot.lane.b32.xlu2 %v741_v53, %s2793_s15  ;;  %v750_v22 = vld [vmem:[#allocation2 + $0x29] sm:$0xff] }
  0xd3   : > { %703 = vst.msk [vmem:[#allocation2 + $0x38] sm:$0xff] %vm4082_vm2, %v3027_v59  ;;  %v792_v24 = vsel %vm3074_vm9, %v750_v22, 0.0  ;;  %v810_v25 = vsel %vm3036_vm7, %v750_v22, 0.0  ;;  %v774_v26 = vsel %vm3103_vm11, %v750_v22, 0.0  ;;  %v3116_v27 = vld [vmem:[#allocation2 + $0x2f] sm:$0xff]  ;;  %vm4173_vm7 = vcmask 441344  }
  0xd4   : > { %947 = vrot.lane.b32.xlu0 %v790_v60, %s4071_s20  ;;  %v801_v33 = vsel %vm3080_vm10, %v3116_v27, 0.0  ;;  %v783_v36 = vsel %vm3118_vm12, %v3116_v27, 0.0 }
  0xd9   : > { %v3062_v6 = vpop.f32.mrf.mxu0 }
  0xda   : > { %1034 = vrot.lane.b32.xlu1 %v808_v0, %s4073_s22  ;;  %860 = vrot.lane.b32.xlu2 %v772_v1, %s4069_s23  ;;  %4133 = vst [vmem:[#allocation13_spill] sm:$0xff] %v3062_v6  ;;  %v744_v30 = vld [vmem:[#allocation2 + $0x38] sm:$0xff]  ;;  %v579_v0 = vadd.s32 48, %v2957_v32 }
  0xdb   : > { %704 = vst.msk [vmem:[#allocation2 + $0x40] sm:$0xff] %vm4082_vm2, %v3062_v6  ;;  %v751_v38 = vld [vmem:[#allocation2 + $0x31] sm:$0xff] }
  0xdc   : > { %892 = vrot.lane.b32.xlu0 %v781_v3, %s2792_s30  ;;  %v793_v43 = vsel %vm3103_vm11, %v751_v38, 0.0  ;;  %v3145_v48 = vld [vmem:[#allocation2 + $0x37] sm:$0xff]  ;;  %v811_v50 = vsel %vm3074_vm9, %v751_v38, 0.0  ;;  %v775_v53 = vsel %vm3141_vm13, %v751_v38, 0.0  ;;  %vm4158_vm9 = vcmask 146432  }
  0xdd   : > { %v784_v55 = vsel %vm3151_vm14, %v3145_v48, 0.0  ;;  %v802_v1 = vsel %vm3118_vm12, %v3145_v48, 0.0 }
  0xe1   : > { %v3099_v20 = vpop.f32.mrf.mxu0 }
  0xe2   : > { %979 = vrot.lane.b32.xlu1 %v799_v5, %s2795_s21  ;;  %832 = vrot.lane.b32.xlu2 %v742_v4, %s4065_s27  ;;  %705 = vst.msk [vmem:[#allocation2 + $0x48] sm:$0xff] %vm4082_vm2, %v3099_v20  ;;  %v752_v60 = vld [vmem:[#allocation2 + $0x39] sm:$0xff]  ;;  %v1133_v5 = vld [vmem:[%s4146_s4 + $0x28] sm:$0xff] }
  0xe3   : > { %v794_v3 = vsel %vm3141_vm13, %v752_v60, 0.0  ;;  %1178 = vmatpush.msrb.mxu0 %v1133_v5  ;;  %2579 = vmatpush.msra.mxu1 %v1133_v5  ;;  %v745_v19 = vld [vmem:[#allocation2 + $0x40] sm:$0xff] }
  0xe4   : > { %919 = vrot.lane.b32.xlu0 %v742_v4, %s4067_s17 }
  0xe9   : > { %v753_v38 = vld [vmem:[#allocation2 + $0x41] sm:$0xff] }
  0xea   : > { %949 = vrot.lane.b32.xlu2 %v791_v9, %s4071_s20  ;;  %1006 = vrot.lane.b32.xlu1 %v742_v4, %s2793_s15  ;;  %v812_v4 = vsel %vm3103_vm11, %v752_v60, 0.0  ;;  %v627_v9 = vand.u32 7, %v579_v0  ;;  %v778_v61 = vld [vmem:[#allocation2 + $0x47] sm:$0xff] }
  0xec   : > { %1036 = vrot.lane.b32.xlu0 %v809_v10, %s4073_s22  ;;  %v1132_v10 = vld [vmem:[%s4146_s4 + $0x20] sm:$0xff]  ;;  %vm3197_vm0 = vcmp.ge.s32.totalorder %v627_v9, 1  ;;  %vm3220_vm15 = vcmp.le.s32.totalorder %v627_v9, 6 }
  0xed   : > { %1179 = vmatpush.msrb.mxu0 %v1132_v10  ;;  %2580 = vmatpush.msra.mxu1 %v1132_v10  ;;  %v776_v42 = vsel %vm3220_vm15, %v752_v60, 0.0  ;;  %v804_v0 = vsel %vm3197_vm0, %v778_v61, 0.0 }
  0xf2   : > { %862 = vrot.lane.b32.xlu1 %v773_v15, %s4069_s23  ;;  %894 = vrot.lane.b32.xlu2 %v782_v16, %s2792_s30  ;;  %v3189_v15 = vld [vmem:[#allocation2 + $0x3f] sm:$0xff] }
  0xf3   : > { %v1131_v16 = vld [vmem:[%s4146_s4 + $0x18] sm:$0xff]  ;;  %v785_v21 = vsel %vm3197_vm0, %v3189_v15, 0.0  ;;  %v803_v22 = vsel %vm3151_vm14, %v3189_v15, 0.0 }
  0xf4   : > { %981 = vrot.lane.b32.xlu0 %v800_v17, %s2795_s21  ;;  %v1130_v17 = vld [vmem:[%s4146_s4 + $0x10] sm:$0xff]  ;;  %1180 = vmatpush.msrb.mxu0 %v1131_v16 }
  0xf5   : > { %2581 = vmatpush.msra.mxu1 %v1131_v16  ;;  %v734_v16 = vsel %vm3118_vm12, %v3078_v13, 0.0  ;;  %vm4168_vm12 = vcmask 48128  }
  0xf6   : > { %1181 = vmatpush.msrb.mxu0 %v1130_v17 }
  0xf7   : > { %2582 = vmatpush.msra.mxu1 %v1130_v17 }
  0xfa   : > { %834 = vrot.lane.b32.xlu1 %v743_v18, %s4065_s27  ;;  %921 = vrot.lane.b32.xlu2 %v743_v18, %s4067_s17 }
  0xfc   : > { %1008 = vrot.lane.b32.xlu0 %v743_v18, %s2793_s15 }
 0x102   : > { %951 = vrot.lane.b32.xlu1 %v792_v24, %s4071_s20  ;;  %1038 = vrot.lane.b32.xlu2 %v810_v25, %s4073_s22  ;;  %v1129_v24 = vld [vmem:[%s4146_s4 + $0x8] sm:$0xff] }
 0x103   : > { %1182 = vmatpush.msrb.mxu0 %v1129_v24  ;;  %2583 = vmatpush.msra.mxu1 %v1129_v24 }
 0x104   : > { %864 = vrot.lane.b32.xlu0 %v774_v26, %s4069_s23 }
 0x10a   : > { %983 = vrot.lane.b32.xlu2 %v801_v33, %s2795_s21  ;;  %896 = vrot.lane.b32.xlu1 %v783_v36, %s2792_s30  ;;  %v1128_v33 = vld [vmem:[%s4146_s4] sm:$0xff]  ;;  %v4149_v36 = vmov 0 }
 0x10b   : > { %v4150_v36 = vsel %vm3220_vm15, 4294967295, %v4149_v36  ;;  %1183 = vmatpush.msrb.mxu0 %v1128_v33  ;;  %2584 = vmatpush.msra.mxu1 %v1128_v33 }
 0x10c   : > { %836 = vrot.lane.b32.xlu0 %v744_v30, %s4065_s27  ;;  %v3131_v37 = vpop.permute.xlu2 %826  ;;  %s4152_s27 = smov 48  }
 0x112   : > { %923 = vrot.lane.b32.xlu1 %v744_v30, %s4067_s17  ;;  %1010 = vrot.lane.b32.xlu2 %v744_v30, %s2793_s15  ;;  %s4153_s17 = smov 24  }
 0x114   : > { %953 = vrot.lane.b32.xlu0 %v793_v43, %s4071_s20  ;;  %v3139_v44 = vpop.permute.xlu2 %915  ;;  %v813_v43 = vsel %vm3141_vm13, %v753_v38, 0.0  ;;  %vm4155_vm13 = vcmask 97280  }
 0x11a   : > { %1040 = vrot.lane.b32.xlu1 %v811_v50, %s4073_s22  ;;  %866 = vrot.lane.b32.xlu2 %v775_v53, %s4069_s23  ;;  %s4154_s23 = smov 30  }
 0x11c   : > { %898 = vrot.lane.b32.xlu0 %v784_v55, %s2792_s30  ;;  %v3163_v58 = vpop.permute.xlu2 %945  ;;  %v706_v55 = vld [vmem:[#allocation2 + $0x7] sm:$0xff] }
 0x11d   : > { %v730_v60 = vsel %vm2975_vm4, %v706_v55, 0.0 }
 0x11e   : > { %v1058_v5 = vsel %vm4082_vm2, %v730_v60, %v3161_v57  ;;  %v788_v57 = vld [vmem:[#allocation2 + $0x49] sm:$0xff] }
 0x122   : > { %985 = vrot.lane.b32.xlu1 %v802_v1, %s2795_s21  ;;  %955 = vrot.lane.b32.xlu2 %v794_v3, %s4071_s20  ;;  %v795_v1 = vsel %vm3220_vm15, %v753_v38, 0.0  ;;  %v580_v3 = vadd.s32 56, %v2957_v32  ;;  %s4159_s20 = smov 6  }
 0x124   : > { %1042 = vrot.lane.b32.xlu0 %v812_v4, %s4073_s22  ;;  %v3182_v7 = vpop.permute.xlu1 %913  ;;  %v3184_v8 = vpop.permute.xlu2 %977  ;;  %v787_v4 = vld [vmem:[#allocation2 + $0x48] sm:$0xff] }
 0x126   : > { %v857_v11 = vpop.permute.xlu0 %856 }
 0x127   : > { %v1066_v33 = vsel %vm4155_vm13, %v1058_v5, %v857_v11  ;;  %vm4085_vm13 = vcmask 244736  }
 0x12a   : > { %1012 = vrot.lane.b32.xlu1 %v745_v19, %s2793_s15  ;;  %900 = vrot.lane.b32.xlu2 %v785_v21, %s2792_s30  ;;  %v733_v21 = vsel %vm3080_vm10, %v3040_v63, 0.0  ;;  %vm4174_vm10 = vcmask 195584  }
 0x12c   : > { %987 = vrot.lane.b32.xlu0 %v803_v22, %s2795_s21  ;;  %v889_v25 = vpop.permute.xlu1 %888  ;;  %v3213_v26 = vpop.permute.xlu2 %1004  ;;  %v634_v22 = vand.u32 7, %v580_v3 }
 0x12d   : > { %v1075_v13 = vsel %vm4158_vm9, %v1066_v33, %v889_v25  ;;  %vm4090_vm9 = vcmask 293888  }
 0x12e   : > { %v3215_v30 = vpop.permute.xlu0 %1002  ;;  %vm3262_vm11 = vcmp.le.s32.totalorder %v634_v22, 6  ;;  %v1084_v11 = vsel %vm4086_vm1, %v1075_v13, %v3182_v7  ;;  %vm4088_vm1 = vcmask 441344  }
 0x12f   : > { %v777_v63 = vsel %vm3262_vm11, %v753_v38, 0.0  ;;  %v1093_v25 = vsel %vm4085_vm13, %v1084_v11, %v3163_v58  ;;  %vm4087_vm13 = vcmask 392192  }
 0x130   : > { %v1102_v38 = vsel %vm4090_vm9, %v1093_v25, %v3184_v8  ;;  %vm4165_vm9 = vcmask 195584   ;;  %v732_v25 = vsel %vm3046_vm8, %v3007_v51, 0.0 }
 0x132   : > { %868 = vrot.lane.b32.xlu1 %v776_v42, %s4151_s16  ;;  %1044 = vrot.lane.b32.xlu2 %v813_v43, %s4152_s27  ;;  %v4156_v42 = vmov 0  ;;  %v814_v43 = vsel %vm3220_vm15, %v788_v57, 0.0  ;;  %vm4089_vm15 = vcmask 343040  }
 0x133   : > { %v4157_v42 = vsel %vm3262_vm11, 4294967295, %v4156_v42  ;;  %v1111_v58 = vsel %vm4089_vm15, %v1102_v38, %v3215_v30  ;;  %v731_v30 = vsel %vm3009_vm6, %v2979_v40, 0.0  ;;  %vm4164_vm15 = vcmask 146432  }
 0x134   : > { %925 = vrot.lane.b32.xlu0 %v745_v19, %s4153_s17  ;;  %v3231_v45 = vpop.permute.xlu1 %828  ;;  %v3233_v50 = vpop.permute.xlu2 %860 }
 0x135   : > { %v1060_v38 = vsel %vm4168_vm12, %v732_v25, %v3231_v45  ;;  %vm4176_vm12 = vcmask 293888  }
 0x136   : > { %v3235_v53 = vpop.permute.xlu0 %858 }
 0x13a   : > { %989 = vrot.lane.b32.xlu2 %v804_v0, %s2795_s21  ;;  %957 = vrot.lane.b32.xlu1 %v795_v1, %s4154_s23  ;;  %v796_v1 = vsel %vm3262_vm11, %v788_v57, 0.0 }
 0x13c   : > { %1014 = vrot.lane.b32.xlu0 %v787_v4, %s2793_s15  ;;  %v891_v9 = vpop.permute.xlu1 %890  ;;  %v833_v10 = vpop.permute.xlu2 %832 }
 0x13d   : > { %v3253_v17 = vsel %vm4082_vm2, %v734_v16, %v833_v10  ;;  %v806_v16 = vld [vmem:[#allocation2 + $0x50] sm:$0xff] }
 0x13e   : > { %v831_v32 = vpop.permute.xlu0 %830 }
 0x13f   : > { %v3259_v24 = vsel %vm4082_vm2, %v733_v21, %v831_v32  ;;  %vm3278_vm2 = vcmp.ge.s32.totalorder %v634_v22, 1 }
 0x140   : > { %v786_v7 = vsel %vm3278_vm2, %v778_v61, 0.0  ;;  %v807_v61 = vld [vmem:[#allocation2 + $0x51] sm:$0xff] }
 0x141   : > { %v815_v32 = vsel %vm3262_vm11, %v807_v61, 0.0  ;;  %vm4166_vm11 = vcmask 244736  }
 0x142   : > { %838 = vrot.lane.b32.xlu2 %v745_v19, %s4159_s20  ;;  %1046 = vrot.lane.b32.xlu1 %v814_v43, %s4152_s27  ;;  %v4160_v19 = vmov 0 }
 0x143   : > { %v4161_v19 = vsel %vm3278_vm2, 4294967295, %v4160_v19 }
 0x144   : > { %870 = vrot.lane.b32.xlu0 %v777_v63, %s4151_s16  ;;  %v918_v55 = vpop.permute.xlu1 %917  ;;  %v950_v60 = vpop.permute.xlu2 %949 }
 0x146   : > { %v948_v0 = vpop.permute.xlu0 %947 }
 0x14a   : > { %927 = vrot.lane.b32.xlu2 %v787_v4, %s4153_s17  ;;  %902 = vrot.lane.b32.xlu1 %v786_v7, %s2792_s30  ;;  %v797_v4 = vld [vmem:[#allocation2 + $0x4f] sm:$0xff] }
 0x14b   : > { %v805_v21 = vsel %vm3278_vm2, %v797_v4, 0.0 }
 0x14c   : > { %959 = vrot.lane.b32.xlu0 %v796_v1, %s4154_s23  ;;  %v1035_v3 = vpop.permute.xlu1 %1034  ;;  %v895_v5 = vpop.permute.xlu2 %894  ;;  %s2321_s23 = scalar_lea.hbm %s4062_s13, %s2889_s29 }
 0x14d   : > { %v1120_v8 = vsel %vm4087_vm13, %v1111_v58, %v1035_v3  ;;  %vm4162_vm13 = vcmask 48128   ;;  %s3992_s1 = sshll.u32 %s2321_s23, 4  ;;  %s2326_s1 = int_to_ptr.hbm [resolvable:$true] %s3992_s1 }
 0x14e   : > { %v893_v10 = vpop.permute.xlu0 %892  ;;  %2470 = vmatmul.msk.f32.vlgmr.msrb.gmra.mxu0 %vm4088_vm1, %v1120_v8  ;;  %v1059_v22 = vsel %vm4162_vm13, %v731_v30, %v3131_v37  ;;  %vm4163_vm1 = vcmask 97280   ;;  %vm4167_vm13 = vcmask 293888  }
 0x14f   : > { %v1067_v57 = vsel %vm4163_vm1, %v1059_v22, %v3235_v53  ;;  %vm4169_vm1 = vcmask 343040  }
 0x150   : > { %v1076_v13 = vsel %vm4164_vm15, %v1067_v57, %v891_v9  ;;  %vm4170_vm15 = vcmask 97280   ;;  %vm4177_vm5 = vmmov %vm4169_vm1 }
 0x151   : > { %v1085_v40 = vsel %vm4165_vm9, %v1076_v13, %v3139_v44  ;;  %v1068_v1 = vsel %vm4170_vm15, %v1060_v38, %v3233_v50  ;;  %vm4171_vm9 = vcmask 392192   ;;  %vm4179_vm15 = vmmov %vm4173_vm7 }
 0x152   : > { %991 = vrot.lane.b32.xlu1 %v805_v21, %s2795_s21  ;;  %1016 = vrot.lane.b32.xlu2 %v806_v16, %s2793_s15  ;;  %v1094_v11 = vsel %vm4166_vm11, %v1085_v40, %v948_v0  ;;  %vm4172_vm11 = vcmask 146432   ;;  %s2797_s15 = smov 122   ;;  %s3974_s21 = sand.u32 1, %s2778_s26  }
 0x153   : > { %v1077_v0 = vsel %vm4172_vm11, %v1068_v1, %v893_v10  ;;  %s454_s22 = scalar_lea.vmem [#allocation6], %s3974_s21 }
 0x154   : > { %1048 = vrot.lane.b32.xlu0 %v815_v32, %s4152_s27  ;;  %v980_v33 = vpop.permute.xlu1 %979  ;;  %v922_v63 = vpop.permute.xlu2 %921  ;;  %v1086_v58 = vsel %vm4174_vm10, %v1077_v0, %v918_v55  ;;  %vm4181_vm10 = vmmov %vm4172_vm11  ;;  %v735_v0 = vsel %vm3151_vm14, %v3116_v27, 0.0  ;;  %s2308_s27 = scalar_lea.hbm %s4061_s12, %s2889_s29  ;;  %s3990_s16 = sshll.u32 %s454_s22, 4  ;;  %s2324_s16 = int_to_ptr.vmem [resolvable:$true] %s3990_s16 }
 0x155   : > { %v1103_v37 = vsel %vm4167_vm13, %v1094_v11, %v980_v33  ;;  %vm4175_vm13 = vcmask 244736   ;;  %vm4184_vm11 = vmmov %vm4176_vm12  ;;  %s3987_s0 = sshll.u32 %s2308_s27, 4  ;;  %s2290_s29 = scalar_lea.sflag [#allocation5], %s3974_s21  ;;  %s2313_s0 = int_to_ptr.hbm [resolvable:$true] %s3987_s0 }
 0x156   : > { %v920_v43 = vpop.permute.xlu0 %919  ;;  %v1112_v9 = vsel %vm4169_vm1, %v1103_v37, %v3213_v26  ;;  %v1095_v45 = vsel %vm4175_vm13, %v1086_v58, %v950_v60  ;;  %vm4178_vm1 = vmmov %vm4171_vm9  ;;  %s2706_s27 = sshra.s32 %s2313_s0, 4  ;;  %s2707_s27 = int_to_ptr.hbm [resolvable:$true] %s2706_s27 }
 0x157   : > { %p2713_p0 = scmp.lt.s32.totalorder %s2707_s27, %s4061_s12 }
 0x15c   : > { %v1007_v53 = vpop.permute.xlu1 %1006  ;;  %v1039_v51 = vpop.permute.xlu2 %1038 }
 0x15e   : > { %v1037_v7 = vpop.permute.xlu0 %1036 }
 0x15f   : > { %v1121_v44 = vsel %vm4171_vm9, %v1112_v9, %v1037_v7  ;;  %vm4183_vm9 = vmmov %vm4175_vm13  ;;  %vm4185_vm13 = vcmask 343040  }
 0x160   : > { %2471 = vmatmul.msk.f32.vlgmr.msra.gmra.mxu1 %vm4173_vm7, %v1121_v44  ;;  %vm4180_vm7 = vcmask 97280  }
 0x164   : > { %v863_v3 = vpop.permute.xlu1 %862  ;;  %v984_v50 = vpop.permute.xlu2 %983 }
 0x165   : > { %v1069_v60 = vsel %vm4180_vm7, %v3259_v24, %v863_v3 }
 0x166   : > { %v982_v8 = vpop.permute.xlu0 %981  ;;  %v1078_v33 = vsel %vm4181_vm10, %v1069_v60, %v895_v5  ;;  %v736_v60 = vsel %vm3197_vm0, %v3145_v48, 0.0  ;;  %v1217_v48 = vld [vmem:[%s4055_s6] sm:$0xff] }
 0x167   : > { %v1104_v61 = vsel %vm4176_vm12, %v1095_v45, %v982_v8  ;;  %vm4186_vm12 = vmmov %vm4178_vm1 }
 0x168   : > { %v1113_v26 = vsel %vm4177_vm5, %v1104_v61, %v1007_v53  ;;  %vm4182_vm5 = vcmask 195584  }
 0x169   : > { %v1122_v4 = vsel %vm4178_vm1, %v1113_v26, %v1039_v51  ;;  %v1087_v40 = vsel %vm4182_vm5, %v1078_v33, %v920_v43  ;;  %vm4187_vm1 = vmmov %vm4179_vm15 }
 0x16a   : > { %2472 = vmatmul.msk.f32.gmra.mxu1 %vm4179_vm15, %v1122_v4  ;;  %vm4188_vm15 = vmmov %vm4180_vm7 }
 0x16b   : > { %vm4189_vm7 = vmmov %vm4181_vm10 }
 0x16c   : > { %v835_v16 = vpop.permute.xlu1 %834  ;;  %v1011_v21 = vpop.permute.xlu2 %1010  ;;  %vm4190_vm10 = vmmov %vm4182_vm5 }
 0x16d   : > { %vm4191_vm5 = vmmov %vm4183_vm9 }
 0x16e   : > { %v1009_v10 = vpop.permute.xlu0 %1008 }
 0x174   : > { %v952_v32 = vpop.permute.xlu1 %951  ;;  %v867_v57 = vpop.permute.xlu2 %866 }
 0x175   : > { %v1096_v25 = vsel %vm4183_vm9, %v1087_v40, %v952_v32  ;;  %vm4192_vm9 = vcmask 48128  }
 0x176   : > { %v865_v30 = vpop.permute.xlu0 %864  ;;  %v1105_v37 = vsel %vm4184_vm11, %v1096_v25, %v984_v50  ;;  %v1063_v3 = vsel %vm4192_vm9, %v735_v0, %v835_v16  ;;  %vm4198_vm9 = vmmov %vm4184_vm11 }
 0x177   : > { %v1114_v7 = vsel %vm4185_vm13, %v1105_v37, %v1009_v10  ;;  %v1070_v24 = vsel %vm4188_vm15, %v3253_v17, %v865_v30  ;;  %vm4193_vm13 = vmmov %vm4188_vm15  ;;  %vm4196_vm15 = vcmask 392192  }
 0x178   : > { %v1071_v61 = vsel %vm4193_vm13, %v1063_v3, %v867_v57  ;;  %vm4200_vm13 = vmmov %vm4196_vm15 }
 0x17c   : > { %v897_v22 = vpop.permute.xlu1 %896  ;;  %v956_v38 = vpop.permute.xlu2 %955 }
 0x17d   : > { %v1079_v5 = vsel %vm4189_vm7, %v1070_v24, %v897_v22 }
 0x17e   : > { %v837_v55 = vpop.permute.xlu0 %836  ;;  %v1088_v44 = vsel %vm4190_vm10, %v1079_v5, %v922_v63 }
 0x184   : > { %v924_v13 = vpop.permute.xlu1 %923  ;;  %v901_v43 = vpop.permute.xlu2 %900 }
 0x186   : > { %v954_v11 = vpop.permute.xlu0 %953 }
 0x187   : > { %v1097_v51 = vsel %vm4191_vm5, %v1088_v44, %v954_v11  ;;  %v737_v44 = vsel %vm3278_vm2, %v3189_v15, 0.0 }
 0x18c   : > { %v1041_v53 = vpop.permute.xlu1 %1040  ;;  %v1045_v50 = vpop.permute.xlu2 %1044 }
 0x18d   : > { %v1123_v1 = vsel %vm4186_vm12, %v1114_v7, %v1041_v53  ;;  %vm4194_vm12 = vcmask 343040   ;;  %v1218_v53 = vld [vmem:[%s4055_s6 + $0x8] sm:$0xff] }
 0x18e   : > { %v899_v9 = vpop.permute.xlu0 %898  ;;  %2473 = vmatmul.msk.f32.gmra.mxu1 %vm4187_vm1, %v1123_v1  ;;  %vm4195_vm1 = vmmov %vm4189_vm7  ;;  %vm4197_vm7 = vcmask 441344   ;;  %1262 = vmatpush.msra.mxu2 %v1218_v53 }
 0x18f   : > { %v1080_v26 = vsel %vm4195_vm1, %v1071_v61, %v899_v9  ;;  %vm4202_vm1 = vcmask 48128  }
 0x190   : > { %v1089_v27 = vsel %vm4190_vm10, %v1080_v26, %v924_v13  ;;  %v1064_v33 = vsel %vm4202_vm1, %v736_v60, %v837_v55  ;;  %1263 = vmatpush.msra.mxu2 %v1217_v48  ;;  %vm4208_vm1 = vcmask 441344  }
 0x191   : > { %v1098_v10 = vsel %vm4191_vm5, %v1089_v27, %v956_v38 }
 0x194   : > { %v986_v58 = vpop.permute.xlu1 %985  ;;  %v990_v13 = vpop.permute.xlu2 %989 }
 0x195   : > { %v1106_v45 = vsel %vm4184_vm11, %v1097_v51, %v986_v58  ;;  %vm4199_vm11 = vmmov %vm4194_vm12 }
 0x196   : > { %v1043_v8 = vpop.permute.xlu0 %1042  ;;  %v1115_v17 = vsel %vm4194_vm12, %v1106_v45, %v1011_v21  ;;  %vm4201_vm12 = vmmov %vm4197_vm7 }
 0x197   : > { %v1124_v63 = vsel %vm4196_vm15, %v1115_v17, %v1043_v8  ;;  %vm4203_vm15 = vcmask 97280  }
 0x198   : > { %2474 = vmatmul.msk.f32.gmra.mxu1 %vm4197_vm7, %v1124_v63  ;;  %vm4204_vm7 = vcmask 146432  }
 0x19c   : > { %v1013_v4 = vpop.permute.xlu1 %1012  ;;  %v839_v55 = vpop.permute.xlu2 %838 }
 0x19e   : > { %v988_v16 = vpop.permute.xlu0 %987 }
 0x19f   : > { %v1107_v32 = vsel %vm4198_vm9, %v1098_v10, %v988_v16  ;;  %vm1223_vm9 = vcmask 130048  }
 0x1a0   : > { %v1116_v30 = vsel %vm4199_vm11, %v1107_v32, %v1013_v4  ;;  %1297 = vst.msk [vmem:[#allocation3] sm:$0xff] %vm1223_vm9, %v2788_v28  ;;  %vm4205_vm11 = vcmask 293888  }
 0x1a1   : > { %v1125_v22 = vsel %vm4200_vm13, %v1116_v30, %v1045_v50  ;;  %1298 = vst.msk [vmem:[#allocation3 + $0x8] sm:$0xff] %vm1223_vm9, %v2788_v28  ;;  %vm4206_vm13 = vcmask 343040   ;;  %v2641_v50 = vld [vmem:[%s4054_s5] ss:$0 sm:$0xff] }
 0x1a2   : > { %2475 = vmatmul.msk.f32.gmra.mxu1 %vm4201_vm12, %v1125_v22  ;;  %1299 = vst.msk [vmem:[#allocation3 + $0x50] sm:$0xff] %vm1223_vm9, %v2788_v28  ;;  %vm4207_vm12 = vcmask 392192  }
 0x1a3   : > { %1300 = vst.msk [vmem:[#allocation3 + $0x58] sm:$0xff] %vm1223_vm9, %v2788_v28 }
 0x1a4   : > { %v869_v21 = vpop.permute.xlu1 %868  ;;  %v928_v0 = vpop.permute.xlu2 %927 }
 0x1a5   : > { %v1072_v40 = vsel %vm4203_vm15, %v1064_v33, %v869_v21  ;;  %vm4209_vm15 = vcmask 48128  }
 0x1a6   : > { %v926_v57 = vpop.permute.xlu0 %925  ;;  %v1081_v11 = vsel %vm4204_vm7, %v1072_v40, %v901_v43  ;;  %v1065_v51 = vsel %vm4209_vm15, %v737_v44, %v839_v55  ;;  %vm4210_vm7 = vcmask 97280   ;;  %vm4217_vm15 = vcmask 441344  }
 0x1a7   : > { %v1090_v37 = vsel %vm4190_vm10, %v1081_v11, %v926_v57  ;;  %vm4211_vm10 = vcmask 146432  }
 0x1a8   : > { %v1325_v44 = vld [vmem:[#allocation3 + $0x8] sm:$0xff] }
 0x1ac   : > { %v958_v25 = vpop.permute.xlu1 %957  ;;  %v1017_v61 = vpop.permute.xlu2 %1016 }
 0x1ad   : > { %v1099_v7 = vsel %vm4191_vm5, %v1090_v37, %v958_v25  ;;  %vm4212_vm5 = vcmask 195584  }
 0x1ae   : > { %v1015_v38 = vpop.permute.xlu0 %1014  ;;  %v1108_v9 = vsel %vm4205_vm11, %v1099_v7, %v990_v13  ;;  %vm4213_vm11 = vcmask 244736  }
 0x1af   : > { %v1117_v1 = vsel %vm4206_vm13, %v1108_v9, %v1015_v38  ;;  %vm4214_vm13 = vcmask 293888  }
 0x1b4   : > { %v1047_v24 = vpop.permute.xlu1 %1046 }
 0x1b5   : > { %v1126_v43 = vsel %vm4207_vm12, %v1117_v1, %v1047_v24  ;;  %vm4215_vm12 = vcmask 343040   ;;  %v2487_v1 = vld [vmem:[%s4057_s8 + $0x18] sm:$0xff] }
 0x1b6   : > { %v871_v5 = vpop.permute.xlu0 %870  ;;  %2476 = vmatmul.msk.f32.gmra.mxu1 %vm4208_vm1, %v1126_v43  ;;  %vm4216_vm1 = vcmask 392192   ;;  %1430 = vmatpush.msra.mxu3 %v2487_v1  ;;  %v2486_v43 = vld [vmem:[%s4057_s8 + $0x10] sm:$0xff] }
 0x1b7   : > { %v1073_v3 = vsel %vm4210_vm7, %v1065_v51, %v871_v5  ;;  %v1388_v5 = vld [vmem:[%s4057_s8 + $0x8] sm:$0xff]  ;;  %vm4218_vm7 = vnez %v4125_v47 }
 0x1b8   : > { %1495 = vmatpush.msra.mxu0 %v1388_v5  ;;  %1431 = vmatpush.msra.mxu3 %v2486_v43  ;;  %v1309_v51 = vld [vmem:[#allocation3 + $0x7] sm:$0xff] }
 0x1b9   : > { %2488 = vmatmul.msk.f32.vlgmr.msra.gmra.mxu3 %vm1223_vm9, %v1325_v44 }
 0x1bc   : > { %v903_v58 = vpop.permute.xlu1 %902 }
 0x1bd   : > { %v1082_v28 = vsel %vm4211_vm10, %v1073_v3, %v903_v58  ;;  %v1317_v58 = vsel %vm2975_vm4, %v1309_v51, 0.0  ;;  %v2525_v3 = vld [vmem:[%s4057_s8 + $0x48] sm:$0xff]  ;;  %vm4219_vm10 = vnez %v4137_v14 }
 0x1be   : > { %v960_v45 = vpop.permute.xlu0 %959  ;;  %v1091_v8 = vsel %vm4212_vm5, %v1082_v28, %v928_v0  ;;  %v1387_v0 = vld [vmem:[%s4057_s8] sm:$0xff]  ;;  %1694 = vmatpush.msrb.mxu1 %v2525_v3  ;;  %vm4220_vm5 = vnez %v4130_v62 }
 0x1bf   : > { %v1100_v17 = vsel %vm4213_vm11, %v1091_v8, %v960_v45  ;;  %1496 = vmatpush.msra.mxu0 %v1387_v0  ;;  %v2505_v45 = vld [vmem:[%s4057_s8 + $0x28] sm:$0xff]  ;;  %v2524_v28 = vld [vmem:[%s4057_s8 + $0x40] sm:$0xff]  ;;  %vm4221_vm11 = vnez %v4141_v29 }
 0x1c0   : > { %2496 = vmatmul.msk.f32.vlgmr.msra.gmra.mxu0 %vm1223_vm9, %v1317_v58  ;;  %1563 = vmatpush.msrb.mxu2 %v2505_v45  ;;  %v2504_v8 = vld [vmem:[%s4057_s8 + $0x20] sm:$0xff] }
 0x1c1   : > { %1695 = vmatpush.msrb.mxu1 %v2524_v28 }
 0x1c2   : > { %1564 = vmatpush.msrb.mxu2 %v2504_v8 }
 0x1c4   : > { %v992_v26 = vpop.permute.xlu1 %991 }
 0x1c5   : > { %v1109_v63 = vsel %vm4214_vm13, %v1100_v17, %v992_v26  ;;  %vm4222_vm13 = vnez %v4135_v12 }
 0x1c6   : > { %v1049_v27 = vpop.permute.xlu0 %1048  ;;  %v1118_v15 = vsel %vm4215_vm12, %v1109_v63, %v1017_v61  ;;  %v3442_v63 = vld [vmem:[%s4056_s7] ss:$0 sm:$0xff]  ;;  %vm4223_vm12 = vnez %v4139_v23 }
 0x1c7   : > { %v1127_v4 = vsel %vm4216_vm1, %v1118_v15, %v1049_v27  ;;  %vm4224_vm1 = vnez %v4143_v46 }
 0x1c8   : > { %2477 = vmatmul.msk.f32.gmra.mxu1 %vm4217_vm15, %v1127_v4  ;;  %vm4225_vm15 = vnez %v4150_v36 }
 0x1cb   : > { %v1185_v10 = vpop.f32.mrf.mxu0 }
 0x1cc   : > { %v1186_v16 = vadd.f32 %v2641_v50, %v1185_v10  ;;  %v2515_v10 = vld [vmem:[%s4057_s8 + $0x38] sm:$0xff] }
 0x1cd   : > { %1639 = vmatpush.msrb.mxu3 %v2515_v10 }
 0x1ce   : > { %v1209_v32 = vmax.f32 %v1186_v16, 0.0 }
 0x1d0   : > { %2478 = vmatmul.msk.f32.vlgmr.msra.gmra.mxu2 %vm1223_vm9, %v1209_v32 }
 0x1dd   : > { %v1188_v30 = vpop.f32.mrf.mxu1 }
 0x1de   : > { %v1189_v22 = vadd.f32 %v2641_v50, %v1188_v30 }
 0x1e0   : > { %v1210_v21 = vmax.f32 %v1189_v22, 0.0 }
 0x1e2   : > { %2479 = vmatmul.msk.f32.gmra.mxu2 %vm1223_vm9, %v1210_v21 }
 0x1e7   : > { %v1191_v60 = vpop.f32.mrf.mxu1 }
 0x1e8   : > { %v1192_v57 = vadd.f32 %v2641_v50, %v1191_v60 }
 0x1ea   : > { %v1211_v33 = vmax.f32 %v1192_v57, 0.0 }
 0x1ec   : > { %2480 = vmatmul.msk.f32.gmra.mxu2 %vm1223_vm9, %v1211_v33 }
 0x20b   : > { %v1194_v13 = vpop.f32.mrf.mxu1 }
 0x20c   : > { %v1195_v40 = vadd.f32 %v2641_v50, %v1194_v13 }
 0x20e   : > { %v1212_v11 = vmax.f32 %v1195_v40, 0.0 }
 0x210   : > { %2481 = vmatmul.msk.f32.gmra.mxu2 %vm1223_vm9, %v1212_v11 }
 0x215   : > { %v1197_v25 = vpop.f32.mrf.mxu1 }
 0x216   : > { %v1198_v37 = vadd.f32 %v2641_v50, %v1197_v25 }
 0x218   : > { %v1213_v38 = vmax.f32 %v1198_v37, 0.0 }
 0x21a   : > { %2482 = vmatmul.msk.f32.gmra.mxu2 %vm1223_vm9, %v1213_v38 }
 0x21f   : > { %v1200_v53 = vpop.f32.mrf.mxu1 }
 0x220   : > { %v1201_v7 = vadd.f32 %v2641_v50, %v1200_v53 }
 0x222   : > { %v1214_v48 = vmax.f32 %v1201_v7, 0.0 }
 0x224   : > { %2483 = vmatmul.msk.f32.gmra.mxu2 %vm1223_vm9, %v1214_v48 }
 0x233   : > { %v1203_v55 = vpop.f32.mrf.mxu1 }
 0x234   : > { %v1204_v9 = vadd.f32 %v2641_v50, %v1203_v55 }
 0x236   : > { %v1215_v24 = vmax.f32 %v1204_v9, 0.0 }
 0x238   : > { %2484 = vmatmul.msk.f32.gmra.mxu2 %vm1223_vm9, %v1215_v24  ;;  %v2514_v24 = vld [vmem:[%s4057_s8 + $0x30] sm:$0xff] }
 0x239   : > { %1640 = vmatpush.msrb.mxu3 %v2514_v24 }
 0x245   : > { %v1206_v61 = vpop.f32.mrf.mxu1 }
 0x246   : > { %v1207_v17 = vadd.f32 %v2641_v50, %v1206_v61 }
 0x248   : > { %v1216_v26 = vmax.f32 %v1207_v17, 0.0 }
 0x24a   : > { %2485 = vmatmul.msk.f32.gmra.mxu2 %vm1223_vm9, %v1216_v26 }
 0x253   : > { %v1265_v27 = vpop.f32.mrf.mxu2 }
 0x254   : > { %v1266_v15 = vadd.f32 %v3442_v63, %v1265_v27 }
 0x256   : > { %v1289_v4 = vmax.f32 %v1266_v15, 0.0 }
 0x258   : > { %1301 = vst.msk [vmem:[#allocation3 + $0x10] sm:$0xff] %vm1223_vm9, %v1289_v4 }
 0x25f   : > { %v1326_v50 = vld [vmem:[#allocation3 + $0x10] sm:$0xff] }
 0x260   : > { %v3449_v16 = vld [vmem:[#allocation3 + $0xf] sm:$0xff]  ;;  %2489 = vmatmul.msk.f32.gmra.mxu3 %vm1223_vm9, %v1326_v50  ;;  %2526 = vmatmul.msk.f32.vlgmr.msrb.gmra.mxu1 %vm1223_vm9, %v1326_v50 }
 0x261   : > { %v1333_v32 = vld [vmem:[#allocation3 + $0x9] sm:$0xff]  ;;  %v1318_v30 = vsel %vm3009_vm6, %v3449_v16, 0.0 }
 0x262   : > { %v1341_v22 = vsel %vm2962_vm3, %v1333_v32, 0.0  ;;  %2497 = vmatmul.msk.f32.gmra.mxu0 %vm1223_vm9, %v1318_v30  ;;  %v2535_v30 = vld [vmem:[%s4057_s8 + $0x58] sm:$0xff] }
 0x263   : > { %2506 = vmatmul.msk.f32.vlgmr.msrb.gmra.mxu2 %vm1223_vm9, %v1341_v22  ;;  %1770 = vmatpush.msrb.mxu0 %v2535_v30  ;;  %v2534_v22 = vld [vmem:[%s4057_s8 + $0x50] sm:$0xff] }
 0x265   : > { %v1268_v21 = vpop.f32.mrf.mxu2  ;;  %1771 = vmatpush.msrb.mxu0 %v2534_v22 }
 0x266   : > { %v1269_v60 = vadd.f32 %v3442_v63, %v1268_v21 }
 0x268   : > { %v1290_v57 = vmax.f32 %v1269_v60, 0.0 }
 0x26a   : > { %1302 = vst.msk [vmem:[#allocation3 + $0x18] sm:$0xff] %vm1223_vm9, %v1290_v57 }
 0x26f   : > { %v1271_v33 = vpop.f32.mrf.mxu2 }
 0x270   : > { %v1272_v13 = vadd.f32 %v3442_v63, %v1271_v33 }
 0x271   : > { %v3463_v40 = vld [vmem:[#allocation3 + $0x18] sm:$0xff] }
 0x272   : > { %v3465_v11 = vld [vmem:[#allocation3 + $0x17] sm:$0xff]  ;;  %v1291_v37 = vmax.f32 %v1272_v13, 0.0  ;;  %2490 = vmatmul.msk.f32.gmra.mxu3 %vm1223_vm9, %v3463_v40  ;;  %2527 = vmatmul.msk.f32.gmra.mxu1 %vm1223_vm9, %v3463_v40 }
 0x273   : > { %v3467_v25 = vld [vmem:[#allocation3 + $0x11] sm:$0xff]  ;;  %v1319_v38 = vsel %vm3046_vm8, %v3465_v11, 0.0 }
 0x274   : > { %v1342_v53 = vsel %vm4218_vm7, %v3467_v25, 0.0  ;;  %2498 = vmatmul.msk.f32.gmra.mxu0 %vm1223_vm9, %v1319_v38  ;;  %1303 = vst.msk [vmem:[#allocation3 + $0x20] sm:$0xff] %vm1223_vm9, %v1291_v37  ;;  %v2545_v37 = vld [vmem:[%s4057_s8 + $0x68] sm:$0xff]  ;;  %v2555_v38 = vld [vmem:[%s4057_s8 + $0x78] sm:$0xff] }
 0x275   : > { %2507 = vmatmul.msk.f32.gmra.mxu2 %vm1223_vm9, %v1342_v53  ;;  %1901 = vmatpush.msra.mxu3 %v2555_v38  ;;  %v2565_v53 = vld [vmem:[%s4057_s8 + $0x88] sm:$0xff]  ;;  %v1369_v38 = vsel %vm2975_vm4, %v3465_v11, 0.0 }
 0x276   : > { %1846 = vmatpush.msra.mxu2 %v2545_v37  ;;  %1977 = vmatpush.msra.mxu1 %v2565_v53 }
 0x27b   : > { %v3482_v7 = vld [vmem:[#allocation3 + $0x20] sm:$0xff] }
 0x27c   : > { %v3484_v48 = vld [vmem:[#allocation3 + $0x1f] sm:$0xff]  ;;  %2491 = vmatmul.msk.f32.gmra.mxu3 %vm1223_vm9, %v3482_v7  ;;  %2528 = vmatmul.msk.f32.gmra.mxu1 %vm1223_vm9, %v3482_v7 }
 0x27d   : > { %v3486_v55 = vld [vmem:[#allocation3 + $0x19] sm:$0xff]  ;;  %v1320_v9 = vsel %vm4219_vm10, %v3484_v48, 0.0  ;;  %v1370_v39 = vsel %vm3009_vm6, %v3484_v48, 0.0 }
 0x27e   : > { %v1343_v1 = vsel %vm4220_vm5, %v3486_v55, 0.0  ;;  %2499 = vmatmul.msk.f32.gmra.mxu0 %vm1223_vm9, %v1320_v9  ;;  %v1379_v37 = vsel %vm2962_vm3, %v3486_v55, 0.0 }
 0x27f   : > { %2508 = vmatmul.msk.f32.gmra.mxu2 %vm1223_vm9, %v1343_v1 }
 0x293   : > { %v1274_v5 = vpop.f32.mrf.mxu2 }
 0x294   : > { %v1275_v43 = vadd.f32 %v3442_v63, %v1274_v5  ;;  %v2564_v5 = vld [vmem:[%s4057_s8 + $0x80] sm:$0xff] }
 0x295   : > { %1978 = vmatpush.msra.mxu1 %v2564_v5 }
 0x296   : > { %v1292_v44 = vmax.f32 %v1275_v43, 0.0  ;;  %v2544_v43 = vld [vmem:[%s4057_s8 + $0x60] sm:$0xff] }
 0x297   : > { %1847 = vmatpush.msra.mxu2 %v2544_v43 }
 0x298   : > { %1304 = vst.msk [vmem:[#allocation3 + $0x28] sm:$0xff] %vm1223_vm9, %v1292_v44 }
 0x29d   : > { %v1277_v0 = vpop.f32.mrf.mxu2 }
 0x29e   : > { %v1278_v51 = vadd.f32 %v3442_v63, %v1277_v0 }
 0x29f   : > { %v3506_v58 = vld [vmem:[#allocation3 + $0x28] sm:$0xff] }
 0x2a0   : > { %v3508_v3 = vld [vmem:[#allocation3 + $0x27] sm:$0xff]  ;;  %v1293_v28 = vmax.f32 %v1278_v51, 0.0  ;;  %2492 = vmatmul.msk.f32.gmra.mxu3 %vm1223_vm9, %v3506_v58  ;;  %2529 = vmatmul.msk.f32.gmra.mxu1 %vm1223_vm9, %v3506_v58 }
 0x2a1   : > { %v3510_v45 = vld [vmem:[#allocation3 + $0x21] sm:$0xff]  ;;  %v1321_v8 = vsel %vm4221_vm11, %v3508_v3, 0.0  ;;  %v1353_v53 = vsel %vm4219_vm10, %v3508_v3, 0.0  ;;  %v1371_v52 = vsel %vm3046_vm8, %v3508_v3, 0.0 }
 0x2a2   : > { %v1344_v61 = vsel %vm4222_vm13, %v3510_v45, 0.0  ;;  %2500 = vmatmul.msk.f32.gmra.mxu0 %vm1223_vm9, %v1321_v8  ;;  %1305 = vst.msk [vmem:[#allocation3 + $0x30] sm:$0xff] %vm1223_vm9, %v1293_v28  ;;  %v1380_v34 = vsel %vm4218_vm7, %v3510_v45, 0.0 }
 0x2a3   : > { %2509 = vmatmul.msk.f32.gmra.mxu2 %vm1223_vm9, %v1344_v61 }
 0x2a7   : > { %v1280_v17 = vpop.f32.mrf.mxu2 }
 0x2a8   : > { %v1281_v26 = vadd.f32 %v3442_v63, %v1280_v17 }
 0x2a9   : > { %v3526_v15 = vld [vmem:[#allocation3 + $0x30] sm:$0xff] }
 0x2aa   : > { %v1294_v27 = vmax.f32 %v1281_v26, 0.0  ;;  %v3528_v4 = vld [vmem:[#allocation3 + $0x2f] sm:$0xff]  ;;  %2493 = vmatmul.msk.f32.gmra.mxu3 %vm1223_vm9, %v3526_v15  ;;  %2530 = vmatmul.msk.f32.gmra.mxu1 %vm1223_vm9, %v3526_v15  ;;  %v1350_v26 = vsel %vm2975_vm4, %v3449_v16, 0.0  ;;  %v1361_v16 = vsel %vm4218_vm7, %v3486_v55, 0.0  ;;  %vm2200_vm4 = vcmask 97328  }
 0x2ab   : > { %v3530_v10 = vld [vmem:[#allocation3 + $0x29] sm:$0xff]  ;;  %v1322_v50 = vsel %vm3151_vm14, %v3528_v4, 0.0  ;;  %v1372_v2 = vsel %vm4219_vm10, %v3528_v4, 0.0 }
 0x2ac   : > { %v1345_v32 = vsel %vm4223_vm12, %v3530_v10, 0.0  ;;  %1306 = vst.msk [vmem:[#allocation3 + $0x38] sm:$0xff] %vm1223_vm9, %v1294_v27  ;;  %2501 = vmatmul.msk.f32.gmra.mxu0 %vm1223_vm9, %v1322_v50  ;;  %v1360_v27 = vsel %vm2962_vm3, %v3467_v25, 0.0  ;;  %v1381_v47 = vsel %vm4220_vm5, %v3530_v10, 0.0  ;;  %vm4227_vm3 = vnez %v4161_v19 }
 0x2ad   : > { %2510 = vmatmul.msk.f32.gmra.mxu2 %vm1223_vm9, %v1345_v32  ;;  %v2554_v32 = vld [vmem:[%s4057_s8 + $0x70] sm:$0xff] }
 0x2ae   : > { %1902 = vmatpush.msra.mxu3 %v2554_v32 }
 0x2b3   : > { %v3551_v21 = vld [vmem:[#allocation3 + $0x38] sm:$0xff] }
 0x2b4   : > { %v3553_v60 = vld [vmem:[#allocation3 + $0x37] sm:$0xff]  ;;  %2494 = vmatmul.msk.f32.gmra.mxu3 %vm1223_vm9, %v3551_v21  ;;  %2531 = vmatmul.msk.f32.gmra.mxu1 %vm1223_vm9, %v3551_v21 }
 0x2b5   : > { %v3555_v57 = vld [vmem:[#allocation3 + $0x31] sm:$0xff]  ;;  %v1323_v33 = vsel %vm3197_vm0, %v3553_v60, 0.0  ;;  %v1373_v14 = vsel %vm4221_vm11, %v3553_v60, 0.0 }
 0x2b6   : > { %v1346_v13 = vsel %vm4224_vm1, %v3555_v57, 0.0  ;;  %2502 = vmatmul.msk.f32.gmra.mxu0 %vm1223_vm9, %v1323_v33  ;;  %v1352_v33 = vsel %vm3046_vm8, %v3484_v48, 0.0  ;;  %v1364_v55 = vsel %vm4223_vm12, %v3555_v57, 0.0  ;;  %v1355_v48 = vsel %vm3151_vm14, %v3553_v60, 0.0  ;;  %v1433_v60 = vpop.f32.mrf.mxu3 }
 0x2b7   : > { %2511 = vmatmul.msk.f32.gmra.mxu2 %vm1223_vm9, %v1346_v13  ;;  %v1362_v13 = vsel %vm4220_vm5, %v3510_v45, 0.0  ;;  %v1382_v62 = vsel %vm4222_vm13, %v3555_v57, 0.0  ;;  %vm4229_vm5 = vcmask 48128  }
 0x2bb   : > { %v1283_v9 = vpop.f32.mrf.mxu2 }
 0x2bc   : > { %v1284_v1 = vadd.f32 %v3442_v63, %v1283_v9  ;;  %v1363_v9 = vsel %vm4222_vm13, %v3530_v10, 0.0  ;;  %vm4231_vm13 = vmmov %vm4229_vm5 }
 0x2be   : > { %v1295_v24 = vmax.f32 %v1284_v1, 0.0 }
 0x2c0   : > { %1307 = vst.msk [vmem:[#allocation3 + $0x40] sm:$0xff] %vm1223_vm9, %v1295_v24 }
 0x2c7   : > { %v3586_v44 = vld [vmem:[#allocation3 + $0x40] sm:$0xff] }
 0x2c8   : > { %v3588_v0 = vld [vmem:[#allocation3 + $0x3f] sm:$0xff]  ;;  %2495 = vmatmul.msk.f32.gmra.mxu3 %vm1223_vm9, %v3586_v44  ;;  %2532 = vmatmul.msk.f32.gmra.mxu1 %vm1223_vm9, %v3586_v44 }
 0x2c9   : > { %v3590_v51 = vld [vmem:[#allocation3 + $0x39] sm:$0xff]  ;;  %v1324_v28 = vsel %vm3278_vm2, %v3588_v0, 0.0  ;;  %vm4226_vm2 = vnez %v4157_v42  ;;  %v1356_v3 = vsel %vm3197_vm0, %v3588_v0, 0.0  ;;  %v1374_v29 = vsel %vm3151_vm14, %v3588_v0, 0.0 }
 0x2ca   : > { %v1347_v8 = vsel %vm4225_vm15, %v3590_v51, 0.0  ;;  %2503 = vmatmul.msk.f32.gmra.mxu0 %vm1223_vm9, %v1324_v28  ;;  %v1365_v45 = vsel %vm4224_vm1, %v3590_v51, 0.0  ;;  %v1383_v12 = vsel %vm4223_vm12, %v3590_v51, 0.0  ;;  %v1498_v51 = vpop.f32.mrf.mxu0 }
 0x2cb   : > { %2512 = vmatmul.msk.f32.gmra.mxu2 %vm1223_vm9, %v1347_v8 }
 0x2cd   : > { %v1286_v61 = vpop.f32.mrf.mxu2 }
 0x2ce   : > { %v1287_v17 = vadd.f32 %v3442_v63, %v1286_v61  ;;  %v1351_v63 = vsel %vm3009_vm6, %v3465_v11, 0.0  ;;  %v1354_v11 = vsel %vm4221_vm11, %v3528_v4, 0.0  ;;  %vm4230_vm11 = vcmask 97280  }
 0x2cf   : > { %vm4232_vm12 = vmmov %vm4230_vm11 }
 0x2d0   : > { %v1296_v50 = vmax.f32 %v1287_v17, 0.0  ;;  %2516 = vmatmul.msk.f32.vlgmr.msrb.gmra.mxu3 %vm1223_vm9, %v1350_v26 }
 0x2d2   : > { %2536 = vmatmul.msk.f32.vlgmr.msrb.gmra.mxu0 %vm1223_vm9, %v1360_v27  ;;  %1308 = vst.msk [vmem:[#allocation3 + $0x48] sm:$0xff] %vm1223_vm9, %v1296_v50 }
 0x2d8   : > { %2517 = vmatmul.msk.f32.gmra.mxu3 %vm1223_vm9, %v1351_v63 }
 0x2d9   : > { %v3625_v25 = vld [vmem:[#allocation3 + $0x48] sm:$0xff] }
 0x2da   : > { %2537 = vmatmul.msk.f32.gmra.mxu0 %vm1223_vm9, %v1361_v16  ;;  %v1340_v30 = vld [vmem:[#allocation3 + $0x41] sm:$0xff]  ;;  %2533 = vmatmul.msk.f32.gmra.mxu1 %vm1223_vm9, %v3625_v25  ;;  %v1359_v57 = vld [vmem:[#allocation3 + $0x49] sm:$0xff] }
 0x2db   : > { %v1348_v22 = vsel %vm4226_vm2, %v1340_v30, 0.0  ;;  %v1366_v10 = vsel %vm4225_vm15, %v1340_v30, 0.0  ;;  %v1349_v4 = vld [vmem:[#allocation3 + $0x47] sm:$0xff]  ;;  %v1367_v24 = vsel %vm4226_vm2, %v1359_v57, 0.0  ;;  %v1384_v23 = vsel %vm4224_vm1, %v1340_v30, 0.0  ;;  %v1368_v43 = vld [vmem:[#allocation3 + $0x4f] sm:$0xff]  ;;  %vm4233_vm1 = vmmov %vm4230_vm11 }
 0x2dc   : > { %2513 = vmatmul.msk.f32.gmra.mxu2 %vm1223_vm9, %v1348_v22  ;;  %v1357_v1 = vsel %vm4227_vm3, %v1349_v4, 0.0  ;;  %v1385_v5 = vsel %vm4225_vm15, %v1359_v57, 0.0  ;;  %v1375_v46 = vsel %vm3197_vm0, %v1349_v4, 0.0  ;;  %v1376_v0 = vsel %vm4227_vm3, %v1368_v43, 0.0  ;;  %vm4234_vm15 = vmmov %vm4233_vm1 }
 0x2dd   : > { %v1697_v28 = vpop.f32.mrf.mxu1  ;;  %vm4235_vm3 = vmmov %vm4233_vm1 }
 0x2df   : > { %v1501_v8 = vpop.f32.mrf.mxu0 }
 0x2e0   : > { %2518 = vmatmul.msk.f32.gmra.mxu3 %vm1223_vm9, %v1352_v33 }
 0x2e2   : > { %2538 = vmatmul.msk.f32.gmra.mxu0 %vm1223_vm9, %v1362_v13  ;;  %2566 = vmatmul.msk.f32.vlgmr.msra.gmra.mxu1 %vm1223_vm9, %v1379_v37 }
 0x2e3   : > { %v1436_v54 = vpop.f32.mrf.mxu3 }
 0x2e4   : > { %2546 = vmatmul.msk.f32.vlgmr.msra.gmra.mxu2 %vm1223_vm9, %v1369_v38 }
 0x2e8   : > { %2519 = vmatmul.msk.f32.gmra.mxu3 %vm1223_vm9, %v1353_v53 }
 0x2ea   : > { %2539 = vmatmul.msk.f32.gmra.mxu0 %vm1223_vm9, %v1363_v9  ;;  %2567 = vmatmul.msk.f32.gmra.mxu1 %vm1223_vm9, %v1380_v34 }
 0x2ec   : > { %2547 = vmatmul.msk.f32.gmra.mxu2 %vm1223_vm9, %v1370_v39 }
 0x2ef   : > { %v1700_v17 = vpop.f32.mrf.mxu1 }
 0x2f0   : > { %2520 = vmatmul.msk.f32.gmra.mxu3 %vm1223_vm9, %v1354_v11 }
 0x2f1   : > { %v1504_v27 = vpop.f32.mrf.mxu0 }
 0x2f2   : > { %2540 = vmatmul.msk.f32.gmra.mxu0 %vm1223_vm9, %v1364_v55  ;;  %2568 = vmatmul.msk.f32.gmra.mxu1 %vm1223_vm9, %v1381_v47 }
 0x2f4   : > { %2548 = vmatmul.msk.f32.gmra.mxu2 %vm1223_vm9, %v1371_v52 }
 0x2f5   : > { %v3739_v36 = vpop.f32.mrf.mxu3 }
 0x2f6   : > { %v1505_v6 = vadd.f32 %v1504_v27, %v3739_v36 }
 0x2f8   : > { %2521 = vmatmul.msk.f32.gmra.mxu3 %vm1223_vm9, %v1355_v48 }
 0x2f9   : > { %v1703_v50 = vpop.f32.mrf.mxu1 }
 0x2fa   : > { %2541 = vmatmul.msk.f32.gmra.mxu0 %vm1223_vm9, %v1365_v45  ;;  %2569 = vmatmul.msk.f32.gmra.mxu1 %vm1223_vm9, %v1382_v62 }
 0x2fb   : > { %v1507_v63 = vpop.f32.mrf.mxu0 }
 0x2fc   : > { %2549 = vmatmul.msk.f32.gmra.mxu2 %vm1223_vm9, %v1372_v2 }
 0x2ff   : > { %v3743_v18 = vpop.f32.mrf.mxu3 }
 0x300   : > { %2522 = vmatmul.msk.f32.gmra.mxu3 %vm1223_vm9, %v1356_v3  ;;  %v1508_v27 = vadd.f32 %v1507_v63, %v3743_v18 }
 0x302   : > { %2542 = vmatmul.msk.f32.gmra.mxu0 %vm1223_vm9, %v1366_v10  ;;  %2570 = vmatmul.msk.f32.gmra.mxu1 %vm1223_vm9, %v1383_v12  ;;  %v1499_v10 = vadd.f32 %v1498_v51, %v1433_v60 }
 0x304   : > { %2550 = vmatmul.msk.f32.gmra.mxu2 %vm1223_vm9, %v1373_v14 }
 0x308   : > { %2523 = vmatmul.msk.f32.gmra.mxu3 %vm1223_vm9, %v1357_v1 }
 0x30a   : > { %2543 = vmatmul.msk.f32.gmra.mxu0 %vm1223_vm9, %v1367_v24  ;;  %2571 = vmatmul.msk.f32.gmra.mxu1 %vm1223_vm9, %v1384_v23 }
 0x30c   : > { %2551 = vmatmul.msk.f32.gmra.mxu2 %vm1223_vm9, %v1374_v29  ;;  %v1502_v29 = vadd.f32 %v1501_v8, %v1436_v54 }
 0x310   : > { %2556 = vmatmul.msk.f32.vlgmr.msra.gmra.mxu3 %vm1223_vm9, %v3463_v40  ;;  %v1378_v40 = vld [vmem:[#allocation3 + $0x51] sm:$0xff] }
 0x312   : > { %2572 = vmatmul.msk.f32.gmra.mxu1 %vm1223_vm9, %v1385_v5 }
 0x314   : > { %2552 = vmatmul.msk.f32.gmra.mxu2 %vm1223_vm9, %v1375_v46 }
 0x318   : > { %2557 = vmatmul.msk.f32.gmra.mxu3 %vm1223_vm9, %v3482_v7  ;;  %v1386_v7 = vsel %vm4226_vm2, %v1378_v40, 0.0 }
 0x31a   : > { %2573 = vmatmul.msk.f32.gmra.mxu1 %vm1223_vm9, %v1386_v7 }
 0x31c   : > { %2553 = vmatmul.msk.f32.gmra.mxu2 %vm1223_vm9, %v1376_v0 }
 0x31d   : > { %v3763_v30 = vpop.f32.mrf.mxu1 }
 0x31f   : > { %v3765_v22 = vpop.f32.mrf.mxu0 }
 0x320   : > { %2558 = vmatmul.msk.f32.gmra.mxu3 %vm1223_vm9, %v3506_v58 }
 0x323   : > { %v3750_v19 = vpop.f32.mrf.mxu3 }
 0x327   : > { %v3769_v13 = vpop.f32.mrf.mxu1 }
 0x328   : > { %2559 = vmatmul.msk.f32.gmra.mxu3 %vm1223_vm9, %v3526_v15  ;;  %v1566_v15 = vpop.f32.mrf.mxu2 }
 0x329   : > { %v3771_v38 = vpop.f32.mrf.mxu0  ;;  %v1590_v14 = vadd.f32 %v1566_v15, %v1499_v10 }
 0x32d   : > { %v3754_v58 = vpop.f32.mrf.mxu3 }
 0x330   : > { %2560 = vmatmul.msk.f32.gmra.mxu3 %vm1223_vm9, %v3551_v21  ;;  %v1569_v61 = vpop.f32.mrf.mxu2  ;;  %v1377_v21 = vld [vmem:[#allocation3 + $0x50] sm:$0xff] }
 0x331   : > { %v3775_v34 = vpop.f32.mrf.mxu1  ;;  %v1591_v46 = vadd.f32 %v1569_v61, %v1502_v29 }
 0x333   : > { %v3777_v39 = vpop.f32.mrf.mxu0 }
 0x337   : > { %v3758_v42 = vpop.f32.mrf.mxu3 }
 0x338   : > { %2561 = vmatmul.msk.f32.gmra.mxu3 %vm1223_vm9, %v3586_v44  ;;  %v1572_v44 = vpop.f32.mrf.mxu2 }
 0x339   : > { %v1592_v10 = vadd.f32 %v1572_v44, %v1505_v6 }
 0x340   : > { %2562 = vmatmul.msk.f32.gmra.mxu3 %vm1223_vm9, %v3625_v25  ;;  %v1575_v16 = vpop.f32.mrf.mxu2 }
 0x341   : > { %v1593_v29 = vadd.f32 %v1575_v16, %v1508_v27 }
 0x345   : > { %v3783_v47 = vpop.f32.mrf.mxu1 }
 0x347   : > { %v3785_v52 = vpop.f32.mrf.mxu0 }
 0x348   : > { %2563 = vmatmul.msk.f32.gmra.mxu3 %vm1223_vm9, %v1377_v21  ;;  %v3767_v33 = vpop.f32.mrf.mxu2 }
 0x34b   : > { %v3761_v26 = vpop.f32.mrf.mxu3 }
 0x34f   : > { %v1773_v2 = vpop.f32.mrf.mxu0 }
 0x350   : > { %v3773_v53 = vpop.f32.mrf.mxu2 }
 0x353   : > { %v1642_v32 = vpop.f32.mrf.mxu3 }
 0x354   : > { %v1666_v57 = vadd.f32 %v1642_v32, %v1590_v14  ;;  %v3801_v32 = vld [vmem:[%s4058_s9] ss:$0 sm:$0xff] }
 0x356   : > { %v1721_v5 = vadd.f32 %v1697_v28, %v1666_v57 }
 0x357   : > { %v3791_v62 = vpop.f32.mrf.mxu1  ;;  %v1776_v1 = vpop.f32.mrf.mxu0 }
 0x358   : > { %v3779_v11 = vpop.f32.mrf.mxu2  ;;  %v1797_v0 = vadd.f32 %v1773_v2, %v1721_v5 }
 0x35b   : > { %v1645_v25 = vpop.f32.mrf.mxu3 }
 0x35c   : > { %v1667_v43 = vadd.f32 %v1645_v25, %v1591_v46 }
 0x35e   : > { %v1722_v60 = vadd.f32 %v1700_v17, %v1667_v43 }
 0x35f   : > { %v1980_v4 = vpop.f32.mrf.mxu1  ;;  %v1779_v51 = vpop.f32.mrf.mxu0 }
 0x360   : > { %v3787_v48 = vpop.f32.mrf.mxu2  ;;  %v1798_v8 = vadd.f32 %v1776_v1, %v1722_v60 }
 0x363   : > { %v1648_v37 = vpop.f32.mrf.mxu3 }
 0x364   : > { %v1668_v28 = vadd.f32 %v1648_v37, %v1592_v10 }
 0x367   : > { %v1983_v40 = vpop.f32.mrf.mxu1  ;;  %v1782_v6 = vpop.f32.mrf.mxu0 }
 0x368   : > { %v1849_v3 = vpop.f32.mrf.mxu2 }
 0x369   : > { %v1873_v7 = vadd.f32 %v1849_v3, %v1797_v0  ;;  %v1723_v3 = vadd.f32 %v1703_v50, %v1668_v28  ;;  %v1511_v50 = vadd.f32 %v3765_v22, %v3750_v19 }
 0x36b   : > { %v1651_v9 = vpop.f32.mrf.mxu3  ;;  %v1799_v5 = vadd.f32 %v1779_v51, %v1723_v3 }
 0x36c   : > { %v1669_v1 = vadd.f32 %v1651_v9, %v1593_v29 }
 0x36e   : > { %v1724_v63 = vadd.f32 %v3763_v30, %v1669_v1 }
 0x36f   : > { %v1986_v36 = vpop.f32.mrf.mxu1  ;;  %v1785_v51 = vpop.f32.mrf.mxu0 }
 0x370   : > { %v1852_v24 = vpop.f32.mrf.mxu2  ;;  %v1800_v10 = vadd.f32 %v1782_v6, %v1724_v63 }
 0x371   : > { %v1874_v25 = vadd.f32 %v1852_v24, %v1798_v8 }
 0x373   : > { %v3781_v55 = vpop.f32.mrf.mxu3 }
 0x377   : > { %v1989_v9 = vpop.f32.mrf.mxu1 }
 0x378   : > { %v1855_v59 = vpop.f32.mrf.mxu2 }
 0x379   : > { %v1875_v43 = vadd.f32 %v1855_v59, %v1799_v5  ;;  %v1517_v5 = vadd.f32 %v3777_v39, %v3758_v42 }
 0x37b   : > { %v3789_v45 = vpop.f32.mrf.mxu3  ;;  %v1596_v63 = vadd.f32 %v3779_v11, %v1517_v5 }
 0x380   : > { %v1858_v44 = vpop.f32.mrf.mxu2 }
 0x381   : > { %v1876_v22 = vadd.f32 %v1858_v44, %v1800_v10 }
 0x383   : > { %v3793_v12 = vpop.f32.mrf.mxu3 }
 0x384   : > { %v1672_v42 = vadd.f32 %v3793_v12, %v1596_v63  ;;  %v1520_v12 = vadd.f32 %v3785_v52, %v3761_v26 }
 0x38b   : > { %v3795_v23 = vpop.f32.mrf.mxu3 }
 0x393   : > { %v1904_v21 = vpop.f32.mrf.mxu3 }
 0x394   : > { %v1928_v15 = vadd.f32 %v1904_v21, %v1873_v7  ;;  %v1594_v7 = vadd.f32 %v3767_v33, %v1511_v50  ;;  %v1514_v33 = vadd.f32 %v3771_v38, %v3754_v58 }
 0x396   : > { %v2004_v54 = vadd.f32 %v1980_v4, %v1928_v15  ;;  %v1670_v15 = vadd.f32 %v3781_v55, %v1594_v7 }
 0x398   : > { %v2016_v61 = vadd.f32 %v3801_v32, %v2004_v54  ;;  %v1861_v54 = vpop.f32.mrf.mxu2 }
 0x39a   : > { %2152 = vrot.lane.b32.xlu1 %v2016_v61, %s4159_s20  ;;  %v3805_v2 = vadd.f32 2.0, %v2016_v61 }
 0x39b   : > { %v1907_v17 = vpop.f32.mrf.mxu3 }
 0x39c   : > { %v2032_v14 = vand.u32 2147483647, %v3805_v2  ;;  %v1929_v57 = vadd.f32 %v1907_v17, %v1874_v25  ;;  %v1725_v25 = vadd.f32 %v3769_v13, %v1670_v15  ;;  %v1595_v17 = vadd.f32 %v3773_v53, %v1514_v33 }
 0x39d   : > { %vm2112_vm2 = vcmp.ge.f32.partialorder %v3805_v2, 0.0 }
 0x39e   : > { %v2040_v37 = vsub.f32 0.0, %v2032_v14  ;;  %v2005_v4 = vadd.f32 %v1983_v40, %v1929_v57  ;;  %v1671_v14 = vadd.f32 %v3789_v45, %v1595_v17  ;;  %v1992_v57 = vpop.f32.mrf.mxu1  ;;  %v1801_v6 = vadd.f32 %v1785_v51, %v1725_v25 }
 0x39f   : > { %v1597_v17 = vadd.f32 %v3787_v48, %v1520_v12 }
 0x3a0   : > { %v2048_v24 = vmul.f32 1.442695, %v2040_v37  ;;  %v2017_v46 = vadd.f32 %v3801_v32, %v2005_v4  ;;  %v1788_v37 = vpop.f32.mrf.mxu0  ;;  %v1877_v4 = vadd.f32 %v1861_v54, %v1801_v6  ;;  %v1864_v1 = vpop.f32.mrf.mxu2 }
 0x3a2   : > { %2644 = vpow2.f32 %v2048_v24  ;;  %2154 = vrot.lane.b32.xlu2 %v2017_v46, %s4159_s20  ;;  %v3811_v0 = vadd.f32 2.0, %v2017_v46  ;;  %v1726_v24 = vadd.f32 %v3775_v34, %v1671_v14 }
 0x3a3   : > { %v1910_v18 = vpop.f32.mrf.mxu3 }
 0x3a4   : > { %v2033_v16 = vand.u32 2147483647, %v3811_v0  ;;  %v1930_v40 = vadd.f32 %v1910_v18, %v1875_v43  ;;  %v1802_v39 = vadd.f32 %v1788_v37, %v1726_v24  ;;  %v2065_v54 = vmin.f32 %v3811_v0, 0.0 }
 0x3a5   : > { %vm2113_vm10 = vcmp.ge.f32.partialorder %v3811_v0, 0.0 }
 0x3a6   : > { %v2041_v21 = vsub.f32 0.0, %v2033_v16  ;;  %v2006_v60 = vadd.f32 %v1986_v36, %v1930_v40  ;;  %v1995_v15 = vpop.f32.mrf.mxu1  ;;  %v1878_v10 = vadd.f32 %v1864_v1, %v1802_v39 }
 0x3a8   : > { %v2645_v59 = vpop.eup %2644  ;;  %v2050_v28 = vmul.f32 1.442695, %v2041_v21  ;;  %v2018_v8 = vadd.f32 %v3801_v32, %v2006_v60  ;;  %v2064_v21 = vmin.f32 %v3805_v2, 0.0  ;;  %v1727_v2 = vadd.f32 %v3783_v47, %v1672_v42  ;;  %v1791_v33 = vpop.f32.mrf.mxu0 }
 0x3a9   : > { %v2072_v19 = vadd.f32 1.0, %v2645_v59  ;;  %v1673_v47 = vadd.f32 %v3795_v23, %v1597_v17 }
 0x3aa   : > { %2646 = vpow2.f32 %v2050_v28  ;;  %2156 = vrot.lane.b32.xlu0 %v2018_v8, %s4159_s20  ;;  %v3821_v30 = vadd.f32 2.0, %v2018_v8  ;;  %v1803_v52 = vadd.f32 %v1791_v33, %v1727_v2 }
 0x3ab   : > { %v1913_v61 = vpop.f32.mrf.mxu3  ;;  %2648 = vrcp.f32 %v2072_v19  ;;  %v1728_v23 = vadd.f32 %v3791_v62, %v1673_v47 }
 0x3ac   : > { %v2034_v55 = vand.u32 2147483647, %v3821_v30  ;;  %v1931_v36 = vadd.f32 %v1913_v61, %v1876_v22  ;;  %2650 = vlog2.f32 %v2072_v19  ;;  %v1867_v61 = vpop.f32.mrf.mxu2  ;;  %v2066_v48 = vmin.f32 %v3821_v30, 0.0 }
 0x3ad   : > { %v1879_v37 = vadd.f32 %v1867_v61, %v1803_v52  ;;  %vm2114_vm6 = vcmp.ge.f32.partialorder %v3821_v30, 0.0 }
 0x3ae   : > { %v2042_v27 = vsub.f32 0.0, %v2034_v55  ;;  %v2007_v3 = vadd.f32 %v1989_v9, %v1931_v36  ;;  %v1998_v24 = vpop.f32.mrf.mxu1 }
 0x3b0   : > { %v3829_v29 = vpop.eup %2646  ;;  %v2052_v44 = vmul.f32 1.442695, %v2042_v27  ;;  %v2019_v58 = vadd.f32 %v3801_v32, %v2007_v3 }
 0x3b1   : > { %v3833_v13 = vadd.f32 1.0, %v3829_v29  ;;  %v2649_v38 = vpop.eup %2648 }
 0x3b2   : > { %2652 = vpow2.f32 %v2052_v44  ;;  %2158 = vrot.lane.b32.xlu1 %v2019_v58, %s4159_s20  ;;  %v3836_v53 = vadd.f32 2.0, %v2019_v58  ;;  %v2651_v45 = vpop.eup %2650  ;;  %v2120_v43 = vmul.f32 %v2649_v38, %v2645_v59 }
 0x3b3   : > { %2654 = vlog2.f32 %v3833_v13  ;;  %v1916_v46 = vpop.f32.mrf.mxu3  ;;  %v2081_v40 = vmul.f32 0.6931472, %v2651_v45 }
 0x3b4   : > { %v2035_v18 = vand.u32 2147483647, %v3836_v53  ;;  %v1932_v50 = vadd.f32 %v1916_v46, %v1877_v4  ;;  %v3845_v16 = vsel %vm2112_vm2, %v2649_v38, %v2120_v43  ;;  %vm2115_vm8 = vcmp.ge.f32.partialorder %v3836_v53, 0.0  ;;  %vm4236_vm2 = vmmov %vm4233_vm1 }
 0x3b5   : > { %v2096_v28 = vsub.f32 %v2064_v21, %v2081_v40  ;;  %v1794_v40 = vpop.f32.mrf.mxu0 }
 0x3b6   : > { %v2043_v9 = vsub.f32 0.0, %v2035_v18  ;;  %v2008_v7 = vadd.f32 %v1992_v57, %v1932_v50  ;;  %v1804_v21 = vadd.f32 %v1794_v40, %v1728_v23  ;;  %v2001_v2 = vpop.f32.mrf.mxu1 }
 0x3b7   : > { %v2201_v27 = vsel %vm2200_vm4, %v2096_v28, 0.0 }
 0x3b8   : > { %v2653_v34 = vpop.eup %2652  ;;  %v2054_v60 = vmul.f32 1.442695, %v2043_v9  ;;  %v2020_v59 = vadd.f32 %v3801_v32, %v2008_v7  ;;  %v1870_v9 = vpop.f32.mrf.mxu2 }
 0x3b9   : > { %v2655_v51 = vpop.eup %2654  ;;  %v2074_v11 = vadd.f32 1.0, %v2653_v34 }
 0x3ba   : > { %v2083_v8 = vmul.f32 0.6931472, %v2655_v51  ;;  %2656 = vpow2.f32 %v2054_v60  ;;  %2160 = vrot.lane.b32.xlu2 %v2020_v59, %s4159_s20  ;;  %v3852_v19 = vadd.f32 2.0, %v2020_v59 }
 0x3bb   : > { %2658 = vlog2.f32 %v2074_v11  ;;  %v1919_v22 = vpop.f32.mrf.mxu3 }
 0x3bc   : > { %v2097_v25 = vsub.f32 %v2065_v54, %v2083_v8  ;;  %v2036_v55 = vand.u32 2147483647, %v3852_v19  ;;  %v1933_v36 = vadd.f32 %v1919_v22, %v1878_v10  ;;  %2660 = vrcp.f32 %v2074_v11 }
 0x3bd   : > { %v1880_v54 = vadd.f32 %v1870_v9, %v1804_v21  ;;  %v2067_v11 = vmin.f32 %v3836_v53, 0.0  ;;  %vm2116_vm14 = vcmp.ge.f32.partialorder %v3852_v19, 0.0 }
 0x3be   : > { %v2202_v3 = vsel %vm2200_vm4, %v2097_v25, 0.0  ;;  %v2044_v14 = vsub.f32 0.0, %v2036_v55  ;;  %v2009_v26 = vadd.f32 %v1995_v15, %v1933_v36 }
 0x3bf   : > { %v2203_v57 = vadd.f32 %v2202_v3, %v2201_v27 }
 0x3c0   : > { %v2657_v6 = vpop.eup %2656  ;;  %v2056_v44 = vmul.f32 1.442695, %v2044_v14  ;;  %v2021_v58 = vadd.f32 %v3801_v32, %v2009_v26 }
 0x3c1   : > { %v2659_v38 = vpop.eup %2658  ;;  %v2075_v4 = vadd.f32 1.0, %v2657_v6 }
 0x3c2   : > { %v2085_v1 = vmul.f32 0.6931472, %v2659_v38  ;;  %2662 = vpow2.f32 %v2056_v44  ;;  %2162 = vrot.lane.b32.xlu0 %v2021_v58, %s4159_s20  ;;  %v3865_v45 = vadd.f32 2.0, %v2021_v58  ;;  %v2661_v5 = vpop.eup %2660  ;;  %v2068_v44 = vmin.f32 %v3852_v19, 0.0 }
 0x3c3   : > { %2664 = vlog2.f32 %v2075_v4  ;;  %v1922_v46 = vpop.f32.mrf.mxu3  ;;  %v2122_v63 = vmul.f32 %v2661_v5, %v2653_v34 }
 0x3c4   : > { %v2098_v43 = vsub.f32 %v2066_v48, %v2085_v1  ;;  %v2037_v18 = vand.u32 2147483647, %v3865_v45  ;;  %v1934_v50 = vadd.f32 %v1922_v46, %v1879_v37  ;;  %2666 = vrcp.f32 %v2075_v4 }
 0x3c5   : > { %v3871_v62 = vsel %vm2114_vm6, %v2661_v5, %v2122_v63  ;;  %vm2117_vm0 = vcmp.ge.f32.partialorder %v3865_v45, 0.0  ;;  %vm4238_vm6 = vmmov %vm4233_vm1 }
 0x3c6   : > { %v2204_v7 = vsel %vm2200_vm4, %v2098_v43, 0.0  ;;  %v2045_v42 = vsub.f32 0.0, %v2037_v18  ;;  %v2010_v39 = vadd.f32 %v1998_v24, %v1934_v50  ;;  %v2069_v18 = vmin.f32 %v3865_v45, 0.0 }
 0x3c7   : > { %v2205_v60 = vadd.f32 %v2204_v7, %v2203_v57 }
 0x3c8   : > { %v2663_v59 = vpop.eup %2662  ;;  %v2058_v51 = vmul.f32 1.442695, %v2045_v42  ;;  %v2022_v15 = vadd.f32 %v3801_v32, %v2010_v39 }
 0x3c9   : > { %v2665_v10 = vpop.eup %2664  ;;  %v2076_v34 = vadd.f32 1.0, %v2663_v59 }
 0x3ca   : > { %v2087_v28 = vmul.f32 0.6931472, %v2665_v10  ;;  %2668 = vpow2.f32 %v2058_v51  ;;  %2164 = vrot.lane.b32.xlu1 %v2022_v15, %s4159_s20  ;;  %v3876_v8 = vadd.f32 2.0, %v2022_v15  ;;  %v2667_v30 = vpop.eup %2666 }
 0x3cb   : > { %2670 = vlog2.f32 %v2076_v34  ;;  %v1925_v12 = vpop.f32.mrf.mxu3  ;;  %v2123_v25 = vmul.f32 %v2667_v30, %v2657_v6 }
 0x3cc   : > { %v2099_v22 = vsub.f32 %v2067_v11, %v2087_v28  ;;  %v2038_v33 = vand.u32 2147483647, %v3876_v8  ;;  %v1935_v61 = vadd.f32 %v1925_v12, %v1880_v54  ;;  %2672 = vrcp.f32 %v2076_v34 }
 0x3cd   : > { %v3881_v3 = vsel %vm2115_vm8, %v2667_v30, %v2123_v25  ;;  %v2070_v51 = vmin.f32 %v3876_v8, 0.0  ;;  %vm2118_vm9 = vcmp.ge.f32.partialorder %v3876_v8, 0.0 }
 0x3ce   : > { %v2206_v55 = vsel %vm2200_vm4, %v2099_v22, 0.0  ;;  %v2046_v36 = vsub.f32 0.0, %v2038_v33  ;;  %v2011_v17 = vadd.f32 %v2001_v2, %v1935_v61 }
 0x3cf   : > { %v2207_v27 = vadd.f32 %v2206_v55, %v2205_v60 }
 0x3d0   : > { %v2669_v14 = vpop.eup %2668  ;;  %v2060_v26 = vmul.f32 1.442695, %v2046_v36  ;;  %v2023_v47 = vadd.f32 %v3801_v32, %v2011_v17 }
 0x3d1   : > { %v2671_v52 = vpop.eup %2670  ;;  %v2077_v57 = vadd.f32 1.0, %v2669_v14 }
 0x3d2   : > { %v2089_v58 = vmul.f32 0.6931472, %v2671_v52  ;;  %2674 = vpow2.f32 %v2060_v26  ;;  %v2031_v6 = vadd.f32 2.0, %v2023_v47  ;;  %2166 = vrot.lane.b32.xlu2 %v2023_v47, %s4159_s20  ;;  %v2673_v38 = vpop.eup %2672  ;;  %s4228_s20 = sshll.u32 %s2924_s24, 6 }
 0x3d3   : > { %2676 = vlog2.f32 %v2077_v57  ;;  %v2124_v4 = vmul.f32 %v2673_v38, %v2663_v59  ;;  %s3910_s30 = scalar_lea.vmem %s4059_s10, %s4228_s20  ;;  %s2708_s20 = scalar_lea.hbm %s2707_s27, 1 }
 0x3d4   : > { %v2100_v37 = vsub.f32 %v2068_v44, %v2089_v58  ;;  %v2039_v53 = vand.u32 2147483647, %v2031_v6  ;;  %2678 = vrcp.f32 %v2077_v57  ;;  %v2071_v12 = vmin.f32 %v2031_v6, 0.0  ;;  %p2709_p11 = scmp.ne.s32.totalorder %s2707_s27, %s2708_s20  ;;  %p2714_p1 = scmp.lt.s32.totalorder %s2712_s2, %s2708_s20 }
 0x3d5   : > { %v3888_v1 = vsel %vm2116_vm14, %v2673_v38, %v2124_v4  ;;  %vm2119_vm7 = vcmp.ge.f32.partialorder %v2031_v6, 0.0  ;;  %vm4240_vm14 = vmmov %vm4233_vm1 }
 0x3d6   : > { %v2208_v48 = vsel %vm2200_vm4, %v2100_v37, 0.0  ;;  %v2047_v32 = vsub.f32 0.0, %v2039_v53  ;;  %p2710_p12 = pnand %p2709_p11, %p2906_p5  ;;  %p2715_p2 = por %p2714_p1, %p2713_p0 }
 0x3d7   : > { %v2209_v5 = vadd.f32 %v2208_v48, %v2207_v27 }
 0x3d8   : > { %v2675_v23 = vpop.eup %2674  ;;  %v2062_v24 = vmul.f32 1.442695, %v2047_v32  ;;  %p2711_p13 = pneg %p2710_p12 }
 0x3d9   : > { %v2677_v46 = vpop.eup %2676  ;;  %v2078_v43 = vadd.f32 1.0, %v2675_v23 }
 0x3da   : > { %v2091_v50 = vmul.f32 0.6931472, %v2677_v46  ;;  %2680 = vpow2.f32 %v2062_v24  ;;  %v2679_v63 = vpop.eup %2678  ;;  %v2140_v24 = vmul.f32 %v3888_v1, %v3019_v56  ;;  %p2716_p3 = pnand %p2715_p2, %p2711_p13 }
 0x3db   : > { %2682 = vlog2.f32 %v2078_v43  ;;  %v2125_v9 = vmul.f32 %v2679_v63, %v2669_v14 }
 0x3dc   : > { %v2101_v40 = vsub.f32 %v2069_v18, %v2091_v50  ;;  %2684 = vrcp.f32 %v2078_v43  ;;  %v2138_v18 = vmul.f32 %v3871_v62, %v2981_v41 }
 0x3dd   : > { %v3893_v7 = vsel %vm2117_vm0, %v2679_v63, %v2125_v9  ;;  %vm4241_vm0 = vmmov %vm4233_vm1 }
 0x3de   : > { %v2210_v19 = vsel %vm2200_vm4, %v2101_v40, 0.0 }
 0x3df   : > { %v2211_v42 = vadd.f32 %v2210_v19, %v2209_v5 }
 0x3e0   : > { %v2681_v39 = vpop.eup %2680 }
 0x3e1   : > { %v2683_v21 = vpop.eup %2682  ;;  %v2079_v60 = vadd.f32 1.0, %v2681_v39 }
 0x3e2   : > { %v2685_v59 = vpop.eup %2684  ;;  %v2093_v15 = vmul.f32 0.6931472, %v2683_v21 }
 0x3e3   : > { %2686 = vlog2.f32 %v2079_v60  ;;  %v2126_v10 = vmul.f32 %v2685_v59, %v2675_v23 }
 0x3e4   : > { %v2102_v54 = vsub.f32 %v2070_v51, %v2093_v15  ;;  %2688 = vrcp.f32 %v2079_v60 }
 0x3e5   : > { %v3897_v34 = vsel %vm2118_vm9, %v2685_v59, %v2126_v10  ;;  %2690 = vrcp.f32 %v3833_v13  ;;  %vm4242_vm9 = vmmov %vm4241_vm0 }
 0x3e6   : > { %v2212_v45 = vsel %vm2200_vm4, %v2102_v54, 0.0 }
 0x3e7   : > { %v2213_v11 = vadd.f32 %v2212_v45, %v2211_v42 }
 0x3e9   : > { %v2687_v28 = vpop.eup %2686 }
 0x3ea   : > { %v2689_v30 = vpop.eup %2688  ;;  %v2095_v2 = vmul.f32 0.6931472, %v2687_v28 }
 0x3eb   : > { %v2127_v22 = vmul.f32 %v2689_v30, %v2681_v39  ;;  %v2691_v8 = vpop.eup %2690  ;;  %v2139_v39 = vmul.f32 %v3881_v3, %v2998_v49 }
 0x3ec   : > { %v2103_v33 = vsub.f32 %v2071_v12, %v2095_v2  ;;  %v2121_v27 = vmul.f32 %v2691_v8, %v3829_v29  ;;  %v2136_v29 = vmul.f32 %v3845_v16, %v2955_v31 }
 0x3ed   : > { %v2135_v61 = vsel %vm2119_vm7, %v2689_v30, %v2127_v22  ;;  %v4251_v22 = vld [vmem:[#allocation12_spill] sm:$0xff] }
 0x3ee   : > { %v2214_v25 = vsel %vm2200_vm4, %v2103_v33, 0.0  ;;  %v2129_v47 = vsel %vm2113_vm10, %v2691_v8, %v2121_v27  ;;  %vm4237_vm4 = vmmov %vm4229_vm5  ;;  %v2143_v3 = vmul.f32 %v2135_v61, %v3099_v20  ;;  %v2141_v33 = vmul.f32 %v3893_v7, %v4251_v22 }
 0x3ef   : > { %v2215_v55 = vadd.f32 %v2214_v25, %v2213_v11  ;;  %v2137_v13 = vmul.f32 %v2129_v47, %v2966_v35  ;;  %vm4239_vm8 = vmmov %vm4237_vm4 }
 0x3f0   : > { %vm4243_vm7 = vmmov %vm4237_vm4 }
 0x3f1   : > { %v2216_v36 = vrot.slane %v2215_v55, 4  ;;  %vm4244_vm10 = vmmov %vm4241_vm0 }
 0x3f3   : > { %v2217_v17 = vadd.f32 %v2216_v36, %v2215_v55 }
 0x3f5   : > { %v2218_v14 = vrot.slane %v2217_v17, 2 }
 0x3f7   : > { %v2219_v26 = vadd.f32 %v2218_v14, %v2217_v17  ;;  %v4256_v14 = vld [vmem:[#allocation13_spill] sm:$0xff] }
 0x3f9   : > { %v2220_v52 = vrot.slane %v2219_v26, 1 }
 0x3fb   : > { %v2221_v57 = vadd.f32 %v2220_v52, %v2219_v26  ;;  %v2142_v26 = vmul.f32 %v3897_v34, %v4256_v14 }
 0x3fc   : > { %v2155_v44 = vpop.permute.xlu2 %2154 }
 0x3fd   : > { %v2177_v58 = vadd.f32 %v2155_v44, %v2137_v13  ;;  %2223 = vrot.lane.b32.xlu0 %v2221_v57, %s2797_s15 }
 0x3ff   : > { %v2185_v0 = vsel %vm4229_vm5, %v2966_v35, %v2177_v58  ;;  %vm4245_vm5 = vmmov %vm4241_vm0 }
 0x400   : > { %2193 = vst.msk [vmem:[%s3910_s30 + $0x8] sm:$0xff] %vm4230_vm11, %v2185_v0  ;;  %v2252_v37 = vmul.f32 %v2185_v0, %v2185_v0  ;;  %v2229_v4 = vsel %vm4232_vm12, %v2185_v0, 0.0  ;;  %vm4246_vm11 = vmmov %vm4241_vm0 }
 0x401   : > { %vm4248_vm12 = vmmov %vm4241_vm0 }
 0x402   : > { %v2260_v5 = vsel %vm4235_vm3, %v2252_v37, 0.0 }
 0x40c   : > { %v2153_v6 = vpop.permute.xlu1 %2152 }
 0x40d   : > { %v2176_v38 = vadd.f32 %v2153_v6, %v2136_v29 }
 0x40f   : > { %v2184_v53 = vsel %vm4231_vm13, %v2955_v31, %v2176_v38  ;;  %vm4247_vm13 = vmmov %vm4241_vm0 }
 0x410   : > { %2192 = vst.msk [vmem:[%s3910_s30] sm:$0xff] %vm4233_vm1, %v2184_v53  ;;  %v2228_v48 = vsel %vm4234_vm15, %v2184_v53, 0.0  ;;  %v2251_v35 = vmul.f32 %v2184_v53, %v2184_v53  ;;  %vm4249_vm1 = vmmov %vm4237_vm4 }
 0x411   : > { %v2230_v32 = vadd.f32 %v2229_v4, %v2228_v48  ;;  %vm4250_vm15 = vmmov %vm4241_vm0 }
 0x412   : > { %v2259_v16 = vsel %vm4236_vm2, %v2251_v35, 0.0  ;;  %vm4252_vm3 = vmmov %vm4249_vm1 }
 0x413   : > { %v2261_v23 = vadd.f32 %v2260_v5, %v2259_v16  ;;  %vm4253_vm2 = vmmov %vm4241_vm0 }
 0x414   : > { %v2161_v46 = vpop.permute.xlu2 %2160 }
 0x415   : > { %v2180_v43 = vadd.f32 %v2161_v46, %v2140_v24 }
 0x417   : > { %v2188_v31 = vsel %vm4237_vm4, %v3019_v56, %v2180_v43  ;;  %vm4254_vm4 = vmmov %vm4241_vm0 }
 0x418   : > { %2196 = vst.msk [vmem:[%s3910_s30 + $0x20] sm:$0xff] %vm4238_vm6, %v2188_v31  ;;  %v2255_v59 = vmul.f32 %v2188_v31, %v2188_v31  ;;  %v2235_v10 = vsel %vm4246_vm11, %v2188_v31, 0.0  ;;  %vm4255_vm6 = vmmov %vm4241_vm0 }
 0x41a   : > { %v2266_v28 = vsel %vm4248_vm12, %v2255_v59, 0.0 }
 0x41c   : > { %v2157_v50 = vpop.permute.xlu0 %2156 }
 0x41d   : > { %v2178_v63 = vadd.f32 %v2157_v50, %v2138_v18 }
 0x41f   : > { %v2186_v40 = vsel %vm4239_vm8, %v2981_v41, %v2178_v63  ;;  %vm4257_vm8 = vmmov %vm4249_vm1 }
 0x420   : > { %2194 = vst.msk [vmem:[%s3910_s30 + $0x10] sm:$0xff] %vm4240_vm14, %v2186_v40  ;;  %v2231_v1 = vsel %vm4241_vm0, %v2186_v40, 0.0  ;;  %v2253_v9 = vmul.f32 %v2186_v40, %v2186_v40  ;;  %vm4258_vm14 = vmmov %vm4241_vm0 }
 0x421   : > { %v2232_v19 = vadd.f32 %v2231_v1, %v2230_v32 }
 0x422   : > { %v2262_v42 = vsel %vm4242_vm9, %v2253_v9, 0.0  ;;  %vm4259_vm9 = vmmov %vm4241_vm0 }
 0x423   : > { %v2263_v56 = vadd.f32 %v2262_v42, %v2261_v23 }
 0x424   : > { %v2159_v21 = vpop.permute.xlu1 %2158 }
 0x425   : > { %v2179_v60 = vadd.f32 %v2159_v21, %v2139_v39 }
 0x427   : > { %v2187_v62 = vsel %vm4243_vm7, %v2998_v49, %v2179_v60  ;;  %vm4260_vm7 = vmmov %vm4241_vm0 }
 0x428   : > { %2195 = vst.msk [vmem:[%s3910_s30 + $0x18] sm:$0xff] %vm4244_vm10, %v2187_v62  ;;  %v2233_v41 = vsel %vm4245_vm5, %v2187_v62, 0.0  ;;  %v2254_v51 = vmul.f32 %v2187_v62, %v2187_v62  ;;  %vm4261_vm10 = vmmov %vm4241_vm0  ;;  %vm2249_vm5 = vcmask 90112  }
 0x429   : > { %v2234_v15 = vadd.f32 %v2233_v41, %v2232_v19 }
 0x42a   : > { %v2264_v54 = vsel %vm4247_vm13, %v2254_v51, 0.0 }
 0x42b   : > { %v2265_v45 = vadd.f32 %v2264_v54, %v2263_v56  ;;  %v2236_v11 = vadd.f32 %v2235_v10, %v2234_v15 }
 0x42c   : > { %v2167_v49 = vpop.permute.xlu2 %2166 }
 0x42d   : > { %v2183_v30 = vadd.f32 %v2167_v49, %v2143_v3  ;;  %v2267_v12 = vadd.f32 %v2266_v28, %v2265_v45 }
 0x42f   : > { %v2191_v2 = vsel %vm4249_vm1, %v3099_v20, %v2183_v30 }
 0x430   : > { %2199 = vst.msk [vmem:[%s3910_s30 + $0x38] sm:$0xff] %vm4250_vm15, %v2191_v2  ;;  %v2258_v13 = vmul.f32 %v2191_v2, %v2191_v2  ;;  %v2241_v0 = vsel %vm4259_vm9, %v2191_v2, 0.0 }
 0x432   : > { %v2272_v38 = vsel %vm4261_vm10, %v2258_v13, 0.0 }
 0x434   : > { %v2163_v25 = vpop.permute.xlu0 %2162 }
 0x435   : > { %v2181_v55 = vadd.f32 %v2163_v25, %v2141_v33 }
 0x437   : > { %v2189_v61 = vsel %vm4252_vm3, %v4251_v22, %v2181_v55 }
 0x438   : > { %2197 = vst.msk [vmem:[%s3910_s30 + $0x28] sm:$0xff] %vm4253_vm2, %v2189_v61  ;;  %v2237_v8 = vsel %vm4254_vm4, %v2189_v61, 0.0  ;;  %v2256_v36 = vmul.f32 %v2189_v61, %v2189_v61 }
 0x439   : > { %v2238_v17 = vadd.f32 %v2237_v8, %v2236_v11 }
 0x43a   : > { %v2268_v27 = vsel %vm4255_vm6, %v2256_v36, 0.0 }
 0x43b   : > { %v2269_v20 = vadd.f32 %v2268_v27, %v2267_v12 }
 0x43c   : > { %v2165_v47 = vpop.permute.xlu1 %2164 }
 0x43d   : > { %v2182_v52 = vadd.f32 %v2165_v47, %v2142_v26 }
 0x43f   : > { %v2190_v7 = vsel %vm4257_vm8, %v4256_v14, %v2182_v52 }
 0x440   : > { %2198 = vst.msk [vmem:[%s3910_s30 + $0x30] sm:$0xff] %vm4258_vm14, %v2190_v7  ;;  %v2239_v57 = vsel %vm4241_vm0, %v2190_v7, 0.0  ;;  %v2257_v44 = vmul.f32 %v2190_v7, %v2190_v7  ;;  %s448_s30 = scalar_lea.vmem [#allocation4], %s3974_s21 }
 0x441   : > { %v2240_v58 = vadd.f32 %v2239_v57, %v2238_v17  ;;  %s3985_s15 = sshll.u32 %s448_s30, 4  ;;  %s2311_s15 = int_to_ptr.vmem [resolvable:$true] %s3985_s15 }
 0x442   : > { %v2270_v29 = vsel %vm4260_vm7, %v2257_v44, 0.0 }
 0x443   : > { %v2242_v34 = vadd.f32 %v2241_v0, %v2240_v58  ;;  %v2271_v6 = vadd.f32 %v2270_v29, %v2269_v20 }
 0x445   : > { %v2243_v37 = vrot.slane %v2242_v34, 4  ;;  %v2273_v53 = vadd.f32 %v2272_v38, %v2271_v6 }
 0x447   : > { %v2244_v4 = vadd.f32 %v2243_v37, %v2242_v34  ;;  %v2274_v48 = vrot.slane %v2273_v53, 4 }
 0x449   : > { %v2245_v35 = vrot.slane %v2244_v4, 2  ;;  %v2275_v32 = vadd.f32 %v2274_v48, %v2273_v53 }
 0x44b   : > { %v2246_v5 = vadd.f32 %v2245_v35, %v2244_v4  ;;  %v2276_v16 = vrot.slane %v2275_v32, 2 }
 0x44d   : > { %v2247_v23 = vrot.slane %v2246_v5, 1  ;;  %v2277_v24 = vadd.f32 %v2276_v16, %v2275_v32 }
 0x44f   : > { %v2248_v46 = vadd.f32 %v2247_v23, %v2246_v5  ;;  %v2278_v43 = vrot.slane %v2277_v24, 1 }
 0x451   : > { %2250 = vst.msk [vmem:[%s448_s30] sm:$0x1] %vm2249_vm5, %v2248_v46  ;;  %v2279_v31 = vadd.f32 %v2278_v43, %v2277_v24 }
 0x452   : > { %2719 = shalt.err (!%p2716_p3)
}
 0x453   : > { %2585 = dma.vmem_to_hbm [thread:$0]  (%p2906_p5), %s2311_s15, 16, %s2313_s0, %s2290_s29   ;;  %2280 = vst.msk [vmem:[%s454_s22] sm:$0x1] %vm2249_vm5, %v2279_v31 }
 0x454   : > { %s2294_s30 = scalar_lea.sflag [#allocation7], %s3974_s21  ;;  %s2734_s17 = sshra.s32 %s2326_s1, 4  ;;  %s2735_s17 = int_to_ptr.hbm [resolvable:$true] %s2734_s17 }
 0x455   : > { %s2736_s23 = scalar_lea.hbm %s2735_s17, 1  ;;  %s2740_s4 = scalar_lea.hbm %s4062_s13, 2 }
 0x456   : > { %p2737_p4 = scmp.ne.s32.totalorder %s2735_s17, %s2736_s23  ;;  %p2741_p9 = scmp.lt.s32.totalorder %s2735_s17, %s4062_s13 }
 0x457   : > { %p2742_p10 = scmp.lt.s32.totalorder %s2740_s4, %s2736_s23 }
 0x458   : > { %p2738_p7 = pnand %p2737_p4, %p2906_p5 }
 0x459   : > { %p2743_p11 = por %p2742_p10, %p2741_p9 }
 0x45a   : > { %p2739_p8 = pneg %p2738_p7 }
 0x45c   : > { %p2744_p12 = pnand %p2743_p11, %p2739_p8 }
 0x45e   : > { %2747 = shalt.err (!%p2744_p12)
}
 0x45f   : > { %2586 = dma.vmem_to_hbm [thread:$0]  (%p2906_p5), %s2324_s16, 16, %s2326_s1, %s2294_s30   ;;  %vm2226_vm11 = vcmask 40960  }
 0x460   : > { %s467_s15 = scalar_lea.vmem %s4060_s11, %s2924_s24 }
 0x46f   : > { %v2224_v18 = vpop.permute.xlu0 %2223 }
 0x470   : > { %2227 = vst.msk [vmem:[%s467_s15] sm:$0x1] %vm2226_vm11, %v2224_v18 }
 0x471 PF: > { %p2596_p13 = scmp.ge.s32.totalorder %s2786_s28, 2  ;;  %s2351_s22 = sand.u32 1, %s2774_s25  }
 0x472   : > { %s2352_s18 = scalar_lea.sflag [#allocation5], %s2351_s22 }
 0x473   : > { %p2590_p0 = pnand %p2596_p13, %p2910_p6 }
 0x475   : > { %p2591_p1 = pneg %p2590_p0 }
 0x477   : > { %2765 = dma.done.wait (%p2591_p1), %s2352_s18, 16  }
 0x478   : > { %2767 = vsyncadd (%p2591_p1), %s2352_s18, 4294967280  ;;  %s2361_s1 = scalar_lea.sflag [#allocation7], %s2351_s22 }
 0x479   : > { %2769 = dma.done.wait (%p2591_p1), %s2361_s1, 16  }
 0x47a   : > { %2771 = vsyncadd (%p2591_p1), %s2361_s1, 4294967280  ;;  %s4262_s24 = sld [smem:[#allocation10_spill]]  ;;  %p27_p5 = scmp.ge.s32.totalorder %s2893_s14, 4  }
 0x47b   : > { %s4263_s27 = sld [smem:[#allocation11_spill]]  ;;  %s4264_s25 = smov %s2778_s26 }
 0x47c   : > { %s4266_s28 = smov %s2893_s14  ;;  %29 = sbr.rel (!%p27_p5) target bundleno = 11 (0xb), region = 144 }
 0x480   : > { %s4265_s26 = smov %s4262_s24 }
 0x481   :  { %2366 = vsyncpa [#allocation5], 1 }
 0x482   :  { %2368 = vsyncpa [#allocation5 + $0x1], 1 }
 0x483   :  { %2369 = vsyncpa [#allocation7], 1 }
 0x484   :  { %2371 = vsyncpa [#allocation7 + $0x1], 1 }

// kernel: custom-call.16
= control target key start
LH: loop header
LB: loop body
LE: loop exit
PB: predicated region body
PF: predicated region fallthrough
CT: control target
= control target key end

     0   :  { %5 = vsyncpa [#allocation1], 0  ;;  %s710_s0 = inlined_call_operand.hbm [shape: f32[12,12], index: 0, kind: input, shape index: {}]   ;;  %s711_s1 = inlined_call_operand.vmem [shape: f32[12,12], index: 1, kind: output, shape index: {0}]   ;;  %s712_s2 = inlined_call_operand.hbm [shape: s32[12], index: 2, kind: output, shape index: {1}]   ;;  %s713_s3 = inlined_call_operand.hbm [shape: s32[12], index: 3, kind: output, shape index: {2}]  }
   0x1   :  { %6 = vsyncpa [#allocation2], 0 }
   0x2   :  { %7 = vsyncpa [#allocation8], 0  ;;  %s11_s14 = sshll.u32 %s710_s0, 4  ;;  %s610_s15 = smov [#allocation0]   ;;  %s12_s14 = int_to_ptr.hbm [resolvable:$true] %s11_s14 }
   0x3   :  { %s13_s16 = sshll.u32 %s610_s15, 4  ;;  %s14_s16 = int_to_ptr.vmem [resolvable:$true] %s13_s16 }
   0x4   :  { %16 = dma.hbm_to_vmem [thread:$0]  %s12_s14, 256, %s14_s16, [#allocation1]  }
   0x5   :  { %588 = dma.done.wait [#allocation1], 256  }
   0x6   :  { %589 = vsyncadd [#allocation1], 4294967040  ;;  %v26_v0 = vlaneseq  ;;  %v611_v1 = vmov 0   ;;  %v19_v3 = vld [vmem:[#allocation0] sm:$0xff]  ;;  %v23_v4 = vld [vmem:[#allocation0 + $0x8] sm:$0xff]  ;;  %s594_s17 = smov 0  }
   0x7   :  { %25 = vst [vmem:[#allocation4] sm:$0x1] %v611_v1 }
   0x8   :  { %v638_v2 = vshrl.u32 %v26_v0, 7  ;;  %20 = vst [vmem:[#allocation3] sm:$0xff] %v19_v3 }
   0x9   :  { %24 = vst [vmem:[#allocation3 + $0x8] sm:$0xff] %v23_v4 }
   0xa LB: > { %s390_s0 = sshll.u32 %s596_s17, 3  ;;  %s34_s17 = sadd.s32 1, %s596_s17   ;;  %s596_s17 = sphi %s594_s17, %s34_s17  }
   0xb   : > { %v38_v5 = vstv %s390_s0  ;;  %s36_s18 = scalar_lea.vmem [#allocation9], %s390_s0  ;;  %p31_p0 = scmp.ge.s32.totalorder %s34_s17, 2  }
   0xc   : > { %v39_v6 = vadd.s32 %v38_v5, %v638_v2  ;;  %s641_s19 = smov (%p31_p0), 0  }
   0xd   :  { %33 = sbr.rel (!%p31_p0) target bundleno = 10 (0xa), region = 94 }
   0xe   : > { %40 = vst [vmem:[%s36_s18] sm:$0xff] %v39_v6 }
  0x12 LB: > { %v51_v7 = vld [vmem:[#allocation3] sm:$0xff]  ;;  %v63_v8 = vld [vmem:[#allocation3 + $0x8] sm:$0xff]  ;;  %v647_v9 = vadd.s32 8, %v638_v2  ;;  %v650_v11 = vstv %s600_s19  ;;  %s109_s20 = ssub.s32 128, %s600_s19  ;;  %v662_v45 = vand.u32 127, %v26_v0  ;;  %s121_s22 = scalar_lea.vmem [#allocation3], %s600_s19  ;;  %s600_s19 = sphi %s641_s19, %s46_s19  }
  0x13   : > { %v52_v10 = vand.u32 2147483647, %v51_v7  ;;  %v64_v12 = vand.u32 2147483647, %v63_v8  ;;  %vm55_vm1 = vcmp.ge.s32.totalorder %v638_v2, %v650_v11  ;;  %v118_v46 = vld [vmem:[#allocation4] ss:$0 sm:$0xff] }
  0x14   : > { %vm68_vm0 = vcmp.lt.s32.totalorder %v647_v9, 12  ;;  %vm67_vm3 = vcmp.ge.s32.totalorder %v647_v9, %v650_v11  ;;  %vm116_vm15 = vcmp.eq.s32.totalorder %v662_v45, %v650_v11  ;;  %v123_v47 = vld [vmem:[%s121_s22] ss:$0 sm:$0xff]  ;;  %s127_s24 = scalar_lea.vmem [#allocation9], %s600_s19  ;;  %s46_s19 = sadd.s32 1, %s600_s19  }
  0x15   : > { %vm392_vm2 = vcmp.gt.f32.partialorder %v52_v10, -inf  ;;  %vm69_vm5 = vmand %vm67_vm3, %vm68_vm0  ;;  %v129_v51 = vld [vmem:[%s127_s24] ss:$0 sm:$0xff]  ;;  %p43_p1 = scmp.ge.s32.totalorder %s46_s19, 12  }
  0x16   : > { %vm59_vm4 = vmand %vm55_vm1, %vm392_vm2  ;;  %vm175_vm1 = vcmp.gt.s32.totalorder %v647_v9, %v650_v11  ;;  %vm147_vm2 = vcmp.gt.s32.totalorder %v638_v2, %v650_v11  ;;  %s602_s28 = smov (%p43_p1), %s711_s1   ;;  %s606_s29 = smov (%p43_p1), [#allocation3]  }
  0x17   : > { %v60_v13 = vsel %vm59_vm4, %v638_v2, %v650_v11  ;;  %v61_v14 = vsel %vm59_vm4, %v52_v10, -inf }
  0x18   : > { %vm70_vm6 = vcmp.lt.f32.partialorder %v61_v14, %v64_v12 }
  0x19   : > { %vm71_vm7 = vmand %vm69_vm5, %vm70_vm6 }
  0x1a   : > { %v72_v15 = vsel %vm71_vm7, %v647_v9, %v60_v13  ;;  %v73_v16 = vsel %vm71_vm7, %v64_v12, %v61_v14 }
  0x1b   : > { %v74_v17 = vrot.slane %v73_v16, 1  ;;  %v75_v18 = vrot.slane %v72_v15, 1 }
  0x1d   : > { %vm76_vm8 = vcmp.ge.f32.partialorder %v74_v17, %v73_v16  ;;  %v79_v19 = vrot.slane %v74_v17, 1  ;;  %v80_v20 = vrot.slane %v75_v18, 1 }
  0x1e   : > { %v77_v21 = vsel %vm76_vm8, %v74_v17, %v73_v16  ;;  %v78_v22 = vsel %vm76_vm8, %v75_v18, %v72_v15 }
  0x1f   : > { %vm81_vm9 = vcmp.ge.f32.partialorder %v79_v19, %v77_v21  ;;  %v84_v23 = vrot.slane %v79_v19, 1  ;;  %v85_v24 = vrot.slane %v80_v20, 1 }
  0x20   : > { %v82_v25 = vsel %vm81_vm9, %v79_v19, %v77_v21  ;;  %v83_v26 = vsel %vm81_vm9, %v80_v20, %v78_v22 }
  0x21   : > { %vm86_vm10 = vcmp.ge.f32.partialorder %v84_v23, %v82_v25  ;;  %v89_v27 = vrot.slane %v84_v23, 1  ;;  %v90_v28 = vrot.slane %v85_v24, 1 }
  0x22   : > { %v87_v29 = vsel %vm86_vm10, %v84_v23, %v82_v25  ;;  %v88_v30 = vsel %vm86_vm10, %v85_v24, %v83_v26 }
  0x23   : > { %vm91_vm11 = vcmp.ge.f32.partialorder %v89_v27, %v87_v29  ;;  %v94_v31 = vrot.slane %v89_v27, 1  ;;  %v95_v32 = vrot.slane %v90_v28, 1 }
  0x24   : > { %v92_v33 = vsel %vm91_vm11, %v89_v27, %v87_v29  ;;  %v93_v34 = vsel %vm91_vm11, %v90_v28, %v88_v30  ;;  %vm192_vm11 = vmand %vm175_vm1, %vm116_vm15 }
  0x25   : > { %vm96_vm12 = vcmp.ge.f32.partialorder %v94_v31, %v92_v33  ;;  %v99_v35 = vrot.slane %v94_v31, 1  ;;  %v100_v36 = vrot.slane %v95_v32, 1 }
  0x26   : > { %v97_v37 = vsel %vm96_vm12, %v94_v31, %v92_v33  ;;  %v98_v38 = vsel %vm96_vm12, %v95_v32, %v93_v34 }
  0x27   : > { %vm101_vm13 = vcmp.ge.f32.partialorder %v99_v35, %v97_v37  ;;  %v104_v39 = vrot.slane %v99_v35, 1  ;;  %v105_v40 = vrot.slane %v100_v36, 1 }
  0x28   : > { %v102_v41 = vsel %vm101_vm13, %v99_v35, %v97_v37  ;;  %v103_v42 = vsel %vm101_vm13, %v100_v36, %v98_v38  ;;  %vm164_vm13 = vmand %vm147_vm2, %vm116_vm15 }
  0x29   : > { %vm106_vm14 = vcmp.ge.f32.partialorder %v104_v39, %v102_v41 }
  0x2a   : > { %v108_v43 = vsel %vm106_vm14, %v105_v40, %v103_v42  ;;  %vm139_vm14 = vcmp.gt.s32.totalorder %v662_v45, %v650_v11 }
  0x2b   : > { %110 = vrot.lane.b32.xlu0 %v108_v43, %s109_s20 }
  0x9d   : > { %v111_v44 = vpop.permute.xlu0 %110 }
  0x9e   : > { %397 = vpush %v111_v44 }
  0xcf   : > { %s398_s21 = spop %397 }
  0xd0   : > { %v117_v48 = vstv %s398_s21  ;;  %s122_s23 = scalar_lea.vmem [#allocation3], %s398_s21  ;;  %s128_s25 = scalar_lea.vmem [#allocation9], %s398_s21 }
  0xd1   : > { %v119_v49 = vsel %vm116_vm15, %v117_v48, %v118_v46  ;;  %v124_v50 = vld [vmem:[%s122_s23] ss:$0 sm:$0xff] }
  0xd2   : > { %120 = vst [vmem:[#allocation4] sm:$0x1] %v119_v49  ;;  %v130_v52 = vld [vmem:[%s128_s25] ss:$0 sm:$0xff]  ;;  %vm133_vm0 = vcmp.ne.f32.partialorder %v124_v50, 0.0  ;;  %v140_v9 = vsel %vm139_vm14, %v124_v50, 0.0 }
  0xd3   : > { %125 = vst [vmem:[%s122_s23] sm:$0x1] %v123_v47  ;;  %vm134_vm3 = vmand %vm116_vm15, %vm133_vm0 }
  0xd4   : > { %126 = vst [vmem:[%s121_s22] sm:$0x1] %v124_v50  ;;  %v135_v53 = vsel %vm134_vm3, %v124_v50, 1.0 }
  0xd5   : > { %131 = vst [vmem:[%s128_s25] sm:$0x1] %v129_v51  ;;  %v176_v54 = vsel %vm175_vm1, %v135_v53, 1.0  ;;  %v148_v55 = vsel %vm147_vm2, %v135_v53, 1.0 }
  0xd6   : > { %132 = vst [vmem:[%s127_s24] sm:$0x1] %v130_v52  ;;  %476 = vrcp.f32 %v176_v54  ;;  %v188_v61 = vand.u32 2147483648, %v176_v54  ;;  %v186_v1 = vand.u32 2147483647, %v176_v54  ;;  %v160_v3 = vand.u32 2147483648, %v148_v55 }
  0xd7   : > { %478 = vrcp.f32 %v148_v55  ;;  %v158_v5 = vand.u32 2147483647, %v148_v55  ;;  %vm182_vm6 = vweird.f32 %v176_v54  ;;  %vm154_vm8 = vweird.f32 %v148_v55 }
  0xd8   : > { %v189_v7 = vor.u32 1.1754944e-38, %v188_v61  ;;  %vm187_vm9 = vcmp.eq.f32.partialorder %v186_v1, 8.507059e+37  ;;  %v161_v12 = vor.u32 1.1754944e-38, %v160_v3 }
  0xd9   : > { %vm159_vm12 = vcmp.eq.f32.partialorder %v158_v5, 8.507059e+37  ;;  %v251_v11 = vld [vmem:[#allocation4] sm:$0x1] (%p43_p1) }
  0xda   :  { %254 = vst [vmem:[#allocation5] sm:$0x1] (%p43_p1), %v251_v11 }
  0xdb   : > { %v172_v13 = vld [vmem:[#allocation3 + $0x8] sm:$0xff]  ;;  %v144_v17 = vld [vmem:[#allocation3] sm:$0xff] }
  0xdc   : > { %v477_v56 = vpop.eup %476 }
  0xdd   : > { %v479_v57 = vpop.eup %478  ;;  %v178_v58 = vmul.f32 %v477_v56, %v176_v54  ;;  %vm183_vm4 = vweird.f32 %v477_v56  ;;  %v199_v28 = vld [vmem:[#allocation9] sm:$0xff] (%p43_p1)  ;;  %v201_v29 = vld [vmem:[#allocation9 + $0x8] sm:$0xff] (%p43_p1) }
  0xde   : > { %v150_v59 = vmul.f32 %v479_v57, %v148_v55  ;;  %vm155_vm5 = vweird.f32 %v479_v57  ;;  %vm184_vm7 = vmor %vm182_vm6, %vm183_vm4 }
  0xdf   : > { %v179_v60 = vsub.f32 1.0, %v178_v58  ;;  %vm156_vm10 = vmor %vm154_vm8, %vm155_vm5 }
  0xe0   : > { %v151_v62 = vsub.f32 1.0, %v150_v59 }
  0xe1   : > { %v180_v63 = vmul.f32 %v477_v56, %v179_v60 }
  0xe2   : > { %v152_v4 = vmul.f32 %v479_v57, %v151_v62 }
  0xe3   : > { %v181_v6 = vadd.f32 %v477_v56, %v180_v63 }
  0xe4   : > { %v153_v8 = vadd.f32 %v479_v57, %v152_v4 }
  0xe5   : > { %v185_v10 = vsel %vm184_vm7, %v477_v56, %v181_v6 }
  0xe6   : > { %v190_v14 = vsel %vm187_vm9, %v189_v7, %v185_v10  ;;  %v157_v15 = vsel %vm156_vm10, %v479_v57, %v153_v8 }
  0xe7   : > { %v191_v16 = vmul.f32 %v190_v14, %v172_v13  ;;  %v162_v18 = vsel %vm159_vm12, %v161_v12, %v157_v15 }
  0xe8   : > { %v163_v19 = vmul.f32 %v162_v18, %v144_v17 }
  0xe9   : > { %v193_v20 = vsel %vm192_vm11, %v191_v16, 0.0 }
  0xea   : > { %194 = vadd.xlane.f32.xlu1 %v193_v20  ;;  %v165_v21 = vsel %vm164_vm13, %v163_v19, 0.0 }
  0xeb   : > { %166 = vadd.xlane.f32.xlu0 %v165_v21 }
 0x114   :  { %216 = vxpose.xlu0.b32.start [1/2] (short) (narrow) (%p43_p1), %v199_v28, 8 }
 0x11c   :  { %217 = vxpose.xlu0.b32.end [2/2] (short) (narrow) (%p43_p1), %v201_v29, 8 }
 0x15d   : > { %v195_v22 = vpop.xlane.xlu1 %194 }
 0x15e   : > { %v196_v23 = vmul.f32 %v195_v22, %v140_v9  ;;  %v167_v24 = vpop.xlane.xlu0 %166 }
 0x15f   : > { %v168_v25 = vmul.f32 %v167_v24, %v140_v9  ;;  %45 = sbr.rel (!%p43_p1) target bundleno = 18 (0x12), region = 105 }
 0x160   : > { %v197_v26 = vsub.f32 %v191_v16, %v196_v23 }
 0x161   : > { %v169_v27 = vsub.f32 %v163_v19, %v168_v25 }
 0x162   : > { %198 = vst [vmem:[#allocation3 + $0x8] sm:$0xff] %v197_v26 }
 0x163   : > { %170 = vst [vmem:[#allocation3] sm:$0xff] %v169_v27 }
 0x1b8   :  { %v232_v30 = vpop.trf.xlu0 }
 0x1b9   :  { %248 = vst [vmem:[#allocation6] sm:$0x1] %v232_v30 }
 0x1c0   :  { %v257_v31 = vld [vmem:[#allocation6] sm:$0x1] }
 0x1c1   :  { %260 = vst [vmem:[#allocation7] sm:$0x1] %v257_v31 }
 0x1c2 LB: > { %v304_v32 = vld [vmem:[%s608_s29] sm:$0xff]  ;;  %s306_s29 = scalar_lea.vmem %s608_s29, 8   ;;  %s608_s29 = sphi %s606_s29, %s306_s29   ;;  %s604_s28 = sphi %s602_s28, %s307_s28  }
 0x1c3   : > { %305 = vst [vmem:[%s604_s28] sm:$0xff] %v304_v32  ;;  %s307_s28 = scalar_lea.vmem %s604_s28, 8   ;;  %p301_p2 = scmp.gt.s32.totalorder %s306_s29, [#allocation3 + $0x8] }
 0x1c4   :  { %s324_s5 = sshll.u32 (%p301_p2), %s712_s2, 4  ;;  %s612_s6 = smov (%p301_p2), [#allocation5]   ;;  %s325_s5 = int_to_ptr.hbm [resolvable:$true] %s324_s5 }
 0x1c5   :  { %303 = sbr.rel (!%p301_p2) target bundleno = 450 (0x1c2), region = 127  ;;  %s322_s7 = sshll.u32 (%p301_p2), %s612_s6, 4  ;;  %s323_s7 = int_to_ptr.vmem [resolvable:$true] %s322_s7 }
 0x1c6   :  { %327 = dma.vmem_to_hbm [thread:$0]  (%p301_p2), %s323_s7, 16, %s325_s5, [#allocation2]  }
 0x1c7   :  { %s613_s1 = smov (%p301_p2), [#allocation7]   ;;  %s335_s11 = sshll.u32 (%p301_p2), %s713_s3, 4  ;;  %s336_s11 = int_to_ptr.hbm [resolvable:$true] %s335_s11 }
 0x1c8   :  { %s333_s8 = sshll.u32 (%p301_p2), %s613_s1, 4  ;;  %s334_s8 = int_to_ptr.vmem [resolvable:$true] %s333_s8 }
 0x1c9   :  { %338 = dma.vmem_to_hbm [thread:$0]  (%p301_p2), %s334_s8, 16, %s336_s11, [#allocation8]  }
 0x1ca   :  { %590 = dma.done.wait [#allocation2], 16  }
 0x1cb   :  { %591 = vsyncadd [#allocation2], 4294967280 }
 0x1cc   :  { %592 = dma.done.wait [#allocation8], 16  }
 0x1cd   :  { %593 = vsyncadd [#allocation8], 4294967280 }
 0x1ce   :  { %347 = vsyncpa [#allocation1], 1 }
 0x1cf   :  { %348 = vsyncpa [#allocation2], 1 }
 0x1d0   :  { %349 = vsyncpa [#allocation8], 1 }

// kernel: _lambda_.11
= control target key start
LH: loop header
LB: loop body
LE: loop exit
PB: predicated region body
PF: predicated region fallthrough
CT: control target
= control target key end

     0   :  { %s2128_s0 = inlined_call_operand.vmem [shape: f32[2,16,24], index: 0, kind: input, shape index: {}]   ;;  %s2129_s1 = inlined_call_operand.vmem [shape: f32[1,24], index: 1, kind: input, shape index: {}]   ;;  %s2130_s2 = inlined_call_operand.vmem [shape: f32[1,24], index: 2, kind: input, shape index: {}]   ;;  %s2131_s3 = inlined_call_operand.vmem [shape: f32[24,24], index: 3, kind: input, shape index: {}]   ;;  %s2132_s4 = inlined_call_operand.vmem [shape: f32[108,16], index: 4, kind: input, shape index: {}]   ;;  %s2133_s5 = inlined_call_operand.vmem [shape: f32[1,16], index: 5, kind: input, shape index: {}, may-alias: {5,7}]   ;;  %s2134_s6 = inlined_call_operand.vmem [shape: f32[16,16], index: 6, kind: input, shape index: {}]   ;;  %s2135_s7 = inlined_call_operand.vmem [shape: f32[1,16], index: 7, kind: input, shape index: {}, may-alias: {5,7}]   ;;  %s2136_s8 = inlined_call_operand.vmem [shape: f32[9,16,24], index: 8, kind: input, shape index: {}]   ;;  %s2137_s9 = inlined_call_operand.vmem [shape: f32[1,24], index: 9, kind: input, shape index: {}]   ;;  %s2138_s10 = inlined_call_operand.hbm [shape: f32[2,16,24], index: 10, kind: output, shape index: {0}]   ;;  %s2139_s11 = inlined_call_operand.vmem [shape: f32[2,1,12], index: 11, kind: output, shape index: {1}]   ;;  %s2140_s12 = inlined_call_operand.hbm [shape: f32[2,1,24], index: 12, kind: output, shape index: {2}]   ;;  %s2141_s13 = inlined_call_operand.hbm [shape: f32[2,1,24], index: 13, kind: output, shape index: {3}]  }
   0x1   :  { %2148 = sst [smem:[#allocation14_spill]] %s2128_s0 }
   0x2   :  { %2149 = sst [smem:[#allocation15_spill]] %s2129_s1 }
   0x3   :  { %2150 = sst [smem:[#allocation16_spill]] %s2130_s2 }
   0x4   :  { %2151 = sst [smem:[#allocation17_spill]] %s2131_s3 }
   0x5   :  { %19 = vsyncpa [#allocation5], 0 }
   0x6   :  { %21 = vsyncpa [#allocation5 + $0x1], 0 }
   0x7   :  { %22 = vsyncpa [#allocation7], 0 }
   0x8   :  { %24 = vsyncpa [#allocation7 + $0x1], 0  ;;  %s1707_s25 = smov 0   ;;  %s1709_s26 = smov 0  }
   0x9   :  { %s1711_s27 = smov 0   ;;  %s1713_s28 = smov 0  }
   0xa LB: > { %2152 = sst [smem:[#allocation11_spill]] %s1619_s27  ;;  %s1728_s29 = sadd.s32 4294967295, %s1623_s28   ;;  %s1623_s28 = sphi %s1713_s28, %s2171_s28   ;;  %s1619_s27 = sphi %s1711_s27, %s2173_s27   ;;  %s1615_s26 = sphi %s1709_s26, %s2175_s26   ;;  %s1611_s25 = sphi %s1707_s25, %s2174_s25  }
   0xb   : > { %s2142_s30 = sadd.s32 4294967294, %s1623_s28   ;;  %s1732_s14 = sadd.s32 1, %s1623_s28  }
   0xc   : > { %2153 = sst [smem:[#allocation12_spill]] %s1732_s14  ;;  %s252_s15 = sadd.s32 1, %s1619_s27 }
   0xd   : > { %s249_s16 = ssub.s32 %s1623_s28, %s1732_s14  ;;  %p262_p0 = scmp.ne.s32.totalorder %s1619_s27, %s1615_s26 }
   0xe   : > { %p250_p1 = scmp.eq.s32.totalorder %s249_s16, 0  ;;  %p263_p2 = scmp.eq.s32.totalorder %s1728_s29, 1 }
   0xf   : > { %p268_p3 = scmp.ne.s32.totalorder %s1615_s26, %s1611_s25  ;;  %p269_p4 = scmp.eq.s32.totalorder %s2142_s30, 1 }
  0x10   : > { %s1745_s17 = scalar_select %p250_p1, %s1619_s27, %s252_s15  }
  0x11   : > { %p1747_p5 = por %p263_p2, %p262_p0  ;;  %p1751_p6 = por %p269_p4, %p268_p3 }
  0x12   : > { %2154 = sst [smem:[#allocation13_spill]] %s1745_s17  ;;  %p1369_p7 = scmp.ge.s32.totalorder %s1623_s28, 1 }
  0x13   : > { %p400_p8 = scmp.lt.s32.totalorder %s1623_s28, 3 }
  0x15   : > { %p401_p9 = pnand %p1369_p7, %p400_p8 }
  0x16   : > { %s2157_s3 = sld [smem:[#allocation17_spill]] (!%p401_p9)  ;;  %p455_p10 = scmp.lt.s32.totalorder (!%p401_p9), %s1728_s29, 1 }
  0x17   : > { %404 = sbr.rel (%p401_p9) target bundleno = 935 (0x3a7), region = 60  ;;  %s2158_s1 = sld [smem:[#allocation15_spill]] (!%p401_p9) }
  0x18   : > { %s2159_s0 = sld [smem:[#allocation14_spill]] (!%p401_p9)  ;;  %s1626_s27 = smov (!%p401_p9), 48  }
  0x19   : > { %s2160_s2 = sld [smem:[#allocation16_spill]] (!%p401_p9)  ;;  %s2146_s30 = smov (!%p401_p9), 12  }
  0x1a   : > { %s1628_s14 = smov (!%p401_p9), 36   ;;  %s1629_s17 = smov (!%p401_p9), 24  }
  0x1b   : > { %s1630_s24 = smov (!%p401_p9), 96   ;;  %s1631_s15 = smov (!%p401_p9), 84  }
  0x1c   : > { %v479_v0 = vld [vmem:[%s2157_s3 + $0x10] sm:$0xff]  ;;  %v478_v1 = vld [vmem:[%s2157_s3 + $0x8] sm:$0xff]  ;;  %v477_v2 = vld [vmem:[%s2157_s3] sm:$0xff]  ;;  %s1768_s16 = scalar_select %p455_p10, %s1728_s29, 1  ;;  %vm480_vm0 = vcmask 195584   ;;  %vm541_vm1 = vcmask 97280   ;;  %v510_v13 = vlaneseq }
  0x1d   : > { %500 = vmatpush.msra.mxu0 %v479_v0  ;;  %v1484_v3 = vld [vmem:[%s2158_s1] ss:$0 sm:$0xff]  ;;  %v1625_v11 = vmov 0.0   ;;  %s1633_s21 = smov 72   ;;  %v679_v47 = vld [vmem:[%s2132_s4 + $0x68] sm:$0xf] }
  0x1e   : > { %s1419_s20 = sshll.u32 %s1768_s16, 4  ;;  %542 = vst.msk [vmem:[#allocation2] sm:$0xff] %vm541_vm1, %v1625_v11  ;;  %v511_v14 = vshrl.u32 %v510_v13, 7  ;;  %vm691_vm6 = vcmask 1043456   ;;  %v678_v48 = vld [vmem:[%s2132_s4 + $0x60] sm:$0xff]  ;;  %v677_v49 = vld [vmem:[%s2132_s4 + $0x58] sm:$0xff] }
  0x1f   : > { %501 = vmatpush.msra.mxu0 %v478_v1  ;;  %s459_s22 = scalar_lea.vmem %s2159_s0, %s1419_s20  ;;  %v1485_v4 = vld [vmem:[%s2160_s2] ss:$0 sm:$0xff]  ;;  %543 = vst.msk [vmem:[#allocation2 + $0x18] sm:$0xff] %vm541_vm1, %v1625_v11  ;;  %s1632_s20 = smov 60   ;;  %1375 = vmatpush.msk.msra.mxu1 %vm691_vm6, %v679_v47  ;;  %v676_v50 = vld [vmem:[%s2132_s4 + $0x50] sm:$0xff]  ;;  %v675_v51 = vld [vmem:[%s2132_s4 + $0x48] sm:$0xff] }
  0x20   : > { %v463_v5 = vld [vmem:[%s459_s22] sm:$0xff]  ;;  %v464_v7 = vld [vmem:[%s459_s22 + $0x8] sm:$0xff]  ;;  %v517_v18 = vand.u32 3, %v511_v14  ;;  %v512_v27 = vadd.s32 8, %v511_v14  ;;  %v673_v53 = vld [vmem:[%s2132_s4 + $0x38] sm:$0xff]  ;;  %vm648_vm7 = vcmask 293888  }
  0x21   : > { %502 = vmatpush.msra.mxu0 %v477_v2  ;;  %v469_v6 = vmul.f32 %v1484_v3, %v463_v5  ;;  %v470_v9 = vmul.f32 %v1484_v3, %v464_v7  ;;  %698 = vmatpush.msra.mxu1 %v678_v48  ;;  %v674_v52 = vld [vmem:[%s2132_s4 + $0x40] sm:$0xff]  ;;  %v672_v54 = vld [vmem:[%s2132_s4 + $0x30] sm:$0xff]  ;;  %v671_v55 = vld [vmem:[%s2132_s4 + $0x28] sm:$0xff]  ;;  %vm651_vm8 = vcmask 392192   ;;  %vm654_vm9 = vcmask 490496  }
  0x22   : > { %vm1796_vm2 = vcmp.ge.s32.totalorder %v517_v18, 1  ;;  %vm1800_vm3 = vcmp.le.s32.totalorder %v517_v18, 2  ;;  %v524_v31 = vand.u32 3, %v512_v27  ;;  %v670_v56 = vld [vmem:[%s2132_s4 + $0x20] sm:$0xff]  ;;  %v669_v57 = vld [vmem:[%s2132_s4 + $0x18] sm:$0xff]  ;;  %v668_v58 = vld [vmem:[%s2132_s4 + $0x10] sm:$0xff] }
  0x23   : > { %v475_v8 = vadd.f32 %v1485_v4, %v469_v6  ;;  %v476_v10 = vadd.f32 %v1485_v4, %v470_v9  ;;  %699 = vmatpush.msra.mxu1 %v677_v49  ;;  %v667_v59 = vld [vmem:[%s2132_s4 + $0x8] sm:$0xff]  ;;  %v666_v60 = vld [vmem:[%s2132_s4] sm:$0xff]  ;;  %vm657_vm10 = vcmask 588800   ;;  %vm660_vm11 = vcmask 687104   ;;  %v1381_v48 = vld [vmem:[%s2136_s8 + $0x18] sm:$0xff] }
  0x24   : > { %vm1813_vm4 = vcmp.ge.s32.totalorder %v524_v31, 1  ;;  %vm1817_vm5 = vcmp.le.s32.totalorder %v524_v31, 2  ;;  %vm663_vm12 = vcmask 785408   ;;  %vm684_vm13 = vcmask 883712   ;;  %v1391_v49 = vld [vmem:[%s2136_s8 + $0x38] sm:$0xff] }
  0x25   : > { %1373 = vmatmul.msk.f32.vlgmr.msra.gmra.mxu0 %vm480_vm0, %v475_v8  ;;  %700 = vmatpush.msra.mxu1 %v676_v50  ;;  %vm726_vm14 = vcmask 130048   ;;  %v1380_v50 = vld [vmem:[%s2136_s8 + $0x10] sm:$0xff] }
  0x26   : > { %758 = vst.msk [vmem:[#allocation3] sm:$0xff] %vm726_vm14, %v1625_v11  ;;  %909 = vmatpush.msrb.mxu0 %v1391_v49 }
  0x27   : > { %701 = vmatpush.msra.mxu1 %v675_v51  ;;  %759 = vst.msk [vmem:[#allocation3 + $0x18] sm:$0xff] %vm726_vm14, %v1625_v11  ;;  %v790_v11 = vld [vmem:[%s2136_s8 + $0x8] sm:$0xff]  ;;  %v789_v51 = vld [vmem:[%s2136_s8] sm:$0xff] }
  0x29   : > { %702 = vmatpush.msra.mxu1 %v674_v52  ;;  %v1390_v52 = vld [vmem:[%s2136_s8 + $0x30] sm:$0xff] }
  0x2a   : > { %910 = vmatpush.msrb.mxu0 %v1390_v52 }
  0x2b   : > { %703 = vmatpush.msra.mxu1 %v673_v53  ;;  %v1387_v53 = vld [vmem:[%s2136_s8 + $0x28] sm:$0xff] }
  0x2d   : > { %1374 = vmatmul.msk.f32.gmra.mxu0 %vm480_vm0, %v476_v10  ;;  %704 = vmatpush.msra.mxu1 %v672_v54  ;;  %v1407_v54 = vld [vmem:[%s2136_s8 + $0x78] sm:$0xff] }
  0x2f   : > { %705 = vmatpush.msra.mxu1 %v671_v55  ;;  %v1395_v55 = vld [vmem:[%s2136_s8 + $0x48] sm:$0xff] }
  0x31   : > { %706 = vmatpush.msra.mxu1 %v670_v56  ;;  %v1487_v56 = vld [vmem:[%s2135_s7] ss:$0 sm:$0xff] }
  0x33   : > { %707 = vmatpush.msra.mxu1 %v669_v57  ;;  %v1406_v57 = vld [vmem:[%s2136_s8 + $0x70] sm:$0xff] }
  0x35   : > { %708 = vmatpush.msra.mxu1 %v668_v58 }
  0x37   : > { %709 = vmatpush.msra.mxu1 %v667_v59 }
  0x39   : > { %710 = vmatpush.msra.mxu1 %v666_v60 }
  0x3b   : > { %1042 = vmatpush.msrb.mxu1 %v1407_v54 }
  0x3d   : > { %1043 = vmatpush.msrb.mxu1 %v1406_v57 }
  0xa2   : > { %v1786_v12 = vpop.f32.mrf.mxu0 }
  0xa3   : > { %544 = vst.msk [vmem:[#allocation2 + $0x8] sm:$0xff] %vm541_vm1, %v1786_v12 }
  0xaa   : > { %v1790_v15 = vpop.f32.mrf.mxu0  ;;  %v568_v16 = vld [vmem:[#allocation2 + $0x8] sm:$0xff] }
  0xab   : > { %v554_v17 = vld [vmem:[#allocation2 + $0x4] sm:$0xff]  ;;  %545 = vst.msk [vmem:[#allocation2 + $0x10] sm:$0xff] %vm541_vm1, %v1790_v15  ;;  %607 = vrot.lane.b32.xlu1 %v568_v16, %s1626_s27 }
  0xac   : > { %583 = vrot.lane.b32.xlu0 %v554_v17, %s2146_s30  ;;  %v564_v20 = vld [vmem:[#allocation2 + $0x7] sm:$0xff] }
  0xad   : > { %v556_v22 = vld [vmem:[#allocation2 + $0x5] sm:$0xff]  ;;  %v566_v23 = vsel %vm1796_vm2, %v564_v20, 0.0 }
  0xae   : > { %v562_v24 = vsel %vm1800_vm3, %v556_v22, 0.0  ;;  %v546_v0 = vld [vmem:[#allocation2 + $0x3] sm:$0xff] }
  0xaf   : > { %v552_v2 = vsel %vm1796_vm2, %v546_v0, 0.0 }
  0xb2   : > { %v555_v25 = vld [vmem:[#allocation2 + $0xc] sm:$0xff]  ;;  %v578_v44 = vld [vmem:[#allocation2 + $0x15] sm:$0xff] }
  0xb3   : > { %599 = vrot.lane.b32.xlu1 %v566_v23, %s1628_s14  ;;  %585 = vrot.lane.b32.xlu2 %v555_v25, %s2146_s30  ;;  %v557_v26 = vld [vmem:[#allocation2 + $0xd] sm:$0xff]  ;;  %v580_v45 = vsel %vm1817_vm5, %v578_v44, 0.0  ;;  %s2024_s30 = sand.u32 1, %s1615_s26  }
  0xb4   : > { %591 = vrot.lane.b32.xlu0 %v562_v24, %s1629_s17  ;;  %v570_v28 = vld [vmem:[#allocation2 + $0x9] sm:$0xff]  ;;  %v579_v29 = vsel %vm1800_vm3, %v557_v26, 0.0  ;;  %v563_v37 = vsel %vm1817_vm5, %v557_v26, 0.0  ;;  %v574_v39 = vld [vmem:[#allocation2 + $0x13] sm:$0xff] }
  0xb5   : > { %v572_v30 = vsel %vm1800_vm3, %v570_v28, 0.0  ;;  %v565_v33 = vld [vmem:[#allocation2 + $0xf] sm:$0xff]  ;;  %v576_v41 = vsel %vm1813_vm4, %v574_v39, 0.0 }
  0xb6   : > { %v1821_v35 = vld [vmem:[#allocation2 + $0xb] sm:$0xff]  ;;  %v567_v36 = vsel %vm1813_vm4, %v565_v33, 0.0  ;;  %v577_v46 = vld [vmem:[#allocation2 + $0x14] sm:$0xff] }
  0xb7   : > { %v575_v38 = vsel %vm1796_vm2, %v1821_v35, 0.0  ;;  %v571_v40 = vld [vmem:[#allocation2 + $0x11] sm:$0xff]  ;;  %v553_v23 = vsel %vm1813_vm4, %v1821_v35, 0.0  ;;  %v721_v39 = vld [vmem:[%s2134_s6 + $0x8] sm:$0xff] }
  0xb8   : > { %v573_v42 = vsel %vm1817_vm5, %v571_v40, 0.0  ;;  %v569_v43 = vld [vmem:[#allocation2 + $0x10] sm:$0xff]  ;;  %747 = vmatpush.msra.mxu2 %v721_v39  ;;  %v720_v40 = vld [vmem:[%s2134_s6] sm:$0xff]  ;;  %1421 = vmatpush.msra.mxu3 %v721_v39 }
  0xba   : > { %748 = vmatpush.msra.mxu2 %v720_v40  ;;  %1422 = vmatpush.msra.mxu3 %v720_v40 }
  0xbb   : > { %638 = vrot.lane.b32.xlu1 %v579_v29, %s1630_s24  ;;  %615 = vrot.lane.b32.xlu2 %v572_v30, %s1632_s20 }
  0xbc   : > { %630 = vrot.lane.b32.xlu0 %v555_v25, %s1631_s15  ;;  %814 = vmatpush.msrb.mxu3 %v1381_v48 }
  0xbd   : > { %843 = vmatpush.msrb.mxu2 %v790_v11 }
  0xbe   : > { %815 = vmatpush.msrb.mxu3 %v1380_v50 }
  0xbf   : > { %844 = vmatpush.msrb.mxu2 %v789_v51 }
  0xc3   : > { %601 = vrot.lane.b32.xlu1 %v567_v36, %s1628_s14  ;;  %623 = vrot.lane.b32.xlu2 %v575_v38, %s1633_s21 }
  0xc4   : > { %593 = vrot.lane.b32.xlu0 %v563_v37, %s1629_s17 }
  0xcb   : > { %625 = vrot.lane.b32.xlu1 %v576_v41, %s1633_s21  ;;  %609 = vrot.lane.b32.xlu2 %v569_v43, %s1626_s27  ;;  %v1486_v41 = vld [vmem:[%s2133_s5] ss:$0 sm:$0xff]  ;;  %s1634_s21 = smov 116   ;;  %s1370_s27 = sshll.u32 %s2024_s30, 4 }
  0xcc   : > { %617 = vrot.lane.b32.xlu0 %v573_v42, %s1632_s20  ;;  %s2169_s20 = smov 12  }
  0xd3   : > { %632 = vrot.lane.b32.xlu2 %v577_v46, %s1631_s15  ;;  %s1420_s15 = sshll.u32 %s1728_s29, 4 }
  0xd4   : > { %640 = vrot.lane.b32.xlu0 %v580_v45, %s1630_s24  ;;  %s437_s24 = scalar_lea.vmem [#allocation4], %s1370_s27  ;;  %s1199_s14 = scalar_lea.hbm %s2138_s10, %s1420_s15 }
  0xd5   : > { %s1200_s17 = sshll.u32 %s437_s24, 4  ;;  %s1201_s17 = int_to_ptr.vmem [resolvable:$true] %s1200_s17 }
 0x10d   : > { %v586_v61 = vpop.permute.xlu2 %585 }
 0x10e   : > { %v645_v24 = vsel %vm541_vm1, %v553_v23, %v586_v61  ;;  %v1386_v61 = vld [vmem:[%s2136_s8 + $0x20] sm:$0xff] }
 0x115   : > { %v616_v1 = vpop.permute.xlu2 %615 }
 0x11d   : > { %v608_v62 = vpop.permute.xlu1 %607  ;;  %v624_v10 = vpop.permute.xlu2 %623 }
 0x11e   : > { %v584_v63 = vpop.permute.xlu0 %583 }
 0x11f   : > { %v644_v3 = vsel %vm541_vm1, %v552_v2, %v584_v63  ;;  %v1403_v63 = vld [vmem:[%s2136_s8 + $0x68] sm:$0xff] }
 0x120   : > { %1011 = vmatpush.msra.mxu0 %v1403_v63 }
 0x125   : > { %v600_v4 = vpop.permute.xlu1 %599  ;;  %v610_v26 = vpop.permute.xlu2 %609 }
 0x126   : > { %v592_v5 = vpop.permute.xlu0 %591 }
 0x127   : > { %v646_v6 = vsel %vm480_vm0, %v644_v3, %v592_v5  ;;  %v1399_v5 = vld [vmem:[%s2136_s8 + $0x58] sm:$0xff] }
 0x128   : > { %v649_v7 = vsel %vm648_vm7, %v646_v6, %v600_v4  ;;  %v1402_v6 = vld [vmem:[%s2136_s8 + $0x60] sm:$0xff] }
 0x129   : > { %v652_v8 = vsel %vm651_vm8, %v649_v7, %v608_v62  ;;  %v1394_v62 = vld [vmem:[%s2136_s8 + $0x40] sm:$0xff]  ;;  %v1411_v7 = vld [vmem:[%s2136_s8 + $0x88] sm:$0xff]  ;;  %1012 = vmatpush.msra.mxu0 %v1402_v6 }
 0x12a   : > { %v655_v9 = vsel %vm654_vm9, %v652_v8, %v616_v1  ;;  %v1398_v8 = vld [vmem:[%s2136_s8 + $0x50] sm:$0xff] }
 0x12b   : > { %v658_v16 = vsel %vm657_vm10, %v655_v9, %v624_v10  ;;  %v1410_v9 = vld [vmem:[%s2136_s8 + $0x80] sm:$0xff] }
 0x12d   : > { %v639_v13 = vpop.permute.xlu1 %638  ;;  %v633_v36 = vpop.permute.xlu2 %632 }
 0x12e   : > { %v631_v14 = vpop.permute.xlu0 %630 }
 0x12f   : > { %v661_v17 = vsel %vm660_vm11, %v658_v16, %v631_v14 }
 0x130   : > { %v664_v18 = vsel %vm663_vm12, %v661_v17, %v639_v13 }
 0x131   : > { %1376 = vmatmul.msk.f32.vlgmr.msra.gmra.mxu1 %vm684_vm13, %v664_v18 }
 0x135   : > { %v602_v20 = vpop.permute.xlu1 %601 }
 0x136   : > { %v594_v22 = vpop.permute.xlu0 %593 }
 0x137   : > { %v647_v25 = vsel %vm480_vm0, %v645_v24, %v594_v22 }
 0x138   : > { %v650_v27 = vsel %vm648_vm7, %v647_v25, %v602_v20 }
 0x139   : > { %v653_v29 = vsel %vm651_vm8, %v650_v27, %v610_v26 }
 0x13d   : > { %v626_v30 = vpop.permute.xlu1 %625 }
 0x13e   : > { %v618_v28 = vpop.permute.xlu0 %617 }
 0x13f   : > { %v656_v31 = vsel %vm654_vm9, %v653_v29, %v618_v28 }
 0x140   : > { %v659_v33 = vsel %vm657_vm10, %v656_v31, %v626_v30 }
 0x141   : > { %v662_v38 = vsel %vm660_vm11, %v659_v33, %v633_v36 }
 0x146   : > { %v641_v37 = vpop.permute.xlu0 %640 }
 0x147   : > { %v665_v35 = vsel %vm663_vm12, %v662_v38, %v641_v37 }
 0x148   : > { %1377 = vmatmul.msk.f32.gmra.mxu1 %vm684_vm13, %v665_v35 }
 0x1ae   : > { %v712_v42 = vpop.f32.mrf.mxu1 }
 0x1af   : > { %v713_v43 = vadd.f32 %v1486_v41, %v712_v42 }
 0x1b1   : > { %v718_v44 = vmax.f32 %v713_v43, 0.0 }
 0x1b3   : > { %1378 = vmatmul.msk.f32.vlgmr.msra.gmra.mxu2 %vm726_vm14, %v718_v44 }
 0x1b4   : > { %943 = vmatpush.msra.mxu2 %v1395_v55 }
 0x1b6   : > { %944 = vmatpush.msra.mxu2 %v1394_v62 }
 0x1c5   : > { %v715_v45 = vpop.f32.mrf.mxu1 }
 0x1c6   : > { %v716_v46 = vadd.f32 %v1486_v41, %v715_v45 }
 0x1c8   : > { %v719_v47 = vmax.f32 %v716_v46, 0.0 }
 0x1ca   : > { %1379 = vmatmul.msk.f32.vlgmr.msra.gmra.mxu3 %vm726_vm14, %v719_v47 }
 0x1cb   : > { %875 = vmatpush.msra.mxu3 %v1387_v53 }
 0x1cd   : > { %876 = vmatpush.msra.mxu3 %v1386_v61  ;;  %v1488_v61 = vld [vmem:[%s2137_s9] ss:$0 sm:$0xff] }
 0x236   : > { %v750_v58 = vpop.f32.mrf.mxu2 }
 0x237   : > { %v751_v59 = vadd.f32 %v1487_v56, %v750_v58 }
 0x239   : > { %v756_v60 = vmax.f32 %v751_v59, 0.0 }
 0x23b   : > { %760 = vst.msk [vmem:[#allocation3 + $0x8] sm:$0xff] %vm726_vm14, %v756_v60 }
 0x242   : > { %v766_v0 = vld [vmem:[#allocation3 + $0x4] sm:$0xff] }
 0x243   : > { %v762_v1 = vld [vmem:[#allocation3 + $0x3] sm:$0xff]  ;;  %1382 = vmatmul.msk.f32.vlgmr.msrb.gmra.mxu3 %vm726_vm14, %v766_v0 }
 0x244   : > { %v772_v2 = vld [vmem:[#allocation3 + $0x7] sm:$0xff]  ;;  %v764_v3 = vsel %vm1796_vm2, %v762_v1, 0.0  ;;  %977 = vmatpush.msrb.mxu3 %v1399_v5 }
 0x245   : > { %v774_v4 = vsel %vm1796_vm2, %v772_v2, 0.0  ;;  %1384 = vmatmul.msk.f32.vlgmr.msrb.gmra.mxu2 %vm726_vm14, %v764_v3  ;;  %v768_v23 = vld [vmem:[#allocation3 + $0x5] sm:$0xff] }
 0x246   : > { %1392 = vmatmul.msk.f32.vlgmr.msrb.gmra.mxu0 %vm726_vm14, %v774_v4  ;;  %1076 = vmatpush.msrb.mxu2 %v1411_v7  ;;  %v770_v24 = vsel %vm1800_vm3, %v768_v23, 0.0  ;;  %v776_v27 = vld [vmem:[#allocation3 + $0x8] sm:$0xff] }
 0x247   : > { %978 = vmatpush.msrb.mxu3 %v1398_v8 }
 0x248   : > { %1077 = vmatpush.msrb.mxu2 %v1410_v9 }
 0x24d   : > { %v753_v10 = vpop.f32.mrf.mxu3 }
 0x24e   : > { %v754_v13 = vadd.f32 %v1487_v56, %v753_v10 }
 0x250   : > { %v757_v14 = vmax.f32 %v754_v13, 0.0 }
 0x252   : > { %761 = vst.msk [vmem:[#allocation3 + $0x10] sm:$0xff] %vm726_vm14, %v757_v14 }
 0x259   : > { %v767_v16 = vld [vmem:[#allocation3 + $0xc] sm:$0xff]  ;;  %v785_v25 = vld [vmem:[#allocation3 + $0x14] sm:$0xff] }
 0x25a   : > { %v763_v17 = vld [vmem:[#allocation3 + $0xb] sm:$0xff]  ;;  %1383 = vmatmul.msk.f32.gmra.mxu3 %vm726_vm14, %v767_v16  ;;  %1408 = vmatmul.msk.f32.vlgmr.msrb.gmra.mxu1 %vm726_vm14, %v767_v16  ;;  %v782_v29 = vld [vmem:[#allocation3 + $0x13] sm:$0xff] }
 0x25b   : > { %v773_v18 = vld [vmem:[#allocation3 + $0xf] sm:$0xff]  ;;  %v765_v20 = vsel %vm1813_vm4, %v763_v17, 0.0  ;;  %v783_v26 = vsel %vm1796_vm2, %v763_v17, 0.0  ;;  %v784_v19 = vsel %vm1813_vm4, %v782_v29, 0.0  ;;  %vm1137_vm2 = vcmask 195680  }
 0x25c   : > { %v775_v22 = vsel %vm1813_vm4, %v773_v18, 0.0  ;;  %1385 = vmatmul.msk.f32.gmra.mxu2 %vm726_vm14, %v765_v20  ;;  %v769_v28 = vld [vmem:[#allocation3 + $0xd] sm:$0xff]  ;;  %v786_v35 = vld [vmem:[#allocation3 + $0x15] sm:$0xff] }
 0x25d   : > { %1393 = vmatmul.msk.f32.gmra.mxu0 %vm726_vm14, %v775_v22  ;;  %v771_v30 = vsel %vm1817_vm5, %v769_v28, 0.0  ;;  %v777_v31 = vld [vmem:[#allocation3 + $0x10] sm:$0xff]  ;;  %v787_v37 = vsel %vm1800_vm3, %v769_v28, 0.0  ;;  %v788_v39 = vsel %vm1817_vm5, %v786_v35, 0.0 }
 0x25e   : > { %v778_v33 = vld [vmem:[#allocation3 + $0x9] sm:$0xff]  ;;  %v779_v38 = vld [vmem:[#allocation3 + $0x11] sm:$0xff] }
 0x25f   : > { %v780_v36 = vsel %vm1800_vm3, %v778_v33, 0.0  ;;  %v781_v32 = vsel %vm1817_vm5, %v779_v38, 0.0 }
 0x262   : > { %1388 = vmatmul.msk.f32.vlgmr.msra.gmra.mxu3 %vm726_vm14, %v770_v24  ;;  %1409 = vmatmul.msk.f32.gmra.mxu1 %vm726_vm14, %v785_v25 }
 0x264   : > { %1396 = vmatmul.msk.f32.vlgmr.msra.gmra.mxu2 %vm726_vm14, %v776_v27 }
 0x265   : > { %1404 = vmatmul.msk.f32.vlgmr.msra.gmra.mxu0 %vm726_vm14, %v783_v26 }
 0x26a   : > { %1389 = vmatmul.msk.f32.gmra.mxu3 %vm726_vm14, %v771_v30 }
 0x26c   : > { %1397 = vmatmul.msk.f32.gmra.mxu2 %vm726_vm14, %v777_v31 }
 0x26d   : > { %1405 = vmatmul.msk.f32.gmra.mxu0 %vm726_vm14, %v784_v19 }
 0x272   : > { %1400 = vmatmul.msk.f32.vlgmr.msrb.gmra.mxu3 %vm726_vm14, %v780_v36 }
 0x274   : > { %1412 = vmatmul.msk.f32.vlgmr.msrb.gmra.mxu2 %vm726_vm14, %v787_v37 }
 0x27a   : > { %1401 = vmatmul.msk.f32.gmra.mxu3 %vm726_vm14, %v781_v32 }
 0x27c   : > { %1413 = vmatmul.msk.f32.gmra.mxu2 %vm726_vm14, %v788_v39 }
 0x2c3   : > { %v912_v43 = vpop.f32.mrf.mxu0 }
 0x2c6   : > { %v817_v40 = vpop.f32.mrf.mxu3 }
 0x2c8   : > { %v846_v41 = vpop.f32.mrf.mxu2 }
 0x2c9   : > { %v847_v46 = vadd.f32 %v846_v41, %v817_v40 }
 0x2d7   : > { %v1045_v56 = vpop.f32.mrf.mxu1 }
 0x2da   : > { %v915_v47 = vpop.f32.mrf.mxu0 }
 0x2dd   : > { %v820_v21 = vpop.f32.mrf.mxu3 }
 0x2df   : > { %v849_v42 = vpop.f32.mrf.mxu2  ;;  %v1048_v6 = vpop.f32.mrf.mxu1 }
 0x2e0   : > { %v850_v51 = vadd.f32 %v849_v42, %v820_v21 }
 0x2e2   : > { %v1014_v34 = vpop.f32.mrf.mxu0 }
 0x2e5   : > { %v878_v44 = vpop.f32.mrf.mxu3 }
 0x2e6   : > { %v884_v48 = vadd.f32 %v878_v44, %v847_v46 }
 0x2e7   : > { %v946_v45 = vpop.f32.mrf.mxu2 }
 0x2e8   : > { %v918_v50 = vadd.f32 %v912_v43, %v884_v48 }
 0x2ea   : > { %v952_v52 = vadd.f32 %v946_v45, %v918_v50  ;;  %v1017_v3 = vpop.f32.mrf.mxu0 }
 0x2ed   : > { %v881_v11 = vpop.f32.mrf.mxu3 }
 0x2ee   : > { %v885_v53 = vadd.f32 %v881_v11, %v850_v51 }
 0x2ef   : > { %v949_v49 = vpop.f32.mrf.mxu2 }
 0x2f0   : > { %v919_v57 = vadd.f32 %v915_v47, %v885_v53 }
 0x2f2   : > { %v953_v62 = vadd.f32 %v949_v49, %v919_v57 }
 0x2f5   : > { %v980_v54 = vpop.f32.mrf.mxu3 }
 0x2f6   : > { %v986_v55 = vadd.f32 %v980_v54, %v952_v52 }
 0x2f7   : > { %v1079_v59 = vpop.f32.mrf.mxu2 }
 0x2f8   : > { %v1020_v58 = vadd.f32 %v1014_v34, %v986_v55 }
 0x2fa   : > { %v1051_v60 = vadd.f32 %v1045_v56, %v1020_v58 }
 0x2fc   : > { %v1085_v63 = vadd.f32 %v1079_v59, %v1051_v60 }
 0x2fd   : > { %v983_v0 = vpop.f32.mrf.mxu3 }
 0x2fe   : > { %v1091_v1 = vadd.f32 %v1488_v61, %v1085_v63  ;;  %v987_v2 = vadd.f32 %v983_v0, %v953_v62 }
 0x2ff   : > { %v1082_v9 = vpop.f32.mrf.mxu2 }
 0x300   : > { %v1093_v4 = vadd.f32 2.0, %v1091_v1  ;;  %v1021_v5 = vadd.f32 %v1017_v3, %v987_v2  ;;  %1125 = vrot.lane.b32.xlu1 %v1091_v1, %s2169_s20 }
 0x302   : > { %v1095_v7 = vand.u32 2147483647, %v1093_v4  ;;  %v1052_v8 = vadd.f32 %v1048_v6, %v1021_v5  ;;  %vm1115_vm15 = vcmp.ge.f32.partialorder %v1093_v4, 0.0  ;;  %v1103_v19 = vmin.f32 %v1093_v4, 0.0 }
 0x304   : > { %v1097_v10 = vsub.f32 0.0, %v1095_v7  ;;  %v1086_v13 = vadd.f32 %v1082_v9, %v1052_v8 }
 0x306   : > { %v1099_v14 = vmul.f32 1.442695, %v1097_v10  ;;  %v1092_v16 = vadd.f32 %v1488_v61, %v1086_v13 }
 0x308   : > { %1489 = vpow2.f32 %v1099_v14  ;;  %v1094_v17 = vadd.f32 2.0, %v1092_v16  ;;  %1127 = vrot.lane.b32.xlu2 %v1092_v16, %s2169_s20  ;;  %s1202_s20 = sshll.u32 %s1199_s14, 4  ;;  %s1521_s14 = scalar_lea.hbm %s2138_s10, 32  ;;  %s1203_s20 = int_to_ptr.hbm [resolvable:$true] %s1202_s20 }
 0x309   : > { %s1515_s27 = sshra.s32 %s1203_s20, 4  ;;  %s1516_s27 = int_to_ptr.hbm [resolvable:$true] %s1515_s27 }
 0x30a   : > { %v1096_v18 = vand.u32 2147483647, %v1094_v17  ;;  %v1104_v38 = vmin.f32 %v1094_v17, 0.0  ;;  %vm1116_vm3 = vcmp.ge.f32.partialorder %v1094_v17, 0.0  ;;  %s1517_s15 = scalar_lea.hbm %s1516_s27, 16  ;;  %p1522_p0 = scmp.lt.s32.totalorder %s1516_s27, %s2138_s10 }
 0x30b   : > { %p1518_p11 = scmp.ne.s32.totalorder %s1516_s27, %s1517_s15  ;;  %p1523_p1 = scmp.lt.s32.totalorder %s1521_s14, %s1517_s15 }
 0x30c   : > { %v1098_v20 = vsub.f32 0.0, %v1096_v18 }
 0x30d   : > { %p1519_p12 = pnand %p1518_p11, %p1747_p5  ;;  %p1524_p2 = por %p1523_p1, %p1522_p0 }
 0x30e   : > { %v1490_v22 = vpop.eup %1489  ;;  %v1101_v23 = vmul.f32 1.442695, %v1098_v20 }
 0x30f   : > { %v1105_v24 = vadd.f32 1.0, %v1490_v22  ;;  %p1520_p13 = pneg %p1519_p12 }
 0x310   : > { %1491 = vpow2.f32 %v1101_v23 }
 0x311   : > { %1493 = vrcp.f32 %v1105_v24  ;;  %p1525_p3 = pnand %p1524_p2, %p1520_p13 }
 0x312   : > { %1495 = vlog2.f32 %v1105_v24 }
 0x316   : > { %v1492_v25 = vpop.eup %1491 }
 0x317   : > { %v1106_v26 = vadd.f32 1.0, %v1492_v25  ;;  %v1494_v27 = vpop.eup %1493 }
 0x318   : > { %v1496_v28 = vpop.eup %1495  ;;  %v1117_v29 = vmul.f32 %v1494_v27, %v1490_v22 }
 0x319   : > { %1497 = vlog2.f32 %v1106_v26  ;;  %v1108_v31 = vmul.f32 0.6931472, %v1496_v28 }
 0x31a   : > { %1499 = vrcp.f32 %v1106_v26  ;;  %v1119_v30 = vsel %vm1115_vm15, %v1494_v27, %v1117_v29 }
 0x31b   : > { %v1111_v37 = vsub.f32 %v1103_v19, %v1108_v31  ;;  %v1121_v52 = vmul.f32 %v1119_v30, %v1786_v12 }
 0x31d   : > { %v1138_v41 = vsel %vm1137_vm2, %v1111_v37, 0.0 }
 0x31f   : > { %v1498_v33 = vpop.eup %1497 }
 0x320   : > { %v1500_v36 = vpop.eup %1499  ;;  %v1110_v35 = vmul.f32 0.6931472, %v1498_v33 }
 0x321   : > { %v1118_v32 = vmul.f32 %v1500_v36, %v1492_v25 }
 0x322   : > { %v1112_v39 = vsub.f32 %v1104_v38, %v1110_v35 }
 0x323   : > { %v1120_v40 = vsel %vm1116_vm3, %v1500_v36, %v1118_v32 }
 0x324   : > { %v1139_v21 = vsel %vm1137_vm2, %v1112_v39, 0.0  ;;  %v1122_v11 = vmul.f32 %v1120_v40, %v1790_v15 }
 0x325   : > { %v1140_v42 = vadd.f32 %v1139_v21, %v1138_v41 }
 0x327   : > { %v1141_v43 = vrot.slane %v1140_v42, 4 }
 0x329   : > { %v1142_v44 = vadd.f32 %v1141_v43, %v1140_v42 }
 0x32b   : > { %v1143_v45 = vrot.slane %v1142_v44, 2 }
 0x32d   : > { %v1144_v46 = vadd.f32 %v1143_v45, %v1142_v44 }
 0x32f   : > { %v1145_v47 = vrot.slane %v1144_v46, 1 }
 0x331   : > { %v1146_v48 = vadd.f32 %v1145_v47, %v1144_v46 }
 0x333   : > { %1148 = vrot.lane.b32.xlu0 %v1146_v48, %s1634_s21  ;;  %s1177_s21 = scalar_lea.sflag [#allocation5], %s2024_s30 }
 0x362   : > { %v1128_v49 = vpop.permute.xlu2 %1127 }
 0x363   : > { %v1132_v50 = vadd.f32 %v1128_v49, %v1122_v11 }
 0x365   : > { %v1134_v51 = vsel %vm541_vm1, %v1790_v15, %v1132_v50 }
 0x366   : > { %1136 = vst.msk [vmem:[%s437_s24 + $0x8] sm:$0xff] %vm480_vm0, %v1134_v51  ;;  %v1165_v54 = vmul.f32 %v1134_v51, %v1134_v51  ;;  %v1154_v55 = vsel %vm480_vm0, %v1134_v51, 0.0 }
 0x372   : > { %v1126_v53 = vpop.permute.xlu1 %1125 }
 0x373   : > { %v1131_v34 = vadd.f32 %v1126_v53, %v1121_v52 }
 0x375   : > { %v1133_v15 = vsel %vm541_vm1, %v1786_v12, %v1131_v34 }
 0x376   : > { %1135 = vst.msk [vmem:[%s437_s24] sm:$0xff] %vm480_vm0, %v1133_v15  ;;  %v1153_v56 = vsel %vm480_vm0, %v1133_v15, 0.0  ;;  %v1164_v57 = vmul.f32 %v1133_v15, %v1133_v15 }
 0x377   : > { %v1155_v58 = vadd.f32 %v1154_v55, %v1153_v56 }
 0x378   : > { %1528 = shalt.err (!%p1525_p3)
}
 0x379   : > { %s1635_s24 = smov 128   ;;  %s1636_s2 = smov 8   ;;  %v1167_v12 = vsel %vm480_vm0, %v1165_v54, 0.0  ;;  %v1166_v59 = vsel %vm480_vm0, %v1164_v57, 0.0  ;;  %v1156_v60 = vrot.slane %v1155_v58, 4  ;;  %vm1162_vm0 = vcmask 188416  }
 0x37a   : > { %1423 = dma.vmem_to_hbm [thread:$0]  (%p1747_p5), %s1201_s17, 256, %s1203_s20, %s1177_s21, %s1635_s24, %s1635_s24, %s1636_s2   ;;  %v1168_v61 = vadd.f32 %v1167_v12, %v1166_v59 }
 0x37b   : > { %v1157_v62 = vadd.f32 %v1156_v60, %v1155_v58  ;;  %s1217_s27 = scalar_lea.hbm %s2140_s12, %s1728_s29  ;;  %s1184_s15 = sand.u32 1, %s1728_s29  }
 0x37c   : > { %v1169_v63 = vrot.slane %v1168_v61, 4  ;;  %s1230_s17 = scalar_lea.hbm %s2141_s13, %s1728_s29  ;;  %s448_s20 = scalar_lea.vmem [#allocation6], %s2024_s30 }
 0x37d   : > { %v1158_v1 = vrot.slane %v1157_v62, 2  ;;  %s2064_s21 = sshll.u32 %s448_s20, 4  ;;  %s2066_s23 = sshll.u32 %s1217_s27, 4  ;;  %s1220_s21 = int_to_ptr.vmem [resolvable:$true] %s2064_s21  ;;  %s1222_s23 = int_to_ptr.hbm [resolvable:$true] %s2066_s23 }
 0x37e   : > { %v1170_v0 = vadd.f32 %v1169_v63, %v1168_v61  ;;  %s454_s14 = scalar_lea.vmem [#allocation8], %s2024_s30  ;;  %s2071_s0 = sshll.u32 %s1230_s17, 4  ;;  %s1235_s0 = int_to_ptr.hbm [resolvable:$true] %s2071_s0 }
 0x37f   : > { %v1159_v2 = vadd.f32 %v1158_v1, %v1157_v62  ;;  %s2069_s24 = sshll.u32 %s454_s14, 4  ;;  %s1185_s29 = scalar_lea.sflag [#allocation7], %s1184_s15  ;;  %s1233_s24 = int_to_ptr.vmem [resolvable:$true] %s2069_s24 }
 0x380   : > { %v1171_v3 = vrot.slane %v1170_v0, 2  ;;  %s1543_s1 = sshra.s32 %s1222_s23, 4  ;;  %s1549_s2 = scalar_lea.hbm %s2140_s12, 2  ;;  %s1544_s1 = int_to_ptr.hbm [resolvable:$true] %s1543_s1 }
 0x381   : > { %v1160_v4 = vrot.slane %v1159_v2, 1  ;;  %s1545_s30 = scalar_lea.hbm %s1544_s1, 1  ;;  %p1550_p9 = scmp.lt.s32.totalorder %s1544_s1, %s2140_s12 }
 0x382   : > { %v1172_v5 = vadd.f32 %v1171_v3, %v1170_v0  ;;  %p1546_p4 = scmp.ne.s32.totalorder %s1544_s1, %s1545_s30  ;;  %p1551_p10 = scmp.lt.s32.totalorder %s1549_s2, %s1545_s30 }
 0x383   : > { %v1161_v6 = vadd.f32 %v1160_v4, %v1159_v2 }
 0x384   : > { %v1173_v7 = vrot.slane %v1172_v5, 1  ;;  %p1547_p7 = pnand %p1546_p4, %p1747_p5  ;;  %p1552_p11 = por %p1551_p10, %p1550_p9 }
 0x385   : > { %1163 = vst.msk [vmem:[%s448_s20] sm:$0x1] %vm1162_vm0, %v1161_v6 }
 0x386   : > { %v1174_v8 = vadd.f32 %v1173_v7, %v1172_v5  ;;  %p1548_p8 = pneg %p1547_p7 }
 0x388   : > { %p1553_p12 = pnand %p1552_p11, %p1548_p8 }
 0x38a   : > { %1556 = shalt.err (!%p1553_p12)
}
 0x38b   : > { %1424 = dma.vmem_to_hbm [thread:$0]  (%p1747_p5), %s1220_s21, 16, %s1222_s23, %s1185_s29   ;;  %1175 = vst.msk [vmem:[%s454_s14] sm:$0x1] %vm1162_vm0, %v1174_v8 }
 0x38c   : > { %s1571_s15 = sshra.s32 %s1235_s0, 4  ;;  %s1577_s30 = scalar_lea.hbm %s2141_s13, 2  ;;  %s1572_s15 = int_to_ptr.hbm [resolvable:$true] %s1571_s15 }
 0x38d   : > { %s1573_s20 = scalar_lea.hbm %s1572_s15, 1  ;;  %p1578_p2 = scmp.lt.s32.totalorder %s1572_s15, %s2141_s13 }
 0x38e   : > { %p1574_p13 = scmp.ne.s32.totalorder %s1572_s15, %s1573_s20  ;;  %p1579_p3 = scmp.lt.s32.totalorder %s1577_s30, %s1573_s20 }
 0x390   : > { %p1575_p0 = pnand %p1574_p13, %p1747_p5  ;;  %p1580_p4 = por %p1579_p3, %p1578_p2 }
 0x392   : > { %p1576_p1 = pneg %p1575_p0 }
 0x394   : > { %p1581_p7 = pnand %p1580_p4, %p1576_p1 }
 0x396   : > { %1584 = shalt.err (!%p1581_p7)
}
 0x397   : > { %1425 = dma.vmem_to_hbm [thread:$0]  (%p1747_p5), %s1233_s24, 16, %s1235_s0, %s1185_s29   ;;  %vm1151_vm1 = vcmask 90112  }
 0x398   : > { %s462_s14 = scalar_lea.vmem %s2139_s11, %s1768_s16 }
 0x3a5   : > { %v1149_v9 = vpop.permute.xlu0 %1148 }
 0x3a6   : > { %1152 = vst.msk [vmem:[%s462_s14] sm:$0x1] %vm1151_vm1, %v1149_v9 }
 0x3a7 PF: > { %p1439_p8 = scmp.ge.s32.totalorder %s1623_s28, 2  ;;  %s1246_s2 = sand.u32 1, %s1611_s25  }
 0x3a8   : > { %s1247_s18 = scalar_lea.sflag [#allocation5], %s1246_s2 }
 0x3a9   : > { %p1430_p9 = pnand %p1439_p8, %p1751_p6 }
 0x3ab   : > { %p1431_p10 = pneg %p1430_p9 }
 0x3ad   : > { %1602 = dma.done.wait (%p1431_p10), %s1247_s18, 256  }
 0x3ae   : > { %1604 = vsyncadd (%p1431_p10), %s1247_s18, 4294967040  ;;  %s2170_s24 = sadd.s32 4294967294, %s1623_s28  }
 0x3af   : > { %s1262_s0 = sand.u32 1, %s2170_s24  }
 0x3b0   : > { %s1263_s29 = scalar_lea.sflag [#allocation7], %s1262_s0 }
 0x3b1   : > { %1606 = dma.done.wait (%p1431_p10), %s1263_s29, 32  }
 0x3b2   : > { %1608 = vsyncadd (%p1431_p10), %s1263_s29, 4294967264  ;;  %s2171_s28 = sld [smem:[#allocation12_spill]]  ;;  %s2174_s25 = smov %s1615_s26 }
 0x3b3   : > { %s2172_s16 = sld [smem:[#allocation11_spill]] }
 0x3b4   : > { %s2173_s27 = sld [smem:[#allocation13_spill]] }
 0x3b8   : > { %p27_p5 = scmp.ge.s32.totalorder %s2171_s28, 4  }
 0x3b9   : > { %s2175_s26 = smov %s2172_s16 }
 0x3ba   :  { %29 = sbr.rel (!%p27_p5) target bundleno = 10 (0xa), region = 147 }
 0x3bf   :  { %1277 = vsyncpa [#allocation5], 1 }
 0x3c0   :  { %1279 = vsyncpa [#allocation5 + $0x1], 1 }
 0x3c1   :  { %1280 = vsyncpa [#allocation7], 1 }
 0x3c2   :  { %1282 = vsyncpa [#allocation7 + $0x1], 1 }

// kernel: _lambda_.10
= control target key start
LH: loop header
LB: loop body
LE: loop exit
PB: predicated region body
PF: predicated region fallthrough
CT: control target
= control target key end

     0   :  { %s1488_s25 = smov 0   ;;  %s1794_s0 = inlined_call_operand.vmem [shape: f32[2,16,24], index: 0, kind: input, shape index: {}]   ;;  %s1795_s1 = inlined_call_operand.vmem [shape: f32[1,24], index: 1, kind: input, shape index: {}]   ;;  %s1796_s2 = inlined_call_operand.vmem [shape: f32[1,24], index: 2, kind: input, shape index: {}]   ;;  %s1797_s3 = inlined_call_operand.vmem [shape: f32[24,24], index: 3, kind: input, shape index: {}]   ;;  %s1798_s4 = inlined_call_operand.vmem [shape: f32[108,16], index: 4, kind: input, shape index: {}]   ;;  %s1799_s5 = inlined_call_operand.vmem [shape: f32[1,16], index: 5, kind: input, shape index: {}, may-alias: {5,7}]   ;;  %s1800_s6 = inlined_call_operand.vmem [shape: f32[16,16], index: 6, kind: input, shape index: {}]   ;;  %s1801_s7 = inlined_call_operand.vmem [shape: f32[1,16], index: 7, kind: input, shape index: {}, may-alias: {5,7}]   ;;  %s1802_s8 = inlined_call_operand.vmem [shape: f32[9,16,24], index: 8, kind: input, shape index: {}]   ;;  %s1803_s9 = inlined_call_operand.vmem [shape: f32[1,24], index: 9, kind: input, shape index: {}]   ;;  %s1804_s10 = inlined_call_operand.vmem [shape: f32[2,16,24], index: 10, kind: output, shape index: {0}]   ;;  %s1805_s11 = inlined_call_operand.vmem [shape: f32[2,1,12], index: 11, kind: output, shape index: {1}]   ;;  %s1806_s12 = inlined_call_operand.vmem [shape: f32[2,1,24], index: 12, kind: output, shape index: {2}]   ;;  %s1807_s13 = inlined_call_operand.vmem [shape: f32[2,1,24], index: 13, kind: output, shape index: {3}]  }
   0x1 LB: > { %s1309_s26 = sadd.s32 4294967295, %s1406_s25   ;;  %p1313_p0 = scmp.ge.s32.totalorder %s1406_s25, 1  ;;  %s1406_s25 = sphi %s1488_s25, %s24_s25  }
   0x2   : > { %p394_p1 = scmp.lt.s32.totalorder %s1406_s25, 3 }
   0x4   : > { %p395_p2 = pnand %p1313_p0, %p394_p1 }
   0x5   : > { %p447_p3 = scmp.lt.s32.totalorder (!%p395_p2), %s1309_s26, 1  ;;  %s1409_s24 = smov (!%p395_p2), 48  }
   0x6   : > { %398 = sbr.rel (%p395_p2) target bundleno = 917 (0x395), region = 60  ;;  %s1410_s27 = smov (!%p395_p2), 12  }
   0x7   : > { %s1411_s28 = smov (!%p395_p2), 36   ;;  %s1412_s29 = smov (!%p395_p2), 24  }
   0x8   : > { %s1413_s30 = smov (!%p395_p2), 96   ;;  %s1414_s14 = smov (!%p395_p2), 84  }
   0x9   : > { %s1415_s15 = smov (!%p395_p2), 60   ;;  %s1416_s16 = smov (!%p395_p2), 72  }
   0xb   : > { %v482_v0 = vld [vmem:[%s1797_s3 + $0x10] sm:$0xff]  ;;  %v481_v1 = vld [vmem:[%s1797_s3 + $0x8] sm:$0xff]  ;;  %v480_v2 = vld [vmem:[%s1797_s3] sm:$0xff]  ;;  %s1817_s26 = smov (!%p447_p3, %s1309_s26), 1  ;;  %vm483_vm0 = vcmask 195584   ;;  %vm544_vm1 = vcmask 97280   ;;  %v513_v13 = vlaneseq }
   0xc   : > { %503 = vmatpush.msra.mxu0 %v482_v0  ;;  %v1383_v3 = vld [vmem:[%s1795_s1] ss:$0 sm:$0xff]  ;;  %s1361_s18 = sshll.u32 %s1817_s26, 4  ;;  %v1408_v11 = vmov 0.0   ;;  %v682_v47 = vld [vmem:[%s1798_s4 + $0x68] sm:$0xf]  ;;  %s462_s17 = scalar_lea.vmem %s1806_s12, %s1817_s26 }
   0xd   : > { %s451_s21 = scalar_lea.vmem %s1794_s0, %s1361_s18  ;;  %v1384_v4 = vld [vmem:[%s1796_s2] ss:$0 sm:$0xff]  ;;  %545 = vst.msk [vmem:[#allocation2] sm:$0xff] %vm544_vm1, %v1408_v11  ;;  %v514_v14 = vshrl.u32 %v513_v13, 7  ;;  %vm694_vm6 = vcmask 1043456   ;;  %v680_v49 = vld [vmem:[%s1798_s4 + $0x58] sm:$0xff] }
   0xe   : > { %504 = vmatpush.msra.mxu0 %v481_v1  ;;  %v466_v5 = vld [vmem:[%s451_s21] sm:$0xff]  ;;  %v467_v7 = vld [vmem:[%s451_s21 + $0x8] sm:$0xff]  ;;  %546 = vst.msk [vmem:[#allocation2 + $0x18] sm:$0xff] %vm544_vm1, %v1408_v11  ;;  %1320 = vmatpush.msk.msra.mxu1 %vm694_vm6, %v682_v47  ;;  %v679_v50 = vld [vmem:[%s1798_s4 + $0x50] sm:$0xff]  ;;  %vm651_vm7 = vcmask 293888   ;;  %vm654_vm8 = vcmask 392192   ;;  %s465_s21 = scalar_lea.vmem %s1807_s13, %s1817_s26 }
   0xf   : > { %v472_v6 = vmul.f32 %v1383_v3, %v466_v5  ;;  %v473_v9 = vmul.f32 %v1383_v3, %v467_v7  ;;  %v520_v18 = vand.u32 3, %v514_v14  ;;  %v515_v27 = vadd.s32 8, %v514_v14  ;;  %v681_v48 = vld [vmem:[%s1798_s4 + $0x60] sm:$0xff]  ;;  %v678_v51 = vld [vmem:[%s1798_s4 + $0x48] sm:$0xff]  ;;  %v676_v53 = vld [vmem:[%s1798_s4 + $0x38] sm:$0xff] }
  0x10   : > { %505 = vmatpush.msra.mxu0 %v480_v2  ;;  %701 = vmatpush.msra.mxu1 %v681_v48  ;;  %v677_v52 = vld [vmem:[%s1798_s4 + $0x40] sm:$0xff]  ;;  %v675_v54 = vld [vmem:[%s1798_s4 + $0x30] sm:$0xff]  ;;  %v674_v55 = vld [vmem:[%s1798_s4 + $0x28] sm:$0xff]  ;;  %vm657_vm9 = vcmask 490496   ;;  %vm660_vm10 = vcmask 588800   ;;  %vm663_vm11 = vcmask 687104  }
  0x11   : > { %v478_v8 = vadd.f32 %v1384_v4, %v472_v6  ;;  %v479_v10 = vadd.f32 %v1384_v4, %v473_v9  ;;  %vm1535_vm2 = vcmp.ge.s32.totalorder %v520_v18, 1  ;;  %vm1539_vm3 = vcmp.le.s32.totalorder %v520_v18, 2  ;;  %v673_v56 = vld [vmem:[%s1798_s4 + $0x20] sm:$0xff]  ;;  %v672_v57 = vld [vmem:[%s1798_s4 + $0x18] sm:$0xff]  ;;  %v671_v58 = vld [vmem:[%s1798_s4 + $0x10] sm:$0xff] }
  0x12   : > { %v527_v31 = vand.u32 3, %v515_v27  ;;  %702 = vmatpush.msra.mxu1 %v680_v49  ;;  %v670_v59 = vld [vmem:[%s1798_s4 + $0x8] sm:$0xff]  ;;  %v669_v60 = vld [vmem:[%s1798_s4] sm:$0xff]  ;;  %vm666_vm12 = vcmask 785408   ;;  %vm687_vm13 = vcmask 883712   ;;  %vm729_vm14 = vcmask 130048  }
  0x13   : > { %1318 = vmatmul.msk.f32.vlgmr.msra.gmra.mxu0 %vm483_vm0, %v478_v8  ;;  %761 = vst.msk [vmem:[#allocation3] sm:$0xff] %vm729_vm14, %v1408_v11  ;;  %v1326_v48 = vld [vmem:[%s1802_s8 + $0x18] sm:$0xff] }
  0x14   : > { %vm1552_vm4 = vcmp.ge.s32.totalorder %v527_v31, 1  ;;  %vm1556_vm5 = vcmp.le.s32.totalorder %v527_v31, 2  ;;  %703 = vmatpush.msra.mxu1 %v679_v50  ;;  %762 = vst.msk [vmem:[#allocation3 + $0x18] sm:$0xff] %vm729_vm14, %v1408_v11  ;;  %v793_v11 = vld [vmem:[%s1802_s8 + $0x8] sm:$0xff]  ;;  %v1336_v49 = vld [vmem:[%s1802_s8 + $0x38] sm:$0xff]  ;;  %v1325_v50 = vld [vmem:[%s1802_s8 + $0x10] sm:$0xff] }
  0x15   : > { %912 = vmatpush.msrb.mxu0 %v1336_v49 }
  0x16   : > { %704 = vmatpush.msra.mxu1 %v678_v51  ;;  %v792_v51 = vld [vmem:[%s1802_s8] sm:$0xff] }
  0x18   : > { %705 = vmatpush.msra.mxu1 %v677_v52  ;;  %v1335_v52 = vld [vmem:[%s1802_s8 + $0x30] sm:$0xff] }
  0x19   : > { %913 = vmatpush.msrb.mxu0 %v1335_v52 }
  0x1a   : > { %706 = vmatpush.msra.mxu1 %v676_v53  ;;  %v1332_v53 = vld [vmem:[%s1802_s8 + $0x28] sm:$0xff] }
  0x1b   : > { %1319 = vmatmul.msk.f32.gmra.mxu0 %vm483_vm0, %v479_v10 }
  0x1c   : > { %707 = vmatpush.msra.mxu1 %v675_v54  ;;  %v1352_v54 = vld [vmem:[%s1802_s8 + $0x78] sm:$0xff] }
  0x1e   : > { %708 = vmatpush.msra.mxu1 %v674_v55  ;;  %v1340_v55 = vld [vmem:[%s1802_s8 + $0x48] sm:$0xff] }
  0x20   : > { %709 = vmatpush.msra.mxu1 %v673_v56  ;;  %v1386_v56 = vld [vmem:[%s1801_s7] ss:$0 sm:$0xff] }
  0x22   : > { %710 = vmatpush.msra.mxu1 %v672_v57  ;;  %v1351_v57 = vld [vmem:[%s1802_s8 + $0x70] sm:$0xff] }
  0x24   : > { %711 = vmatpush.msra.mxu1 %v671_v58 }
  0x26   : > { %712 = vmatpush.msra.mxu1 %v670_v59 }
  0x28   : > { %713 = vmatpush.msra.mxu1 %v669_v60 }
  0x2a   : > { %1045 = vmatpush.msrb.mxu1 %v1352_v54 }
  0x2c   : > { %1046 = vmatpush.msrb.mxu1 %v1351_v57 }
  0x90   : > { %v1525_v12 = vpop.f32.mrf.mxu0 }
  0x91   : > { %547 = vst.msk [vmem:[#allocation2 + $0x8] sm:$0xff] %vm544_vm1, %v1525_v12 }
  0x98   : > { %v1529_v15 = vpop.f32.mrf.mxu0  ;;  %v571_v16 = vld [vmem:[#allocation2 + $0x8] sm:$0xff] }
  0x99   : > { %v557_v17 = vld [vmem:[#allocation2 + $0x4] sm:$0xff]  ;;  %548 = vst.msk [vmem:[#allocation2 + $0x10] sm:$0xff] %vm544_vm1, %v1529_v15  ;;  %610 = vrot.lane.b32.xlu1 %v571_v16, %s1409_s24 }
  0x9a   : > { %586 = vrot.lane.b32.xlu0 %v557_v17, %s1410_s27  ;;  %v567_v20 = vld [vmem:[#allocation2 + $0x7] sm:$0xff] }
  0x9b   : > { %v559_v22 = vld [vmem:[#allocation2 + $0x5] sm:$0xff]  ;;  %v569_v23 = vsel %vm1535_vm2, %v567_v20, 0.0 }
  0x9c   : > { %v565_v24 = vsel %vm1539_vm3, %v559_v22, 0.0  ;;  %v549_v0 = vld [vmem:[#allocation2 + $0x3] sm:$0xff] }
  0x9d   : > { %v555_v2 = vsel %vm1535_vm2, %v549_v0, 0.0 }
  0xa0   : > { %v558_v25 = vld [vmem:[#allocation2 + $0xc] sm:$0xff]  ;;  %v581_v44 = vld [vmem:[#allocation2 + $0x15] sm:$0xff] }
  0xa1   : > { %602 = vrot.lane.b32.xlu1 %v569_v23, %s1411_s28  ;;  %588 = vrot.lane.b32.xlu2 %v558_v25, %s1410_s27  ;;  %v560_v26 = vld [vmem:[#allocation2 + $0xd] sm:$0xff]  ;;  %v583_v45 = vsel %vm1556_vm5, %v581_v44, 0.0 }
  0xa2   : > { %594 = vrot.lane.b32.xlu0 %v565_v24, %s1412_s29  ;;  %v573_v28 = vld [vmem:[#allocation2 + $0x9] sm:$0xff]  ;;  %v582_v29 = vsel %vm1539_vm3, %v560_v26, 0.0  ;;  %v566_v37 = vsel %vm1556_vm5, %v560_v26, 0.0  ;;  %v577_v39 = vld [vmem:[#allocation2 + $0x13] sm:$0xff] }
  0xa3   : > { %v575_v30 = vsel %vm1539_vm3, %v573_v28, 0.0  ;;  %v568_v33 = vld [vmem:[#allocation2 + $0xf] sm:$0xff]  ;;  %v579_v41 = vsel %vm1552_vm4, %v577_v39, 0.0 }
  0xa4   : > { %v1560_v35 = vld [vmem:[#allocation2 + $0xb] sm:$0xff]  ;;  %v570_v36 = vsel %vm1552_vm4, %v568_v33, 0.0  ;;  %v580_v46 = vld [vmem:[#allocation2 + $0x14] sm:$0xff] }
  0xa5   : > { %v578_v38 = vsel %vm1535_vm2, %v1560_v35, 0.0  ;;  %v574_v40 = vld [vmem:[#allocation2 + $0x11] sm:$0xff]  ;;  %v556_v23 = vsel %vm1552_vm4, %v1560_v35, 0.0  ;;  %v724_v39 = vld [vmem:[%s1800_s6 + $0x8] sm:$0xff] }
  0xa6   : > { %v576_v42 = vsel %vm1556_vm5, %v574_v40, 0.0  ;;  %v572_v43 = vld [vmem:[#allocation2 + $0x10] sm:$0xff]  ;;  %750 = vmatpush.msra.mxu2 %v724_v39  ;;  %v723_v40 = vld [vmem:[%s1800_s6] sm:$0xff]  ;;  %1363 = vmatpush.msra.mxu3 %v724_v39 }
  0xa8   : > { %751 = vmatpush.msra.mxu2 %v723_v40  ;;  %1364 = vmatpush.msra.mxu3 %v723_v40 }
  0xa9   : > { %641 = vrot.lane.b32.xlu1 %v582_v29, %s1413_s30  ;;  %618 = vrot.lane.b32.xlu2 %v575_v30, %s1415_s15 }
  0xaa   : > { %633 = vrot.lane.b32.xlu0 %v558_v25, %s1414_s14  ;;  %817 = vmatpush.msrb.mxu3 %v1326_v48 }
  0xab   : > { %846 = vmatpush.msrb.mxu2 %v793_v11 }
  0xac   : > { %818 = vmatpush.msrb.mxu3 %v1325_v50 }
  0xad   : > { %847 = vmatpush.msrb.mxu2 %v792_v51 }
  0xb1   : > { %604 = vrot.lane.b32.xlu1 %v570_v36, %s1411_s28  ;;  %626 = vrot.lane.b32.xlu2 %v578_v38, %s1416_s16 }
  0xb2   : > { %596 = vrot.lane.b32.xlu0 %v566_v37, %s1412_s29 }
  0xb9   : > { %628 = vrot.lane.b32.xlu1 %v579_v41, %s1416_s16  ;;  %612 = vrot.lane.b32.xlu2 %v572_v43, %s1409_s24  ;;  %v1385_v41 = vld [vmem:[%s1799_s5] ss:$0 sm:$0xff]  ;;  %s459_s24 = scalar_lea.vmem %s1805_s11, %s1817_s26 }
  0xba   : > { %620 = vrot.lane.b32.xlu0 %v576_v42, %s1415_s15  ;;  %s456_s15 = scalar_lea.vmem %s1804_s10, %s1361_s18 }
  0xc1   : > { %635 = vrot.lane.b32.xlu2 %v580_v46, %s1414_s14 }
  0xc2   : > { %643 = vrot.lane.b32.xlu0 %v583_v45, %s1413_s30 }
  0xfb   : > { %v589_v61 = vpop.permute.xlu2 %588 }
  0xfc   : > { %v648_v24 = vsel %vm544_vm1, %v556_v23, %v589_v61  ;;  %v1331_v61 = vld [vmem:[%s1802_s8 + $0x20] sm:$0xff] }
 0x103   : > { %v619_v1 = vpop.permute.xlu2 %618 }
 0x10b   : > { %v611_v62 = vpop.permute.xlu1 %610  ;;  %v627_v10 = vpop.permute.xlu2 %626 }
 0x10c   : > { %v587_v63 = vpop.permute.xlu0 %586 }
 0x10d   : > { %v647_v3 = vsel %vm544_vm1, %v555_v2, %v587_v63  ;;  %v1348_v63 = vld [vmem:[%s1802_s8 + $0x68] sm:$0xff] }
 0x10e   : > { %1014 = vmatpush.msra.mxu0 %v1348_v63 }
 0x113   : > { %v603_v4 = vpop.permute.xlu1 %602  ;;  %v613_v26 = vpop.permute.xlu2 %612 }
 0x114   : > { %v595_v5 = vpop.permute.xlu0 %594 }
 0x115   : > { %v649_v6 = vsel %vm483_vm0, %v647_v3, %v595_v5  ;;  %v1344_v5 = vld [vmem:[%s1802_s8 + $0x58] sm:$0xff] }
 0x116   : > { %v652_v7 = vsel %vm651_vm7, %v649_v6, %v603_v4  ;;  %v1347_v6 = vld [vmem:[%s1802_s8 + $0x60] sm:$0xff] }
 0x117   : > { %v655_v8 = vsel %vm654_vm8, %v652_v7, %v611_v62  ;;  %v1339_v62 = vld [vmem:[%s1802_s8 + $0x40] sm:$0xff]  ;;  %v1356_v7 = vld [vmem:[%s1802_s8 + $0x88] sm:$0xff]  ;;  %1015 = vmatpush.msra.mxu0 %v1347_v6 }
 0x118   : > { %v658_v9 = vsel %vm657_vm9, %v655_v8, %v619_v1  ;;  %v1343_v8 = vld [vmem:[%s1802_s8 + $0x50] sm:$0xff] }
 0x119   : > { %v661_v16 = vsel %vm660_vm10, %v658_v9, %v627_v10  ;;  %v1355_v9 = vld [vmem:[%s1802_s8 + $0x80] sm:$0xff] }
 0x11b   : > { %v642_v13 = vpop.permute.xlu1 %641  ;;  %v636_v36 = vpop.permute.xlu2 %635 }
 0x11c   : > { %v634_v14 = vpop.permute.xlu0 %633 }
 0x11d   : > { %v664_v17 = vsel %vm663_vm11, %v661_v16, %v634_v14 }
 0x11e   : > { %v667_v18 = vsel %vm666_vm12, %v664_v17, %v642_v13 }
 0x11f   : > { %1321 = vmatmul.msk.f32.vlgmr.msra.gmra.mxu1 %vm687_vm13, %v667_v18 }
 0x123   : > { %v605_v20 = vpop.permute.xlu1 %604 }
 0x124   : > { %v597_v22 = vpop.permute.xlu0 %596 }
 0x125   : > { %v650_v25 = vsel %vm483_vm0, %v648_v24, %v597_v22 }
 0x126   : > { %v653_v27 = vsel %vm651_vm7, %v650_v25, %v605_v20 }
 0x127   : > { %v656_v29 = vsel %vm654_vm8, %v653_v27, %v613_v26 }
 0x12b   : > { %v629_v30 = vpop.permute.xlu1 %628 }
 0x12c   : > { %v621_v28 = vpop.permute.xlu0 %620 }
 0x12d   : > { %v659_v31 = vsel %vm657_vm9, %v656_v29, %v621_v28 }
 0x12e   : > { %v662_v33 = vsel %vm660_vm10, %v659_v31, %v629_v30 }
 0x12f   : > { %v665_v38 = vsel %vm663_vm11, %v662_v33, %v636_v36 }
 0x134   : > { %v644_v37 = vpop.permute.xlu0 %643 }
 0x135   : > { %v668_v35 = vsel %vm666_vm12, %v665_v38, %v644_v37 }
 0x136   : > { %1322 = vmatmul.msk.f32.gmra.mxu1 %vm687_vm13, %v668_v35 }
 0x19c   : > { %v715_v42 = vpop.f32.mrf.mxu1 }
 0x19d   : > { %v716_v43 = vadd.f32 %v1385_v41, %v715_v42 }
 0x19f   : > { %v721_v44 = vmax.f32 %v716_v43, 0.0 }
 0x1a1   : > { %1323 = vmatmul.msk.f32.vlgmr.msra.gmra.mxu2 %vm729_vm14, %v721_v44 }
 0x1a2   : > { %946 = vmatpush.msra.mxu2 %v1340_v55 }
 0x1a4   : > { %947 = vmatpush.msra.mxu2 %v1339_v62 }
 0x1b3   : > { %v718_v45 = vpop.f32.mrf.mxu1 }
 0x1b4   : > { %v719_v46 = vadd.f32 %v1385_v41, %v718_v45 }
 0x1b6   : > { %v722_v47 = vmax.f32 %v719_v46, 0.0 }
 0x1b8   : > { %1324 = vmatmul.msk.f32.vlgmr.msra.gmra.mxu3 %vm729_vm14, %v722_v47 }
 0x1b9   : > { %878 = vmatpush.msra.mxu3 %v1332_v53 }
 0x1bb   : > { %879 = vmatpush.msra.mxu3 %v1331_v61  ;;  %v1387_v61 = vld [vmem:[%s1803_s9] ss:$0 sm:$0xff] }
 0x224   : > { %v753_v58 = vpop.f32.mrf.mxu2 }
 0x225   : > { %v754_v59 = vadd.f32 %v1386_v56, %v753_v58 }
 0x227   : > { %v759_v60 = vmax.f32 %v754_v59, 0.0 }
 0x229   : > { %763 = vst.msk [vmem:[#allocation3 + $0x8] sm:$0xff] %vm729_vm14, %v759_v60 }
 0x230   : > { %v769_v0 = vld [vmem:[#allocation3 + $0x4] sm:$0xff] }
 0x231   : > { %v765_v1 = vld [vmem:[#allocation3 + $0x3] sm:$0xff]  ;;  %1327 = vmatmul.msk.f32.vlgmr.msrb.gmra.mxu3 %vm729_vm14, %v769_v0 }
 0x232   : > { %v775_v2 = vld [vmem:[#allocation3 + $0x7] sm:$0xff]  ;;  %v767_v3 = vsel %vm1535_vm2, %v765_v1, 0.0  ;;  %980 = vmatpush.msrb.mxu3 %v1344_v5 }
 0x233   : > { %v777_v4 = vsel %vm1535_vm2, %v775_v2, 0.0  ;;  %1329 = vmatmul.msk.f32.vlgmr.msrb.gmra.mxu2 %vm729_vm14, %v767_v3  ;;  %v771_v23 = vld [vmem:[#allocation3 + $0x5] sm:$0xff] }
 0x234   : > { %1337 = vmatmul.msk.f32.vlgmr.msrb.gmra.mxu0 %vm729_vm14, %v777_v4  ;;  %1079 = vmatpush.msrb.mxu2 %v1356_v7  ;;  %v773_v24 = vsel %vm1539_vm3, %v771_v23, 0.0  ;;  %v779_v27 = vld [vmem:[#allocation3 + $0x8] sm:$0xff] }
 0x235   : > { %981 = vmatpush.msrb.mxu3 %v1343_v8 }
 0x236   : > { %1080 = vmatpush.msrb.mxu2 %v1355_v9 }
 0x23b   : > { %v756_v10 = vpop.f32.mrf.mxu3 }
 0x23c   : > { %v757_v13 = vadd.f32 %v1386_v56, %v756_v10 }
 0x23e   : > { %v760_v14 = vmax.f32 %v757_v13, 0.0 }
 0x240   : > { %764 = vst.msk [vmem:[#allocation3 + $0x10] sm:$0xff] %vm729_vm14, %v760_v14 }
 0x247   : > { %v770_v16 = vld [vmem:[#allocation3 + $0xc] sm:$0xff]  ;;  %v788_v25 = vld [vmem:[#allocation3 + $0x14] sm:$0xff] }
 0x248   : > { %v766_v17 = vld [vmem:[#allocation3 + $0xb] sm:$0xff]  ;;  %1328 = vmatmul.msk.f32.gmra.mxu3 %vm729_vm14, %v770_v16  ;;  %1353 = vmatmul.msk.f32.vlgmr.msrb.gmra.mxu1 %vm729_vm14, %v770_v16  ;;  %v785_v29 = vld [vmem:[#allocation3 + $0x13] sm:$0xff] }
 0x249   : > { %v776_v18 = vld [vmem:[#allocation3 + $0xf] sm:$0xff]  ;;  %v768_v20 = vsel %vm1552_vm4, %v766_v17, 0.0  ;;  %v786_v26 = vsel %vm1535_vm2, %v766_v17, 0.0  ;;  %v787_v19 = vsel %vm1552_vm4, %v785_v29, 0.0  ;;  %vm1140_vm2 = vcmask 195680  }
 0x24a   : > { %v778_v22 = vsel %vm1552_vm4, %v776_v18, 0.0  ;;  %1330 = vmatmul.msk.f32.gmra.mxu2 %vm729_vm14, %v768_v20  ;;  %v772_v28 = vld [vmem:[#allocation3 + $0xd] sm:$0xff]  ;;  %v789_v35 = vld [vmem:[#allocation3 + $0x15] sm:$0xff] }
 0x24b   : > { %1338 = vmatmul.msk.f32.gmra.mxu0 %vm729_vm14, %v778_v22  ;;  %v774_v30 = vsel %vm1556_vm5, %v772_v28, 0.0  ;;  %v780_v31 = vld [vmem:[#allocation3 + $0x10] sm:$0xff]  ;;  %v790_v37 = vsel %vm1539_vm3, %v772_v28, 0.0  ;;  %v791_v39 = vsel %vm1556_vm5, %v789_v35, 0.0 }
 0x24c   : > { %v781_v33 = vld [vmem:[#allocation3 + $0x9] sm:$0xff]  ;;  %v782_v38 = vld [vmem:[#allocation3 + $0x11] sm:$0xff] }
 0x24d   : > { %v783_v36 = vsel %vm1539_vm3, %v781_v33, 0.0  ;;  %v784_v32 = vsel %vm1556_vm5, %v782_v38, 0.0 }
 0x250   : > { %1333 = vmatmul.msk.f32.vlgmr.msra.gmra.mxu3 %vm729_vm14, %v773_v24  ;;  %1354 = vmatmul.msk.f32.gmra.mxu1 %vm729_vm14, %v788_v25 }
 0x252   : > { %1341 = vmatmul.msk.f32.vlgmr.msra.gmra.mxu2 %vm729_vm14, %v779_v27 }
 0x253   : > { %1349 = vmatmul.msk.f32.vlgmr.msra.gmra.mxu0 %vm729_vm14, %v786_v26 }
 0x258   : > { %1334 = vmatmul.msk.f32.gmra.mxu3 %vm729_vm14, %v774_v30 }
 0x25a   : > { %1342 = vmatmul.msk.f32.gmra.mxu2 %vm729_vm14, %v780_v31 }
 0x25b   : > { %1350 = vmatmul.msk.f32.gmra.mxu0 %vm729_vm14, %v787_v19 }
 0x260   : > { %1345 = vmatmul.msk.f32.vlgmr.msrb.gmra.mxu3 %vm729_vm14, %v783_v36 }
 0x262   : > { %1357 = vmatmul.msk.f32.vlgmr.msrb.gmra.mxu2 %vm729_vm14, %v790_v37 }
 0x268   : > { %1346 = vmatmul.msk.f32.gmra.mxu3 %vm729_vm14, %v784_v32 }
 0x26a   : > { %1358 = vmatmul.msk.f32.gmra.mxu2 %vm729_vm14, %v791_v39 }
 0x2b1   : > { %v915_v43 = vpop.f32.mrf.mxu0 }
 0x2b4   : > { %v820_v40 = vpop.f32.mrf.mxu3 }
 0x2b6   : > { %v849_v41 = vpop.f32.mrf.mxu2 }
 0x2b7   : > { %v850_v46 = vadd.f32 %v849_v41, %v820_v40 }
 0x2c5   : > { %v1048_v56 = vpop.f32.mrf.mxu1 }
 0x2c8   : > { %v918_v47 = vpop.f32.mrf.mxu0 }
 0x2cb   : > { %v823_v21 = vpop.f32.mrf.mxu3 }
 0x2cd   : > { %v852_v42 = vpop.f32.mrf.mxu2  ;;  %v1051_v6 = vpop.f32.mrf.mxu1 }
 0x2ce   : > { %v853_v51 = vadd.f32 %v852_v42, %v823_v21 }
 0x2d0   : > { %v1017_v34 = vpop.f32.mrf.mxu0 }
 0x2d3   : > { %v881_v44 = vpop.f32.mrf.mxu3 }
 0x2d4   : > { %v887_v48 = vadd.f32 %v881_v44, %v850_v46 }
 0x2d5   : > { %v949_v45 = vpop.f32.mrf.mxu2 }
 0x2d6   : > { %v921_v50 = vadd.f32 %v915_v43, %v887_v48 }
 0x2d8   : > { %v955_v52 = vadd.f32 %v949_v45, %v921_v50  ;;  %v1020_v3 = vpop.f32.mrf.mxu0 }
 0x2db   : > { %v884_v11 = vpop.f32.mrf.mxu3 }
 0x2dc   : > { %v888_v53 = vadd.f32 %v884_v11, %v853_v51 }
 0x2dd   : > { %v952_v49 = vpop.f32.mrf.mxu2 }
 0x2de   : > { %v922_v57 = vadd.f32 %v918_v47, %v888_v53 }
 0x2e0   : > { %v956_v62 = vadd.f32 %v952_v49, %v922_v57 }
 0x2e3   : > { %v983_v54 = vpop.f32.mrf.mxu3 }
 0x2e4   : > { %v989_v55 = vadd.f32 %v983_v54, %v955_v52 }
 0x2e5   : > { %v1082_v59 = vpop.f32.mrf.mxu2 }
 0x2e6   : > { %v1023_v58 = vadd.f32 %v1017_v34, %v989_v55 }
 0x2e8   : > { %v1054_v60 = vadd.f32 %v1048_v56, %v1023_v58 }
 0x2ea   : > { %v1088_v63 = vadd.f32 %v1082_v59, %v1054_v60 }
 0x2eb   : > { %v986_v0 = vpop.f32.mrf.mxu3 }
 0x2ec   : > { %v1094_v1 = vadd.f32 %v1387_v61, %v1088_v63  ;;  %v990_v2 = vadd.f32 %v986_v0, %v956_v62 }
 0x2ed   : > { %v1085_v9 = vpop.f32.mrf.mxu2 }
 0x2ee   : > { %v1096_v4 = vadd.f32 2.0, %v1094_v1  ;;  %v1024_v5 = vadd.f32 %v1020_v3, %v990_v2  ;;  %1128 = vrot.lane.b32.xlu1 %v1094_v1, %s1410_s27 }
 0x2f0   : > { %v1098_v7 = vand.u32 2147483647, %v1096_v4  ;;  %v1055_v8 = vadd.f32 %v1051_v6, %v1024_v5  ;;  %vm1118_vm15 = vcmp.ge.f32.partialorder %v1096_v4, 0.0  ;;  %v1106_v19 = vmin.f32 %v1096_v4, 0.0 }
 0x2f2   : > { %v1100_v10 = vsub.f32 0.0, %v1098_v7  ;;  %v1089_v13 = vadd.f32 %v1085_v9, %v1055_v8 }
 0x2f4   : > { %v1102_v14 = vmul.f32 1.442695, %v1100_v10  ;;  %v1095_v16 = vadd.f32 %v1387_v61, %v1089_v13 }
 0x2f6   : > { %1388 = vpow2.f32 %v1102_v14  ;;  %v1097_v17 = vadd.f32 2.0, %v1095_v16  ;;  %1130 = vrot.lane.b32.xlu2 %v1095_v16, %s1410_s27  ;;  %s1417_s27 = smov 116  }
 0x2f8   : > { %v1099_v18 = vand.u32 2147483647, %v1097_v17  ;;  %v1107_v38 = vmin.f32 %v1097_v17, 0.0  ;;  %vm1119_vm3 = vcmp.ge.f32.partialorder %v1097_v17, 0.0 }
 0x2fa   : > { %v1101_v20 = vsub.f32 0.0, %v1099_v18 }
 0x2fc   : > { %v1389_v22 = vpop.eup %1388  ;;  %v1104_v23 = vmul.f32 1.442695, %v1101_v20 }
 0x2fd   : > { %v1108_v24 = vadd.f32 1.0, %v1389_v22 }
 0x2fe   : > { %1390 = vpow2.f32 %v1104_v23 }
 0x2ff   : > { %1392 = vrcp.f32 %v1108_v24 }
 0x300   : > { %1394 = vlog2.f32 %v1108_v24 }
 0x304   : > { %v1391_v25 = vpop.eup %1390 }
 0x305   : > { %v1109_v26 = vadd.f32 1.0, %v1391_v25  ;;  %v1393_v27 = vpop.eup %1392 }
 0x306   : > { %v1395_v28 = vpop.eup %1394  ;;  %v1120_v29 = vmul.f32 %v1393_v27, %v1389_v22 }
 0x307   : > { %1396 = vlog2.f32 %v1109_v26  ;;  %v1111_v31 = vmul.f32 0.6931472, %v1395_v28 }
 0x308   : > { %1398 = vrcp.f32 %v1109_v26  ;;  %v1122_v30 = vsel %vm1118_vm15, %v1393_v27, %v1120_v29 }
 0x309   : > { %v1114_v37 = vsub.f32 %v1106_v19, %v1111_v31  ;;  %v1124_v52 = vmul.f32 %v1122_v30, %v1525_v12 }
 0x30b   : > { %v1141_v41 = vsel %vm1140_vm2, %v1114_v37, 0.0 }
 0x30d   : > { %v1397_v33 = vpop.eup %1396 }
 0x30e   : > { %v1399_v36 = vpop.eup %1398  ;;  %v1113_v35 = vmul.f32 0.6931472, %v1397_v33 }
 0x30f   : > { %v1121_v32 = vmul.f32 %v1399_v36, %v1391_v25 }
 0x310   : > { %v1115_v39 = vsub.f32 %v1107_v38, %v1113_v35 }
 0x311   : > { %v1123_v40 = vsel %vm1119_vm3, %v1399_v36, %v1121_v32 }
 0x312   : > { %v1142_v21 = vsel %vm1140_vm2, %v1115_v39, 0.0  ;;  %v1125_v11 = vmul.f32 %v1123_v40, %v1529_v15 }
 0x313   : > { %v1143_v42 = vadd.f32 %v1142_v21, %v1141_v41 }
 0x315   : > { %v1144_v43 = vrot.slane %v1143_v42, 4 }
 0x317   : > { %v1145_v44 = vadd.f32 %v1144_v43, %v1143_v42 }
 0x319   : > { %v1146_v45 = vrot.slane %v1145_v44, 2 }
 0x31b   : > { %v1147_v46 = vadd.f32 %v1146_v45, %v1145_v44 }
 0x31d   : > { %v1148_v47 = vrot.slane %v1147_v46, 1 }
 0x31f   : > { %v1149_v48 = vadd.f32 %v1148_v47, %v1147_v46 }
 0x321   : > { %1151 = vrot.lane.b32.xlu0 %v1149_v48, %s1417_s27 }
 0x350   : > { %v1131_v49 = vpop.permute.xlu2 %1130 }
 0x351   : > { %v1135_v50 = vadd.f32 %v1131_v49, %v1125_v11 }
 0x353   : > { %v1137_v51 = vsel %vm544_vm1, %v1529_v15, %v1135_v50 }
 0x354   : > { %1139 = vst.msk [vmem:[%s456_s15 + $0x8] sm:$0xff] %vm483_vm0, %v1137_v51  ;;  %v1168_v54 = vmul.f32 %v1137_v51, %v1137_v51  ;;  %v1157_v56 = vsel %vm483_vm0, %v1137_v51, 0.0 }
 0x356   : > { %v1170_v15 = vsel %vm483_vm0, %v1168_v54, 0.0 }
 0x360   : > { %v1129_v53 = vpop.permute.xlu1 %1128 }
 0x361   : > { %v1134_v34 = vadd.f32 %v1129_v53, %v1124_v52 }
 0x363   : > { %v1136_v55 = vsel %vm544_vm1, %v1525_v12, %v1134_v34  ;;  %vm1165_vm1 = vcmask 188416  }
 0x364   : > { %1138 = vst.msk [vmem:[%s456_s15] sm:$0xff] %vm483_vm0, %v1136_v55  ;;  %v1156_v57 = vsel %vm483_vm0, %v1136_v55, 0.0  ;;  %v1167_v58 = vmul.f32 %v1136_v55, %v1136_v55 }
 0x365   : > { %v1158_v59 = vadd.f32 %v1157_v56, %v1156_v57 }
 0x366   : > { %v1169_v60 = vsel %vm483_vm0, %v1167_v58, 0.0  ;;  %vm1154_vm0 = vcmask 90112  }
 0x367   : > { %v1159_v61 = vrot.slane %v1158_v59, 4  ;;  %v1171_v62 = vadd.f32 %v1170_v15, %v1169_v60 }
 0x369   : > { %v1160_v63 = vadd.f32 %v1159_v61, %v1158_v59  ;;  %v1172_v0 = vrot.slane %v1171_v62, 4 }
 0x36b   : > { %v1161_v12 = vrot.slane %v1160_v63, 2  ;;  %v1173_v1 = vadd.f32 %v1172_v0, %v1171_v62 }
 0x36d   : > { %v1162_v2 = vadd.f32 %v1161_v12, %v1160_v63  ;;  %v1174_v3 = vrot.slane %v1173_v1, 2 }
 0x36f   : > { %v1163_v4 = vrot.slane %v1162_v2, 1  ;;  %v1175_v5 = vadd.f32 %v1174_v3, %v1173_v1 }
 0x371   : > { %v1164_v6 = vadd.f32 %v1163_v4, %v1162_v2  ;;  %v1176_v7 = vrot.slane %v1175_v5, 1 }
 0x373   : > { %1166 = vst.msk [vmem:[%s462_s17] sm:$0x1] %vm1165_vm1, %v1164_v6  ;;  %v1177_v8 = vadd.f32 %v1176_v7, %v1175_v5 }
 0x375   : > { %1178 = vst.msk [vmem:[%s465_s21] sm:$0x1] %vm1165_vm1, %v1177_v8 }
 0x393   : > { %v1152_v9 = vpop.permute.xlu0 %1151 }
 0x394   : > { %1155 = vst.msk [vmem:[%s459_s24] sm:$0x1] %vm1154_vm0, %v1152_v9 }
 0x395 PF: > { %s24_s25 = sadd.s32 1, %s1406_s25  }
 0x396   : > { %p21_p4 = scmp.ge.s32.totalorder %s24_s25, 4  }
 0x398   :  { %23 = sbr.rel (!%p21_p4) target bundleno = 1 (0x1), region = 134 }

</bundles_post_ra>
